<compile_context>
chip_gen: v5e
topology: v5e:2x2
jax: 0.10.0
libtpu: 0.0.40
codegen_flags: <defaults>
</compile_context>

<pallas_src>
import functools

import numpy as np
import jax
import jax.numpy as jnp
from jax.experimental import pallas as pl
from jax.experimental.pallas import tpu as pltpu

_EPS = 1e-5


# ---------------------------------------------------------------------------
# Pallas kernels (whole-array, VMEM-resident)
# ---------------------------------------------------------------------------
def _leaky(y):
    return jnp.where(y > 0, y, 0.2 * y)


def _conv_bn_act_kernel(cols_ref, w_ref, g_ref, b_ref, o_ref, *, count):
    """Down block: conv (matmul on im2col cols) + batch-stats BN + LeakyReLU."""
    acc = jnp.dot(cols_ref[...], w_ref[...], preferred_element_type=jnp.float32)
    mean = jnp.sum(acc, axis=0, keepdims=True) * (1.0 / count)
    d = acc - mean
    var = jnp.sum(d * d, axis=0, keepdims=True) * (1.0 / count)
    inv = jax.lax.rsqrt(var + _EPS)
    scale = g_ref[...] * inv
    shift = b_ref[...] - mean * scale
    o_ref[...] = _leaky(acc * scale + shift).astype(o_ref.dtype)


def _convt_bn_relu_add_kernel(cols_ref, w_ref, g_ref, b_ref, skip_ref, o_ref, *, count):
    """Up block: convT (matmul on dilated im2col) + BN + ReLU + fused skip add."""
    acc = jnp.dot(cols_ref[...], w_ref[...], preferred_element_type=jnp.float32)
    mean = jnp.sum(acc, axis=0, keepdims=True) * (1.0 / count)
    d = acc - mean
    var = jnp.sum(d * d, axis=0, keepdims=True) * (1.0 / count)
    inv = jax.lax.rsqrt(var + _EPS)
    scale = g_ref[...] * inv
    shift = b_ref[...] - mean * scale
    y = jnp.maximum(acc * scale + shift, 0.0) + skip_ref[...].astype(jnp.float32)
    o_ref[...] = y.astype(o_ref.dtype)


def _head_kernel(cols_ref, w_ref, bias_ref, alpha_ref, beta_ref, o_ref):
    """Fused img/mask heads: convT matmul + bias + per-lane tanh/sigmoid via one tanh."""
    acc = jnp.dot(cols_ref[...], w_ref[...], preferred_element_type=jnp.float32)
    t = jnp.tanh(acc + bias_ref[...])
    o_ref[...] = alpha_ref[...] * t + beta_ref[...]


def _middle_kernel(e3_ref, z_ref, wd4_ref, wbn_ref, wfs_ref, wfh_ref, bfs_ref, bfh_ref,
                   wu4_ref, wu3_ref, r4_ref, r4t_ref, r3_ref, r3t_ref, bnp_ref, o_ref,
                   *, count4, count3, c3):
    """e3 -> d4 -> bottleneck -> AdaIN -> u4 -> u3 fully resident in one kernel.

    Activations stay in (N, H*W*C) layout; convs are dense pre-packed matmuls;
    per-channel BN stats use 0/1 selector matmuls (R: (HW*C, C), Rt = R.T).
    """
    f32 = jnp.float32
    bf16 = jnp.bfloat16

    def bn_grouped(acc, gamma, beta, r, rt, count):
        s1 = jnp.sum(jnp.dot(acc, r, preferred_element_type=f32), axis=0, keepdims=True)
        mean_c = s1 * (1.0 / count)
        mean_p = jnp.dot(mean_c, rt, preferred_element_type=f32)
        d = acc - mean_p
        var_c = jnp.sum(jnp.dot(d * d, r, preferred_element_type=f32),
                        axis=0, keepdims=True) * (1.0 / count)
        inv_c = jax.lax.rsqrt(var_c + _EPS)
        scale_c = gamma * inv_c
        shift_c = beta - mean_c * scale_c
        scale_p = jnp.dot(scale_c, rt, preferred_element_type=f32)
        shift_p = jnp.dot(shift_c, rt, preferred_element_type=f32)
        return acc * scale_p + shift_p

    e3_b = e3_ref[...]                                                     # (N, P3) bf16

    # d4: Conv(4f->8f), BN, LeakyReLU.
    a4 = jnp.dot(e3_b, wd4_ref[...], preferred_element_type=f32)           # (N, P4)
    e4 = _leaky(bn_grouped(a4, bnp_ref[0:1, :], bnp_ref[1:2, :],
                           r4_ref[...], r4t_ref[...], count4))

    # bottleneck: Conv(8f->8f) -> 1x1 spatial (channel == column), BN, ReLU.
    ab = jnp.dot(e4.astype(bf16), wbn_ref[...], preferred_element_type=f32)  # (N, C4)
    mean = jnp.mean(ab, axis=0, keepdims=True)
    d = ab - mean
    var = jnp.mean(d * d, axis=0, keepdims=True)
    inv = jax.lax.rsqrt(var + _EPS)
    scale = bnp_ref[2:3, :] * inv
    shift = bnp_ref[3:4, :] - mean * scale
    b = jnp.maximum(ab * scale + shift, 0.0)

    # AdaIN noise injection: b = b * (fc_scale(z) + 1) + fc_shift(z).
    zb = z_ref[...]
    s_ = jnp.dot(zb, wfs_ref[...], preferred_element_type=f32) + bfs_ref[...]
    sh = jnp.dot(zb, wfh_ref[...], preferred_element_type=f32) + bfh_ref[...]
    b = b * (s_ + 1.0) + sh

    # u4: ConvT(8f->8f), BN, ReLU, + e4.
    au4 = jnp.dot(b.astype(bf16), wu4_ref[...], preferred_element_type=f32)  # (N, P4)
    d4 = jnp.maximum(bn_grouped(au4, bnp_ref[4:5, :], bnp_ref[5:6, :],
                                r4_ref[...], r4t_ref[...], count4), 0.0) + e4

    # u3: ConvT(8f->4f), BN, ReLU, + e3.
    au3 = jnp.dot(d4.astype(bf16), wu3_ref[...], preferred_element_type=f32)  # (N, P3)
    d3 = jnp.maximum(bn_grouped(au3, bnp_ref[6:7, 0:c3], bnp_ref[7:8, 0:c3],
                                r3_ref[...], r3t_ref[...], count3), 0.0) \
        + e3_b.astype(f32)

    o_ref[...] = d3.astype(o_ref.dtype)


# ---------------------------------------------------------------------------
# XLA glue: im2col (bf16) for the outer, larger-M layers
# ---------------------------------------------------------------------------
def _conv_cols(x_nhwc):
    """Conv2d(4,2,1) im2col -> (N*Ho*Wo, 16*C), rows (n,oh,ow), cols (kh,kw,ci)."""
    N, H, W, C = x_nhwc.shape
    Ho, Wo = H // 2, W // 2
    xp = jnp.pad(x_nhwc, ((0, 0), (1, 1), (1, 1), (0, 0)))
    patches = [xp[:, kh:kh + 2 * Ho:2, kw:kw + 2 * Wo:2, :]
               for kh in range(4) for kw in range(4)]
    cols = jnp.stack(patches, axis=-2)
    return cols.reshape(N * Ho * Wo, 16 * C), (N, Ho, Wo)


def _convt_cols(x_nhwc):
    """ConvT(4,2,1) as stride-1 conv on the 2x-dilated, 2-padded input (flipped kernel)."""
    N, H, W, C = x_nhwc.shape
    Ho, Wo = 2 * H, 2 * W
    xd = jnp.zeros((N, Ho + 3, Wo + 3, C), x_nhwc.dtype)
    xd = xd.at[:, 2:2 + Ho - 1:2, 2:2 + Wo - 1:2, :].set(x_nhwc)
    patches = [xd[:, kh:kh + Ho, kw:kw + Wo, :] for kh in range(4) for kw in range(4)]
    cols = jnp.stack(patches, axis=-2)
    return cols.reshape(N * Ho * Wo, 16 * C), (N, Ho, Wo)


# ---------------------------------------------------------------------------
# Blocks (one pallas_call each)
# ---------------------------------------------------------------------------
def _down_block(x_nhwc, wmat, gamma, beta):
    cols, (N, Ho, Wo) = _conv_cols(x_nhwc)
    M = cols.shape[0]
    oc = wmat.shape[1]
    y2d = pl.pallas_call(
        functools.partial(_conv_bn_act_kernel, count=float(M)),
        out_shape=jax.ShapeDtypeStruct((M, oc), jnp.bfloat16),
    )(cols, wmat, gamma, beta)
    return y2d, (N, Ho, Wo, oc)


def _up_block(x_nhwc, wmat, gamma, beta, skip2d):
    cols, (N, Ho, Wo) = _convt_cols(x_nhwc)
    M = cols.shape[0]
    oc = wmat.shape[1]
    y2d = pl.pallas_call(
        functools.partial(_convt_bn_relu_add_kernel, count=float(M)),
        out_shape=jax.ShapeDtypeStruct((M, oc), jnp.bfloat16),
    )(cols, wmat, gamma, beta, skip2d)
    return y2d, (N, Ho, Wo, oc)


def _middle(e3_flat, z, prep):
    N, P3 = e3_flat.shape
    C3 = prep["mid_r3"].shape[1]
    C4 = prep["mid_r4"].shape[1]
    hw4 = prep["mid_r4"].shape[0] // C4
    hw3 = P3 // C3
    kern = functools.partial(_middle_kernel, count4=float(N * hw4),
                             count3=float(N * hw3), c3=C3)
    return pl.pallas_call(
        kern, out_shape=jax.ShapeDtypeStruct((N, P3), jnp.bfloat16),
    )(e3_flat, z.astype(jnp.bfloat16),
      prep["mid_wd4"], prep["mid_wbn"], prep["mid_wfs"], prep["mid_wfh"],
      prep["mid_bfs"], prep["mid_bfh"], prep["mid_wu4"], prep["mid_wu3"],
      prep["mid_r4"], prep["mid_r4t"], prep["mid_r3"], prep["mid_r3t"],
      prep["mid_bnp"])


def _dual_head(x_nhwc, w, bias, alpha, beta, img_c, mask_c):
    cols, (N, Ho, Wo) = _convt_cols(x_nhwc)
    M, K = cols.shape
    hc = img_c + mask_c
    out_shape = jax.ShapeDtypeStruct((M, hc), jnp.float32)
    if M % 16 == 0:
        bm = M // 2   # 2 row blocks: shards across both TCs on v7x, ~free elsewhere.
        y = pl.pallas_call(
            _head_kernel,
            grid=(2,),
            in_specs=[pl.BlockSpec((bm, K), lambda i: (i, 0)),
                      pl.BlockSpec((K, hc), lambda i: (0, 0)),
                      pl.BlockSpec((1, hc), lambda i: (0, 0)),
                      pl.BlockSpec((1, hc), lambda i: (0, 0)),
                      pl.BlockSpec((1, hc), lambda i: (0, 0))],
            out_specs=pl.BlockSpec((bm, hc), lambda i: (i, 0)),
            out_shape=out_shape,
            compiler_params=pltpu.CompilerParams(dimension_semantics=("parallel",)),
        )(cols, w, bias, alpha, beta)
    else:
        y = pl.pallas_call(_head_kernel, out_shape=out_shape)(cols, w, bias, alpha, beta)
    y = y.reshape(N, Ho, Wo, hc)
    return y[..., :img_c], y[..., img_c:]


# ---------------------------------------------------------------------------
# DAGANGenerator forward
# ---------------------------------------------------------------------------
def dagan_generator(prep, img_nchw, mask_nchw, z, img_c=3, mask_c=1):
    x = jnp.concatenate([img_nchw, mask_nchw], axis=1)
    x = jnp.transpose(x, (0, 2, 3, 1)).astype(jnp.bfloat16)          # NHWC bf16

    e1_2d, s1 = _down_block(x, prep["d1_w"], prep["d1_g"], prep["d1_b"])
    e2_2d, s2 = _down_block(e1_2d.reshape(s1), prep["d2_w"], prep["d2_g"], prep["d2_b"])
    e3_2d, s3 = _down_block(e2_2d.reshape(s2), prep["d3_w"], prep["d3_g"], prep["d3_b"])

    N, H3, W3, C3 = s3
    # Collapsed middle (d4, bottleneck, fc/AdaIN, u4, u3) — one kernel.
    d3_flat = _middle(e3_2d.reshape(N, H3 * W3 * C3), z, prep)
    d3 = d3_flat.reshape(N, H3, W3, C3)

    d2_2d, _ = _up_block(d3, prep["u2_w"], prep["u2_g"], prep["u2_b"], e2_2d)
    d1_2d, _ = _up_block(d2_2d.reshape(s2), prep["u1_w"], prep["u1_g"], prep["u1_b"],
                         e1_2d)

    img_out, mask_out = _dual_head(d1_2d.reshape(s1), prep["head_w"], prep["head_b"],
                                   prep["head_alpha"], prep["head_beta"], img_c, mask_c)
    return (jnp.transpose(img_out, (0, 3, 1, 2)),                    # -> NCHW
            jnp.transpose(mask_out, (0, 3, 1, 2)))


# ---------------------------------------------------------------------------
# One-time host-side weight packing
# ---------------------------------------------------------------------------
def _pack_conv_w(w_oihw):
    """Conv2d (oc,ic,4,4) -> (16*ic, oc) bf16, rows (kh,kw,ci)."""
    oc = w_oihw.shape[0]
    return jnp.transpose(w_oihw, (2, 3, 1, 0)).reshape(-1, oc).astype(jnp.bfloat16)


def _pack_convt_w(w_iohw):
    """ConvT (ic,oc,4,4) -> (16*ic, oc) bf16 for the dilated-conv formulation (flip)."""
    oc = w_iohw.shape[1]
    w_flip = w_iohw[:, :, ::-1, ::-1]
    return jnp.transpose(w_flip, (2, 3, 0, 1)).reshape(-1, oc).astype(jnp.bfloat16)


def _dense_conv_matrix(w_oihw, hi, wi):
    """Conv(4,2,1) on a (hi,wi) grid as one dense (hi*wi*ic, ho*wo*oc) matmul."""
    w = np.asarray(w_oihw, np.float32)
    oc, ic = w.shape[0], w.shape[1]
    ho, wo = hi // 2, wi // 2
    m = np.zeros((hi * wi * ic, ho * wo * oc), np.float32)
    for oh in range(ho):
        for ow in range(wo):
            for kh in range(4):
                ih = 2 * oh - 1 + kh
                if not 0 <= ih < hi:
                    continue
                for kw in range(4):
                    iw = 2 * ow - 1 + kw
                    if not 0 <= iw < wi:
                        continue
                    r0 = (ih * wi + iw) * ic
                    c0 = (oh * wo + ow) * oc
                    m[r0:r0 + ic, c0:c0 + oc] = w[:, :, kh, kw].T
    return jnp.asarray(m, jnp.bfloat16)


def _dense_convt_matrix(w_iohw, hi, wi):
    """ConvT(4,2,1) on a (hi,wi) grid as one dense (hi*wi*ic, 2hi*2wi*oc) matmul."""
    w = np.asarray(w_iohw, np.float32)
    ic, oc = w.shape[0], w.shape[1]
    ho, wo = 2 * hi, 2 * wi
    m = np.zeros((hi * wi * ic, ho * wo * oc), np.float32)
    for ih in range(hi):
        for iw in range(wi):
            for kh in range(4):
                oh = 2 * ih - 1 + kh
                if not 0 <= oh < ho:
                    continue
                for kw in range(4):
                    ow = 2 * iw - 1 + kw
                    if not 0 <= ow < wo:
                        continue
                    r0 = (ih * wi + iw) * ic
                    c0 = (oh * wo + ow) * oc
                    m[r0:r0 + ic, c0:c0 + oc] = w[:, :, kh, kw]
    return jnp.asarray(m, jnp.bfloat16)


def preprocess_params(p, img_c=3, mask_c=1, img_hw=32):
    f32 = jnp.float32
    q = {}

    def vec(v):
        return jnp.asarray(v, f32).reshape(1, -1)

    for name in ["d1", "d2", "d3"]:
        q[f"{name}_w"] = _pack_conv_w(p[f"{name}_w"])
        q[f"{name}_g"] = vec(p[f"{name}_g"])
        q[f"{name}_b"] = vec(p[f"{name}_b"])
    for name in ["u2", "u1"]:
        q[f"{name}_w"] = _pack_convt_w(p[f"{name}_w"])
        q[f"{name}_g"] = vec(p[f"{name}_g"])
        q[f"{name}_b"] = vec(p[f"{name}_b"])

    # Collapsed-middle dense matrices + per-channel selector matrices.
    h3 = img_hw // 8
    c4 = p["d4_w"].shape[0]
    c3 = p["d3_w"].shape[0]
    q["mid_wd4"] = _dense_conv_matrix(p["d4_w"], h3, h3)
    q["mid_wbn"] = _dense_conv_matrix(p["bn_w"], h3 // 2, h3 // 2)
    q["mid_wu4"] = _dense_convt_matrix(p["u4_w"], h3 // 4, h3 // 4)
    q["mid_wu3"] = _dense_convt_matrix(p["u3_w"], h3 // 2, h3 // 2)
    q["mid_wfs"] = jnp.asarray(p["fcs_w"], f32).T.astype(jnp.bfloat16)
    q["mid_wfh"] = jnp.asarray(p["fch_w"], f32).T.astype(jnp.bfloat16)
    q["mid_bfs"] = vec(p["fcs_b"])
    q["mid_bfh"] = vec(p["fch_b"])
    q["mid_r4"] = jnp.asarray(np.tile(np.eye(c4, dtype=np.float32), ((h3 // 2) ** 2, 1)))
    q["mid_r4t"] = q["mid_r4"].T
    q["mid_r3"] = jnp.asarray(np.tile(np.eye(c3, dtype=np.float32), (h3 * h3, 1)))
    q["mid_r3t"] = q["mid_r3"].T

    def pad_c4(v):
        v = jnp.asarray(v, f32)
        return jnp.pad(v, (0, c4 - v.shape[0]))

    q["mid_bnp"] = jnp.stack(
        [jnp.asarray(p["d4_g"], f32), jnp.asarray(p["d4_b"], f32),
         jnp.asarray(p["bn_g"], f32), jnp.asarray(p["bn_b"], f32),
         jnp.asarray(p["u4_g"], f32), jnp.asarray(p["u4_b"], f32),
         pad_c4(p["u3_g"]), pad_c4(p["u3_b"])], axis=0)

    # Fused dual head: sigmoid folded into tanh (pre-scale mask columns/bias by 0.5,
    # post-affine alpha=0.5, beta=0.5).
    w_img = _pack_convt_w(p["img_w"]).astype(f32)
    w_msk = _pack_convt_w(p["mask_w"]).astype(f32)
    q["head_w"] = jnp.concatenate([w_img, 0.5 * w_msk], axis=1).astype(jnp.bfloat16)
    q["head_b"] = jnp.concatenate([jnp.asarray(p["img_b"], f32),
                                   0.5 * jnp.asarray(p["mask_b"], f32)]).reshape(1, -1)
    q["head_alpha"] = jnp.concatenate([jnp.ones((img_c,), f32),
                                       0.5 * jnp.ones((mask_c,), f32)]).reshape(1, -1)
    q["head_beta"] = jnp.concatenate([jnp.zeros((img_c,), f32),
                                      0.5 * jnp.ones((mask_c,), f32)]).reshape(1, -1)
    return q


# ---------------------------------------------------------------------------
# Deterministic parameter init (shapes match the PyTorch module)
# ---------------------------------------------------------------------------
def init_params(key, img_c=3, mask_c=1, noise_dim=16, feat=8):
    keys = jax.random.split(key, 16)
    f = feat

    def conv_w(k, oc, ic):
        return 0.05 * jax.random.normal(k, (oc, ic, 4, 4), jnp.float32)

    def convt_w(k, ic, oc):
        return 0.05 * jax.random.normal(k, (ic, oc, 4, 4), jnp.float32)

    p = {}
    for i, (ic, oc) in enumerate(
            [(img_c + mask_c, f), (f, 2 * f), (2 * f, 4 * f), (4 * f, 8 * f)], start=1):
        p[f"d{i}_w"] = conv_w(keys[i - 1], oc, ic)
        p[f"d{i}_g"] = jnp.ones((oc,), jnp.float32)
        p[f"d{i}_b"] = jnp.zeros((oc,), jnp.float32)

    p["bn_w"] = conv_w(keys[4], 8 * f, 8 * f)
    p["bn_g"] = jnp.ones((8 * f,), jnp.float32)
    p["bn_b"] = jnp.zeros((8 * f,), jnp.float32)

    p["fcs_w"] = 0.05 * jax.random.normal(keys[5], (8 * f, noise_dim), jnp.float32)
    p["fcs_b"] = jnp.zeros((8 * f,), jnp.float32)
    p["fch_w"] = 0.05 * jax.random.normal(keys[6], (8 * f, noise_dim), jnp.float32)
    p["fch_b"] = jnp.zeros((8 * f,), jnp.float32)

    for (ic, oc), nm, k in zip(
            [(8 * f, 8 * f), (8 * f, 4 * f), (4 * f, 2 * f), (2 * f, f)],
            ["u4", "u3", "u2", "u1"], keys[7:11]):
        p[f"{nm}_w"] = convt_w(k, ic, oc)
        p[f"{nm}_g"] = jnp.ones((oc,), jnp.float32)
        p[f"{nm}_b"] = jnp.zeros((oc,), jnp.float32)

    p["img_w"] = convt_w(keys[11], f, img_c)
    p["img_b"] = jnp.zeros((img_c,), jnp.float32)
    p["mask_w"] = convt_w(keys[12], f, mask_c)
    p["mask_b"] = jnp.zeros((mask_c,), jnp.float32)
    return p


if __name__ == "__main__":
    key = jax.random.PRNGKey(0)
    kp, ki, km, kz = jax.random.split(key, 4)

    params = init_params(kp, img_c=3, mask_c=1, noise_dim=16, feat=8)
    prep = preprocess_params(params, img_c=3, mask_c=1, img_hw=32)  # one-time packing

    img = jax.random.normal(ki, (2, 3, 32, 32), jnp.float32)
    mask = jax.random.uniform(km, (2, 1, 32, 32), jnp.float32)
    z = jax.random.normal(kz, (2, 16), jnp.float32)

    fwd = jax.jit(dagan_generator)
    img_out, mask_out = fwd(prep, img, mask, z)
    jax.block_until_ready((img_out, mask_out))

    assert img_out.shape == (2, 3, 32, 32)
    assert mask_out.shape == (2, 1, 32, 32)
    assert bool(jnp.all(jnp.isfinite(img_out)))
    assert bool(jnp.all(jnp.isfinite(mask_out)))
    print("KERNEL_OK")
</pallas_src>

<mosaic_0001>
module attributes {stable_mosaic.version = 11 : i64} {
  func.func @_conv_bn_act_kernel(%arg0: memref<512x64xbf16, #tpu.memory_space<vmem>>, %arg1: memref<64x8xbf16, #tpu.memory_space<vmem>>, %arg2: memref<1x8xf32, #tpu.memory_space<vmem>>, %arg3: memref<1x8xf32, #tpu.memory_space<vmem>>, %arg4: memref<512x8xbf16, #tpu.memory_space<vmem>>) attributes {dimension_semantics = [], scalar_prefetch = 0 : i64, scratch_operands = 0 : i64, tpu.core_type = #tpu.core_type<tc>} {
    %c0 = arith.constant 0 : index
    %c0_0 = arith.constant 0 : index
    %0 = vector.load %arg0[%c0, %c0_0] : memref<512x64xbf16, #tpu.memory_space<vmem>>, vector<512x64xbf16>
    %c0_1 = arith.constant 0 : index
    %c0_2 = arith.constant 0 : index
    %1 = vector.load %arg1[%c0_1, %c0_2] : memref<64x8xbf16, #tpu.memory_space<vmem>>, vector<64x8xbf16>
    %cst = arith.constant dense<0.000000e+00> : vector<512x8xf32>
    %2 = tpu.matmul %0, %1, %cst {dimension_numbers = #tpu.dot_dimension_numbers<[1], [0], [0], [1], [0, 0, 1, 1], [], []>} : vector<512x64xbf16>, vector<64x8xbf16>, vector<512x8xf32> -> vector<512x8xf32>
    %cst_3 = arith.constant dense<0.000000e+00> : vector<8xf32>
    %3 = vector.multi_reduction <add>, %2, %cst_3 [0] : vector<512x8xf32> to vector<8xf32>
    %4 = vector.shape_cast %3 : vector<8xf32> to vector<1x8xf32>
    %cst_4 = arith.constant 0.001953125 : f32
    %5 = vector.broadcast %cst_4 : f32 to vector<1x8xf32>
    %6 = arith.mulf %4, %5 : vector<1x8xf32>
    %7 = vector.broadcast %6 : vector<1x8xf32> to vector<512x8xf32>
    %8 = arith.subf %2, %7 : vector<512x8xf32>
    %9 = arith.mulf %8, %8 : vector<512x8xf32>
    %cst_5 = arith.constant dense<0.000000e+00> : vector<8xf32>
    %10 = vector.multi_reduction <add>, %9, %cst_5 [0] : vector<512x8xf32> to vector<8xf32>
    %11 = vector.shape_cast %10 : vector<8xf32> to vector<1x8xf32>
    %cst_6 = arith.constant 0.001953125 : f32
    %12 = vector.broadcast %cst_6 : f32 to vector<1x8xf32>
    %13 = arith.mulf %11, %12 : vector<1x8xf32>
    %cst_7 = arith.constant 9.99999974E-6 : f32
    %14 = vector.broadcast %cst_7 : f32 to vector<1x8xf32>
    %15 = arith.addf %13, %14 : vector<1x8xf32>
    %16 = math.rsqrt %15 : vector<1x8xf32>
    %c0_8 = arith.constant 0 : index
    %c0_9 = arith.constant 0 : index
    %17 = vector.load %arg2[%c0_8, %c0_9] : memref<1x8xf32, #tpu.memory_space<vmem>>, vector<1x8xf32>
    %18 = arith.mulf %17, %16 : vector<1x8xf32>
    %c0_10 = arith.constant 0 : index
    %c0_11 = arith.constant 0 : index
    %19 = vector.load %arg3[%c0_10, %c0_11] : memref<1x8xf32, #tpu.memory_space<vmem>>, vector<1x8xf32>
    %20 = arith.mulf %6, %18 : vector<1x8xf32>
    %21 = arith.subf %19, %20 : vector<1x8xf32>
    %22 = vector.broadcast %18 : vector<1x8xf32> to vector<512x8xf32>
    %23 = arith.mulf %2, %22 : vector<512x8xf32>
    %24 = vector.broadcast %21 : vector<1x8xf32> to vector<512x8xf32>
    %25 = arith.addf %23, %24 : vector<512x8xf32>
    %cst_12 = arith.constant 0.000000e+00 : f32
    %26 = vector.broadcast %cst_12 : f32 to vector<512x8xf32>
    %27 = arith.cmpf ogt, %25, %26 : vector<512x8xf32>
    %cst_13 = arith.constant 2.000000e-01 : f32
    %28 = vector.broadcast %cst_13 : f32 to vector<512x8xf32>
    %29 = arith.mulf %28, %25 : vector<512x8xf32>
    %30 = arith.select %27, %25, %29 : vector<512x8xi1>, vector<512x8xf32>
    %31 = arith.truncf %30 : vector<512x8xf32> to vector<512x8xbf16>
    %c0_14 = arith.constant 0 : index
    %c0_15 = arith.constant 0 : index
    %32 = vector.load %arg4[%c0_14, %c0_15] : memref<512x8xbf16, #tpu.memory_space<vmem>>, vector<512x8xbf16>
    tpu.vector_store %arg4[%c0_14, %c0_15], %31 {strides = array<i32>} : memref<512x8xbf16, #tpu.memory_space<vmem>>, vector<512x8xbf16>,
    return
  }
}

module attributes {stable_mosaic.version = 11 : i64} {
  func.func @_conv_bn_act_kernel(%arg0: memref<128x128xbf16, #tpu.memory_space<vmem>>, %arg1: memref<128x16xbf16, #tpu.memory_space<vmem>>, %arg2: memref<1x16xf32, #tpu.memory_space<vmem>>, %arg3: memref<1x16xf32, #tpu.memory_space<vmem>>, %arg4: memref<128x16xbf16, #tpu.memory_space<vmem>>) attributes {dimension_semantics = [], scalar_prefetch = 0 : i64, scratch_operands = 0 : i64, tpu.core_type = #tpu.core_type<tc>} {
    %c0 = arith.constant 0 : index
    %c0_0 = arith.constant 0 : index
    %0 = vector.load %arg0[%c0, %c0_0] : memref<128x128xbf16, #tpu.memory_space<vmem>>, vector<128x128xbf16>
    %c0_1 = arith.constant 0 : index
    %c0_2 = arith.constant 0 : index
    %1 = vector.load %arg1[%c0_1, %c0_2] : memref<128x16xbf16, #tpu.memory_space<vmem>>, vector<128x16xbf16>
    %cst = arith.constant dense<0.000000e+00> : vector<128x16xf32>
    %2 = tpu.matmul %0, %1, %cst {dimension_numbers = #tpu.dot_dimension_numbers<[1], [0], [0], [1], [0, 0, 1, 1], [], []>} : vector<128x128xbf16>, vector<128x16xbf16>, vector<128x16xf32> -> vector<128x16xf32>
    %cst_3 = arith.constant dense<0.000000e+00> : vector<16xf32>
    %3 = vector.multi_reduction <add>, %2, %cst_3 [0] : vector<128x16xf32> to vector<16xf32>
    %4 = vector.shape_cast %3 : vector<16xf32> to vector<1x16xf32>
    %cst_4 = arith.constant 7.812500e-03 : f32
    %5 = vector.broadcast %cst_4 : f32 to vector<1x16xf32>
    %6 = arith.mulf %4, %5 : vector<1x16xf32>
    %7 = vector.broadcast %6 : vector<1x16xf32> to vector<128x16xf32>
    %8 = arith.subf %2, %7 : vector<128x16xf32>
    %9 = arith.mulf %8, %8 : vector<128x16xf32>
    %cst_5 = arith.constant dense<0.000000e+00> : vector<16xf32>
    %10 = vector.multi_reduction <add>, %9, %cst_5 [0] : vector<128x16xf32> to vector<16xf32>
    %11 = vector.shape_cast %10 : vector<16xf32> to vector<1x16xf32>
    %cst_6 = arith.constant 7.812500e-03 : f32
    %12 = vector.broadcast %cst_6 : f32 to vector<1x16xf32>
    %13 = arith.mulf %11, %12 : vector<1x16xf32>
    %cst_7 = arith.constant 9.99999974E-6 : f32
    %14 = vector.broadcast %cst_7 : f32 to vector<1x16xf32>
    %15 = arith.addf %13, %14 : vector<1x16xf32>
    %16 = math.rsqrt %15 : vector<1x16xf32>
    %c0_8 = arith.constant 0 : index
    %c0_9 = arith.constant 0 : index
    %17 = vector.load %arg2[%c0_8, %c0_9] : memref<1x16xf32, #tpu.memory_space<vmem>>, vector<1x16xf32>
    %18 = arith.mulf %17, %16 : vector<1x16xf32>
    %c0_10 = arith.constant 0 : index
    %c0_11 = arith.constant 0 : index
    %19 = vector.load %arg3[%c0_10, %c0_11] : memref<1x16xf32, #tpu.memory_space<vmem>>, vector<1x16xf32>
    %20 = arith.mulf %6, %18 : vector<1x16xf32>
    %21 = arith.subf %19, %20 : vector<1x16xf32>
    %22 = vector.broadcast %18 : vector<1x16xf32> to vector<128x16xf32>
    %23 = arith.mulf %2, %22 : vector<128x16xf32>
    %24 = vector.broadcast %21 : vector<1x16xf32> to vector<128x16xf32>
    %25 = arith.addf %23, %24 : vector<128x16xf32>
    %cst_12 = arith.constant 0.000000e+00 : f32
    %26 = vector.broadcast %cst_12 : f32 to vector<128x16xf32>
    %27 = arith.cmpf ogt, %25, %26 : vector<128x16xf32>
    %cst_13 = arith.constant 2.000000e-01 : f32
    %28 = vector.broadcast %cst_13 : f32 to vector<128x16xf32>
    %29 = arith.mulf %28, %25 : vector<128x16xf32>
    %30 = arith.select %27, %25, %29 : vector<128x16xi1>, vector<128x16xf32>
    %31 = arith.truncf %30 : vector<128x16xf32> to vector<128x16xbf16>
    %c0_14 = arith.constant 0 : index
    %c0_15 = arith.constant 0 : index
    %32 = vector.load %arg4[%c0_14, %c0_15] : memref<128x16xbf16, #tpu.memory_space<vmem>>, vector<128x16xbf16>
    tpu.vector_store %arg4[%c0_14, %c0_15], %31 {strides = array<i32>} : memref<128x16xbf16, #tpu.memory_space<vmem>>, vector<128x16xbf16>,
    return
  }
}

module attributes {stable_mosaic.version = 11 : i64} {
  func.func @_conv_bn_act_kernel(%arg0: memref<32x256xbf16, #tpu.memory_space<vmem>>, %arg1: memref<256x32xbf16, #tpu.memory_space<vmem>>, %arg2: memref<1x32xf32, #tpu.memory_space<vmem>>, %arg3: memref<1x32xf32, #tpu.memory_space<vmem>>, %arg4: memref<32x32xbf16, #tpu.memory_space<vmem>>) attributes {dimension_semantics = [], scalar_prefetch = 0 : i64, scratch_operands = 0 : i64, tpu.core_type = #tpu.core_type<tc>} {
    %c0 = arith.constant 0 : index
    %c0_0 = arith.constant 0 : index
    %0 = vector.load %arg0[%c0, %c0_0] : memref<32x256xbf16, #tpu.memory_space<vmem>>, vector<32x256xbf16>
    %c0_1 = arith.constant 0 : index
    %c0_2 = arith.constant 0 : index
    %1 = vector.load %arg1[%c0_1, %c0_2] : memref<256x32xbf16, #tpu.memory_space<vmem>>, vector<256x32xbf16>
    %cst = arith.constant dense<0.000000e+00> : vector<32x32xf32>
    %2 = tpu.matmul %0, %1, %cst {dimension_numbers = #tpu.dot_dimension_numbers<[1], [0], [0], [1], [0, 0, 1, 1], [], []>} : vector<32x256xbf16>, vector<256x32xbf16>, vector<32x32xf32> -> vector<32x32xf32>
    %cst_3 = arith.constant dense<0.000000e+00> : vector<32xf32>
    %3 = vector.multi_reduction <add>, %2, %cst_3 [0] : vector<32x32xf32> to vector<32xf32>
    %4 = vector.shape_cast %3 : vector<32xf32> to vector<1x32xf32>
    %cst_4 = arith.constant 3.125000e-02 : f32
    %5 = vector.broadcast %cst_4 : f32 to vector<1x32xf32>
    %6 = arith.mulf %4, %5 : vector<1x32xf32>
    %7 = vector.broadcast %6 : vector<1x32xf32> to vector<32x32xf32>
    %8 = arith.subf %2, %7 : vector<32x32xf32>
    %9 = arith.mulf %8, %8 : vector<32x32xf32>
    %cst_5 = arith.constant dense<0.000000e+00> : vector<32xf32>
    %10 = vector.multi_reduction <add>, %9, %cst_5 [0] : vector<32x32xf32> to vector<32xf32>
    %11 = vector.shape_cast %10 : vector<32xf32> to vector<1x32xf32>
    %cst_6 = arith.constant 3.125000e-02 : f32
    %12 = vector.broadcast %cst_6 : f32 to vector<1x32xf32>
    %13 = arith.mulf %11, %12 : vector<1x32xf32>
    %cst_7 = arith.constant 9.99999974E-6 : f32
    %14 = vector.broadcast %cst_7 : f32 to vector<1x32xf32>
    %15 = arith.addf %13, %14 : vector<1x32xf32>
    %16 = math.rsqrt %15 : vector<1x32xf32>
    %c0_8 = arith.constant 0 : index
    %c0_9 = arith.constant 0 : index
    %17 = vector.load %arg2[%c0_8, %c0_9] : memref<1x32xf32, #tpu.memory_space<vmem>>, vector<1x32xf32>
    %18 = arith.mulf %17, %16 : vector<1x32xf32>
    %c0_10 = arith.constant 0 : index
    %c0_11 = arith.constant 0 : index
    %19 = vector.load %arg3[%c0_10, %c0_11] : memref<1x32xf32, #tpu.memory_space<vmem>>, vector<1x32xf32>
    %20 = arith.mulf %6, %18 : vector<1x32xf32>
    %21 = arith.subf %19, %20 : vector<1x32xf32>
    %22 = vector.broadcast %18 : vector<1x32xf32> to vector<32x32xf32>
    %23 = arith.mulf %2, %22 : vector<32x32xf32>
    %24 = vector.broadcast %21 : vector<1x32xf32> to vector<32x32xf32>
    %25 = arith.addf %23, %24 : vector<32x32xf32>
    %cst_12 = arith.constant 0.000000e+00 : f32
    %26 = vector.broadcast %cst_12 : f32 to vector<32x32xf32>
    %27 = arith.cmpf ogt, %25, %26 : vector<32x32xf32>
    %cst_13 = arith.constant 2.000000e-01 : f32
    %28 = vector.broadcast %cst_13 : f32 to vector<32x32xf32>
    %29 = arith.mulf %28, %25 : vector<32x32xf32>
    %30 = arith.select %27, %25, %29 : vector<32x32xi1>, vector<32x32xf32>
    %31 = arith.truncf %30 : vector<32x32xf32> to vector<32x32xbf16>
    %c0_14 = arith.constant 0 : index
    %c0_15 = arith.constant 0 : index
    %32 = vector.load %arg4[%c0_14, %c0_15] : memref<32x32xbf16, #tpu.memory_space<vmem>>, vector<32x32xbf16>
    tpu.vector_store %arg4[%c0_14, %c0_15], %31 {strides = array<i32>} : memref<32x32xbf16, #tpu.memory_space<vmem>>, vector<32x32xbf16>,
    return
  }
}

module attributes {stable_mosaic.version = 11 : i64} {
  func.func @_middle_kernel(%arg0: memref<2x512xbf16, #tpu.memory_space<vmem>>, %arg1: memref<2x16xbf16, #tpu.memory_space<vmem>>, %arg2: memref<512x256xbf16, #tpu.memory_space<vmem>>, %arg3: memref<256x64xbf16, #tpu.memory_space<vmem>>, %arg4: memref<16x64xbf16, #tpu.memory_space<vmem>>, %arg5: memref<16x64xbf16, #tpu.memory_space<vmem>>, %arg6: memref<1x64xf32, #tpu.memory_space<vmem>>, %arg7: memref<1x64xf32, #tpu.memory_space<vmem>>, %arg8: memref<64x256xbf16, #tpu.memory_space<vmem>>, %arg9: memref<256x512xbf16, #tpu.memory_space<vmem>>, %arg10: memref<256x64xf32, #tpu.memory_space<vmem>>, %arg11: memref<64x256xf32, #tpu.memory_space<vmem>>, %arg12: memref<512x32xf32, #tpu.memory_space<vmem>>, %arg13: memref<32x512xf32, #tpu.memory_space<vmem>>, %arg14: memref<8x64xf32, #tpu.memory_space<vmem>>, %arg15: memref<2x512xbf16, #tpu.memory_space<vmem>>) attributes {dimension_semantics = [], scalar_prefetch = 0 : i64, scratch_operands = 0 : i64, tpu.core_type = #tpu.core_type<tc>} {
    %c0 = arith.constant 0 : index
    %c0_0 = arith.constant 0 : index
    %0 = vector.load %arg0[%c0, %c0_0] : memref<2x512xbf16, #tpu.memory_space<vmem>>, vector<2x512xbf16>
    %c0_1 = arith.constant 0 : index
    %c0_2 = arith.constant 0 : index
    %1 = vector.load %arg2[%c0_1, %c0_2] : memref<512x256xbf16, #tpu.memory_space<vmem>>, vector<512x256xbf16>
    %cst = arith.constant dense<0.000000e+00> : vector<2x256xf32>
    %2 = tpu.matmul %0, %1, %cst {dimension_numbers = #tpu.dot_dimension_numbers<[1], [0], [0], [1], [0, 0, 1, 1], [], []>} : vector<2x512xbf16>, vector<512x256xbf16>, vector<2x256xf32> -> vector<2x256xf32>
    %c0_3 = arith.constant 0 : index
    %c0_4 = arith.constant 0 : index
    %3 = vector.load %arg14[%c0_3, %c0_4] : memref<8x64xf32, #tpu.memory_space<vmem>>, vector<1x64xf32>
    %c1 = arith.constant 1 : index
    %c0_5 = arith.constant 0 : index
    %4 = vector.load %arg14[%c1, %c0_5] : memref<8x64xf32, #tpu.memory_space<vmem>>, vector<1x64xf32>
    %c0_6 = arith.constant 0 : index
    %c0_7 = arith.constant 0 : index
    %5 = vector.load %arg10[%c0_6, %c0_7] : memref<256x64xf32, #tpu.memory_space<vmem>>, vector<256x64xf32>
    %c0_8 = arith.constant 0 : index
    %c0_9 = arith.constant 0 : index
    %6 = vector.load %arg11[%c0_8, %c0_9] : memref<64x256xf32, #tpu.memory_space<vmem>>, vector<64x256xf32>
    %cst_10 = arith.constant dense<0.000000e+00> : vector<2x64xf32>
    %7 = tpu.matmul %2, %5, %cst_10 {dimension_numbers = #tpu.dot_dimension_numbers<[1], [0], [0], [1], [0, 0, 1, 1], [], []>} : vector<2x256xf32>, vector<256x64xf32>, vector<2x64xf32> -> vector<2x64xf32>
    %cst_11 = arith.constant dense<0.000000e+00> : vector<64xf32>
    %8 = vector.multi_reduction <add>, %7, %cst_11 [0] : vector<2x64xf32> to vector<64xf32>
    %9 = vector.shape_cast %8 : vector<64xf32> to vector<1x64xf32>
    %cst_12 = arith.constant 1.250000e-01 : f32
    %10 = vector.broadcast %cst_12 : f32 to vector<1x64xf32>
    %11 = arith.mulf %9, %10 : vector<1x64xf32>
    %cst_13 = arith.constant dense<0.000000e+00> : vector<1x256xf32>
    %12 = tpu.matmul %11, %6, %cst_13 {dimension_numbers = #tpu.dot_dimension_numbers<[1], [0], [0], [1], [0, 0, 1, 1], [], []>} : vector<1x64xf32>, vector<64x256xf32>, vector<1x256xf32> -> vector<1x256xf32>
    %13 = vector.broadcast %12 : vector<1x256xf32> to vector<2x256xf32>
    %14 = arith.subf %2, %13 : vector<2x256xf32>
    %15 = arith.mulf %14, %14 : vector<2x256xf32>
    %cst_14 = arith.constant dense<0.000000e+00> : vector<2x64xf32>
    %16 = tpu.matmul %15, %5, %cst_14 {dimension_numbers = #tpu.dot_dimension_numbers<[1], [0], [0], [1], [0, 0, 1, 1], [], []>} : vector<2x256xf32>, vector<256x64xf32>, vector<2x64xf32> -> vector<2x64xf32>
    %cst_15 = arith.constant dense<0.000000e+00> : vector<64xf32>
    %17 = vector.multi_reduction <add>, %16, %cst_15 [0] : vector<2x64xf32> to vector<64xf32>
    %18 = vector.shape_cast %17 : vector<64xf32> to vector<1x64xf32>
    %cst_16 = arith.constant 1.250000e-01 : f32
    %19 = vector.broadcast %cst_16 : f32 to vector<1x64xf32>
    %20 = arith.mulf %18, %19 : vector<1x64xf32>
    %cst_17 = arith.constant 9.99999974E-6 : f32
    %21 = vector.broadcast %cst_17 : f32 to vector<1x64xf32>
    %22 = arith.addf %20, %21 : vector<1x64xf32>
    %23 = math.rsqrt %22 : vector<1x64xf32>
    %24 = arith.mulf %3, %23 : vector<1x64xf32>
    %25 = arith.mulf %11, %24 : vector<1x64xf32>
    %26 = arith.subf %4, %25 : vector<1x64xf32>
    %cst_18 = arith.constant dense<0.000000e+00> : vector<1x256xf32>
    %27 = tpu.matmul %24, %6, %cst_18 {dimension_numbers = #tpu.dot_dimension_numbers<[1], [0], [0], [1], [0, 0, 1, 1], [], []>} : vector<1x64xf32>, vector<64x256xf32>, vector<1x256xf32> -> vector<1x256xf32>
    %cst_19 = arith.constant dense<0.000000e+00> : vector<1x256xf32>
    %28 = tpu.matmul %26, %6, %cst_19 {dimension_numbers = #tpu.dot_dimension_numbers<[1], [0], [0], [1], [0, 0, 1, 1], [], []>} : vector<1x64xf32>, vector<64x256xf32>, vector<1x256xf32> -> vector<1x256xf32>
    %29 = vector.broadcast %27 : vector<1x256xf32> to vector<2x256xf32>
    %30 = arith.mulf %2, %29 : vector<2x256xf32>
    %31 = vector.broadcast %28 : vector<1x256xf32> to vector<2x256xf32>
    %32 = arith.addf %30, %31 : vector<2x256xf32>
    %cst_20 = arith.constant 0.000000e+00 : f32
    %33 = vector.broadcast %cst_20 : f32 to vector<2x256xf32>
    %34 = arith.cmpf ogt, %32, %33 : vector<2x256xf32>
    %cst_21 = arith.constant 2.000000e-01 : f32
    %35 = vector.broadcast %cst_21 : f32 to vector<2x256xf32>
    %36 = arith.mulf %35, %32 : vector<2x256xf32>
    %37 = arith.select %34, %32, %36 : vector<2x256xi1>, vector<2x256xf32>
    %38 = arith.truncf %37 : vector<2x256xf32> to vector<2x256xbf16>
    %c0_22 = arith.constant 0 : index
    %c0_23 = arith.constant 0 : index
    %39 = vector.load %arg3[%c0_22, %c0_23] : memref<256x64xbf16, #tpu.memory_space<vmem>>, vector<256x64xbf16>
    %cst_24 = arith.constant dense<0.000000e+00> : vector<2x64xf32>
    %40 = tpu.matmul %38, %39, %cst_24 {dimension_numbers = #tpu.dot_dimension_numbers<[1], [0], [0], [1], [0, 0, 1, 1], [], []>} : vector<2x256xbf16>, vector<256x64xbf16>, vector<2x64xf32> -> vector<2x64xf32>
    %cst_25 = arith.constant dense<0.000000e+00> : vector<64xf32>
    %41 = vector.multi_reduction <add>, %40, %cst_25 [0] : vector<2x64xf32> to vector<64xf32>
    %42 = vector.shape_cast %41 : vector<64xf32> to vector<1x64xf32>
    %cst_26 = arith.constant 2.000000e+00 : f32
    %43 = vector.broadcast %cst_26 : f32 to vector<1x64xf32>
    %44 = arith.divf %42, %43 : vector<1x64xf32>
    %45 = vector.broadcast %44 : vector<1x64xf32> to vector<2x64xf32>
    %46 = arith.subf %40, %45 : vector<2x64xf32>
    %47 = arith.mulf %46, %46 : vector<2x64xf32>
    %cst_27 = arith.constant dense<0.000000e+00> : vector<64xf32>
    %48 = vector.multi_reduction <add>, %47, %cst_27 [0] : vector<2x64xf32> to vector<64xf32>
    %49 = vector.shape_cast %48 : vector<64xf32> to vector<1x64xf32>
    %cst_28 = arith.constant 2.000000e+00 : f32
    %50 = vector.broadcast %cst_28 : f32 to vector<1x64xf32>
    %51 = arith.divf %49, %50 : vector<1x64xf32>
    %cst_29 = arith.constant 9.99999974E-6 : f32
    %52 = vector.broadcast %cst_29 : f32 to vector<1x64xf32>
    %53 = arith.addf %51, %52 : vector<1x64xf32>
    %54 = math.rsqrt %53 : vector<1x64xf32>
    %c2 = arith.constant 2 : index
    %c0_30 = arith.constant 0 : index
    %55 = vector.load %arg14[%c2, %c0_30] : memref<8x64xf32, #tpu.memory_space<vmem>>, vector<1x64xf32>
    %56 = arith.mulf %55, %54 : vector<1x64xf32>
    %c3 = arith.constant 3 : index
    %c0_31 = arith.constant 0 : index
    %57 = vector.load %arg14[%c3, %c0_31] : memref<8x64xf32, #tpu.memory_space<vmem>>, vector<1x64xf32>
    %58 = arith.mulf %44, %56 : vector<1x64xf32>
    %59 = arith.subf %57, %58 : vector<1x64xf32>
    %60 = vector.broadcast %56 : vector<1x64xf32> to vector<2x64xf32>
    %61 = arith.mulf %40, %60 : vector<2x64xf32>
    %62 = vector.broadcast %59 : vector<1x64xf32> to vector<2x64xf32>
    %63 = arith.addf %61, %62 : vector<2x64xf32>
    %cst_32 = arith.constant 0.000000e+00 : f32
    %64 = vector.broadcast %cst_32 : f32 to vector<2x64xf32>
    %65 = arith.maximumf %63, %64 : vector<2x64xf32>
    %c0_33 = arith.constant 0 : index
    %c0_34 = arith.constant 0 : index
    %66 = vector.load %arg1[%c0_33, %c0_34] : memref<2x16xbf16, #tpu.memory_space<vmem>>, vector<2x16xbf16>
    %c0_35 = arith.constant 0 : index
    %c0_36 = arith.constant 0 : index
    %67 = vector.load %arg4[%c0_35, %c0_36] : memref<16x64xbf16, #tpu.memory_space<vmem>>, vector<16x64xbf16>
    %cst_37 = arith.constant dense<0.000000e+00> : vector<2x64xf32>
    %68 = tpu.matmul %66, %67, %cst_37 {dimension_numbers = #tpu.dot_dimension_numbers<[1], [0], [0], [1], [0, 0, 1, 1], [], []>} : vector<2x16xbf16>, vector<16x64xbf16>, vector<2x64xf32> -> vector<2x64xf32>
    %c0_38 = arith.constant 0 : index
    %c0_39 = arith.constant 0 : index
    %69 = vector.load %arg6[%c0_38, %c0_39] : memref<1x64xf32, #tpu.memory_space<vmem>>, vector<1x64xf32>
    %70 = vector.broadcast %69 : vector<1x64xf32> to vector<2x64xf32>
    %71 = arith.addf %68, %70 : vector<2x64xf32>
    %c0_40 = arith.constant 0 : index
    %c0_41 = arith.constant 0 : index
    %72 = vector.load %arg5[%c0_40, %c0_41] : memref<16x64xbf16, #tpu.memory_space<vmem>>, vector<16x64xbf16>
    %cst_42 = arith.constant dense<0.000000e+00> : vector<2x64xf32>
    %73 = tpu.matmul %66, %72, %cst_42 {dimension_numbers = #tpu.dot_dimension_numbers<[1], [0], [0], [1], [0, 0, 1, 1], [], []>} : vector<2x16xbf16>, vector<16x64xbf16>, vector<2x64xf32> -> vector<2x64xf32>
    %c0_43 = arith.constant 0 : index
    %c0_44 = arith.constant 0 : index
    %74 = vector.load %arg7[%c0_43, %c0_44] : memref<1x64xf32, #tpu.memory_space<vmem>>, vector<1x64xf32>
    %75 = vector.broadcast %74 : vector<1x64xf32> to vector<2x64xf32>
    %76 = arith.addf %73, %75 : vector<2x64xf32>
    %cst_45 = arith.constant 1.000000e+00 : f32
    %77 = vector.broadcast %cst_45 : f32 to vector<2x64xf32>
    %78 = arith.addf %71, %77 : vector<2x64xf32>
    %79 = arith.mulf %65, %78 : vector<2x64xf32>
    %80 = arith.addf %79, %76 : vector<2x64xf32>
    %81 = arith.truncf %80 : vector<2x64xf32> to vector<2x64xbf16>
    %c0_46 = arith.constant 0 : index
    %c0_47 = arith.constant 0 : index
    %82 = vector.load %arg8[%c0_46, %c0_47] : memref<64x256xbf16, #tpu.memory_space<vmem>>, vector<64x256xbf16>
    %cst_48 = arith.constant dense<0.000000e+00> : vector<2x256xf32>
    %83 = tpu.matmul %81, %82, %cst_48 {dimension_numbers = #tpu.dot_dimension_numbers<[1], [0], [0], [1], [0, 0, 1, 1], [], []>} : vector<2x64xbf16>, vector<64x256xbf16>, vector<2x256xf32> -> vector<2x256xf32>
    %c4 = arith.constant 4 : index
    %c0_49 = arith.constant 0 : index
    %84 = vector.load %arg14[%c4, %c0_49] : memref<8x64xf32, #tpu.memory_space<vmem>>, vector<1x64xf32>
    %c5 = arith.constant 5 : index
    %c0_50 = arith.constant 0 : index
    %85 = vector.load %arg14[%c5, %c0_50] : memref<8x64xf32, #tpu.memory_space<vmem>>, vector<1x64xf32>
    %c0_51 = arith.constant 0 : index
    %c0_52 = arith.constant 0 : index
    %86 = vector.load %arg10[%c0_51, %c0_52] : memref<256x64xf32, #tpu.memory_space<vmem>>, vector<256x64xf32>
    %c0_53 = arith.constant 0 : index
    %c0_54 = arith.constant 0 : index
    %87 = vector.load %arg11[%c0_53, %c0_54] : memref<64x256xf32, #tpu.memory_space<vmem>>, vector<64x256xf32>
    %cst_55 = arith.constant dense<0.000000e+00> : vector<2x64xf32>
    %88 = tpu.matmul %83, %86, %cst_55 {dimension_numbers = #tpu.dot_dimension_numbers<[1], [0], [0], [1], [0, 0, 1, 1], [], []>} : vector<2x256xf32>, vector<256x64xf32>, vector<2x64xf32> -> vector<2x64xf32>
    %cst_56 = arith.constant dense<0.000000e+00> : vector<64xf32>
    %89 = vector.multi_reduction <add>, %88, %cst_56 [0] : vector<2x64xf32> to vector<64xf32>
    %90 = vector.shape_cast %89 : vector<64xf32> to vector<1x64xf32>
    %cst_57 = arith.constant 1.250000e-01 : f32
    %91 = vector.broadcast %cst_57 : f32 to vector<1x64xf32>
    %92 = arith.mulf %90, %91 : vector<1x64xf32>
    %cst_58 = arith.constant dense<0.000000e+00> : vector<1x256xf32>
    %93 = tpu.matmul %92, %87, %cst_58 {dimension_numbers = #tpu.dot_dimension_numbers<[1], [0], [0], [1], [0, 0, 1, 1], [], []>} : vector<1x64xf32>, vector<64x256xf32>, vector<1x256xf32> -> vector<1x256xf32>
    %94 = vector.broadcast %93 : vector<1x256xf32> to vector<2x256xf32>
    %95 = arith.subf %83, %94 : vector<2x256xf32>
    %96 = arith.mulf %95, %95 : vector<2x256xf32>
    %cst_59 = arith.constant dense<0.000000e+00> : vector<2x64xf32>
    %97 = tpu.matmul %96, %86, %cst_59 {dimension_numbers = #tpu.dot_dimension_numbers<[1], [0], [0], [1], [0, 0, 1, 1], [], []>} : vector<2x256xf32>, vector<256x64xf32>, vector<2x64xf32> -> vector<2x64xf32>
    %cst_60 = arith.constant dense<0.000000e+00> : vector<64xf32>
    %98 = vector.multi_reduction <add>, %97, %cst_60 [0] : vector<2x64xf32> to vector<64xf32>
    %99 = vector.shape_cast %98 : vector<64xf32> to vector<1x64xf32>
    %cst_61 = arith.constant 1.250000e-01 : f32
    %100 = vector.broadcast %cst_61 : f32 to vector<1x64xf32>
    %101 = arith.mulf %99, %100 : vector<1x64xf32>
    %cst_62 = arith.constant 9.99999974E-6 : f32
    %102 = vector.broadcast %cst_62 : f32 to vector<1x64xf32>
    %103 = arith.addf %101, %102 : vector<1x64xf32>
    %104 = math.rsqrt %103 : vector<1x64xf32>
    %105 = arith.mulf %84, %104 : vector<1x64xf32>
    %106 = arith.mulf %92, %105 : vector<1x64xf32>
    %107 = arith.subf %85, %106 : vector<1x64xf32>
    %cst_63 = arith.constant dense<0.000000e+00> : vector<1x256xf32>
    %108 = tpu.matmul %105, %87, %cst_63 {dimension_numbers = #tpu.dot_dimension_numbers<[1], [0], [0], [1], [0, 0, 1, 1], [], []>} : vector<1x64xf32>, vector<64x256xf32>, vector<1x256xf32> -> vector<1x256xf32>
    %cst_64 = arith.constant dense<0.000000e+00> : vector<1x256xf32>
    %109 = tpu.matmul %107, %87, %cst_64 {dimension_numbers = #tpu.dot_dimension_numbers<[1], [0], [0], [1], [0, 0, 1, 1], [], []>} : vector<1x64xf32>, vector<64x256xf32>, vector<1x256xf32> -> vector<1x256xf32>
    %110 = vector.broadcast %108 : vector<1x256xf32> to vector<2x256xf32>
    %111 = arith.mulf %83, %110 : vector<2x256xf32>
    %112 = vector.broadcast %109 : vector<1x256xf32> to vector<2x256xf32>
    %113 = arith.addf %111, %112 : vector<2x256xf32>
    %cst_65 = arith.constant 0.000000e+00 : f32
    %114 = vector.broadcast %cst_65 : f32 to vector<2x256xf32>
    %115 = arith.maximumf %113, %114 : vector<2x256xf32>
    %116 = arith.addf %115, %37 : vector<2x256xf32>
    %117 = arith.truncf %116 : vector<2x256xf32> to vector<2x256xbf16>
    %c0_66 = arith.constant 0 : index
    %c0_67 = arith.constant 0 : index
    %118 = vector.load %arg9[%c0_66, %c0_67] : memref<256x512xbf16, #tpu.memory_space<vmem>>, vector<256x512xbf16>
    %cst_68 = arith.constant dense<0.000000e+00> : vector<2x512xf32>
    %119 = tpu.matmul %117, %118, %cst_68 {dimension_numbers = #tpu.dot_dimension_numbers<[1], [0], [0], [1], [0, 0, 1, 1], [], []>} : vector<2x256xbf16>, vector<256x512xbf16>, vector<2x512xf32> -> vector<2x512xf32>
    %c6 = arith.constant 6 : index
    %c0_69 = arith.constant 0 : index
    %120 = vector.load %arg14[%c6, %c0_69] : memref<8x64xf32, #tpu.memory_space<vmem>>, vector<1x32xf32>
    %c7 = arith.constant 7 : index
    %c0_70 = arith.constant 0 : index
    %121 = vector.load %arg14[%c7, %c0_70] : memref<8x64xf32, #tpu.memory_space<vmem>>, vector<1x32xf32>
    %c0_71 = arith.constant 0 : index
    %c0_72 = arith.constant 0 : index
    %122 = vector.load %arg12[%c0_71, %c0_72] : memref<512x32xf32, #tpu.memory_space<vmem>>, vector<512x32xf32>
    %c0_73 = arith.constant 0 : index
    %c0_74 = arith.constant 0 : index
    %123 = vector.load %arg13[%c0_73, %c0_74] : memref<32x512xf32, #tpu.memory_space<vmem>>, vector<32x512xf32>
    %cst_75 = arith.constant dense<0.000000e+00> : vector<2x32xf32>
    %124 = tpu.matmul %119, %122, %cst_75 {dimension_numbers = #tpu.dot_dimension_numbers<[1], [0], [0], [1], [0, 0, 1, 1], [], []>} : vector<2x512xf32>, vector<512x32xf32>, vector<2x32xf32> -> vector<2x32xf32>
    %cst_76 = arith.constant dense<0.000000e+00> : vector<32xf32>
    %125 = vector.multi_reduction <add>, %124, %cst_76 [0] : vector<2x32xf32> to vector<32xf32>
    %126 = vector.shape_cast %125 : vector<32xf32> to vector<1x32xf32>
    %cst_77 = arith.constant 3.125000e-02 : f32
    %127 = vector.broadcast %cst_77 : f32 to vector<1x32xf32>
    %128 = arith.mulf %126, %127 : vector<1x32xf32>
    %cst_78 = arith.constant dense<0.000000e+00> : vector<1x512xf32>
    %129 = tpu.matmul %128, %123, %cst_78 {dimension_numbers = #tpu.dot_dimension_numbers<[1], [0], [0], [1], [0, 0, 1, 1], [], []>} : vector<1x32xf32>, vector<32x512xf32>, vector<1x512xf32> -> vector<1x512xf32>
    %130 = vector.broadcast %129 : vector<1x512xf32> to vector<2x512xf32>
    %131 = arith.subf %119, %130 : vector<2x512xf32>
    %132 = arith.mulf %131, %131 : vector<2x512xf32>
    %cst_79 = arith.constant dense<0.000000e+00> : vector<2x32xf32>
    %133 = tpu.matmul %132, %122, %cst_79 {dimension_numbers = #tpu.dot_dimension_numbers<[1], [0], [0], [1], [0, 0, 1, 1], [], []>} : vector<2x512xf32>, vector<512x32xf32>, vector<2x32xf32> -> vector<2x32xf32>
    %cst_80 = arith.constant dense<0.000000e+00> : vector<32xf32>
    %134 = vector.multi_reduction <add>, %133, %cst_80 [0] : vector<2x32xf32> to vector<32xf32>
    %135 = vector.shape_cast %134 : vector<32xf32> to vector<1x32xf32>
    %cst_81 = arith.constant 3.125000e-02 : f32
    %136 = vector.broadcast %cst_81 : f32 to vector<1x32xf32>
    %137 = arith.mulf %135, %136 : vector<1x32xf32>
    %cst_82 = arith.constant 9.99999974E-6 : f32
    %138 = vector.broadcast %cst_82 : f32 to vector<1x32xf32>
    %139 = arith.addf %137, %138 : vector<1x32xf32>
    %140 = math.rsqrt %139 : vector<1x32xf32>
    %141 = arith.mulf %120, %140 : vector<1x32xf32>
    %142 = arith.mulf %128, %141 : vector<1x32xf32>
    %143 = arith.subf %121, %142 : vector<1x32xf32>
    %cst_83 = arith.constant dense<0.000000e+00> : vector<1x512xf32>
    %144 = tpu.matmul %141, %123, %cst_83 {dimension_numbers = #tpu.dot_dimension_numbers<[1], [0], [0], [1], [0, 0, 1, 1], [], []>} : vector<1x32xf32>, vector<32x512xf32>, vector<1x512xf32> -> vector<1x512xf32>
    %cst_84 = arith.constant dense<0.000000e+00> : vector<1x512xf32>
    %145 = tpu.matmul %143, %123, %cst_84 {dimension_numbers = #tpu.dot_dimension_numbers<[1], [0], [0], [1], [0, 0, 1, 1], [], []>} : vector<1x32xf32>, vector<32x512xf32>, vector<1x512xf32> -> vector<1x512xf32>
    %146 = vector.broadcast %144 : vector<1x512xf32> to vector<2x512xf32>
    %147 = arith.mulf %119, %146 : vector<2x512xf32>
    %148 = vector.broadcast %145 : vector<1x512xf32> to vector<2x512xf32>
    %149 = arith.addf %147, %148 : vector<2x512xf32>
    %cst_85 = arith.constant 0.000000e+00 : f32
    %150 = vector.broadcast %cst_85 : f32 to vector<2x512xf32>
    %151 = arith.maximumf %149, %150 : vector<2x512xf32>
    %152 = arith.extf %0 : vector<2x512xbf16> to vector<2x512xf32>
    %153 = arith.addf %151, %152 : vector<2x512xf32>
    %154 = arith.truncf %153 : vector<2x512xf32> to vector<2x512xbf16>
    %c0_86 = arith.constant 0 : index
    %c0_87 = arith.constant 0 : index
    %155 = vector.load %arg15[%c0_86, %c0_87] : memref<2x512xbf16, #tpu.memory_space<vmem>>, vector<2x512xbf16>
    tpu.vector_store %arg15[%c0_86, %c0_87], %154 {strides = array<i32>} : memref<2x512xbf16, #tpu.memory_space<vmem>>, vector<2x512xbf16>,
    return
  }
}

module attributes {stable_mosaic.version = 11 : i64} {
  func.func @_convt_bn_relu_add_kernel(%arg0: memref<128x512xbf16, #tpu.memory_space<vmem>>, %arg1: memref<512x16xbf16, #tpu.memory_space<vmem>>, %arg2: memref<1x16xf32, #tpu.memory_space<vmem>>, %arg3: memref<1x16xf32, #tpu.memory_space<vmem>>, %arg4: memref<128x16xbf16, #tpu.memory_space<vmem>>, %arg5: memref<128x16xbf16, #tpu.memory_space<vmem>>) attributes {dimension_semantics = [], scalar_prefetch = 0 : i64, scratch_operands = 0 : i64, tpu.core_type = #tpu.core_type<tc>} {
    %c0 = arith.constant 0 : index
    %c0_0 = arith.constant 0 : index
    %0 = vector.load %arg0[%c0, %c0_0] : memref<128x512xbf16, #tpu.memory_space<vmem>>, vector<128x512xbf16>
    %c0_1 = arith.constant 0 : index
    %c0_2 = arith.constant 0 : index
    %1 = vector.load %arg1[%c0_1, %c0_2] : memref<512x16xbf16, #tpu.memory_space<vmem>>, vector<512x16xbf16>
    %cst = arith.constant dense<0.000000e+00> : vector<128x16xf32>
    %2 = tpu.matmul %0, %1, %cst {dimension_numbers = #tpu.dot_dimension_numbers<[1], [0], [0], [1], [0, 0, 1, 1], [], []>} : vector<128x512xbf16>, vector<512x16xbf16>, vector<128x16xf32> -> vector<128x16xf32>
    %cst_3 = arith.constant dense<0.000000e+00> : vector<16xf32>
    %3 = vector.multi_reduction <add>, %2, %cst_3 [0] : vector<128x16xf32> to vector<16xf32>
    %4 = vector.shape_cast %3 : vector<16xf32> to vector<1x16xf32>
    %cst_4 = arith.constant 7.812500e-03 : f32
    %5 = vector.broadcast %cst_4 : f32 to vector<1x16xf32>
    %6 = arith.mulf %4, %5 : vector<1x16xf32>
    %7 = vector.broadcast %6 : vector<1x16xf32> to vector<128x16xf32>
    %8 = arith.subf %2, %7 : vector<128x16xf32>
    %9 = arith.mulf %8, %8 : vector<128x16xf32>
    %cst_5 = arith.constant dense<0.000000e+00> : vector<16xf32>
    %10 = vector.multi_reduction <add>, %9, %cst_5 [0] : vector<128x16xf32> to vector<16xf32>
    %11 = vector.shape_cast %10 : vector<16xf32> to vector<1x16xf32>
    %cst_6 = arith.constant 7.812500e-03 : f32
    %12 = vector.broadcast %cst_6 : f32 to vector<1x16xf32>
    %13 = arith.mulf %11, %12 : vector<1x16xf32>
    %cst_7 = arith.constant 9.99999974E-6 : f32
    %14 = vector.broadcast %cst_7 : f32 to vector<1x16xf32>
    %15 = arith.addf %13, %14 : vector<1x16xf32>
    %16 = math.rsqrt %15 : vector<1x16xf32>
    %c0_8 = arith.constant 0 : index
    %c0_9 = arith.constant 0 : index
    %17 = vector.load %arg2[%c0_8, %c0_9] : memref<1x16xf32, #tpu.memory_space<vmem>>, vector<1x16xf32>
    %18 = arith.mulf %17, %16 : vector<1x16xf32>
    %c0_10 = arith.constant 0 : index
    %c0_11 = arith.constant 0 : index
    %19 = vector.load %arg3[%c0_10, %c0_11] : memref<1x16xf32, #tpu.memory_space<vmem>>, vector<1x16xf32>
    %20 = arith.mulf %6, %18 : vector<1x16xf32>
    %21 = arith.subf %19, %20 : vector<1x16xf32>
    %22 = vector.broadcast %18 : vector<1x16xf32> to vector<128x16xf32>
    %23 = arith.mulf %2, %22 : vector<128x16xf32>
    %24 = vector.broadcast %21 : vector<1x16xf32> to vector<128x16xf32>
    %25 = arith.addf %23, %24 : vector<128x16xf32>
    %cst_12 = arith.constant 0.000000e+00 : f32
    %26 = vector.broadcast %cst_12 : f32 to vector<128x16xf32>
    %27 = arith.maximumf %25, %26 : vector<128x16xf32>
    %c0_13 = arith.constant 0 : index
    %c0_14 = arith.constant 0 : index
    %28 = vector.load %arg4[%c0_13, %c0_14] : memref<128x16xbf16, #tpu.memory_space<vmem>>, vector<128x16xbf16>
    %29 = arith.extf %28 : vector<128x16xbf16> to vector<128x16xf32>
    %30 = arith.addf %27, %29 : vector<128x16xf32>
    %31 = arith.truncf %30 : vector<128x16xf32> to vector<128x16xbf16>
    %c0_15 = arith.constant 0 : index
    %c0_16 = arith.constant 0 : index
    %32 = vector.load %arg5[%c0_15, %c0_16] : memref<128x16xbf16, #tpu.memory_space<vmem>>, vector<128x16xbf16>
    tpu.vector_store %arg5[%c0_15, %c0_16], %31 {strides = array<i32>} : memref<128x16xbf16, #tpu.memory_space<vmem>>, vector<128x16xbf16>,
    return
  }
}

module attributes {stable_mosaic.version = 11 : i64} {
  func.func @_convt_bn_relu_add_kernel(%arg0: memref<512x256xbf16, #tpu.memory_space<vmem>>, %arg1: memref<256x8xbf16, #tpu.memory_space<vmem>>, %arg2: memref<1x8xf32, #tpu.memory_space<vmem>>, %arg3: memref<1x8xf32, #tpu.memory_space<vmem>>, %arg4: memref<512x8xbf16, #tpu.memory_space<vmem>>, %arg5: memref<512x8xbf16, #tpu.memory_space<vmem>>) attributes {dimension_semantics = [], scalar_prefetch = 0 : i64, scratch_operands = 0 : i64, tpu.core_type = #tpu.core_type<tc>} {
    %c0 = arith.constant 0 : index
    %c0_0 = arith.constant 0 : index
    %0 = vector.load %arg0[%c0, %c0_0] : memref<512x256xbf16, #tpu.memory_space<vmem>>, vector<512x256xbf16>
    %c0_1 = arith.constant 0 : index
    %c0_2 = arith.constant 0 : index
    %1 = vector.load %arg1[%c0_1, %c0_2] : memref<256x8xbf16, #tpu.memory_space<vmem>>, vector<256x8xbf16>
    %cst = arith.constant dense<0.000000e+00> : vector<512x8xf32>
    %2 = tpu.matmul %0, %1, %cst {dimension_numbers = #tpu.dot_dimension_numbers<[1], [0], [0], [1], [0, 0, 1, 1], [], []>} : vector<512x256xbf16>, vector<256x8xbf16>, vector<512x8xf32> -> vector<512x8xf32>
    %cst_3 = arith.constant dense<0.000000e+00> : vector<8xf32>
    %3 = vector.multi_reduction <add>, %2, %cst_3 [0] : vector<512x8xf32> to vector<8xf32>
    %4 = vector.shape_cast %3 : vector<8xf32> to vector<1x8xf32>
    %cst_4 = arith.constant 0.001953125 : f32
    %5 = vector.broadcast %cst_4 : f32 to vector<1x8xf32>
    %6 = arith.mulf %4, %5 : vector<1x8xf32>
    %7 = vector.broadcast %6 : vector<1x8xf32> to vector<512x8xf32>
    %8 = arith.subf %2, %7 : vector<512x8xf32>
    %9 = arith.mulf %8, %8 : vector<512x8xf32>
    %cst_5 = arith.constant dense<0.000000e+00> : vector<8xf32>
    %10 = vector.multi_reduction <add>, %9, %cst_5 [0] : vector<512x8xf32> to vector<8xf32>
    %11 = vector.shape_cast %10 : vector<8xf32> to vector<1x8xf32>
    %cst_6 = arith.constant 0.001953125 : f32
    %12 = vector.broadcast %cst_6 : f32 to vector<1x8xf32>
    %13 = arith.mulf %11, %12 : vector<1x8xf32>
    %cst_7 = arith.constant 9.99999974E-6 : f32
    %14 = vector.broadcast %cst_7 : f32 to vector<1x8xf32>
    %15 = arith.addf %13, %14 : vector<1x8xf32>
    %16 = math.rsqrt %15 : vector<1x8xf32>
    %c0_8 = arith.constant 0 : index
    %c0_9 = arith.constant 0 : index
    %17 = vector.load %arg2[%c0_8, %c0_9] : memref<1x8xf32, #tpu.memory_space<vmem>>, vector<1x8xf32>
    %18 = arith.mulf %17, %16 : vector<1x8xf32>
    %c0_10 = arith.constant 0 : index
    %c0_11 = arith.constant 0 : index
    %19 = vector.load %arg3[%c0_10, %c0_11] : memref<1x8xf32, #tpu.memory_space<vmem>>, vector<1x8xf32>
    %20 = arith.mulf %6, %18 : vector<1x8xf32>
    %21 = arith.subf %19, %20 : vector<1x8xf32>
    %22 = vector.broadcast %18 : vector<1x8xf32> to vector<512x8xf32>
    %23 = arith.mulf %2, %22 : vector<512x8xf32>
    %24 = vector.broadcast %21 : vector<1x8xf32> to vector<512x8xf32>
    %25 = arith.addf %23, %24 : vector<512x8xf32>
    %cst_12 = arith.constant 0.000000e+00 : f32
    %26 = vector.broadcast %cst_12 : f32 to vector<512x8xf32>
    %27 = arith.maximumf %25, %26 : vector<512x8xf32>
    %c0_13 = arith.constant 0 : index
    %c0_14 = arith.constant 0 : index
    %28 = vector.load %arg4[%c0_13, %c0_14] : memref<512x8xbf16, #tpu.memory_space<vmem>>, vector<512x8xbf16>
    %29 = arith.extf %28 : vector<512x8xbf16> to vector<512x8xf32>
    %30 = arith.addf %27, %29 : vector<512x8xf32>
    %31 = arith.truncf %30 : vector<512x8xf32> to vector<512x8xbf16>
    %c0_15 = arith.constant 0 : index
    %c0_16 = arith.constant 0 : index
    %32 = vector.load %arg5[%c0_15, %c0_16] : memref<512x8xbf16, #tpu.memory_space<vmem>>, vector<512x8xbf16>
    tpu.vector_store %arg5[%c0_15, %c0_16], %31 {strides = array<i32>} : memref<512x8xbf16, #tpu.memory_space<vmem>>, vector<512x8xbf16>,
    return
  }
}

module attributes {stable_mosaic.version = 11 : i64} {
  func.func @_head_kernel(%arg0: i32, %arg1: memref<1024x128xbf16, #tpu.memory_space<vmem>>, %arg2: memref<128x4xbf16, #tpu.memory_space<vmem>>, %arg3: memref<1x4xf32, #tpu.memory_space<vmem>>, %arg4: memref<1x4xf32, #tpu.memory_space<vmem>>, %arg5: memref<1x4xf32, #tpu.memory_space<vmem>>, %arg6: memref<1024x4xf32, #tpu.memory_space<vmem>>) attributes {dimension_semantics = [#tpu.dimension_semantics<parallel>], iteration_bounds = array<i64: 2>, scalar_prefetch = 0 : i64, scratch_operands = 0 : i64, tpu.core_type = #tpu.core_type<tc>, window_params = [{transform_indices = @transform_0, window_bounds = array<i64: 1024, 128>}, {pipeline_mode = #tpu.pipeline_mode<synchronous>, transform_indices = @transform_1, window_bounds = array<i64: 128, 4>}, {pipeline_mode = #tpu.pipeline_mode<synchronous>, transform_indices = @transform_2, window_bounds = array<i64: 1, 4>}, {pipeline_mode = #tpu.pipeline_mode<synchronous>, transform_indices = @transform_3, window_bounds = array<i64: 1, 4>}, {pipeline_mode = #tpu.pipeline_mode<synchronous>, transform_indices = @transform_4, window_bounds = array<i64: 1, 4>}, {transform_indices = @transform_5, window_bounds = array<i64: 1024, 4>}]} {
    %c0 = arith.constant 0 : index
    %c0_0 = arith.constant 0 : index
    %0 = vector.load %arg1[%c0, %c0_0] : memref<1024x128xbf16, #tpu.memory_space<vmem>>, vector<1024x128xbf16>
    %c0_1 = arith.constant 0 : index
    %c0_2 = arith.constant 0 : index
    %1 = vector.load %arg2[%c0_1, %c0_2] : memref<128x4xbf16, #tpu.memory_space<vmem>>, vector<128x4xbf16>
    %cst = arith.constant dense<0.000000e+00> : vector<1024x4xf32>
    %2 = tpu.matmul %0, %1, %cst {dimension_numbers = #tpu.dot_dimension_numbers<[1], [0], [0], [1], [0, 0, 1, 1], [], []>} : vector<1024x128xbf16>, vector<128x4xbf16>, vector<1024x4xf32> -> vector<1024x4xf32>
    %c0_3 = arith.constant 0 : index
    %c0_4 = arith.constant 0 : index
    %3 = vector.load %arg3[%c0_3, %c0_4] : memref<1x4xf32, #tpu.memory_space<vmem>>, vector<1x4xf32>
    %4 = vector.broadcast %3 : vector<1x4xf32> to vector<1024x4xf32>
    %5 = arith.addf %2, %4 : vector<1024x4xf32>
    %6 = math.tanh %5 : vector<1024x4xf32>
    %c0_5 = arith.constant 0 : index
    %c0_6 = arith.constant 0 : index
    %7 = vector.load %arg4[%c0_5, %c0_6] : memref<1x4xf32, #tpu.memory_space<vmem>>, vector<1x4xf32>
    %8 = vector.broadcast %7 : vector<1x4xf32> to vector<1024x4xf32>
    %9 = arith.mulf %8, %6 : vector<1024x4xf32>
    %c0_7 = arith.constant 0 : index
    %c0_8 = arith.constant 0 : index
    %10 = vector.load %arg5[%c0_7, %c0_8] : memref<1x4xf32, #tpu.memory_space<vmem>>, vector<1x4xf32>
    %11 = vector.broadcast %10 : vector<1x4xf32> to vector<1024x4xf32>
    %12 = arith.addf %9, %11 : vector<1024x4xf32>
    %c0_9 = arith.constant 0 : index
    %c0_10 = arith.constant 0 : index
    %13 = vector.load %arg6[%c0_9, %c0_10] : memref<1024x4xf32, #tpu.memory_space<vmem>>, vector<1024x4xf32>
    tpu.vector_store %arg6[%c0_9, %c0_10], %12 {strides = array<i32>} : memref<1024x4xf32, #tpu.memory_space<vmem>>, vector<1024x4xf32>,
    return
  }
  func.func @transform_0(%arg0: i32) -> (i32, i32) {
    %c0_i32 = arith.constant 0 : i32
    %c0_i32_0 = arith.constant 0 : i32
    return %arg0, %c0_i32 : i32, i32
  }
  func.func @transform_1(%arg0: i32) -> (i32, i32) {
    %c0_i32 = arith.constant 0 : i32
    %c0_i32_0 = arith.constant 0 : i32
    %c0_i32_1 = arith.constant 0 : i32
    return %c0_i32, %c0_i32_0 : i32, i32
  }
  func.func @transform_2(%arg0: i32) -> (i32, i32) {
    %c0_i32 = arith.constant 0 : i32
    %c0_i32_0 = arith.constant 0 : i32
    %c0_i32_1 = arith.constant 0 : i32
    return %c0_i32, %c0_i32_0 : i32, i32
  }
  func.func @transform_3(%arg0: i32) -> (i32, i32) {
    %c0_i32 = arith.constant 0 : i32
    %c0_i32_0 = arith.constant 0 : i32
    %c0_i32_1 = arith.constant 0 : i32
    return %c0_i32, %c0_i32_0 : i32, i32
  }
  func.func @transform_4(%arg0: i32) -> (i32, i32) {
    %c0_i32 = arith.constant 0 : i32
    %c0_i32_0 = arith.constant 0 : i32
    %c0_i32_1 = arith.constant 0 : i32
    return %c0_i32, %c0_i32_0 : i32, i32
  }
  func.func @transform_5(%arg0: i32) -> (i32, i32) {
    %c0_i32 = arith.constant 0 : i32
    %c0_i32_0 = arith.constant 0 : i32
    return %arg0, %c0_i32 : i32, i32
  }
}

</mosaic_0001>

<bundles_post_ra>
// kernel: dagan_generator.7
= control target key start
LH: loop header
LB: loop body
LE: loop exit
PB: predicated region body
PF: predicated region fallthrough
CT: control target
= control target key end

     0   :  { %vm274_vm0 = vcmask 523264   ;;  %vm540_vm1 = vcmask 64512   ;;  %vm1343_vm15 = vcmask 60416   ;;  %s3331_s1 = inlined_call_operand.vmem [shape: bf16[64,8], index: 1, kind: input, shape index: {}]   ;;  %s3332_s0 = inlined_call_operand.vmem [shape: bf16[512,64], index: 0, kind: input, shape index: {}]   ;;  %s3333_s2 = inlined_call_operand.vmem [shape: f32[1,8], index: 2, kind: input, shape index: {}]   ;;  %s3334_s3 = inlined_call_operand.vmem [shape: f32[1,8], index: 3, kind: input, shape index: {}]   ;;  %s3335_s4 = inlined_call_operand.vmem [shape: bf16[512,8], index: 4, kind: output, shape index: {}]  }
   0x1   :  { %v1623_v0 = vld [vmem:[%s3331_s1 + $0x18] sm:$0xff]  ;;  %v1622_v1 = vld [vmem:[%s3331_s1 + $0x10] sm:$0xff]  ;;  %v1621_v2 = vld [vmem:[%s3331_s1 + $0x8] sm:$0xff] }
   0x2   :  { %375 = vmatpush.bf16.msra.mxu0 %v1623_v0  ;;  %1624 = vmatpush.bf16.msra.mxu1 %v1623_v0  ;;  %v1620_v3 = vld [vmem:[%s3331_s1] sm:$0xff]  ;;  %v1589_v6 = vld [vmem:[%s3332_s0 + $0x8] sm:$0xff]  ;;  %v1590_v9 = vld [vmem:[%s3332_s0 + $0x10] sm:$0xff] }
   0x3   :  { %1625 = vmatpush.bf16.msra.mxu2 %v1623_v0  ;;  %1626 = vmatpush.bf16.msra.mxu3 %v1623_v0  ;;  %v1588_v4 = vld [vmem:[%s3332_s0] sm:$0xff]  ;;  %v1597_v7 = vld [vmem:[%s3332_s0 + $0x48] sm:$0xff]  ;;  %v1598_v10 = vld [vmem:[%s3332_s0 + $0x50] sm:$0xff] }
   0x4   :  { %v1596_v5 = vld [vmem:[%s3332_s0 + $0x40] sm:$0xff]  ;;  %v1605_v11 = vld [vmem:[%s3332_s0 + $0x88] sm:$0xff]  ;;  %v1591_v12 = vld [vmem:[%s3332_s0 + $0x18] sm:$0xff] }
   0x5   :  { %v1604_v8 = vld [vmem:[%s3332_s0 + $0x80] sm:$0xff]  ;;  %v1599_v13 = vld [vmem:[%s3332_s0 + $0x58] sm:$0xff]  ;;  %v1606_v14 = vld [vmem:[%s3332_s0 + $0x90] sm:$0xff] }
   0x6   :  { %376 = vmatpush.bf16.msra.mxu0 %v1622_v1  ;;  %1627 = vmatpush.bf16.msra.mxu1 %v1622_v1  ;;  %v1612_v15 = vld [vmem:[%s3332_s0 + $0xc0] sm:$0xff]  ;;  %v1607_v18 = vld [vmem:[%s3332_s0 + $0x98] sm:$0xff]  ;;  %v1613_v19 = vld [vmem:[%s3332_s0 + $0xc8] sm:$0xff] }
   0x7   :  { %1628 = vmatpush.bf16.msra.mxu2 %v1622_v1  ;;  %1629 = vmatpush.bf16.msra.mxu3 %v1622_v1  ;;  %v1592_v16 = vld [vmem:[%s3332_s0 + $0x20] sm:$0xff]  ;;  %v1593_v20 = vld [vmem:[%s3332_s0 + $0x28] sm:$0xff]  ;;  %v1614_v23 = vld [vmem:[%s3332_s0 + $0xd0] sm:$0xff] }
   0x8   :  { %v1600_v17 = vld [vmem:[%s3332_s0 + $0x60] sm:$0xff]  ;;  %v1601_v21 = vld [vmem:[%s3332_s0 + $0x68] sm:$0xff]  ;;  %v1594_v24 = vld [vmem:[%s3332_s0 + $0x30] sm:$0xff] }
   0x9   :  { %v1608_v22 = vld [vmem:[%s3332_s0 + $0xa0] sm:$0xff]  ;;  %v1602_v25 = vld [vmem:[%s3332_s0 + $0x70] sm:$0xff]  ;;  %v1609_v26 = vld [vmem:[%s3332_s0 + $0xa8] sm:$0xff] }
   0xa   :  { %377 = vmatpush.bf16.msra.mxu0 %v1621_v2  ;;  %1630 = vmatpush.bf16.msra.mxu1 %v1621_v2  ;;  %v1615_v27 = vld [vmem:[%s3332_s0 + $0xd8] sm:$0xff]  ;;  %v1610_v30 = vld [vmem:[%s3332_s0 + $0xb0] sm:$0xff]  ;;  %v1616_v31 = vld [vmem:[%s3332_s0 + $0xe0] sm:$0xff] }
   0xb   :  { %1631 = vmatpush.bf16.msra.mxu2 %v1621_v2  ;;  %1632 = vmatpush.bf16.msra.mxu3 %v1621_v2  ;;  %v1595_v28 = vld [vmem:[%s3332_s0 + $0x38] sm:$0xff]  ;;  %v1617_v35 = vld [vmem:[%s3332_s0 + $0xe8] sm:$0xff]  ;;  %v1618_v39 = vld [vmem:[%s3332_s0 + $0xf0] sm:$0xff] }
   0xc   :  { %v1603_v29 = vld [vmem:[%s3332_s0 + $0x78] sm:$0xff] }
   0xd   :  { %v1611_v34 = vld [vmem:[%s3332_s0 + $0xb8] sm:$0xff] }
   0xe   :  { %378 = vmatpush.bf16.msra.mxu0 %v1620_v3  ;;  %1633 = vmatpush.bf16.msra.mxu1 %v1620_v3  ;;  %v1619_v45 = vld [vmem:[%s3332_s0 + $0xf8] sm:$0xff] }
   0xf   :  { %1634 = vmatpush.bf16.msra.mxu2 %v1620_v3  ;;  %1635 = vmatpush.bf16.msra.mxu3 %v1620_v3 }
  0x11   :  { %1556 = vmatmul.msk.bf16.vlgmr.msra.gmra.mxu0 %vm274_vm0, %v1588_v4  ;;  %1564 = vmatmul.msk.bf16.vlgmr.msra.gmra.mxu1 %vm274_vm0, %v1596_v5 }
  0x12   :  { %1572 = vmatmul.msk.bf16.vlgmr.msra.gmra.mxu2 %vm274_vm0, %v1604_v8  ;;  %1580 = vmatmul.msk.bf16.vlgmr.msra.gmra.mxu3 %vm274_vm0, %v1612_v15 }
  0x21   :  { %1557 = vmatmul.msk.bf16.gmra.mxu0 %vm274_vm0, %v1589_v6  ;;  %1565 = vmatmul.msk.bf16.gmra.mxu1 %vm274_vm0, %v1597_v7 }
  0x22   :  { %1573 = vmatmul.msk.bf16.gmra.mxu2 %vm274_vm0, %v1605_v11  ;;  %1581 = vmatmul.msk.bf16.gmra.mxu3 %vm274_vm0, %v1613_v19 }
  0x31   :  { %1558 = vmatmul.msk.bf16.gmra.mxu0 %vm274_vm0, %v1590_v9  ;;  %1566 = vmatmul.msk.bf16.gmra.mxu1 %vm274_vm0, %v1598_v10 }
  0x32   :  { %1574 = vmatmul.msk.bf16.gmra.mxu2 %vm274_vm0, %v1606_v14  ;;  %1582 = vmatmul.msk.bf16.gmra.mxu3 %vm274_vm0, %v1614_v23 }
  0x41   :  { %1559 = vmatmul.msk.bf16.gmra.mxu0 %vm274_vm0, %v1591_v12  ;;  %1567 = vmatmul.msk.bf16.gmra.mxu1 %vm274_vm0, %v1599_v13 }
  0x42   :  { %1575 = vmatmul.msk.bf16.gmra.mxu2 %vm274_vm0, %v1607_v18  ;;  %1583 = vmatmul.msk.bf16.gmra.mxu3 %vm274_vm0, %v1615_v27 }
  0x51   :  { %1560 = vmatmul.msk.bf16.gmra.mxu0 %vm274_vm0, %v1592_v16  ;;  %1568 = vmatmul.msk.bf16.gmra.mxu1 %vm274_vm0, %v1600_v17 }
  0x52   :  { %1576 = vmatmul.msk.bf16.gmra.mxu2 %vm274_vm0, %v1608_v22  ;;  %1584 = vmatmul.msk.bf16.gmra.mxu3 %vm274_vm0, %v1616_v31 }
  0x61   :  { %1561 = vmatmul.msk.bf16.gmra.mxu0 %vm274_vm0, %v1593_v20  ;;  %1569 = vmatmul.msk.bf16.gmra.mxu1 %vm274_vm0, %v1601_v21 }
  0x62   :  { %1577 = vmatmul.msk.bf16.gmra.mxu2 %vm274_vm0, %v1609_v26  ;;  %1585 = vmatmul.msk.bf16.gmra.mxu3 %vm274_vm0, %v1617_v35 }
  0x71   :  { %1562 = vmatmul.msk.bf16.gmra.mxu0 %vm274_vm0, %v1594_v24  ;;  %1570 = vmatmul.msk.bf16.gmra.mxu1 %vm274_vm0, %v1602_v25 }
  0x72   :  { %1578 = vmatmul.msk.bf16.gmra.mxu2 %vm274_vm0, %v1610_v30  ;;  %1586 = vmatmul.msk.bf16.gmra.mxu3 %vm274_vm0, %v1618_v39 }
  0x81   :  { %1563 = vmatmul.msk.bf16.gmra.mxu0 %vm274_vm0, %v1595_v28  ;;  %1571 = vmatmul.msk.bf16.gmra.mxu1 %vm274_vm0, %v1603_v29 }
  0x82   :  { %1579 = vmatmul.msk.bf16.gmra.mxu2 %vm274_vm0, %v1611_v34  ;;  %1587 = vmatmul.msk.bf16.gmra.mxu3 %vm274_vm0, %v1619_v45 }
  0x8e   :  { %v1787_v32 = vpop.f32.mrf.mxu0  ;;  %v1789_v33 = vpop.f32.mrf.mxu1 }
  0x8f   :  { %v541_v5 = vsel %vm540_vm1, %v1787_v32, 0.0 }
  0x95   :  { %v1815_v43 = vpop.f32.mrf.mxu2  ;;  %v1849_v59 = vpop.f32.mrf.mxu3 }
  0x96   :  { %v1799_v36 = vpop.f32.mrf.mxu0  ;;  %v1801_v37 = vpop.f32.mrf.mxu1  ;;  %3400 = vst [vmem:[#allocation5_spill] sm:$0xff] %v1815_v43 }
  0x97   :  { %3397 = vst [vmem:[#allocation2_spill] sm:$0xff] %v1799_v36  ;;  %v542_v2 = vsel %vm540_vm1, %v1799_v36, 0.0 }
  0x98   :  { %v543_v7 = vadd.f32 %v542_v2, %v541_v5 }
  0x9d   :  { %v1827_v48 = vpop.f32.mrf.mxu2  ;;  %v1857_v63 = vpop.f32.mrf.mxu3 }
  0x9e   :  { %v1803_v38 = vpop.f32.mrf.mxu0  ;;  %v1808_v40 = vpop.f32.mrf.mxu1  ;;  %3403 = vst [vmem:[#allocation8_spill] sm:$0xff] %v1827_v48 }
  0x9f   :  { %3398 = vst [vmem:[#allocation3_spill] sm:$0xff] %v1803_v38  ;;  %v544_v6 = vsel %vm540_vm1, %v1803_v38, 0.0 }
  0xa0   :  { %v545_v9 = vadd.f32 %v544_v6, %v543_v7 }
  0xa5   :  { %v1833_v51 = vpop.f32.mrf.mxu2  ;;  %v1867_v4 = vpop.f32.mrf.mxu3 }
  0xa6   :  { %v1811_v41 = vpop.f32.mrf.mxu0  ;;  %v1813_v42 = vpop.f32.mrf.mxu1  ;;  %3408 = vst [vmem:[#allocation13_spill] sm:$0xff] %v1867_v4 }
  0xa7   :  { %3399 = vst [vmem:[#allocation4_spill] sm:$0xff] %v1811_v41  ;;  %v546_v8 = vsel %vm540_vm1, %v1811_v41, 0.0 }
  0xa8   :  { %v547_v12 = vadd.f32 %v546_v8, %v545_v9 }
  0xad   :  { %v1839_v54 = vpop.f32.mrf.mxu2  ;;  %v1887_v19 = vpop.f32.mrf.mxu3 }
  0xae   :  { %v1817_v44 = vpop.f32.mrf.mxu0  ;;  %v1825_v47 = vpop.f32.mrf.mxu1  ;;  %3404 = vst [vmem:[#allocation9_spill] sm:$0xff] %v1839_v54 }
  0xaf   :  { %3401 = vst [vmem:[#allocation6_spill] sm:$0xff] %v1817_v44  ;;  %v548_v11 = vsel %vm540_vm1, %v1817_v44, 0.0 }
  0xb0   :  { %v549_v14 = vadd.f32 %v548_v11, %v547_v12 }
  0xb5   :  { %v1845_v57 = vpop.f32.mrf.mxu2  ;;  %v1907_v39 = vpop.f32.mrf.mxu3 }
  0xb6   :  { %v1823_v46 = vpop.f32.mrf.mxu0  ;;  %v1831_v50 = vpop.f32.mrf.mxu1  ;;  %3405 = vst [vmem:[#allocation10_spill] sm:$0xff] %v1845_v57 }
  0xb7   :  { %3402 = vst [vmem:[#allocation7_spill] sm:$0xff] %v1823_v46  ;;  %v550_v13 = vsel %vm540_vm1, %v1823_v46, 0.0 }
  0xb8   :  { %v551_v18 = vadd.f32 %v550_v13, %v549_v14  ;;  %3412 = vst [vmem:[#allocation17_spill] sm:$0xff] %v1907_v39 }
  0xbd   :  { %v1855_v62 = vpop.f32.mrf.mxu2 }
  0xbe   :  { %v1829_v49 = vpop.f32.mrf.mxu0  ;;  %v1837_v53 = vpop.f32.mrf.mxu1  ;;  %3406 = vst [vmem:[#allocation11_spill] sm:$0xff] %v1855_v62 }
  0xbf   :  { %v552_v16 = vsel %vm540_vm1, %v1829_v49, 0.0 }
  0xc0   :  { %v553_v21 = vadd.f32 %v552_v16, %v551_v18  ;;  %v1923_v18 = vpop.f32.mrf.mxu3 }
  0xc5   :  { %v1865_v3 = vpop.f32.mrf.mxu2 }
  0xc6   :  { %v1835_v52 = vpop.f32.mrf.mxu0  ;;  %v1843_v56 = vpop.f32.mrf.mxu1  ;;  %3407 = vst [vmem:[#allocation12_spill] sm:$0xff] %v1865_v3 }
  0xc7   :  { %v554_v20 = vsel %vm540_vm1, %v1835_v52, 0.0 }
  0xc8   :  { %v555_v24 = vadd.f32 %v554_v20, %v553_v21  ;;  %v572_v20 = vsel %vm540_vm1, %v1789_v33, 0.0 }
  0xcd   :  { %v1885_v17 = vpop.f32.mrf.mxu2 }
  0xce   :  { %v1841_v55 = vpop.f32.mrf.mxu0  ;;  %v1853_v61 = vpop.f32.mrf.mxu1 }
  0xcf   :  { %v556_v23 = vsel %vm540_vm1, %v1841_v55, 0.0 }
  0xd0   :  { %v557_v26 = vadd.f32 %v556_v23, %v555_v24  ;;  %v574_v23 = vsel %vm540_vm1, %v1801_v37, 0.0 }
  0xd5   :  { %v1903_v31 = vpop.f32.mrf.mxu2 }
  0xd6   :  { %v1847_v58 = vpop.f32.mrf.mxu0  ;;  %v1861_v1 = vpop.f32.mrf.mxu1  ;;  %3411 = vst [vmem:[#allocation16_spill] sm:$0xff] %v1903_v31 }
  0xd7   :  { %v558_v25 = vsel %vm540_vm1, %v1847_v58, 0.0 }
  0xd8   :  { %v559_v28 = vadd.f32 %v558_v25, %v557_v26  ;;  %v576_v25 = vsel %vm540_vm1, %v1808_v40, 0.0 }
  0xdd   :  { %v1921_v16 = vpop.f32.mrf.mxu2 }
  0xde   :  { %v1851_v60 = vpop.f32.mrf.mxu0  ;;  %v1881_v15 = vpop.f32.mrf.mxu1  ;;  %3414 = vst [vmem:[#allocation19_spill] sm:$0xff] %v1921_v16 }
  0xdf   :  { %3409 = vst [vmem:[#allocation14_spill] sm:$0xff] %v1881_v15  ;;  %v560_v27 = vsel %vm540_vm1, %v1851_v60, 0.0 }
  0xe0   :  { %v561_v34 = vadd.f32 %v560_v27, %v559_v28  ;;  %v578_v27 = vsel %vm540_vm1, %v1813_v42, 0.0 }
  0xe6   :  { %v1859_v0 = vpop.f32.mrf.mxu0  ;;  %v1899_v29 = vpop.f32.mrf.mxu1 }
  0xe7   :  { %3410 = vst [vmem:[#allocation15_spill] sm:$0xff] %v1899_v29  ;;  %v562_v30 = vsel %vm540_vm1, %v1859_v0, 0.0 }
  0xe8   :  { %v563_v2 = vadd.f32 %v562_v30, %v561_v34  ;;  %v580_v34 = vsel %vm540_vm1, %v1825_v47, 0.0 }
  0xee   :  { %v1875_v10 = vpop.f32.mrf.mxu0  ;;  %v1917_v12 = vpop.f32.mrf.mxu1 }
  0xef   :  { %v564_v45 = vsel %vm540_vm1, %v1875_v10, 0.0  ;;  %3413 = vst [vmem:[#allocation18_spill] sm:$0xff] %v1917_v12 }
  0xf0   :  { %v565_v6 = vadd.f32 %v564_v45, %v563_v2  ;;  %v1937_v2 = vpop.f32.mrf.mxu2 }
  0xf1   :  { %3416 = vst [vmem:[#allocation21_spill] sm:$0xff] %v1937_v2 }
  0xf6   :  { %v1891_v22 = vpop.f32.mrf.mxu0  ;;  %v1933_v30 = vpop.f32.mrf.mxu1 }
  0xf7   :  { %v566_v5 = vsel %vm540_vm1, %v1891_v22, 0.0  ;;  %3415 = vst [vmem:[#allocation20_spill] sm:$0xff] %v1933_v30 }
  0xf8   :  { %v567_v8 = vadd.f32 %v566_v5, %v565_v6  ;;  %v1939_v5 = vpop.f32.mrf.mxu3  ;;  %v582_v6 = vsel %vm540_vm1, %v1831_v50, 0.0 }
  0xf9   :  { %3417 = vst [vmem:[#allocation22_spill] sm:$0xff] %v1939_v5 }
  0xfe   :  { %v1905_v35 = vpop.f32.mrf.mxu0 }
  0xff   :  { %v568_v7 = vsel %vm540_vm1, %v1905_v35, 0.0 }
 0x100   :  { %v569_v9 = vadd.f32 %v568_v7, %v567_v8  ;;  %v584_v8 = vsel %vm540_vm1, %v1837_v53, 0.0 }
 0x106   :  { %v1915_v11 = vpop.f32.mrf.mxu0 }
 0x107   :  { %v570_v13 = vsel %vm540_vm1, %v1915_v11, 0.0 }
 0x108   :  { %v571_v14 = vadd.f32 %v570_v13, %v569_v9  ;;  %v586_v13 = vsel %vm540_vm1, %v1843_v56, 0.0 }
 0x10a   :  { %v573_v21 = vadd.f32 %v572_v20, %v571_v14  ;;  %v588_v20 = vsel %vm540_vm1, %v1853_v61, 0.0 }
 0x10c   :  { %v575_v24 = vadd.f32 %v574_v23, %v573_v21  ;;  %v1949_v23 = vpop.f32.mrf.mxu1 }
 0x10d   :  { %3418 = vst [vmem:[#allocation23_spill] sm:$0xff] %v1949_v23 }
 0x10e   :  { %v577_v26 = vadd.f32 %v576_v25, %v575_v24  ;;  %v590_v24 = vsel %vm540_vm1, %v1861_v1, 0.0 }
 0x110   :  { %v579_v28 = vadd.f32 %v578_v27, %v577_v26  ;;  %v1953_v26 = vpop.f32.mrf.mxu2  ;;  %v1955_v27 = vpop.f32.mrf.mxu3 }
 0x111   :  { %3419 = vst [vmem:[#allocation24_spill] sm:$0xff] %v1955_v27 }
 0x112   :  { %v581_v45 = vadd.f32 %v580_v34, %v579_v28  ;;  %v592_v28 = vsel %vm540_vm1, %v1881_v15, 0.0 }
 0x114   :  { %v583_v7 = vadd.f32 %v582_v6, %v581_v45  ;;  %v594_v45 = vsel %vm540_vm1, %v1899_v29, 0.0 }
 0x116   :  { %v585_v9 = vadd.f32 %v584_v8, %v583_v7  ;;  %v596_v7 = vsel %vm540_vm1, %v1917_v12, 0.0 }
 0x118   :  { %v587_v14 = vadd.f32 %v586_v13, %v585_v9  ;;  %v598_v9 = vsel %vm540_vm1, %v1933_v30, 0.0 }
 0x11a   :  { %v589_v21 = vadd.f32 %v588_v20, %v587_v14  ;;  %v1965_v14 = vpop.f32.mrf.mxu1  ;;  %v600_v20 = vsel %vm540_vm1, %v1949_v23, 0.0 }
 0x11b   :  { %3420 = vst [vmem:[#allocation25_spill] sm:$0xff] %v1965_v14 }
 0x11c   :  { %v591_v25 = vadd.f32 %v590_v24, %v589_v21  ;;  %v1969_v24 = vpop.f32.mrf.mxu2 }
 0x11e   :  { %v593_v34 = vadd.f32 %v592_v28, %v591_v25  ;;  %v1971_v25 = vpop.f32.mrf.mxu3  ;;  %v602_v28 = vsel %vm540_vm1, %v1965_v14, 0.0 }
 0x11f   :  { %3421 = vst [vmem:[#allocation26_spill] sm:$0xff] %v1971_v25 }
 0x120   :  { %v595_v6 = vadd.f32 %v594_v45, %v593_v34  ;;  %v604_v45 = vsel %vm540_vm1, %v1815_v43, 0.0 }
 0x122   :  { %v597_v8 = vadd.f32 %v596_v7, %v595_v6  ;;  %v606_v7 = vsel %vm540_vm1, %v1827_v48, 0.0 }
 0x124   :  { %v599_v13 = vadd.f32 %v598_v9, %v597_v8  ;;  %v608_v9 = vsel %vm540_vm1, %v1833_v51, 0.0  ;;  %v1983_v30 = vpop.f32.mrf.mxu2 }
 0x125   :  { %3422 = vst [vmem:[#allocation27_spill] sm:$0xff] %v1983_v30 }
 0x126   :  { %v601_v21 = vadd.f32 %v600_v20, %v599_v13  ;;  %v610_v20 = vsel %vm540_vm1, %v1839_v54, 0.0  ;;  %v1985_v14 = vpop.f32.mrf.mxu3 }
 0x127   :  { %3423 = vst [vmem:[#allocation28_spill] sm:$0xff] %v1985_v14 }
 0x128   :  { %v603_v34 = vadd.f32 %v602_v28, %v601_v21  ;;  %v612_v21 = vsel %vm540_vm1, %v1845_v57, 0.0 }
 0x12a   :  { %v605_v6 = vadd.f32 %v604_v45, %v603_v34  ;;  %v614_v34 = vsel %vm540_vm1, %v1855_v62, 0.0 }
 0x12c   :  { %v607_v8 = vadd.f32 %v606_v7, %v605_v6  ;;  %v616_v6 = vsel %vm540_vm1, %v1865_v3, 0.0  ;;  %v1997_v54 = vpop.f32.mrf.mxu2 }
 0x12e   :  { %v609_v13 = vadd.f32 %v608_v9, %v607_v8  ;;  %v618_v8 = vsel %vm540_vm1, %v1885_v17, 0.0  ;;  %v1999_v57 = vpop.f32.mrf.mxu3 }
 0x12f   :  { %3424 = vst [vmem:[#allocation29_spill] sm:$0xff] %v1999_v57 }
 0x130   :  { %v611_v23 = vadd.f32 %v610_v20, %v609_v13  ;;  %v620_v13 = vsel %vm540_vm1, %v1903_v31, 0.0 }
 0x132   :  { %v613_v28 = vadd.f32 %v612_v21, %v611_v23  ;;  %v622_v23 = vsel %vm540_vm1, %v1921_v16, 0.0 }
 0x134   :  { %v615_v45 = vadd.f32 %v614_v34, %v613_v28  ;;  %v624_v28 = vsel %vm540_vm1, %v1937_v2, 0.0  ;;  %v2011_v31 = vpop.f32.mrf.mxu2 }
 0x135   :  { %3425 = vst [vmem:[#allocation30_spill] sm:$0xff] %v2011_v31 }
 0x136   :  { %v617_v7 = vadd.f32 %v616_v6, %v615_v45  ;;  %v626_v45 = vsel %vm540_vm1, %v1953_v26, 0.0  ;;  %v2013_v16 = vpop.f32.mrf.mxu3 }
 0x137   :  { %3426 = vst [vmem:[#allocation31_spill] sm:$0xff] %v2013_v16 }
 0x138   :  { %v619_v9 = vadd.f32 %v618_v8, %v617_v7  ;;  %v628_v7 = vsel %vm540_vm1, %v1969_v24, 0.0 }
 0x13a   :  { %v621_v20 = vadd.f32 %v620_v13, %v619_v9  ;;  %v630_v9 = vsel %vm540_vm1, %v1983_v30, 0.0 }
 0x13c   :  { %v623_v21 = vadd.f32 %v622_v23, %v621_v20  ;;  %v632_v20 = vsel %vm540_vm1, %v1997_v54, 0.0 }
 0x13e   :  { %v625_v34 = vadd.f32 %v624_v28, %v623_v21  ;;  %v634_v21 = vsel %vm540_vm1, %v2011_v31, 0.0  ;;  %v2025_v30 = vpop.f32.mrf.mxu3 }
 0x13f   :  { %3427 = vst [vmem:[#allocation32_spill] sm:$0xff] %v2025_v30 }
 0x140   :  { %v627_v6 = vadd.f32 %v626_v45, %v625_v34  ;;  %v636_v34 = vsel %vm540_vm1, %v1849_v59, 0.0 }
 0x142   :  { %v629_v8 = vadd.f32 %v628_v7, %v627_v6  ;;  %v638_v6 = vsel %vm540_vm1, %v1857_v63, 0.0 }
 0x144   :  { %v631_v13 = vadd.f32 %v630_v9, %v629_v8  ;;  %v640_v8 = vsel %vm540_vm1, %v1867_v4, 0.0 }
 0x146   :  { %v633_v23 = vadd.f32 %v632_v20, %v631_v13  ;;  %v642_v13 = vsel %vm540_vm1, %v1887_v19, 0.0  ;;  %v2037_v4 = vpop.f32.mrf.mxu3 }
 0x147   :  { %3428 = vst [vmem:[#allocation33_spill] sm:$0xff] %v2037_v4 }
 0x148   :  { %v635_v28 = vadd.f32 %v634_v21, %v633_v23  ;;  %v644_v23 = vsel %vm540_vm1, %v1907_v39, 0.0 }
 0x14a   :  { %v637_v45 = vadd.f32 %v636_v34, %v635_v28  ;;  %v646_v28 = vsel %vm540_vm1, %v1923_v18, 0.0 }
 0x14c   :  { %v639_v7 = vadd.f32 %v638_v6, %v637_v45  ;;  %v648_v45 = vsel %vm540_vm1, %v1939_v5, 0.0 }
 0x14e   :  { %v641_v9 = vadd.f32 %v640_v8, %v639_v7  ;;  %v650_v7 = vsel %vm540_vm1, %v1955_v27, 0.0  ;;  %v2047_v27 = vpop.f32.mrf.mxu3 }
 0x14f   :  { %3429 = vst [vmem:[#allocation34_spill] sm:$0xff] %v2047_v27 }
 0x150   :  { %v643_v20 = vadd.f32 %v642_v13, %v641_v9  ;;  %v652_v9 = vsel %vm540_vm1, %v1971_v25, 0.0 }
 0x152   :  { %v645_v21 = vadd.f32 %v644_v23, %v643_v20  ;;  %v654_v20 = vsel %vm540_vm1, %v1985_v14, 0.0 }
 0x154   :  { %v647_v34 = vadd.f32 %v646_v28, %v645_v21  ;;  %v656_v21 = vsel %vm540_vm1, %v1999_v57, 0.0 }
 0x156   :  { %v649_v6 = vadd.f32 %v648_v45, %v647_v34  ;;  %v658_v34 = vsel %vm540_vm1, %v2013_v16, 0.0  ;;  %v2055_v57 = vpop.f32.mrf.mxu3 }
 0x158   :  { %v651_v8 = vadd.f32 %v650_v7, %v649_v6  ;;  %v660_v6 = vsel %vm540_vm1, %v2025_v30, 0.0 }
 0x15a   :  { %v653_v13 = vadd.f32 %v652_v9, %v651_v8  ;;  %v662_v8 = vsel %vm540_vm1, %v2037_v4, 0.0 }
 0x15c   :  { %v655_v23 = vadd.f32 %v654_v20, %v653_v13  ;;  %v664_v13 = vsel %vm540_vm1, %v2047_v27, 0.0 }
 0x15e   :  { %v657_v28 = vadd.f32 %v656_v21, %v655_v23  ;;  %v666_v23 = vsel %vm540_vm1, %v2055_v57, 0.0 }
 0x160   :  { %v659_v45 = vadd.f32 %v658_v34, %v657_v28 }
 0x162   :  { %v661_v7 = vadd.f32 %v660_v6, %v659_v45 }
 0x164   :  { %v663_v9 = vadd.f32 %v662_v8, %v661_v7 }
 0x166   :  { %v665_v20 = vadd.f32 %v664_v13, %v663_v9 }
 0x168   :  { %v667_v21 = vadd.f32 %v666_v23, %v665_v20 }
 0x16a   :  { %v668_v28 = vrot.slane %v667_v21, 4 }
 0x16c   :  { %v669_v34 = vadd.f32 %v668_v28, %v667_v21 }
 0x16e   :  { %v670_v16 = vrot.slane %v669_v34, 2 }
 0x170   :  { %v671_v14 = vadd.f32 %v670_v16, %v669_v34 }
 0x172   :  { %v672_v30 = vrot.slane %v671_v14, 1 }
 0x174   :  { %v673_v45 = vadd.f32 %v672_v30, %v671_v14 }
 0x176   :  { %v2059_v6 = vmul.f32 0.001953125, %v673_v45 }
 0x178   :  { %v675_v7 = vsub.f32 %v1787_v32, %v2059_v6  ;;  %v676_v8 = vsub.f32 %v1799_v36, %v2059_v6  ;;  %v677_v9 = vsub.f32 %v1803_v38, %v2059_v6  ;;  %v678_v13 = vsub.f32 %v1811_v41, %v2059_v6 }
 0x179   :  { %v679_v16 = vsub.f32 %v1817_v44, %v2059_v6  ;;  %v680_v14 = vsub.f32 %v1823_v46, %v2059_v6  ;;  %v681_v38 = vsub.f32 %v1829_v49, %v2059_v6  ;;  %v682_v44 = vsub.f32 %v1835_v52, %v2059_v6 }
 0x17a   :  { %v739_v20 = vmul.f32 %v675_v7, %v675_v7  ;;  %v740_v23 = vmul.f32 %v676_v8, %v676_v8  ;;  %v741_v30 = vmul.f32 %v677_v9, %v677_v9  ;;  %v742_v21 = vmul.f32 %v678_v13, %v678_v13 }
 0x17b   :  { %v743_v36 = vmul.f32 %v679_v16, %v679_v16  ;;  %v744_v9 = vmul.f32 %v680_v14, %v680_v14  ;;  %v683_v13 = vsub.f32 %v1841_v55, %v2059_v6  ;;  %v684_v16 = vsub.f32 %v1847_v58, %v2059_v6 }
 0x17c   :  { %v803_v28 = vsel %vm540_vm1, %v739_v20, 0.0  ;;  %v804_v34 = vsel %vm540_vm1, %v740_v23, 0.0  ;;  %v806_v7 = vsel %vm540_vm1, %v741_v30, 0.0  ;;  %v808_v41 = vsel %vm540_vm1, %v742_v21, 0.0 }
 0x17d   :  { %v805_v45 = vadd.f32 %v804_v34, %v803_v28  ;;  %v745_v20 = vmul.f32 %v681_v38, %v681_v38  ;;  %v810_v23 = vsel %vm540_vm1, %v743_v36, 0.0  ;;  %v746_v34 = vmul.f32 %v682_v44, %v682_v44 }
 0x17e   :  { %v812_v30 = vsel %vm540_vm1, %v744_v9, 0.0  ;;  %v685_v14 = vsub.f32 %v1851_v60, %v2059_v6  ;;  %v686_v38 = vsub.f32 %v1859_v0, %v2059_v6  ;;  %v687_v44 = vsub.f32 %v1875_v10, %v2059_v6 }
 0x17f   :  { %v807_v8 = vadd.f32 %v806_v7, %v805_v45  ;;  %v747_v7 = vmul.f32 %v683_v13, %v683_v13  ;;  %v816_v36 = vsel %vm540_vm1, %v746_v34, 0.0  ;;  %v688_v13 = vsub.f32 %v1891_v22, %v2059_v6 }
 0x181   :  { %v809_v46 = vadd.f32 %v808_v41, %v807_v8  ;;  %v814_v41 = vsel %vm540_vm1, %v745_v20, 0.0  ;;  %v748_v8 = vmul.f32 %v684_v16, %v684_v16  ;;  %v818_v9 = vsel %vm540_vm1, %v747_v7, 0.0 }
 0x182   :  { %v689_v16 = vsub.f32 %v1905_v35, %v2059_v6 }
 0x183   :  { %v811_v28 = vadd.f32 %v810_v23, %v809_v46  ;;  %v749_v23 = vmul.f32 %v685_v14, %v685_v14  ;;  %v820_v20 = vsel %vm540_vm1, %v748_v8, 0.0  ;;  %v690_v14 = vsub.f32 %v1915_v11, %v2059_v6 }
 0x185   :  { %v813_v45 = vadd.f32 %v812_v30, %v811_v28  ;;  %v750_v30 = vmul.f32 %v686_v38, %v686_v38  ;;  %v822_v34 = vsel %vm540_vm1, %v749_v23, 0.0  ;;  %v691_v38 = vsub.f32 %v1789_v33, %v2059_v6 }
 0x187   :  { %v815_v21 = vadd.f32 %v814_v41, %v813_v45  ;;  %v751_v41 = vmul.f32 %v687_v44, %v687_v44  ;;  %v824_v7 = vsel %vm540_vm1, %v750_v30, 0.0  ;;  %v692_v44 = vsub.f32 %v1801_v37, %v2059_v6 }
 0x189   :  { %v817_v46 = vadd.f32 %v816_v36, %v815_v21  ;;  %v752_v36 = vmul.f32 %v688_v13, %v688_v13  ;;  %v826_v8 = vsel %vm540_vm1, %v751_v41, 0.0  ;;  %v693_v13 = vsub.f32 %v1808_v40, %v2059_v6 }
 0x18b   :  { %v819_v28 = vadd.f32 %v818_v9, %v817_v46  ;;  %v753_v9 = vmul.f32 %v689_v16, %v689_v16  ;;  %v828_v23 = vsel %vm540_vm1, %v752_v36, 0.0  ;;  %v694_v16 = vsub.f32 %v1813_v42, %v2059_v6 }
 0x18d   :  { %v821_v45 = vadd.f32 %v820_v20, %v819_v28  ;;  %v754_v20 = vmul.f32 %v690_v14, %v690_v14  ;;  %v830_v30 = vsel %vm540_vm1, %v753_v9, 0.0  ;;  %v695_v14 = vsub.f32 %v1825_v47, %v2059_v6 }
 0x18f   :  { %v823_v21 = vadd.f32 %v822_v34, %v821_v45  ;;  %v755_v34 = vmul.f32 %v691_v38, %v691_v38  ;;  %v832_v41 = vsel %vm540_vm1, %v754_v20, 0.0  ;;  %v696_v38 = vsub.f32 %v1831_v50, %v2059_v6 }
 0x191   :  { %v825_v46 = vadd.f32 %v824_v7, %v823_v21  ;;  %v756_v7 = vmul.f32 %v692_v44, %v692_v44  ;;  %v834_v36 = vsel %vm540_vm1, %v755_v34, 0.0  ;;  %v697_v44 = vsub.f32 %v1837_v53, %v2059_v6 }
 0x193   :  { %v827_v28 = vadd.f32 %v826_v8, %v825_v46  ;;  %v757_v8 = vmul.f32 %v693_v13, %v693_v13  ;;  %v836_v9 = vsel %vm540_vm1, %v756_v7, 0.0  ;;  %v698_v13 = vsub.f32 %v1843_v56, %v2059_v6 }
 0x195   :  { %v829_v45 = vadd.f32 %v828_v23, %v827_v28  ;;  %v758_v23 = vmul.f32 %v694_v16, %v694_v16  ;;  %v838_v20 = vsel %vm540_vm1, %v757_v8, 0.0  ;;  %v699_v16 = vsub.f32 %v1853_v61, %v2059_v6 }
 0x197   :  { %v831_v21 = vadd.f32 %v830_v30, %v829_v45  ;;  %v759_v30 = vmul.f32 %v695_v14, %v695_v14  ;;  %v840_v34 = vsel %vm540_vm1, %v758_v23, 0.0  ;;  %v700_v14 = vsub.f32 %v1861_v1, %v2059_v6 }
 0x199   :  { %v833_v46 = vadd.f32 %v832_v41, %v831_v21  ;;  %v760_v41 = vmul.f32 %v696_v38, %v696_v38  ;;  %v842_v7 = vsel %vm540_vm1, %v759_v30, 0.0  ;;  %v701_v38 = vsub.f32 %v1881_v15, %v2059_v6 }
 0x19b   :  { %v835_v28 = vadd.f32 %v834_v36, %v833_v46  ;;  %v761_v36 = vmul.f32 %v697_v44, %v697_v44  ;;  %v844_v8 = vsel %vm540_vm1, %v760_v41, 0.0  ;;  %v702_v44 = vsub.f32 %v1899_v29, %v2059_v6 }
 0x19d   :  { %v837_v45 = vadd.f32 %v836_v9, %v835_v28  ;;  %v762_v9 = vmul.f32 %v698_v13, %v698_v13  ;;  %v846_v23 = vsel %vm540_vm1, %v761_v36, 0.0  ;;  %v703_v13 = vsub.f32 %v1917_v12, %v2059_v6 }
 0x19e   :  { %v766_v15 = vmul.f32 %v702_v44, %v702_v44  ;;  %v707_v44 = vsub.f32 %v1815_v43, %v2059_v6 }
 0x19f   :  { %v839_v21 = vadd.f32 %v838_v20, %v837_v45  ;;  %v763_v20 = vmul.f32 %v699_v16, %v699_v16  ;;  %v848_v30 = vsel %vm540_vm1, %v762_v9, 0.0  ;;  %v767_v29 = vmul.f32 %v703_v13, %v703_v13 }
 0x1a0   :  { %v708_v13 = vsub.f32 %v1827_v48, %v2059_v6 }
 0x1a1   :  { %v841_v46 = vadd.f32 %v840_v34, %v839_v21  ;;  %v764_v34 = vmul.f32 %v700_v14, %v700_v14  ;;  %v850_v41 = vsel %vm540_vm1, %v763_v20, 0.0  ;;  %v856_v20 = vsel %vm540_vm1, %v766_v15, 0.0 }
 0x1a2   :  { %v772_v43 = vmul.f32 %v708_v13, %v708_v13  ;;  %v713_v13 = vsub.f32 %v1865_v3, %v2059_v6 }
 0x1a3   :  { %v843_v28 = vadd.f32 %v842_v7, %v841_v46  ;;  %v765_v7 = vmul.f32 %v701_v38, %v701_v38  ;;  %v852_v36 = vsel %vm540_vm1, %v764_v34, 0.0  ;;  %v858_v34 = vsel %vm540_vm1, %v767_v29, 0.0 }
 0x1a5   :  { %v845_v45 = vadd.f32 %v844_v8, %v843_v28  ;;  %v3430_v8 = vld [vmem:[#allocation20_spill] sm:$0xff]  ;;  %v854_v9 = vsel %vm540_vm1, %v765_v7, 0.0 }
 0x1a6   :  { %v704_v16 = vsub.f32 %v3430_v8, %v2059_v6 }
 0x1a7   :  { %v847_v21 = vadd.f32 %v846_v23, %v845_v45  ;;  %v3431_v23 = vld [vmem:[#allocation23_spill] sm:$0xff] }
 0x1a8   :  { %v705_v14 = vsub.f32 %v3431_v23, %v2059_v6  ;;  %v768_v12 = vmul.f32 %v704_v16, %v704_v16  ;;  %v709_v16 = vsub.f32 %v1833_v51, %v2059_v6 }
 0x1a9   :  { %v849_v46 = vadd.f32 %v848_v30, %v847_v21  ;;  %v3432_v30 = vld [vmem:[#allocation25_spill] sm:$0xff] }
 0x1aa   :  { %v706_v38 = vsub.f32 %v3432_v30, %v2059_v6  ;;  %v860_v7 = vsel %vm540_vm1, %v768_v12, 0.0  ;;  %v773_v48 = vmul.f32 %v709_v16, %v709_v16  ;;  %v714_v16 = vsub.f32 %v1885_v17, %v2059_v6 }
 0x1ab   :  { %v851_v28 = vadd.f32 %v850_v41, %v849_v46  ;;  %v769_v41 = vmul.f32 %v705_v14, %v705_v14 }
 0x1ac   :  { %v778_v3 = vmul.f32 %v714_v16, %v714_v16  ;;  %v719_v16 = vsub.f32 %v1969_v24, %v2059_v6 }
 0x1ad   :  { %v853_v45 = vadd.f32 %v852_v36, %v851_v28  ;;  %v770_v36 = vmul.f32 %v706_v38, %v706_v38  ;;  %v862_v15 = vsel %vm540_vm1, %v769_v41, 0.0  ;;  %v868_v41 = vsel %vm540_vm1, %v772_v43, 0.0 }
 0x1af   :  { %v855_v21 = vadd.f32 %v854_v9, %v853_v45  ;;  %v771_v9 = vmul.f32 %v707_v44, %v707_v44  ;;  %v864_v29 = vsel %vm540_vm1, %v770_v36, 0.0  ;;  %v712_v44 = vsub.f32 %v1855_v62, %v2059_v6 }
 0x1b0   :  { %v870_v36 = vsel %vm540_vm1, %v773_v48, 0.0  ;;  %v777_v62 = vmul.f32 %v713_v13, %v713_v13  ;;  %v718_v13 = vsub.f32 %v1953_v26, %v2059_v6 }
 0x1b1   :  { %v857_v46 = vadd.f32 %v856_v20, %v855_v21  ;;  %v3433_v20 = vld [vmem:[#allocation9_spill] sm:$0xff]  ;;  %v866_v12 = vsel %vm540_vm1, %v771_v9, 0.0 }
 0x1b2   :  { %v710_v14 = vsub.f32 %v3433_v20, %v2059_v6 }
 0x1b3   :  { %v859_v28 = vadd.f32 %v858_v34, %v857_v46  ;;  %v3434_v34 = vld [vmem:[#allocation10_spill] sm:$0xff] }
 0x1b4   :  { %v711_v38 = vsub.f32 %v3434_v34, %v2059_v6 }
 0x1b5   :  { %v861_v45 = vadd.f32 %v860_v7, %v859_v28  ;;  %v774_v7 = vmul.f32 %v710_v14, %v710_v14 }
 0x1b7   :  { %v863_v21 = vadd.f32 %v862_v15, %v861_v45  ;;  %v775_v15 = vmul.f32 %v711_v38, %v711_v38  ;;  %v872_v9 = vsel %vm540_vm1, %v774_v7, 0.0  ;;  %v878_v7 = vsel %vm540_vm1, %v777_v62, 0.0 }
 0x1b9   :  { %v865_v46 = vadd.f32 %v864_v29, %v863_v21  ;;  %v776_v29 = vmul.f32 %v712_v44, %v712_v44  ;;  %v874_v43 = vsel %vm540_vm1, %v775_v15, 0.0  ;;  %v717_v44 = vsub.f32 %v1937_v2, %v2059_v6 }
 0x1ba   :  { %v880_v15 = vsel %vm540_vm1, %v778_v3, 0.0  ;;  %v782_v2 = vmul.f32 %v718_v13, %v718_v13  ;;  %v723_v13 = vsub.f32 %v1849_v59, %v2059_v6 }
 0x1bb   :  { %v867_v28 = vadd.f32 %v866_v12, %v865_v46  ;;  %v3435_v12 = vld [vmem:[#allocation16_spill] sm:$0xff]  ;;  %v876_v48 = vsel %vm540_vm1, %v776_v29, 0.0 }
 0x1bc   :  { %v715_v14 = vsub.f32 %v3435_v12, %v2059_v6 }
 0x1bd   :  { %v869_v45 = vadd.f32 %v868_v41, %v867_v28  ;;  %v3436_v41 = vld [vmem:[#allocation19_spill] sm:$0xff] }
 0x1be   :  { %v716_v38 = vsub.f32 %v3436_v41, %v2059_v6 }
 0x1bf   :  { %v871_v21 = vadd.f32 %v870_v36, %v869_v45  ;;  %v779_v36 = vmul.f32 %v715_v14, %v715_v14 }
 0x1c1   :  { %v873_v46 = vadd.f32 %v872_v9, %v871_v21  ;;  %v780_v9 = vmul.f32 %v716_v38, %v716_v38  ;;  %v882_v29 = vsel %vm540_vm1, %v779_v36, 0.0  ;;  %v721_v38 = vsub.f32 %v1997_v54, %v2059_v6 }
 0x1c2   :  { %v888_v36 = vsel %vm540_vm1, %v782_v2, 0.0 }
 0x1c3   :  { %v875_v28 = vadd.f32 %v874_v43, %v873_v46  ;;  %v781_v43 = vmul.f32 %v717_v44, %v717_v44  ;;  %v884_v62 = vsel %vm540_vm1, %v780_v9, 0.0  ;;  %v722_v44 = vsub.f32 %v2011_v31, %v2059_v6 }
 0x1c4   :  { %v787_v31 = vmul.f32 %v723_v13, %v723_v13  ;;  %v728_v13 = vsub.f32 %v1923_v18, %v2059_v6 }
 0x1c5   :  { %v877_v45 = vadd.f32 %v876_v48, %v875_v28  ;;  %v3437_v48 = vld [vmem:[#allocation27_spill] sm:$0xff]  ;;  %v886_v3 = vsel %vm540_vm1, %v781_v43, 0.0 }
 0x1c6   :  { %v720_v14 = vsub.f32 %v3437_v48, %v2059_v6 }
 0x1c7   :  { %v879_v21 = vadd.f32 %v878_v7, %v877_v45  ;;  %v783_v7 = vmul.f32 %v719_v16, %v719_v16  ;;  %v724_v16 = vsub.f32 %v1857_v63, %v2059_v6 }
 0x1c9   :  { %v881_v46 = vadd.f32 %v880_v15, %v879_v21  ;;  %v784_v15 = vmul.f32 %v720_v14, %v720_v14  ;;  %v890_v9 = vsel %vm540_vm1, %v783_v7, 0.0 }
 0x1cb   :  { %v883_v28 = vadd.f32 %v882_v29, %v881_v46  ;;  %v785_v29 = vmul.f32 %v721_v38, %v721_v38  ;;  %v892_v43 = vsel %vm540_vm1, %v784_v15, 0.0  ;;  %v726_v38 = vsub.f32 %v1887_v19, %v2059_v6 }
 0x1cc   :  { %v898_v15 = vsel %vm540_vm1, %v787_v31, 0.0 }
 0x1cd   :  { %v885_v45 = vadd.f32 %v884_v62, %v883_v28  ;;  %v786_v62 = vmul.f32 %v722_v44, %v722_v44  ;;  %v894_v2 = vsel %vm540_vm1, %v785_v29, 0.0  ;;  %v727_v44 = vsub.f32 %v1907_v39, %v2059_v6 }
 0x1ce   :  { %v792_v39 = vmul.f32 %v728_v13, %v728_v13 }
 0x1cf   :  { %v887_v21 = vadd.f32 %v886_v3, %v885_v45  ;;  %v3438_v3 = vld [vmem:[#allocation13_spill] sm:$0xff]  ;;  %v896_v7 = vsel %vm540_vm1, %v786_v62, 0.0 }
 0x1d0   :  { %v725_v14 = vsub.f32 %v3438_v3, %v2059_v6 }
 0x1d1   :  { %v889_v46 = vadd.f32 %v888_v36, %v887_v21  ;;  %v788_v36 = vmul.f32 %v724_v16, %v724_v16  ;;  %v729_v16 = vsub.f32 %v1939_v5, %v2059_v6 }
 0x1d3   :  { %v891_v28 = vadd.f32 %v890_v9, %v889_v46  ;;  %v789_v9 = vmul.f32 %v725_v14, %v725_v14  ;;  %v900_v29 = vsel %vm540_vm1, %v788_v36, 0.0 }
 0x1d5   :  { %v893_v45 = vadd.f32 %v892_v43, %v891_v28  ;;  %v790_v43 = vmul.f32 %v726_v38, %v726_v38  ;;  %v902_v62 = vsel %vm540_vm1, %v789_v9, 0.0  ;;  %v731_v38 = vsub.f32 %v1971_v25, %v2059_v6 }
 0x1d6   :  { %v908_v9 = vsel %vm540_vm1, %v792_v39, 0.0 }
 0x1d7   :  { %v895_v21 = vadd.f32 %v894_v2, %v893_v45  ;;  %v791_v2 = vmul.f32 %v727_v44, %v727_v44  ;;  %v904_v31 = vsel %vm540_vm1, %v790_v43, 0.0 }
 0x1d9   :  { %v897_v46 = vadd.f32 %v896_v7, %v895_v21  ;;  %v3439_v7 = vld [vmem:[#allocation24_spill] sm:$0xff]  ;;  %v906_v36 = vsel %vm540_vm1, %v791_v2, 0.0 }
 0x1da   :  { %v730_v14 = vsub.f32 %v3439_v7, %v2059_v6  ;;  %v795_v7 = vmul.f32 %v731_v38, %v731_v38  ;;  %v736_v38 = vsub.f32 %v2037_v4, %v2059_v6 }
 0x1db   :  { %v899_v28 = vadd.f32 %v898_v15, %v897_v46  ;;  %v793_v15 = vmul.f32 %v729_v16, %v729_v16 }
 0x1dc   :  { %v794_v5 = vmul.f32 %v730_v14, %v730_v14  ;;  %v914_v39 = vsel %vm540_vm1, %v795_v7, 0.0 }
 0x1dd   :  { %v901_v45 = vadd.f32 %v900_v29, %v899_v28  ;;  %v3440_v29 = vld [vmem:[#allocation28_spill] sm:$0xff]  ;;  %v910_v43 = vsel %vm540_vm1, %v793_v15, 0.0 }
 0x1de   :  { %v732_v44 = vsub.f32 %v3440_v29, %v2059_v6  ;;  %v912_v2 = vsel %vm540_vm1, %v794_v5, 0.0 }
 0x1df   :  { %v903_v21 = vadd.f32 %v902_v62, %v901_v45  ;;  %v3441_v62 = vld [vmem:[#allocation29_spill] sm:$0xff] }
 0x1e0   :  { %v733_v13 = vsub.f32 %v3441_v62, %v2059_v6  ;;  %v796_v25 = vmul.f32 %v732_v44, %v732_v44  ;;  %v737_v44 = vsub.f32 %v2047_v27, %v2059_v6 }
 0x1e1   :  { %v905_v46 = vadd.f32 %v904_v31, %v903_v21  ;;  %v3442_v31 = vld [vmem:[#allocation31_spill] sm:$0xff] }
 0x1e2   :  { %v734_v16 = vsub.f32 %v3442_v31, %v2059_v6  ;;  %v797_v29 = vmul.f32 %v733_v13, %v733_v13  ;;  %v916_v15 = vsel %vm540_vm1, %v796_v25, 0.0  ;;  %v738_v13 = vsub.f32 %v2055_v57, %v2059_v6 }
 0x1e3   :  { %v907_v28 = vadd.f32 %v906_v36, %v905_v46  ;;  %v3443_v36 = vld [vmem:[#allocation32_spill] sm:$0xff] }
 0x1e4   :  { %v735_v14 = vsub.f32 %v3443_v36, %v2059_v6  ;;  %v918_v5 = vsel %vm540_vm1, %v797_v29, 0.0  ;;  %v802_v25 = vmul.f32 %v738_v13, %v738_v13 }
 0x1e5   :  { %v909_v45 = vadd.f32 %v908_v9, %v907_v28  ;;  %v798_v9 = vmul.f32 %v734_v16, %v734_v16 }
 0x1e6   :  { %v928_v29 = vsel %vm540_vm1, %v802_v25, 0.0  ;;  %v950_v25 = vld [vmem:[%s3334_s3] sm:$0x1] }
 0x1e7   :  { %v911_v21 = vadd.f32 %v910_v43, %v909_v45  ;;  %v799_v43 = vmul.f32 %v735_v14, %v735_v14  ;;  %v920_v7 = vsel %vm540_vm1, %v798_v9, 0.0 }
 0x1e9   :  { %v913_v46 = vadd.f32 %v912_v2, %v911_v21  ;;  %v800_v2 = vmul.f32 %v736_v38, %v736_v38  ;;  %v922_v16 = vsel %vm540_vm1, %v799_v43, 0.0 }
 0x1eb   :  { %v915_v28 = vadd.f32 %v914_v39, %v913_v46  ;;  %v801_v39 = vmul.f32 %v737_v44, %v737_v44 }
 0x1ed   :  { %v917_v45 = vadd.f32 %v916_v15, %v915_v28  ;;  %v924_v28 = vsel %vm540_vm1, %v800_v2, 0.0  ;;  %v926_v14 = vsel %vm540_vm1, %v801_v39, 0.0 }
 0x1ef   :  { %v919_v21 = vadd.f32 %v918_v5, %v917_v45 }
 0x1f1   :  { %v921_v46 = vadd.f32 %v920_v7, %v919_v21 }
 0x1f3   :  { %v923_v4 = vadd.f32 %v922_v16, %v921_v46 }
 0x1f5   :  { %v925_v15 = vadd.f32 %v924_v28, %v923_v4 }
 0x1f7   :  { %v927_v27 = vadd.f32 %v926_v14, %v925_v15 }
 0x1f9   :  { %v929_v45 = vadd.f32 %v928_v29, %v927_v27  ;;  %v948_v27 = vld [vmem:[%s3333_s2] sm:$0x1] }
 0x1fb   :  { %v930_v5 = vrot.slane %v929_v45, 4 }
 0x1fd   :  { %v931_v36 = vadd.f32 %v930_v5, %v929_v45 }
 0x1ff   :  { %v932_v38 = vrot.slane %v931_v36, 2 }
 0x201   :  { %v933_v31 = vadd.f32 %v932_v38, %v931_v36 }
 0x203   :  { %v934_v9 = vrot.slane %v933_v31, 1 }
 0x205   :  { %v935_v21 = vadd.f32 %v934_v9, %v933_v31  ;;  %v3446_v9 = vld [vmem:[#allocation3_spill] sm:$0xff] }
 0x207   :  { %v936_v44 = vmul.f32 0.001953125, %v935_v21 }
 0x209   :  { %v937_v7 = vadd.f32 1e-05, %v936_v44  ;;  %v3447_v44 = vld [vmem:[#allocation4_spill] sm:$0xff] }
 0x20b   :  { %1636 = vrsqrt.f32 %v937_v7  ;;  %vm944_vm3 = vweird.f32 %v937_v7 }
 0x211   :  { %v1637_v43 = vpop.eup %1636 }
 0x212   :  { %v939_v13 = vmul.f32 %v1637_v43, %v937_v7  ;;  %vm945_vm2 = vweird.f32 %v1637_v43 }
 0x213   :  { %vm946_vm4 = vmor %vm944_vm3, %vm945_vm2 }
 0x214   :  { %v940_v46 = vmul.f32 %v1637_v43, %v939_v13  ;;  %v3449_v13 = vld [vmem:[#allocation7_spill] sm:$0xff] }
 0x216   :  { %v941_v2 = vmul.f32 0.5, %v940_v46 }
 0x218   :  { %v942_v4 = vsub.f32 1.5, %v941_v2 }
 0x21a   :  { %v943_v16 = vmul.f32 %v1637_v43, %v942_v4 }
 0x21c   :  { %v947_v39 = vsel %vm946_vm4, %v1637_v43, %v943_v16 }
 0x21d   :  { %v949_v36 = vmul.f32 %v948_v27, %v947_v39  ;;  %v3450_v27 = vld [vmem:[#allocation14_spill] sm:$0xff] }
 0x21f   :  { %v951_v31 = vmul.f32 %v949_v36, %v2059_v6  ;;  %v2260_v15 = vperm.slane %v949_v36, 0  ;;  %v3445_v6 = vld [vmem:[#allocation2_spill] sm:$0xff]  ;;  %v3451_v36 = vld [vmem:[#allocation15_spill] sm:$0xff] }
 0x221   :  { %v952_v28 = vsub.f32 %v950_v25, %v951_v31  ;;  %v1019_v29 = vmul.f32 %v2260_v15, %v2055_v57  ;;  %v2271_v5 = vmul.f32 %v2260_v15, %v1787_v32  ;;  %v2275_v38 = vmul.f32 %v2260_v15, %v3445_v6  ;;  %v3448_v57 = vld [vmem:[#allocation6_spill] sm:$0xff]  ;;  %v3454_v6 = vld [vmem:[#allocation8_spill] sm:$0xff] }
 0x222   :  { %v2279_v21 = vmul.f32 %v2260_v15, %v3446_v9  ;;  %v2283_v7 = vmul.f32 %v2260_v15, %v3447_v44  ;;  %v2287_v43 = vmul.f32 %v2260_v15, %v3448_v57  ;;  %v2291_v32 = vmul.f32 %v2260_v15, %v3449_v13  ;;  %v3452_v31 = vld [vmem:[#allocation18_spill] sm:$0xff]  ;;  %v3455_v44 = vld [vmem:[#allocation11_spill] sm:$0xff]  ;;  %v3456_v13 = vld [vmem:[#allocation12_spill] sm:$0xff] }
 0x223   :  { %v2262_v14 = vperm.slane %v952_v28, 0  ;;  %v2295_v46 = vmul.f32 %v2260_v15, %v1829_v49  ;;  %v2299_v2 = vmul.f32 %v2260_v15, %v1835_v52  ;;  %v2303_v4 = vmul.f32 %v2260_v15, %v1841_v55  ;;  %v3453_v28 = vld [vmem:[#allocation5_spill] sm:$0xff] }
 0x224   :  { %v2307_v16 = vmul.f32 %v2260_v15, %v1847_v58  ;;  %v2311_v39 = vmul.f32 %v2260_v15, %v1851_v60  ;;  %v2315_v49 = vmul.f32 %v2260_v15, %v1859_v0  ;;  %v2319_v52 = vmul.f32 %v2260_v15, %v1875_v10 }
 0x225   :  { %v2267_v45 = vadd.f32 %v2262_v14, %v1019_v29  ;;  %v2323_v55 = vmul.f32 %v2260_v15, %v1891_v22  ;;  %v2327_v58 = vmul.f32 %v2260_v15, %v1905_v35  ;;  %v2331_v60 = vmul.f32 %v2260_v15, %v1915_v11 }
 0x226   :  { %v2335_v0 = vmul.f32 %v2260_v15, %v1789_v33  ;;  %v2339_v10 = vmul.f32 %v2260_v15, %v1801_v37  ;;  %v2343_v22 = vmul.f32 %v2260_v15, %v1808_v40  ;;  %v2347_v35 = vmul.f32 %v2260_v15, %v1813_v42 }
 0x227   :  { %3444 = vst [vmem:[#allocation20_spill] sm:$0xff] %v2267_v45  ;;  %v2351_v11 = vmul.f32 %v2260_v15, %v1825_v47  ;;  %v2355_v33 = vmul.f32 %v2260_v15, %v1831_v50  ;;  %v2359_v37 = vmul.f32 %v2260_v15, %v1837_v53  ;;  %v2363_v40 = vmul.f32 %v2260_v15, %v1843_v56  ;;  %v3465_v45 = vld [vmem:[#allocation24_spill] sm:$0xff] }
 0x228   :  { %v2367_v42 = vmul.f32 %v2260_v15, %v1853_v61  ;;  %v2371_v47 = vmul.f32 %v2260_v15, %v1861_v1  ;;  %v2375_v50 = vmul.f32 %v2260_v15, %v3450_v27  ;;  %v2379_v53 = vmul.f32 %v2260_v15, %v3451_v36  ;;  %v3457_v36 = vld [vmem:[#allocation21_spill] sm:$0xff] }
 0x229   :  { %v2383_v56 = vmul.f32 %v2260_v15, %v3452_v31  ;;  %v2387_v61 = vmul.f32 %v2260_v15, %v3430_v8  ;;  %v2391_v1 = vmul.f32 %v2260_v15, %v3431_v23  ;;  %v2395_v25 = vmul.f32 %v2260_v15, %v3432_v30 }
 0x22a   :  { %v2399_v29 = vmul.f32 %v2260_v15, %v3453_v28  ;;  %v2403_v9 = vmul.f32 %v2260_v15, %v3454_v6  ;;  %v2407_v8 = vmul.f32 %v2260_v15, %v1833_v51  ;;  %v2411_v23 = vmul.f32 %v2260_v15, %v3433_v20  ;;  %v3458_v6 = vld [vmem:[#allocation30_spill] sm:$0xff] }
 0x22b   :  { %v2415_v30 = vmul.f32 %v2260_v15, %v3434_v34  ;;  %v2419_v57 = vmul.f32 %v2260_v15, %v3455_v44  ;;  %v2423_v27 = vmul.f32 %v2260_v15, %v3456_v13  ;;  %v2427_v51 = vmul.f32 %v2260_v15, %v1885_v17  ;;  %v3461_v13 = vld [vmem:[#allocation17_spill] sm:$0xff] }
 0x22c   :  { %v2431_v20 = vmul.f32 %v2260_v15, %v3435_v12  ;;  %v2435_v34 = vmul.f32 %v2260_v15, %v3436_v41  ;;  %v2439_v31 = vmul.f32 %v2260_v15, %v3457_v36  ;;  %v2443_v28 = vmul.f32 %v2260_v15, %v1953_v26 }
 0x22d   :  { %v2447_v17 = vmul.f32 %v2260_v15, %v1969_v24  ;;  %v2451_v12 = vmul.f32 %v2260_v15, %v3437_v48  ;;  %v2455_v41 = vmul.f32 %v2260_v15, %v1997_v54  ;;  %v2459_v44 = vmul.f32 %v2260_v15, %v3458_v6  ;;  %v3463_v6 = vld [vmem:[#allocation22_spill] sm:$0xff] }
 0x22e   :  { %v2463_v26 = vmul.f32 %v2260_v15, %v1849_v59  ;;  %v2467_v24 = vmul.f32 %v2260_v15, %v1857_v63  ;;  %v2471_v48 = vmul.f32 %v2260_v15, %v3438_v3  ;;  %v2475_v54 = vmul.f32 %v2260_v15, %v1887_v19 }
 0x22f   :  { %v2479_v36 = vmul.f32 %v2260_v15, %v3461_v13  ;;  %v2483_v59 = vmul.f32 %v2260_v15, %v1923_v18  ;;  %v2487_v63 = vmul.f32 %v2260_v15, %v3463_v6  ;;  %v2491_v3 = vmul.f32 %v2260_v15, %v3465_v45 }
 0x230   :  { %3459 = vst [vmem:[#allocation23_spill] sm:$0xff] %v2471_v48  ;;  %v3467_v48 = vld [vmem:[#allocation26_spill] sm:$0xff]  ;;  %v2503_v18 = vmul.f32 %v2260_v15, %v3441_v62  ;;  %v2523_v62 = vadd.f32 %v2262_v14, %v2271_v5  ;;  %v2543_v5 = vadd.f32 %v2262_v14, %v2291_v32  ;;  %v2563_v32 = vadd.f32 %v2262_v14, %v2311_v39 }
 0x231   :  { %3460 = vst [vmem:[#allocation25_spill] sm:$0xff] %v2475_v54  ;;  %v2495_v19 = vmul.f32 %v2260_v15, %v3467_v48  ;;  %v3469_v54 = vld [vmem:[#allocation28_spill] sm:$0xff]  ;;  %v2583_v39 = vadd.f32 %v2262_v14, %v2331_v60  ;;  %v2603_v60 = vadd.f32 %v2262_v14, %v2351_v11  ;;  %v2623_v11 = vadd.f32 %v2262_v14, %v2371_v47 }
 0x232   :  { %3462 = vst [vmem:[#allocation9_spill] sm:$0xff] %v2483_v59  ;;  %v2499_v13 = vmul.f32 %v2260_v15, %v3469_v54  ;;  %v3470_v59 = vld [vmem:[#allocation31_spill] sm:$0xff]  ;;  %v2643_v47 = vadd.f32 %v2262_v14, %v2391_v1  ;;  %v2663_v1 = vadd.f32 %v2262_v14, %v2411_v23  ;;  %v2683_v23 = vadd.f32 %v2262_v14, %v2431_v20 }
 0x233   :  { %3464 = vst [vmem:[#allocation10_spill] sm:$0xff] %v2487_v63  ;;  %v2507_v6 = vmul.f32 %v2260_v15, %v3470_v59  ;;  %v3471_v63 = vld [vmem:[#allocation32_spill] sm:$0xff]  ;;  %v2527_v59 = vadd.f32 %v2262_v14, %v2275_v38  ;;  %v2547_v38 = vadd.f32 %v2262_v14, %v2295_v46  ;;  %v2567_v46 = vadd.f32 %v2262_v14, %v2315_v49 }
 0x234   :  { %3466 = vst [vmem:[#allocation16_spill] sm:$0xff] %v2491_v3  ;;  %v2511_v45 = vmul.f32 %v2260_v15, %v3471_v63  ;;  %v3472_v3 = vld [vmem:[#allocation33_spill] sm:$0xff]  ;;  %v2531_v63 = vadd.f32 %v2262_v14, %v2279_v21  ;;  %v2551_v21 = vadd.f32 %v2262_v14, %v2299_v2  ;;  %v2571_v2 = vadd.f32 %v2262_v14, %v2319_v52 }
 0x235   :  { %3468 = vst [vmem:[#allocation19_spill] sm:$0xff] %v2495_v19  ;;  %v2515_v48 = vmul.f32 %v2260_v15, %v3472_v3  ;;  %v3473_v19 = vld [vmem:[#allocation34_spill] sm:$0xff]  ;;  %v2535_v3 = vadd.f32 %v2262_v14, %v2283_v7  ;;  %v2555_v7 = vadd.f32 %v2262_v14, %v2303_v4  ;;  %v2575_v4 = vadd.f32 %v2262_v14, %v2323_v55 }
 0x236   :  { %v2519_v54 = vmul.f32 %v2260_v15, %v3473_v19  ;;  %v2539_v15 = vadd.f32 %v2262_v14, %v2287_v43  ;;  %v2559_v43 = vadd.f32 %v2262_v14, %v2307_v16  ;;  %v2579_v16 = vadd.f32 %v2262_v14, %v2327_v58 }
 0x237   :  { %v2587_v49 = vadd.f32 %v2262_v14, %v2335_v0  ;;  %v2591_v52 = vadd.f32 %v2262_v14, %v2339_v10  ;;  %v2595_v55 = vadd.f32 %v2262_v14, %v2343_v22  ;;  %v2599_v58 = vadd.f32 %v2262_v14, %v2347_v35  ;;  %v3478_v19 = vld [vmem:[#allocation23_spill] sm:$0xff] }
 0x238   :  { %v2607_v0 = vadd.f32 %v2262_v14, %v2355_v33  ;;  %v2611_v10 = vadd.f32 %v2262_v14, %v2359_v37  ;;  %v2615_v22 = vadd.f32 %v2262_v14, %v2363_v40  ;;  %v2619_v35 = vadd.f32 %v2262_v14, %v2367_v42 }
 0x239   :  { %v2627_v33 = vadd.f32 %v2262_v14, %v2375_v50  ;;  %v2631_v37 = vadd.f32 %v2262_v14, %v2379_v53  ;;  %v2635_v40 = vadd.f32 %v2262_v14, %v2383_v56  ;;  %v2639_v42 = vadd.f32 %v2262_v14, %v2387_v61 }
 0x23a   :  { %v2647_v50 = vadd.f32 %v2262_v14, %v2395_v25  ;;  %v2651_v53 = vadd.f32 %v2262_v14, %v2399_v29  ;;  %v2655_v56 = vadd.f32 %v2262_v14, %v2403_v9  ;;  %v2659_v61 = vadd.f32 %v2262_v14, %v2407_v8 }
 0x23b   :  { %v2667_v25 = vadd.f32 %v2262_v14, %v2415_v30  ;;  %v2671_v29 = vadd.f32 %v2262_v14, %v2419_v57  ;;  %v2675_v9 = vadd.f32 %v2262_v14, %v2423_v27  ;;  %v2679_v8 = vadd.f32 %v2262_v14, %v2427_v51 }
 0x23c   :  { %v2687_v30 = vadd.f32 %v2262_v14, %v2435_v34  ;;  %v2691_v57 = vadd.f32 %v2262_v14, %v2439_v31  ;;  %v2695_v27 = vadd.f32 %v2262_v14, %v2443_v28  ;;  %v2699_v51 = vadd.f32 %v2262_v14, %v2447_v17 }
 0x23d   :  { %v2703_v20 = vadd.f32 %v2262_v14, %v2451_v12  ;;  %v2707_v34 = vadd.f32 %v2262_v14, %v2455_v41  ;;  %v2711_v31 = vadd.f32 %v2262_v14, %v2459_v44  ;;  %v2715_v28 = vadd.f32 %v2262_v14, %v2463_v26 }
 0x23e   :  { %v2719_v17 = vadd.f32 %v2262_v14, %v2467_v24  ;;  %v2723_v12 = vadd.f32 %v2262_v14, %v3478_v19  ;;  %v2731_v44 = vadd.f32 %v2262_v14, %v2479_v36  ;;  %v3484_v19 = vld [vmem:[#allocation16_spill] sm:$0xff]  ;;  %vm1087_vm5 = vcmp.gt.f32.partialorder %v2523_v62, 0.0 }
 0x23f   :  { %3474 = vst [vmem:[#allocation27_spill] sm:$0xff] %v2703_v20  ;;  %v3480_v20 = vld [vmem:[#allocation25_spill] sm:$0xff]  ;;  %v1152_v36 = vmul.f32 0.2, %v2527_v59  ;;  %vm1088_vm6 = vcmp.gt.f32.partialorder %v2527_v59, 0.0  ;;  %vm1089_vm7 = vcmp.gt.f32.partialorder %v2531_v63, 0.0 }
 0x240   :  { %3475 = vst [vmem:[#allocation13_spill] sm:$0xff] %v2711_v31  ;;  %v2727_v41 = vadd.f32 %v2262_v14, %v3480_v20  ;;  %v3482_v31 = vld [vmem:[#allocation9_spill] sm:$0xff]  ;;  %v3485_v20 = vld [vmem:[#allocation19_spill] sm:$0xff]  ;;  %vm1090_vm8 = vcmp.gt.f32.partialorder %v2535_v3, 0.0  ;;  %vm1091_vm9 = vcmp.gt.f32.partialorder %v2539_v15, 0.0  ;;  %vm1092_vm10 = vcmp.gt.f32.partialorder %v2543_v5, 0.0 }
 0x241   :  { %3476 = vst [vmem:[#allocation29_spill] sm:$0xff] %v2715_v28  ;;  %v2735_v26 = vadd.f32 %v2262_v14, %v3482_v31  ;;  %v3483_v28 = vld [vmem:[#allocation10_spill] sm:$0xff]  ;;  %v2754_v31 = vadd.f32 %v2262_v14, %v2499_v13  ;;  %v1154_v13 = vmul.f32 0.2, %v2535_v3  ;;  %vm1093_vm11 = vcmp.gt.f32.partialorder %v2547_v38, 0.0 }
 0x242   :  { %3477 = vst [vmem:[#allocation2_spill] sm:$0xff] %v2719_v17  ;;  %v2739_v24 = vadd.f32 %v2262_v14, %v3483_v28  ;;  %v1151_v17 = vmul.f32 0.2, %v2523_v62  ;;  %v2758_v28 = vadd.f32 %v2262_v14, %v2503_v18  ;;  %v2774_v18 = vadd.f32 %v2262_v14, %v2515_v48 }
 0x243   :  { %3479 = vst [vmem:[#allocation3_spill] sm:$0xff] %v2723_v12  ;;  %v2744_v12 = vadd.f32 %v2262_v14, %v3484_v19  ;;  %v1153_v19 = vmul.f32 0.2, %v2531_v63  ;;  %v1157_v48 = vmul.f32 0.2, %v2547_v38  ;;  %vm1094_vm12 = vcmp.gt.f32.partialorder %v2551_v21, 0.0 }
 0x244   :  { %3481 = vst [vmem:[#allocation4_spill] sm:$0xff] %v2727_v41  ;;  %v2748_v41 = vadd.f32 %v2262_v14, %v3485_v20  ;;  %v2764_v20 = vadd.f32 %v2262_v14, %v2507_v6  ;;  %v2781_v6 = vadd.f32 %v2262_v14, %v2519_v54  ;;  %vm1095_vm13 = vcmp.gt.f32.partialorder %v2555_v7, 0.0 }
 0x245   :  { %3487 = vst [vmem:[#allocation7_spill] sm:$0xff] %v2754_v31  ;;  %v1215_v31 = vsel %vm1087_vm5, %v2523_v62, %v1151_v17  ;;  %v1158_v62 = vmul.f32 0.2, %v2551_v21  ;;  %v1159_v17 = vmul.f32 0.2, %v2555_v7  ;;  %vm1096_vm14 = vcmp.gt.f32.partialorder %v2559_v43, 0.0 }
 0x246   :  { %3486 = vst [vmem:[#allocation6_spill] sm:$0xff] %v2748_v41  ;;  %v2768_v41 = vadd.f32 %v2262_v14, %v2511_v45  ;;  %v1156_v45 = vmul.f32 0.2, %v2543_v5  ;;  %v1218_v14 = vsel %vm1090_vm8, %v2535_v3, %v1154_v13  ;;  %v1279_v54 = vpack.c.bf16 %v1215_v31, %v1215_v31 }
 0x247   :  { %3488 = vst [vmem:[#allocation14_spill] sm:$0xff] %v2758_v28  ;;  %v1155_v28 = vmul.f32 0.2, %v2539_v15  ;;  %v1221_v3 = vsel %vm1093_vm11, %v2547_v38, %v1157_v48  ;;  %v1282_v31 = vpack.c.bf16 %v1218_v14, %v1218_v14  ;;  %vm1097_vm0 = vcmp.gt.f32.partialorder %v2563_v32, 0.0 }
 0x248   :  { %3489 = vst [vmem:[#allocation15_spill] sm:$0xff] %v2764_v20  ;;  %v1161_v20 = vmul.f32 0.2, %v2563_v32  ;;  %vm1098_vm1 = vcmp.gt.f32.partialorder %v2567_v46, 0.0  ;;  %v1223_v38 = vsel %vm1095_vm13, %v2555_v7, %v1159_v17  ;;  %vm1099_vm2 = vcmp.gt.f32.partialorder %v2571_v2, 0.0 }
 0x249   :  { %3490 = vst [vmem:[#allocation18_spill] sm:$0xff] %v2768_v41  ;;  %v1216_v41 = vsel %vm1088_vm6, %v2527_v59, %v1152_v36  ;;  %v1219_v59 = vsel %vm1091_vm9, %v2539_v15, %v1155_v28  ;;  %v1162_v15 = vmul.f32 0.2, %v2567_v46  ;;  %vm1100_vm3 = vcmp.gt.f32.partialorder %v2575_v4, 0.0 }
 0x24a   :  { %3491 = vst [vmem:[#allocation5_spill] sm:$0xff] %v2774_v18  ;;  %v1217_v18 = vsel %vm1089_vm7, %v2531_v63, %v1153_v19  ;;  %v1280_v36 = vpack.c.bf16 %v1216_v41, %v1216_v41  ;;  %v1220_v63 = vsel %vm1092_vm10, %v2543_v5, %v1156_v45  ;;  %v1222_v41 = vsel %vm1094_vm12, %v2551_v21, %v1158_v62 }
 0x24b   :  { %3492 = vst [vmem:[#allocation8_spill] sm:$0xff] %v2781_v6  ;;  %v1160_v6 = vmul.f32 0.2, %v2559_v43  ;;  %v1281_v19 = vpack.c.bf16 %v1217_v18, %v1217_v18  ;;  %v1283_v28 = vpack.c.bf16 %v1219_v59, %v1219_v59  ;;  %v1163_v5 = vmul.f32 0.2, %v2571_v2 }
 0x24c   :  { %1344 = vst.msk [vmem:[%s3335_s4] sm:$0xf] %vm1343_vm15, %v1279_v54  ;;  %v1284_v13 = vpack.c.bf16 %v1220_v63, %v1220_v63  ;;  %v1164_v21 = vmul.f32 0.2, %v2575_v4  ;;  %v1285_v45 = vpack.c.bf16 %v1221_v3, %v1221_v3  ;;  %v1165_v7 = vmul.f32 0.2, %v2579_v16 }
 0x24d   :  { %1345 = vst.msk [vmem:[%s3335_s4 + $0x4] sm:$0xf] %vm1343_vm15, %v1280_v36  ;;  %v1224_v18 = vsel %vm1096_vm14, %v2559_v43, %v1160_v6  ;;  %v1225_v48 = vsel %vm1097_vm0, %v2563_v32, %v1161_v20  ;;  %v1286_v62 = vpack.c.bf16 %v1222_v41, %v1222_v41  ;;  %vm1101_vm4 = vcmp.gt.f32.partialorder %v2579_v16, 0.0 }
 0x24e   :  { %1346 = vst.msk [vmem:[%s3335_s4 + $0x8] sm:$0xf] %vm1343_vm15, %v1281_v19  ;;  %v1166_v43 = vmul.f32 0.2, %v2583_v39  ;;  %v1226_v6 = vsel %vm1098_vm1, %v2567_v46, %v1162_v15  ;;  %v1287_v14 = vpack.c.bf16 %v1223_v38, %v1223_v38  ;;  %vm1102_vm5 = vcmp.gt.f32.partialorder %v2583_v39, 0.0 }
 0x24f   :  { %1347 = vst.msk [vmem:[%s3335_s4 + $0xc] sm:$0xf] %vm1343_vm15, %v1282_v31  ;;  %v1167_v32 = vmul.f32 0.2, %v2587_v49  ;;  %v1227_v20 = vsel %vm1099_vm2, %v2571_v2, %v1163_v5  ;;  %v1288_v54 = vpack.c.bf16 %v1224_v18, %v1224_v18  ;;  %vm1103_vm6 = vcmp.gt.f32.partialorder %v2587_v49, 0.0 }
 0x250   :  { %1348 = vst.msk [vmem:[%s3335_s4 + $0x10] sm:$0xf] %vm1343_vm15, %v1283_v28  ;;  %v1168_v46 = vmul.f32 0.2, %v2591_v52  ;;  %v1228_v17 = vsel %vm1100_vm3, %v2575_v4, %v1164_v21  ;;  %v1289_v59 = vpack.c.bf16 %v1225_v48, %v1225_v48  ;;  %vm1104_vm7 = vcmp.gt.f32.partialorder %v2591_v52, 0.0 }
 0x251   :  { %1349 = vst.msk [vmem:[%s3335_s4 + $0x14] sm:$0xf] %vm1343_vm15, %v1284_v13  ;;  %v1169_v2 = vmul.f32 0.2, %v2595_v55  ;;  %v1229_v36 = vsel %vm1101_vm4, %v2579_v16, %v1165_v7  ;;  %v1290_v63 = vpack.c.bf16 %v1226_v6, %v1226_v6  ;;  %vm1105_vm8 = vcmp.gt.f32.partialorder %v2595_v55, 0.0 }
 0x252   :  { %1350 = vst.msk [vmem:[%s3335_s4 + $0x18] sm:$0xf] %vm1343_vm15, %v1285_v45  ;;  %v1170_v4 = vmul.f32 0.2, %v2599_v58  ;;  %v1230_v19 = vsel %vm1102_vm5, %v2583_v39, %v1166_v43  ;;  %v1291_v3 = vpack.c.bf16 %v1227_v20, %v1227_v20  ;;  %vm1106_vm9 = vcmp.gt.f32.partialorder %v2599_v58, 0.0 }
 0x253   :  { %1351 = vst.msk [vmem:[%s3335_s4 + $0x1c] sm:$0xf] %vm1343_vm15, %v1286_v62  ;;  %v1171_v16 = vmul.f32 0.2, %v2603_v60  ;;  %v1231_v31 = vsel %vm1103_vm6, %v2587_v49, %v1167_v32  ;;  %v1292_v15 = vpack.c.bf16 %v1228_v17, %v1228_v17  ;;  %vm1107_vm10 = vcmp.gt.f32.partialorder %v2603_v60, 0.0 }
 0x254   :  { %1352 = vst.msk [vmem:[%s3335_s4 + $0x20] sm:$0xf] %vm1343_vm15, %v1287_v14  ;;  %v1172_v39 = vmul.f32 0.2, %v2607_v0  ;;  %v1232_v41 = vsel %vm1104_vm7, %v2591_v52, %v1168_v46  ;;  %v1293_v28 = vpack.c.bf16 %v1229_v36, %v1229_v36  ;;  %vm1108_vm11 = vcmp.gt.f32.partialorder %v2607_v0, 0.0 }
 0x255   :  { %1353 = vst.msk [vmem:[%s3335_s4 + $0x24] sm:$0xf] %vm1343_vm15, %v1288_v54  ;;  %v1173_v49 = vmul.f32 0.2, %v2611_v10  ;;  %v1233_v5 = vsel %vm1105_vm8, %v2595_v55, %v1169_v2  ;;  %v1294_v38 = vpack.c.bf16 %v1230_v19, %v1230_v19  ;;  %vm1109_vm12 = vcmp.gt.f32.partialorder %v2611_v10, 0.0 }
 0x256   :  { %1354 = vst.msk [vmem:[%s3335_s4 + $0x28] sm:$0xf] %vm1343_vm15, %v1289_v59  ;;  %v1174_v52 = vmul.f32 0.2, %v2615_v22  ;;  %v1234_v13 = vsel %vm1106_vm9, %v2599_v58, %v1170_v4  ;;  %v1295_v21 = vpack.c.bf16 %v1231_v31, %v1231_v31  ;;  %vm1110_vm13 = vcmp.gt.f32.partialorder %v2615_v22, 0.0 }
 0x257   :  { %1355 = vst.msk [vmem:[%s3335_s4 + $0x2c] sm:$0xf] %vm1343_vm15, %v1290_v63  ;;  %v1175_v55 = vmul.f32 0.2, %v2619_v35  ;;  %v1235_v18 = vsel %vm1107_vm10, %v2603_v60, %v1171_v16  ;;  %v1296_v45 = vpack.c.bf16 %v1232_v41, %v1232_v41  ;;  %vm1111_vm14 = vcmp.gt.f32.partialorder %v2619_v35, 0.0 }
 0x258   :  { %1356 = vst.msk [vmem:[%s3335_s4 + $0x30] sm:$0xf] %vm1343_vm15, %v1291_v3  ;;  %v1176_v58 = vmul.f32 0.2, %v2623_v11  ;;  %v1236_v7 = vsel %vm1108_vm11, %v2607_v0, %v1172_v39  ;;  %v1297_v48 = vpack.c.bf16 %v1233_v5, %v1233_v5  ;;  %vm1112_vm0 = vcmp.gt.f32.partialorder %v2623_v11, 0.0 }
 0x259   :  { %1357 = vst.msk [vmem:[%s3335_s4 + $0x34] sm:$0xf] %vm1343_vm15, %v1292_v15  ;;  %v1177_v60 = vmul.f32 0.2, %v2627_v33  ;;  %v1237_v62 = vsel %vm1109_vm12, %v2611_v10, %v1173_v49  ;;  %v1298_v43 = vpack.c.bf16 %v1234_v13, %v1234_v13  ;;  %vm1113_vm1 = vcmp.gt.f32.partialorder %v2627_v33, 0.0 }
 0x25a   :  { %1358 = vst.msk [vmem:[%s3335_s4 + $0x38] sm:$0xf] %vm1343_vm15, %v1293_v28  ;;  %v1178_v0 = vmul.f32 0.2, %v2631_v37  ;;  %v1238_v6 = vsel %vm1110_vm13, %v2615_v22, %v1174_v52  ;;  %v1299_v14 = vpack.c.bf16 %v1235_v18, %v1235_v18  ;;  %vm1114_vm2 = vcmp.gt.f32.partialorder %v2631_v37, 0.0 }
 0x25b   :  { %1359 = vst.msk [vmem:[%s3335_s4 + $0x3c] sm:$0xf] %vm1343_vm15, %v1294_v38  ;;  %v1179_v10 = vmul.f32 0.2, %v2635_v40  ;;  %v1239_v32 = vsel %vm1111_vm14, %v2619_v35, %v1175_v55  ;;  %v1300_v20 = vpack.c.bf16 %v1236_v7, %v1236_v7  ;;  %vm1115_vm3 = vcmp.gt.f32.partialorder %v2635_v40, 0.0 }
 0x25c   :  { %1360 = vst.msk [vmem:[%s3335_s4 + $0x40] sm:$0xf] %vm1343_vm15, %v1295_v21  ;;  %v1180_v22 = vmul.f32 0.2, %v2639_v42  ;;  %v1240_v54 = vsel %vm1112_vm0, %v2623_v11, %v1176_v58  ;;  %v1301_v46 = vpack.c.bf16 %v1237_v62, %v1237_v62  ;;  %vm1116_vm4 = vcmp.gt.f32.partialorder %v2639_v42, 0.0 }
 0x25d   :  { %1361 = vst.msk [vmem:[%s3335_s4 + $0x44] sm:$0xf] %vm1343_vm15, %v1296_v45  ;;  %v1181_v35 = vmul.f32 0.2, %v2643_v47  ;;  %v1241_v17 = vsel %vm1113_vm1, %v2627_v33, %v1177_v60  ;;  %v1302_v59 = vpack.c.bf16 %v1238_v6, %v1238_v6  ;;  %vm1117_vm5 = vcmp.gt.f32.partialorder %v2643_v47, 0.0 }
 0x25e   :  { %1362 = vst.msk [vmem:[%s3335_s4 + $0x48] sm:$0xf] %vm1343_vm15, %v1297_v48  ;;  %v1182_v11 = vmul.f32 0.2, %v2647_v50  ;;  %v1242_v2 = vsel %vm1114_vm2, %v2631_v37, %v1178_v0  ;;  %v1303_v36 = vpack.c.bf16 %v1239_v32, %v1239_v32  ;;  %vm1118_vm6 = vcmp.gt.f32.partialorder %v2647_v50, 0.0 }
 0x25f   :  { %1363 = vst.msk [vmem:[%s3335_s4 + $0x4c] sm:$0xf] %vm1343_vm15, %v1298_v43  ;;  %v1183_v33 = vmul.f32 0.2, %v2651_v53  ;;  %v1243_v63 = vsel %vm1115_vm3, %v2635_v40, %v1179_v10  ;;  %v1304_v4 = vpack.c.bf16 %v1240_v54, %v1240_v54  ;;  %vm1119_vm7 = vcmp.gt.f32.partialorder %v2651_v53, 0.0 }
 0x260   :  { %1364 = vst.msk [vmem:[%s3335_s4 + $0x50] sm:$0xf] %vm1343_vm15, %v1299_v14  ;;  %v1184_v37 = vmul.f32 0.2, %v2655_v56  ;;  %v1244_v19 = vsel %vm1116_vm4, %v2639_v42, %v1180_v22  ;;  %v1305_v3 = vpack.c.bf16 %v1241_v17, %v1241_v17  ;;  %vm1120_vm8 = vcmp.gt.f32.partialorder %v2655_v56, 0.0 }
 0x261   :  { %1365 = vst.msk [vmem:[%s3335_s4 + $0x54] sm:$0xf] %vm1343_vm15, %v1300_v20  ;;  %v1185_v40 = vmul.f32 0.2, %v2659_v61  ;;  %v1245_v16 = vsel %vm1117_vm5, %v2643_v47, %v1181_v35  ;;  %v1306_v31 = vpack.c.bf16 %v1242_v2, %v1242_v2  ;;  %vm1121_vm9 = vcmp.gt.f32.partialorder %v2659_v61, 0.0 }
 0x262   :  { %1366 = vst.msk [vmem:[%s3335_s4 + $0x58] sm:$0xf] %vm1343_vm15, %v1301_v46  ;;  %v1186_v42 = vmul.f32 0.2, %v2663_v1  ;;  %v1246_v15 = vsel %vm1118_vm6, %v2647_v50, %v1182_v11  ;;  %v1307_v39 = vpack.c.bf16 %v1243_v63, %v1243_v63  ;;  %vm1122_vm10 = vcmp.gt.f32.partialorder %v2663_v1, 0.0 }
 0x263   :  { %1367 = vst.msk [vmem:[%s3335_s4 + $0x5c] sm:$0xf] %vm1343_vm15, %v1302_v59  ;;  %v1187_v47 = vmul.f32 0.2, %v2667_v25  ;;  %v1247_v41 = vsel %vm1119_vm7, %v2651_v53, %v1183_v33  ;;  %v1308_v28 = vpack.c.bf16 %v1244_v19, %v1244_v19  ;;  %vm1123_vm11 = vcmp.gt.f32.partialorder %v2667_v25, 0.0 }
 0x264   :  { %1368 = vst.msk [vmem:[%s3335_s4 + $0x60] sm:$0xf] %vm1343_vm15, %v1303_v36  ;;  %v1188_v50 = vmul.f32 0.2, %v2671_v29  ;;  %v1248_v49 = vsel %vm1120_vm8, %v2655_v56, %v1184_v37  ;;  %v1309_v5 = vpack.c.bf16 %v1245_v16, %v1245_v16  ;;  %vm1124_vm12 = vcmp.gt.f32.partialorder %v2671_v29, 0.0  ;;  %v3498_v37 = vld [vmem:[#allocation4_spill] sm:$0xff] }
 0x265   :  { %1369 = vst.msk [vmem:[%s3335_s4 + $0x64] sm:$0xf] %vm1343_vm15, %v1304_v4  ;;  %v1189_v53 = vmul.f32 0.2, %v2675_v9  ;;  %v1249_v38 = vsel %vm1121_vm9, %v2659_v61, %v1185_v40  ;;  %v1310_v52 = vpack.c.bf16 %v1246_v15, %v1246_v15  ;;  %vm1125_vm13 = vcmp.gt.f32.partialorder %v2675_v9, 0.0 }
 0x266   :  { %1370 = vst.msk [vmem:[%s3335_s4 + $0x68] sm:$0xf] %vm1343_vm15, %v1305_v3  ;;  %v1190_v56 = vmul.f32 0.2, %v2679_v8  ;;  %v1250_v13 = vsel %vm1122_vm10, %v2663_v1, %v1186_v42  ;;  %v1311_v21 = vpack.c.bf16 %v1247_v41, %v1247_v41  ;;  %vm1126_vm14 = vcmp.gt.f32.partialorder %v2679_v8, 0.0 }
 0x267   :  { %1371 = vst.msk [vmem:[%s3335_s4 + $0x6c] sm:$0xf] %vm1343_vm15, %v1306_v31  ;;  %v1191_v61 = vmul.f32 0.2, %v2683_v23  ;;  %v1251_v55 = vsel %vm1123_vm11, %v2667_v25, %v1187_v47  ;;  %v1312_v18 = vpack.c.bf16 %v1248_v49, %v1248_v49  ;;  %vm1127_vm0 = vcmp.gt.f32.partialorder %v2683_v23, 0.0 }
 0x268   :  { %1372 = vst.msk [vmem:[%s3335_s4 + $0x70] sm:$0xf] %vm1343_vm15, %v1307_v39  ;;  %v1192_v1 = vmul.f32 0.2, %v2687_v30  ;;  %v1252_v45 = vsel %vm1124_vm12, %v2671_v29, %v1188_v50  ;;  %v1313_v58 = vpack.c.bf16 %v1249_v38, %v1249_v38  ;;  %vm1128_vm1 = vcmp.gt.f32.partialorder %v2687_v30, 0.0 }
 0x269   :  { %1373 = vst.msk [vmem:[%s3335_s4 + $0x74] sm:$0xf] %vm1343_vm15, %v1308_v28  ;;  %v1193_v25 = vmul.f32 0.2, %v2691_v57  ;;  %v1253_v7 = vsel %vm1125_vm13, %v2675_v9, %v1189_v53  ;;  %v1314_v48 = vpack.c.bf16 %v1250_v13, %v1250_v13  ;;  %vm1129_vm2 = vcmp.gt.f32.partialorder %v2691_v57, 0.0  ;;  %v3499_v53 = vld [vmem:[#allocation6_spill] sm:$0xff] }
 0x26a   :  { %1374 = vst.msk [vmem:[%s3335_s4 + $0x78] sm:$0xf] %vm1343_vm15, %v1309_v5  ;;  %v1194_v29 = vmul.f32 0.2, %v2695_v27  ;;  %v1254_v60 = vsel %vm1126_vm14, %v2679_v8, %v1190_v56  ;;  %v1315_v62 = vpack.c.bf16 %v1251_v55, %v1251_v55  ;;  %vm1130_vm3 = vcmp.gt.f32.partialorder %v2695_v27, 0.0  ;;  %v3493_v8 = vld [vmem:[#allocation27_spill] sm:$0xff] }
 0x26b   :  { %1375 = vst.msk [vmem:[%s3335_s4 + $0x7c] sm:$0xf] %vm1343_vm15, %v1310_v52  ;;  %v1195_v9 = vmul.f32 0.2, %v2699_v51  ;;  %v1255_v43 = vsel %vm1127_vm0, %v2683_v23, %v1191_v61  ;;  %v1316_v0 = vpack.c.bf16 %v1252_v45, %v1252_v45  ;;  %vm1131_vm4 = vcmp.gt.f32.partialorder %v2699_v51, 0.0  ;;  %v3500_v13 = vld [vmem:[#allocation7_spill] sm:$0xff] }
 0x26c   :  { %1376 = vst.msk [vmem:[%s3335_s4 + $0x80] sm:$0xf] %vm1343_vm15, %v1311_v21  ;;  %v1196_v6 = vmul.f32 0.2, %v3493_v8  ;;  %v1256_v14 = vsel %vm1128_vm1, %v2687_v30, %v1192_v1  ;;  %v1317_v10 = vpack.c.bf16 %v1253_v7, %v1253_v7  ;;  %vm1132_vm5 = vcmp.gt.f32.partialorder %v3493_v8, 0.0  ;;  %v3494_v30 = vld [vmem:[#allocation13_spill] sm:$0xff] }
 0x26d   :  { %1377 = vst.msk [vmem:[%s3335_s4 + $0x84] sm:$0xf] %vm1343_vm15, %v1312_v18  ;;  %v1197_v23 = vmul.f32 0.2, %v2707_v34  ;;  %v1257_v32 = vsel %vm1129_vm2, %v2691_v57, %v1193_v25  ;;  %v1318_v20 = vpack.c.bf16 %v1254_v60, %v1254_v60  ;;  %vm1133_vm6 = vcmp.gt.f32.partialorder %v2707_v34, 0.0  ;;  %v3495_v57 = vld [vmem:[#allocation29_spill] sm:$0xff] }
 0x26e   :  { %1378 = vst.msk [vmem:[%s3335_s4 + $0x88] sm:$0xf] %vm1343_vm15, %v1313_v58  ;;  %v1198_v22 = vmul.f32 0.2, %v3494_v30  ;;  %v1258_v54 = vsel %vm1130_vm3, %v2695_v27, %v1194_v29  ;;  %v1319_v46 = vpack.c.bf16 %v1255_v43, %v1255_v43  ;;  %vm1134_vm7 = vcmp.gt.f32.partialorder %v3494_v30, 0.0  ;;  %v3496_v27 = vld [vmem:[#allocation2_spill] sm:$0xff] }
 0x26f   :  { %1379 = vst.msk [vmem:[%s3335_s4 + $0x8c] sm:$0xf] %vm1343_vm15, %v1314_v48  ;;  %v1199_v35 = vmul.f32 0.2, %v3495_v57  ;;  %v1259_v17 = vsel %vm1131_vm4, %v2699_v51, %v1195_v9  ;;  %v1320_v59 = vpack.c.bf16 %v1256_v14, %v1256_v14  ;;  %vm1135_vm8 = vcmp.gt.f32.partialorder %v3495_v57, 0.0  ;;  %v3497_v51 = vld [vmem:[#allocation3_spill] sm:$0xff] }
 0x270   :  { %1380 = vst.msk [vmem:[%s3335_s4 + $0x90] sm:$0xf] %vm1343_vm15, %v1315_v62  ;;  %v1200_v11 = vmul.f32 0.2, %v3496_v27  ;;  %v1260_v2 = vsel %vm1132_vm5, %v3493_v8, %v1196_v6  ;;  %v1321_v36 = vpack.c.bf16 %v1257_v32, %v1257_v32  ;;  %vm1136_vm9 = vcmp.gt.f32.partialorder %v3496_v27, 0.0 }
 0x271   :  { %1381 = vst.msk [vmem:[%s3335_s4 + $0x94] sm:$0xf] %vm1343_vm15, %v1316_v0  ;;  %v1201_v33 = vmul.f32 0.2, %v3497_v51  ;;  %v1261_v63 = vsel %vm1133_vm6, %v2707_v34, %v1197_v23  ;;  %v1322_v4 = vpack.c.bf16 %v1258_v54, %v1258_v54  ;;  %vm1137_vm10 = vcmp.gt.f32.partialorder %v3497_v51, 0.0  ;;  %v3505_v0 = vld [vmem:[#allocation8_spill] sm:$0xff] }
 0x272   :  { %1382 = vst.msk [vmem:[%s3335_s4 + $0x98] sm:$0xf] %vm1343_vm15, %v1317_v10  ;;  %v1202_v19 = vmul.f32 0.2, %v3498_v37  ;;  %v1262_v3 = vsel %vm1134_vm7, %v3494_v30, %v1198_v22  ;;  %v1323_v40 = vpack.c.bf16 %v1259_v17, %v1259_v17  ;;  %vm1138_vm11 = vcmp.gt.f32.partialorder %v3498_v37, 0.0  ;;  %v3506_v10 = vld [vmem:[#allocation20_spill] sm:$0xff] }
 0x273   :  { %1383 = vst.msk [vmem:[%s3335_s4 + $0x9c] sm:$0xf] %vm1343_vm15, %v1318_v20  ;;  %v1203_v34 = vmul.f32 0.2, %v2731_v44  ;;  %v1263_v16 = vsel %vm1135_vm8, %v3495_v57, %v1199_v35  ;;  %v1324_v31 = vpack.c.bf16 %v1260_v2, %v1260_v2  ;;  %vm1139_vm12 = vcmp.gt.f32.partialorder %v2731_v44, 0.0 }
 0x274   :  { %1384 = vst.msk [vmem:[%s3335_s4 + $0xa0] sm:$0xf] %vm1343_vm15, %v1319_v46  ;;  %v1204_v42 = vmul.f32 0.2, %v2735_v26  ;;  %v1264_v15 = vsel %vm1136_vm9, %v3496_v27, %v1200_v11  ;;  %v1325_v39 = vpack.c.bf16 %v1261_v63, %v1261_v63  ;;  %vm1140_vm13 = vcmp.gt.f32.partialorder %v2735_v26, 0.0 }
 0x275   :  { %1385 = vst.msk [vmem:[%s3335_s4 + $0xa4] sm:$0xf] %vm1343_vm15, %v1320_v59  ;;  %v1205_v47 = vmul.f32 0.2, %v2739_v24  ;;  %v1265_v41 = vsel %vm1137_vm10, %v3497_v51, %v1201_v33  ;;  %v1326_v28 = vpack.c.bf16 %v1262_v3, %v1262_v3  ;;  %vm1141_vm14 = vcmp.gt.f32.partialorder %v2739_v24, 0.0 }
 0x276   :  { %1386 = vst.msk [vmem:[%s3335_s4 + $0xa8] sm:$0xf] %vm1343_vm15, %v1321_v36  ;;  %v1206_v50 = vmul.f32 0.2, %v2744_v12  ;;  %v1266_v49 = vsel %vm1138_vm11, %v3498_v37, %v1202_v19  ;;  %v1327_v5 = vpack.c.bf16 %v1263_v16, %v1263_v16  ;;  %vm1142_vm0 = vcmp.gt.f32.partialorder %v2744_v12, 0.0 }
 0x277   :  { %1387 = vst.msk [vmem:[%s3335_s4 + $0xac] sm:$0xf] %vm1343_vm15, %v1322_v4  ;;  %v1207_v38 = vmul.f32 0.2, %v3499_v53  ;;  %v1267_v52 = vsel %vm1139_vm12, %v2731_v44, %v1203_v34  ;;  %v1328_v56 = vpack.c.bf16 %v1264_v15, %v1264_v15  ;;  %vm1143_vm1 = vcmp.gt.f32.partialorder %v3499_v53, 0.0  ;;  %v3501_v44 = vld [vmem:[#allocation14_spill] sm:$0xff] }
 0x278   :  { %1388 = vst.msk [vmem:[%s3335_s4 + $0xb0] sm:$0xf] %vm1343_vm15, %v1323_v40  ;;  %v1208_v21 = vmul.f32 0.2, %v3500_v13  ;;  %v1268_v61 = vsel %vm1140_vm13, %v2735_v26, %v1204_v42  ;;  %v1329_v55 = vpack.c.bf16 %v1265_v41, %v1265_v41  ;;  %vm1144_vm2 = vcmp.gt.f32.partialorder %v3500_v13, 0.0  ;;  %v3502_v26 = vld [vmem:[#allocation15_spill] sm:$0xff] }
 0x279   :  { %1389 = vst.msk [vmem:[%s3335_s4 + $0xb4] sm:$0xf] %vm1343_vm15, %v1324_v31  ;;  %v1209_v18 = vmul.f32 0.2, %v3501_v44  ;;  %v1269_v1 = vsel %vm1141_vm14, %v2739_v24, %v1205_v47  ;;  %v1330_v45 = vpack.c.bf16 %v1266_v49, %v1266_v49  ;;  %vm1145_vm3 = vcmp.gt.f32.partialorder %v3501_v44, 0.0  ;;  %v3503_v24 = vld [vmem:[#allocation18_spill] sm:$0xff] }
 0x27a   :  { %1390 = vst.msk [vmem:[%s3335_s4 + $0xb8] sm:$0xf] %vm1343_vm15, %v1325_v39  ;;  %v1210_v58 = vmul.f32 0.2, %v3502_v26  ;;  %v1270_v25 = vsel %vm1142_vm0, %v2744_v12, %v1206_v50  ;;  %v1331_v7 = vpack.c.bf16 %v1267_v52, %v1267_v52  ;;  %vm1146_vm4 = vcmp.gt.f32.partialorder %v3502_v26, 0.0  ;;  %v3504_v12 = vld [vmem:[#allocation5_spill] sm:$0xff] }
 0x27b   :  { %1391 = vst.msk [vmem:[%s3335_s4 + $0xbc] sm:$0xf] %vm1343_vm15, %v1326_v28  ;;  %v1211_v48 = vmul.f32 0.2, %v3503_v24  ;;  %v1271_v29 = vsel %vm1143_vm1, %v3499_v53, %v1207_v38  ;;  %v1332_v60 = vpack.c.bf16 %v1268_v61, %v1268_v61  ;;  %vm1147_vm5 = vcmp.gt.f32.partialorder %v3503_v24, 0.0 }
 0x27c   :  { %1392 = vst.msk [vmem:[%s3335_s4 + $0xc0] sm:$0xf] %vm1343_vm15, %v1327_v5  ;;  %v1212_v62 = vmul.f32 0.2, %v3504_v12  ;;  %v1272_v9 = vsel %vm1144_vm2, %v3500_v13, %v1208_v21  ;;  %v1333_v43 = vpack.c.bf16 %v1269_v1, %v1269_v1  ;;  %vm1148_vm6 = vcmp.gt.f32.partialorder %v3504_v12, 0.0 }
 0x27d   :  { %1393 = vst.msk [vmem:[%s3335_s4 + $0xc4] sm:$0xf] %vm1343_vm15, %v1328_v56  ;;  %v1213_v8 = vmul.f32 0.2, %v3505_v0  ;;  %v1273_v6 = vsel %vm1145_vm3, %v3501_v44, %v1209_v18  ;;  %v1334_v14 = vpack.c.bf16 %v1270_v25, %v1270_v25  ;;  %vm1149_vm7 = vcmp.gt.f32.partialorder %v3505_v0, 0.0 }
 0x27e   :  { %1394 = vst.msk [vmem:[%s3335_s4 + $0xc8] sm:$0xf] %vm1343_vm15, %v1329_v55  ;;  %v1214_v23 = vmul.f32 0.2, %v3506_v10  ;;  %v1274_v32 = vsel %vm1146_vm4, %v3502_v26, %v1210_v58  ;;  %v1335_v20 = vpack.c.bf16 %v1271_v29, %v1271_v29  ;;  %vm1150_vm8 = vcmp.gt.f32.partialorder %v3506_v10, 0.0 }
 0x27f   :  { %1395 = vst.msk [vmem:[%s3335_s4 + $0xcc] sm:$0xf] %vm1343_vm15, %v1330_v45  ;;  %v1275_v30 = vsel %vm1147_vm5, %v3503_v24, %v1211_v48  ;;  %v1336_v22 = vpack.c.bf16 %v1272_v9, %v1272_v9  ;;  %v1276_v54 = vsel %vm1148_vm6, %v3504_v12, %v1212_v62  ;;  %v1337_v46 = vpack.c.bf16 %v1273_v6, %v1273_v6 }
 0x280   :  { %1396 = vst.msk [vmem:[%s3335_s4 + $0xd0] sm:$0xf] %vm1343_vm15, %v1331_v7  ;;  %v1277_v57 = vsel %vm1149_vm7, %v3505_v0, %v1213_v8  ;;  %v1338_v35 = vpack.c.bf16 %v1274_v32, %v1274_v32  ;;  %v1278_v17 = vsel %vm1150_vm8, %v3506_v10, %v1214_v23  ;;  %v1339_v59 = vpack.c.bf16 %v1275_v30, %v1275_v30 }
 0x281   :  { %1397 = vst.msk [vmem:[%s3335_s4 + $0xd4] sm:$0xf] %vm1343_vm15, %v1332_v60  ;;  %v1340_v27 = vpack.c.bf16 %v1276_v54, %v1276_v54  ;;  %v1341_v11 = vpack.c.bf16 %v1277_v57, %v1277_v57  ;;  %v1342_v2 = vpack.c.bf16 %v1278_v17, %v1278_v17 }
 0x282   :  { %1398 = vst.msk [vmem:[%s3335_s4 + $0xd8] sm:$0xf] %vm1343_vm15, %v1333_v43 }
 0x283   :  { %1399 = vst.msk [vmem:[%s3335_s4 + $0xdc] sm:$0xf] %vm1343_vm15, %v1334_v14 }
 0x284   :  { %1400 = vst.msk [vmem:[%s3335_s4 + $0xe0] sm:$0xf] %vm1343_vm15, %v1335_v20 }
 0x285   :  { %1401 = vst.msk [vmem:[%s3335_s4 + $0xe4] sm:$0xf] %vm1343_vm15, %v1336_v22 }
 0x286   :  { %1402 = vst.msk [vmem:[%s3335_s4 + $0xe8] sm:$0xf] %vm1343_vm15, %v1337_v46 }
 0x287   :  { %1403 = vst.msk [vmem:[%s3335_s4 + $0xec] sm:$0xf] %vm1343_vm15, %v1338_v35 }
 0x288   :  { %1404 = vst.msk [vmem:[%s3335_s4 + $0xf0] sm:$0xf] %vm1343_vm15, %v1339_v59 }
 0x289   :  { %1405 = vst.msk [vmem:[%s3335_s4 + $0xf4] sm:$0xf] %vm1343_vm15, %v1340_v27 }
 0x28a   :  { %1406 = vst.msk [vmem:[%s3335_s4 + $0xf8] sm:$0xf] %vm1343_vm15, %v1341_v11 }
 0x28b   :  { %1407 = vst.msk [vmem:[%s3335_s4 + $0xfc] sm:$0xf] %vm1343_vm15, %v1342_v2 }

// kernel: dagan_generator.8
= control target key start
LH: loop header
LB: loop body
LE: loop exit
PB: predicated region body
PF: predicated region fallthrough
CT: control target
= control target key end

     0   :  { %vm194_vm0 = vcmask 130048   ;;  %vm421_vm4 = vcmask 125952   ;;  %s841_s1 = inlined_call_operand.vmem [shape: bf16[128,16], index: 1, kind: input, shape index: {}]   ;;  %s842_s0 = inlined_call_operand.vmem [shape: bf16[128,128], index: 0, kind: input, shape index: {}]   ;;  %s843_s2 = inlined_call_operand.vmem [shape: f32[1,16], index: 2, kind: input, shape index: {}]   ;;  %s844_s3 = inlined_call_operand.vmem [shape: f32[1,16], index: 3, kind: input, shape index: {}]   ;;  %s845_s4 = inlined_call_operand.vmem [shape: bf16[128,16], index: 4, kind: output, shape index: {}]  }
   0x1   :  { %v521_v0 = vld [vmem:[%s841_s1 + $0x38] sm:$0xff]  ;;  %v520_v1 = vld [vmem:[%s841_s1 + $0x30] sm:$0xff]  ;;  %v519_v2 = vld [vmem:[%s841_s1 + $0x28] sm:$0xff] }
   0x2   :  { %145 = vmatpush.bf16.msra.mxu0 %v521_v0  ;;  %522 = vmatpush.bf16.msra.mxu1 %v521_v0  ;;  %v518_v3 = vld [vmem:[%s841_s1 + $0x20] sm:$0xff]  ;;  %v517_v4 = vld [vmem:[%s841_s1 + $0x18] sm:$0xff]  ;;  %v516_v5 = vld [vmem:[%s841_s1 + $0x10] sm:$0xff] }
   0x3   :  { %523 = vmatpush.bf16.msra.mxu2 %v521_v0  ;;  %524 = vmatpush.bf16.msra.mxu3 %v521_v0  ;;  %v515_v6 = vld [vmem:[%s841_s1 + $0x8] sm:$0xff]  ;;  %v514_v7 = vld [vmem:[%s841_s1] sm:$0xff]  ;;  %v508_v9 = vld [vmem:[%s842_s0 + $0x10] sm:$0xff] }
   0x4   :  { %v506_v8 = vld [vmem:[%s842_s0] sm:$0xff]  ;;  %v512_v11 = vld [vmem:[%s842_s0 + $0x30] sm:$0xff]  ;;  %v507_v12 = vld [vmem:[%s842_s0 + $0x8] sm:$0xff] }
   0x5   :  { %v510_v10 = vld [vmem:[%s842_s0 + $0x20] sm:$0xff]  ;;  %v509_v13 = vld [vmem:[%s842_s0 + $0x18] sm:$0xff]  ;;  %v511_v14 = vld [vmem:[%s842_s0 + $0x28] sm:$0xff] }
   0x6   :  { %146 = vmatpush.bf16.msra.mxu0 %v520_v1  ;;  %525 = vmatpush.bf16.msra.mxu1 %v520_v1  ;;  %v513_v15 = vld [vmem:[%s842_s0 + $0x38] sm:$0xff] }
   0x7   :  { %526 = vmatpush.bf16.msra.mxu2 %v520_v1  ;;  %527 = vmatpush.bf16.msra.mxu3 %v520_v1 }
   0xa   :  { %147 = vmatpush.bf16.msra.mxu0 %v519_v2  ;;  %528 = vmatpush.bf16.msra.mxu1 %v519_v2 }
   0xb   :  { %529 = vmatpush.bf16.msra.mxu2 %v519_v2  ;;  %530 = vmatpush.bf16.msra.mxu3 %v519_v2 }
   0xe   :  { %148 = vmatpush.bf16.msra.mxu0 %v518_v3  ;;  %531 = vmatpush.bf16.msra.mxu1 %v518_v3 }
   0xf   :  { %532 = vmatpush.bf16.msra.mxu2 %v518_v3  ;;  %533 = vmatpush.bf16.msra.mxu3 %v518_v3 }
  0x12   :  { %149 = vmatpush.bf16.msra.mxu0 %v517_v4  ;;  %534 = vmatpush.bf16.msra.mxu1 %v517_v4 }
  0x13   :  { %535 = vmatpush.bf16.msra.mxu2 %v517_v4  ;;  %536 = vmatpush.bf16.msra.mxu3 %v517_v4 }
  0x16   :  { %150 = vmatpush.bf16.msra.mxu0 %v516_v5  ;;  %537 = vmatpush.bf16.msra.mxu1 %v516_v5 }
  0x17   :  { %538 = vmatpush.bf16.msra.mxu2 %v516_v5  ;;  %539 = vmatpush.bf16.msra.mxu3 %v516_v5 }
  0x1a   :  { %151 = vmatpush.bf16.msra.mxu0 %v515_v6  ;;  %540 = vmatpush.bf16.msra.mxu1 %v515_v6 }
  0x1b   :  { %541 = vmatpush.bf16.msra.mxu2 %v515_v6  ;;  %542 = vmatpush.bf16.msra.mxu3 %v515_v6 }
  0x1e   :  { %152 = vmatpush.bf16.msra.mxu0 %v514_v7  ;;  %543 = vmatpush.bf16.msra.mxu1 %v514_v7 }
  0x1f   :  { %544 = vmatpush.bf16.msra.mxu2 %v514_v7  ;;  %545 = vmatpush.bf16.msra.mxu3 %v514_v7 }
  0x21   :  { %153 = vmatmul.bf16.vlgmr.msra.gmra.mxu0 %v506_v8  ;;  %163 = vmatmul.bf16.vlgmr.msra.gmra.mxu1 %v508_v9 }
  0x22   :  { %173 = vmatmul.bf16.vlgmr.msra.gmra.mxu2 %v510_v10  ;;  %183 = vmatmul.bf16.vlgmr.msra.gmra.mxu3 %v512_v11 }
  0x31   :  { %158 = vmatmul.bf16.gmra.mxu0 %v507_v12  ;;  %168 = vmatmul.bf16.gmra.mxu1 %v509_v13 }
  0x32   :  { %178 = vmatmul.bf16.gmra.mxu2 %v511_v14  ;;  %188 = vmatmul.bf16.gmra.mxu3 %v513_v15 }
  0x9e   :  { %v621_v16 = vpop.f32.mrf.mxu0  ;;  %v623_v17 = vpop.f32.mrf.mxu1 }
  0x9f   :  { %v195_v26 = vsel %vm194_vm0, %v621_v16, 0.0  ;;  %v202_v34 = vsel %vm194_vm0, %v623_v17, 0.0 }
  0xa5   :  { %v627_v19 = vpop.f32.mrf.mxu2  ;;  %v633_v22 = vpop.f32.mrf.mxu3 }
  0xa6   :  { %v625_v18 = vpop.f32.mrf.mxu0  ;;  %v629_v20 = vpop.f32.mrf.mxu1  ;;  %v210_v44 = vsel %vm194_vm0, %v627_v19, 0.0  ;;  %v218_v54 = vsel %vm194_vm0, %v633_v22, 0.0 }
  0xa7   :  { %v196_v24 = vsel %vm194_vm0, %v625_v18, 0.0  ;;  %v204_v37 = vsel %vm194_vm0, %v629_v20, 0.0 }
  0xa8   :  { %v197_v28 = vadd.f32 %v196_v24, %v195_v26 }
  0xad   :  { %v635_v23 = vpop.f32.mrf.mxu2  ;;  %v649_v33 = vpop.f32.mrf.mxu3 }
  0xae   :  { %v631_v21 = vpop.f32.mrf.mxu0  ;;  %v639_v25 = vpop.f32.mrf.mxu1  ;;  %v212_v47 = vsel %vm194_vm0, %v635_v23, 0.0  ;;  %v220_v56 = vsel %vm194_vm0, %v649_v33, 0.0 }
  0xaf   :  { %v198_v27 = vsel %vm194_vm0, %v631_v21, 0.0  ;;  %v206_v40 = vsel %vm194_vm0, %v639_v25, 0.0 }
  0xb0   :  { %v199_v29 = vadd.f32 %v198_v27, %v197_v28 }
  0xb5   :  { %v653_v36 = vpop.f32.mrf.mxu2  ;;  %v665_v46 = vpop.f32.mrf.mxu3 }
  0xb6   :  { %v645_v30 = vpop.f32.mrf.mxu0  ;;  %v657_v38 = vpop.f32.mrf.mxu1  ;;  %v214_v50 = vsel %vm194_vm0, %v653_v36, 0.0  ;;  %v222_v59 = vsel %vm194_vm0, %v665_v46, 0.0 }
  0xb7   :  { %v200_v31 = vsel %vm194_vm0, %v645_v30, 0.0  ;;  %v208_v42 = vsel %vm194_vm0, %v657_v38, 0.0 }
  0xb8   :  { %v201_v32 = vadd.f32 %v200_v31, %v199_v29 }
  0xba   :  { %v203_v35 = vadd.f32 %v202_v34, %v201_v32 }
  0xbc   :  { %v205_v39 = vadd.f32 %v204_v37, %v203_v35 }
  0xbd   :  { %v669_v49 = vpop.f32.mrf.mxu2  ;;  %v679_v58 = vpop.f32.mrf.mxu3 }
  0xbe   :  { %v207_v41 = vadd.f32 %v206_v40, %v205_v39  ;;  %v216_v52 = vsel %vm194_vm0, %v669_v49, 0.0  ;;  %v224_v61 = vsel %vm194_vm0, %v679_v58, 0.0 }
  0xc0   :  { %v209_v43 = vadd.f32 %v208_v42, %v207_v41 }
  0xc2   :  { %v211_v45 = vadd.f32 %v210_v44, %v209_v43 }
  0xc4   :  { %v213_v48 = vadd.f32 %v212_v47, %v211_v45 }
  0xc6   :  { %v215_v51 = vadd.f32 %v214_v50, %v213_v48 }
  0xc8   :  { %v217_v53 = vadd.f32 %v216_v52, %v215_v51 }
  0xca   :  { %v219_v55 = vadd.f32 %v218_v54, %v217_v53 }
  0xcc   :  { %v221_v57 = vadd.f32 %v220_v56, %v219_v55 }
  0xce   :  { %v223_v60 = vadd.f32 %v222_v59, %v221_v57 }
  0xd0   :  { %v225_v62 = vadd.f32 %v224_v61, %v223_v60 }
  0xd2   :  { %v226_v63 = vrot.slane %v225_v62, 4 }
  0xd4   :  { %v227_v0 = vadd.f32 %v226_v63, %v225_v62 }
  0xd6   :  { %v228_v1 = vrot.slane %v227_v0, 2 }
  0xd8   :  { %v229_v2 = vadd.f32 %v228_v1, %v227_v0 }
  0xda   :  { %v230_v3 = vrot.slane %v229_v2, 1 }
  0xdc   :  { %v231_v4 = vadd.f32 %v230_v3, %v229_v2 }
  0xde   :  { %v685_v5 = vmul.f32 0.0078125, %v231_v4 }
  0xe0   :  { %v233_v6 = vsub.f32 %v621_v16, %v685_v5  ;;  %v234_v7 = vsub.f32 %v625_v18, %v685_v5  ;;  %v235_v8 = vsub.f32 %v631_v21, %v685_v5  ;;  %v236_v9 = vsub.f32 %v645_v30, %v685_v5 }
  0xe1   :  { %v237_v12 = vsub.f32 %v623_v17, %v685_v5  ;;  %v238_v14 = vsub.f32 %v629_v20, %v685_v5  ;;  %v239_v28 = vsub.f32 %v639_v25, %v685_v5  ;;  %v240_v34 = vsub.f32 %v657_v38, %v685_v5 }
  0xe2   :  { %v249_v10 = vmul.f32 %v233_v6, %v233_v6  ;;  %v250_v11 = vmul.f32 %v234_v7, %v234_v7  ;;  %v251_v13 = vmul.f32 %v235_v8, %v235_v8  ;;  %v252_v15 = vmul.f32 %v236_v9, %v236_v9 }
  0xe3   :  { %v253_v29 = vmul.f32 %v237_v12, %v237_v12  ;;  %v254_v35 = vmul.f32 %v238_v14, %v238_v14  ;;  %v241_v40 = vsub.f32 %v627_v19, %v685_v5  ;;  %v255_v41 = vmul.f32 %v239_v28, %v239_v28 }
  0xe4   :  { %v265_v24 = vsel %vm194_vm0, %v249_v10, 0.0  ;;  %v266_v26 = vsel %vm194_vm0, %v250_v11, 0.0  ;;  %v268_v31 = vsel %vm194_vm0, %v251_v13, 0.0  ;;  %v270_v37 = vsel %vm194_vm0, %v252_v15, 0.0 }
  0xe5   :  { %v267_v27 = vadd.f32 %v266_v26, %v265_v24  ;;  %v272_v42 = vsel %vm194_vm0, %v253_v29, 0.0  ;;  %v242_v44 = vsub.f32 %v635_v23, %v685_v5  ;;  %v256_v45 = vmul.f32 %v240_v34, %v240_v34 }
  0xe6   :  { %v274_v47 = vsel %vm194_vm0, %v254_v35, 0.0  ;;  %v243_v50 = vsub.f32 %v653_v36, %v685_v5  ;;  %v257_v51 = vmul.f32 %v241_v40, %v241_v40  ;;  %v276_v52 = vsel %vm194_vm0, %v255_v41, 0.0 }
  0xe7   :  { %v269_v32 = vadd.f32 %v268_v31, %v267_v27  ;;  %v244_v54 = vsub.f32 %v669_v49, %v685_v5  ;;  %v258_v55 = vmul.f32 %v242_v44, %v242_v44  ;;  %v278_v56 = vsel %vm194_vm0, %v256_v45, 0.0 }
  0xe8   :  { %v245_v59 = vsub.f32 %v633_v22, %v685_v5  ;;  %v259_v60 = vmul.f32 %v243_v50, %v243_v50  ;;  %v280_v61 = vsel %vm194_vm0, %v257_v51, 0.0  ;;  %v246_v63 = vsub.f32 %v649_v33, %v685_v5  ;;  %v314_v51 = vld [vmem:[%s843_s2] sm:$0x1] }
  0xe9   :  { %v271_v39 = vadd.f32 %v270_v37, %v269_v32  ;;  %v260_v0 = vmul.f32 %v244_v54, %v244_v54  ;;  %v282_v1 = vsel %vm194_vm0, %v258_v55, 0.0  ;;  %v247_v3 = vsub.f32 %v665_v46, %v685_v5  ;;  %v316_v55 = vld [vmem:[%s844_s3] sm:$0x1] }
  0xea   :  { %v261_v4 = vmul.f32 %v245_v59, %v245_v59  ;;  %v284_v6 = vsel %vm194_vm0, %v259_v60, 0.0  ;;  %v248_v8 = vsub.f32 %v679_v58, %v685_v5  ;;  %v262_v9 = vmul.f32 %v246_v63, %v246_v63 }
  0xeb   :  { %v273_v43 = vadd.f32 %v272_v42, %v271_v39  ;;  %v286_v10 = vsel %vm194_vm0, %v260_v0, 0.0  ;;  %v263_v12 = vmul.f32 %v247_v3, %v247_v3 }
  0xec   :  { %v288_v13 = vsel %vm194_vm0, %v261_v4, 0.0  ;;  %v264_v15 = vmul.f32 %v248_v8, %v248_v8  ;;  %v290_v24 = vsel %vm194_vm0, %v262_v9, 0.0 }
  0xed   :  { %v275_v48 = vadd.f32 %v274_v47, %v273_v43  ;;  %v292_v27 = vsel %vm194_vm0, %v263_v12, 0.0 }
  0xee   :  { %v294_v29 = vsel %vm194_vm0, %v264_v15, 0.0 }
  0xef   :  { %v277_v53 = vadd.f32 %v276_v52, %v275_v48 }
  0xf1   :  { %v279_v57 = vadd.f32 %v278_v56, %v277_v53 }
  0xf3   :  { %v281_v62 = vadd.f32 %v280_v61, %v279_v57 }
  0xf5   :  { %v283_v2 = vadd.f32 %v282_v1, %v281_v62 }
  0xf7   :  { %v285_v7 = vadd.f32 %v284_v6, %v283_v2 }
  0xf9   :  { %v287_v11 = vadd.f32 %v286_v10, %v285_v7 }
  0xfb   :  { %v289_v14 = vadd.f32 %v288_v13, %v287_v11 }
  0xfd   :  { %v291_v26 = vadd.f32 %v290_v24, %v289_v14 }
  0xff   :  { %v293_v28 = vadd.f32 %v292_v27, %v291_v26 }
 0x101   :  { %v295_v31 = vadd.f32 %v294_v29, %v293_v28 }
 0x103   :  { %v296_v32 = vrot.slane %v295_v31, 4 }
 0x105   :  { %v297_v34 = vadd.f32 %v296_v32, %v295_v31 }
 0x107   :  { %v298_v35 = vrot.slane %v297_v34, 2 }
 0x109   :  { %v299_v37 = vadd.f32 %v298_v35, %v297_v34 }
 0x10b   :  { %v300_v39 = vrot.slane %v299_v37, 1 }
 0x10d   :  { %v301_v40 = vadd.f32 %v300_v39, %v299_v37 }
 0x10f   :  { %v302_v41 = vmul.f32 0.0078125, %v301_v40 }
 0x111   :  { %v303_v42 = vadd.f32 1e-05, %v302_v41 }
 0x113   :  { %546 = vrsqrt.f32 %v303_v42  ;;  %vm310_vm2 = vweird.f32 %v303_v42 }
 0x119   :  { %v547_v43 = vpop.eup %546 }
 0x11a   :  { %v305_v44 = vmul.f32 %v547_v43, %v303_v42  ;;  %vm311_vm1 = vweird.f32 %v547_v43 }
 0x11b   :  { %vm312_vm3 = vmor %vm310_vm2, %vm311_vm1 }
 0x11c   :  { %v306_v45 = vmul.f32 %v547_v43, %v305_v44 }
 0x11e   :  { %v307_v47 = vmul.f32 0.5, %v306_v45 }
 0x120   :  { %v308_v48 = vsub.f32 1.5, %v307_v47 }
 0x122   :  { %v309_v50 = vmul.f32 %v547_v43, %v308_v48 }
 0x124   :  { %v313_v52 = vsel %vm312_vm3, %v547_v43, %v309_v50 }
 0x125   :  { %v315_v53 = vmul.f32 %v314_v51, %v313_v52 }
 0x127   :  { %v317_v54 = vmul.f32 %v315_v53, %v685_v5  ;;  %v320_v57 = vperm.slane %v315_v53, 0 }
 0x129   :  { %v318_v56 = vsub.f32 %v316_v55, %v317_v54  ;;  %v322_v60 = vmul.f32 %v320_v57, %v621_v16  ;;  %v323_v61 = vmul.f32 %v320_v57, %v625_v18  ;;  %v324_v62 = vmul.f32 %v320_v57, %v631_v21 }
 0x12a   :  { %v325_v63 = vmul.f32 %v320_v57, %v645_v30  ;;  %v326_v0 = vmul.f32 %v320_v57, %v623_v17  ;;  %v327_v1 = vmul.f32 %v320_v57, %v629_v20  ;;  %v328_v5 = vmul.f32 %v320_v57, %v639_v25 }
 0x12b   :  { %v339_v59 = vperm.slane %v318_v56, 0  ;;  %v329_v2 = vmul.f32 %v320_v57, %v657_v38  ;;  %v330_v3 = vmul.f32 %v320_v57, %v627_v19  ;;  %v331_v4 = vmul.f32 %v320_v57, %v635_v23 }
 0x12c   :  { %v332_v16 = vmul.f32 %v320_v57, %v653_v36  ;;  %v333_v18 = vmul.f32 %v320_v57, %v669_v49  ;;  %v334_v21 = vmul.f32 %v320_v57, %v633_v22  ;;  %v335_v30 = vmul.f32 %v320_v57, %v649_v33 }
 0x12d   :  { %v341_v6 = vadd.f32 %v339_v59, %v322_v60  ;;  %v342_v17 = vadd.f32 %v339_v59, %v323_v61  ;;  %v336_v20 = vmul.f32 %v320_v57, %v665_v46  ;;  %v337_v25 = vmul.f32 %v320_v57, %v679_v58 }
 0x12e   :  { %v343_v7 = vadd.f32 %v339_v59, %v324_v62  ;;  %v344_v38 = vadd.f32 %v339_v59, %v325_v63  ;;  %v345_v8 = vadd.f32 %v339_v59, %v326_v0  ;;  %v346_v19 = vadd.f32 %v339_v59, %v327_v1 }
 0x12f   :  { %v347_v9 = vadd.f32 %v339_v59, %v328_v5  ;;  %v348_v23 = vadd.f32 %v339_v59, %v329_v2  ;;  %v349_v36 = vadd.f32 %v339_v59, %v330_v3  ;;  %v350_v10 = vadd.f32 %v339_v59, %v331_v4 }
 0x130   :  { %v351_v49 = vadd.f32 %v339_v59, %v332_v16  ;;  %v352_v11 = vadd.f32 %v339_v59, %v333_v18  ;;  %v758_v22 = vadd.f32 %v339_v59, %v334_v21  ;;  %v760_v33 = vadd.f32 %v339_v59, %v335_v30 }
 0x131   :  { %v373_v12 = vmul.f32 0.2, %v341_v6  ;;  %v374_v13 = vmul.f32 0.2, %v342_v17  ;;  %vm357_vm5 = vcmp.gt.f32.partialorder %v341_v6, 0.0  ;;  %vm358_vm6 = vcmp.gt.f32.partialorder %v342_v17, 0.0 }
 0x132   :  { %v375_v46 = vmul.f32 0.2, %v343_v7  ;;  %v376_v58 = vmul.f32 0.2, %v344_v38  ;;  %v355_v14 = vadd.f32 %v339_v59, %v336_v20  ;;  %vm359_vm7 = vcmp.gt.f32.partialorder %v343_v7, 0.0 }
 0x133   :  { %vm360_vm8 = vcmp.gt.f32.partialorder %v344_v38, 0.0  ;;  %v377_v15 = vmul.f32 0.2, %v345_v8  ;;  %v356_v24 = vadd.f32 %v339_v59, %v337_v25  ;;  %vm361_vm9 = vcmp.gt.f32.partialorder %v345_v8, 0.0 }
 0x134   :  { %vm362_vm10 = vcmp.gt.f32.partialorder %v346_v19, 0.0  ;;  %v378_v26 = vmul.f32 0.2, %v346_v19  ;;  %vm363_vm11 = vcmp.gt.f32.partialorder %v347_v9, 0.0  ;;  %v379_v27 = vmul.f32 0.2, %v347_v9 }
 0x135   :  { %v389_v28 = vsel %vm357_vm5, %v341_v6, %v373_v12  ;;  %v390_v29 = vsel %vm358_vm6, %v342_v17, %v374_v13  ;;  %vm364_vm12 = vcmp.gt.f32.partialorder %v348_v23, 0.0  ;;  %v380_v31 = vmul.f32 0.2, %v348_v23 }
 0x136   :  { %v391_v32 = vsel %vm359_vm7, %v343_v7, %v375_v46  ;;  %v392_v34 = vsel %vm360_vm8, %v344_v38, %v376_v58  ;;  %vm365_vm13 = vcmp.gt.f32.partialorder %v349_v36, 0.0  ;;  %vm366_vm14 = vcmp.gt.f32.partialorder %v350_v10, 0.0 }
 0x137   :  { %v381_v35 = vmul.f32 0.2, %v349_v36  ;;  %v393_v37 = vsel %vm361_vm9, %v345_v8, %v377_v15  ;;  %v382_v39 = vmul.f32 0.2, %v350_v10  ;;  %v394_v40 = vsel %vm362_vm10, %v346_v19, %v378_v26 }
 0x138   :  { %v405_v41 = vpack.c.bf16 %v389_v28, %v389_v28  ;;  %v406_v42 = vpack.c.bf16 %v390_v29, %v390_v29  ;;  %v383_v43 = vmul.f32 0.2, %v351_v49  ;;  %v395_v44 = vsel %vm363_vm11, %v347_v9, %v379_v27 }
 0x139   :  { %v407_v45 = vpack.c.bf16 %v391_v32, %v391_v32  ;;  %v408_v47 = vpack.c.bf16 %v392_v34, %v392_v34  ;;  %vm367_vm15 = vcmp.gt.f32.partialorder %v351_v49, 0.0  ;;  %v384_v48 = vmul.f32 0.2, %v352_v11 }
 0x13a   :  { %v396_v50 = vsel %vm364_vm12, %v348_v23, %v380_v31  ;;  %v409_v51 = vpack.c.bf16 %v393_v37, %v393_v37  ;;  %422 = vst.msk [vmem:[%s845_s4] sm:$0xf] %vm421_vm4, %v405_v41  ;;  %vm368_vm0 = vcmp.gt.f32.partialorder %v352_v11, 0.0  ;;  %v385_v52 = vmul.f32 0.2, %v758_v22 }
 0x13b   :  { %v397_v53 = vsel %vm365_vm13, %v349_v36, %v381_v35  ;;  %v410_v54 = vpack.c.bf16 %v394_v40, %v394_v40  ;;  %423 = vst.msk [vmem:[%s845_s4 + $0x4] sm:$0xf] %vm421_vm4, %v406_v42  ;;  %vm369_vm1 = vcmp.gt.f32.partialorder %v758_v22, 0.0  ;;  %v386_v55 = vmul.f32 0.2, %v760_v33 }
 0x13c   :  { %v398_v56 = vsel %vm366_vm14, %v350_v10, %v382_v39  ;;  %v411_v57 = vpack.c.bf16 %v395_v44, %v395_v44  ;;  %424 = vst.msk [vmem:[%s845_s4 + $0x8] sm:$0xf] %vm421_vm4, %v407_v45  ;;  %vm370_vm2 = vcmp.gt.f32.partialorder %v760_v33, 0.0  ;;  %v387_v59 = vmul.f32 0.2, %v355_v14 }
 0x13d   :  { %v399_v60 = vsel %vm367_vm15, %v351_v49, %v383_v43  ;;  %v412_v61 = vpack.c.bf16 %v396_v50, %v396_v50  ;;  %425 = vst.msk [vmem:[%s845_s4 + $0xc] sm:$0xf] %vm421_vm4, %v408_v47  ;;  %vm371_vm3 = vcmp.gt.f32.partialorder %v355_v14, 0.0  ;;  %v388_v62 = vmul.f32 0.2, %v356_v24 }
 0x13e   :  { %v400_v63 = vsel %vm368_vm0, %v352_v11, %v384_v48  ;;  %v413_v0 = vpack.c.bf16 %v397_v53, %v397_v53  ;;  %426 = vst.msk [vmem:[%s845_s4 + $0x10] sm:$0xf] %vm421_vm4, %v409_v51  ;;  %vm372_vm5 = vcmp.gt.f32.partialorder %v356_v24, 0.0  ;;  %v401_v1 = vsel %vm369_vm1, %v758_v22, %v385_v52 }
 0x13f   :  { %v414_v5 = vpack.c.bf16 %v398_v56, %v398_v56  ;;  %427 = vst.msk [vmem:[%s845_s4 + $0x14] sm:$0xf] %vm421_vm4, %v410_v54  ;;  %v402_v2 = vsel %vm370_vm2, %v760_v33, %v386_v55  ;;  %v415_v3 = vpack.c.bf16 %v399_v60, %v399_v60  ;;  %v403_v4 = vsel %vm371_vm3, %v355_v14, %v387_v59 }
 0x140   :  { %428 = vst.msk [vmem:[%s845_s4 + $0x18] sm:$0xf] %vm421_vm4, %v411_v57  ;;  %v416_v16 = vpack.c.bf16 %v400_v63, %v400_v63  ;;  %v404_v18 = vsel %vm372_vm5, %v356_v24, %v388_v62  ;;  %v417_v21 = vpack.c.bf16 %v401_v1, %v401_v1  ;;  %v418_v30 = vpack.c.bf16 %v402_v2, %v402_v2 }
 0x141   :  { %429 = vst.msk [vmem:[%s845_s4 + $0x1c] sm:$0xf] %vm421_vm4, %v412_v61  ;;  %v419_v6 = vpack.c.bf16 %v403_v4, %v403_v4  ;;  %v420_v17 = vpack.c.bf16 %v404_v18, %v404_v18 }
 0x142   :  { %430 = vst.msk [vmem:[%s845_s4 + $0x20] sm:$0xf] %vm421_vm4, %v413_v0 }
 0x143   :  { %431 = vst.msk [vmem:[%s845_s4 + $0x24] sm:$0xf] %vm421_vm4, %v414_v5 }
 0x144   :  { %432 = vst.msk [vmem:[%s845_s4 + $0x28] sm:$0xf] %vm421_vm4, %v415_v3 }
 0x145   :  { %433 = vst.msk [vmem:[%s845_s4 + $0x2c] sm:$0xf] %vm421_vm4, %v416_v16 }
 0x146   :  { %434 = vst.msk [vmem:[%s845_s4 + $0x30] sm:$0xf] %vm421_vm4, %v417_v21 }
 0x147   :  { %435 = vst.msk [vmem:[%s845_s4 + $0x34] sm:$0xf] %vm421_vm4, %v418_v30 }
 0x148   :  { %436 = vst.msk [vmem:[%s845_s4 + $0x38] sm:$0xf] %vm421_vm4, %v419_v6 }
 0x149   :  { %437 = vst.msk [vmem:[%s845_s4 + $0x3c] sm:$0xf] %vm421_vm4, %v420_v17 }

// kernel: dagan_generator.9
= control target key start
LH: loop header
LB: loop body
LE: loop exit
PB: predicated region body
PF: predicated region fallthrough
CT: control target
= control target key end

     0   :  { %vm207_vm0 = vcmask 261120   ;;  %vm290_vm8 = vcmask 257024   ;;  %s545_s1 = inlined_call_operand.vmem [shape: bf16[256,32], index: 1, kind: input, shape index: {}]   ;;  %s546_s0 = inlined_call_operand.vmem [shape: bf16[32,256], index: 0, kind: input, shape index: {}]   ;;  %s547_s2 = inlined_call_operand.vmem [shape: f32[1,32], index: 2, kind: input, shape index: {}]   ;;  %s548_s3 = inlined_call_operand.vmem [shape: f32[1,32], index: 3, kind: input, shape index: {}]   ;;  %s549_s4 = inlined_call_operand.vmem [shape: bf16[32,32], index: 4, kind: output, shape index: {}]  }
   0x1   :  { %v390_v0 = vld [vmem:[%s545_s1 + $0x38] sm:$0xff]  ;;  %v389_v2 = vld [vmem:[%s545_s1 + $0x30] sm:$0xff]  ;;  %v388_v4 = vld [vmem:[%s545_s1 + $0x28] sm:$0xff] }
   0x2   :  { %v398_v1 = vld [vmem:[%s545_s1 + $0x78] sm:$0xff]  ;;  %169 = vmatpush.bf16.msra.mxu0 %v390_v0  ;;  %399 = vmatpush.bf16.msra.mxu2 %v390_v0  ;;  %v397_v3 = vld [vmem:[%s545_s1 + $0x70] sm:$0xff]  ;;  %v396_v5 = vld [vmem:[%s545_s1 + $0x68] sm:$0xff] }
   0x3   :  { %188 = vmatpush.bf16.msra.mxu1 %v398_v1  ;;  %407 = vmatpush.bf16.msra.mxu3 %v398_v1  ;;  %v387_v6 = vld [vmem:[%s545_s1 + $0x20] sm:$0xff]  ;;  %v386_v8 = vld [vmem:[%s545_s1 + $0x18] sm:$0xff]  ;;  %v385_v10 = vld [vmem:[%s545_s1 + $0x10] sm:$0xff] }
   0x4   :  { %v395_v7 = vld [vmem:[%s545_s1 + $0x60] sm:$0xff]  ;;  %v394_v9 = vld [vmem:[%s545_s1 + $0x58] sm:$0xff]  ;;  %v393_v11 = vld [vmem:[%s545_s1 + $0x50] sm:$0xff] }
   0x5   :  { %v384_v12 = vld [vmem:[%s545_s1 + $0x8] sm:$0xff]  ;;  %v383_v14 = vld [vmem:[%s545_s1] sm:$0xff]  ;;  %v309_v18 = vld [vmem:[%s546_s0 + $0x10] sm:$0xf] }
   0x6   :  { %170 = vmatpush.bf16.msra.mxu0 %v389_v2  ;;  %400 = vmatpush.bf16.msra.mxu2 %v389_v2  ;;  %v392_v13 = vld [vmem:[%s545_s1 + $0x48] sm:$0xff]  ;;  %v391_v15 = vld [vmem:[%s545_s1 + $0x40] sm:$0xff]  ;;  %v382_v19 = vld [vmem:[%s546_s0 + $0x14] sm:$0xf0] }
   0x7   :  { %189 = vmatpush.bf16.msra.mxu1 %v397_v3  ;;  %408 = vmatpush.bf16.msra.mxu3 %v397_v3  ;;  %v301_v16 = vld [vmem:[%s546_s0] sm:$0xf]  ;;  %v380_v17 = vld [vmem:[%s546_s0 + $0x4] sm:$0xf0]  ;;  %v379_v20 = vld [vmem:[%s546_s0 + $0x4] sm:$0xf]  ;;  %v310_v25 = vor.u32 %v382_v19, %v309_v18 }
   0x8   :  { %v303_v21 = vld [vmem:[%s546_s0 + $0x8] sm:$0xf0]  ;;  %v381_v22 = vld [vmem:[%s546_s0 + $0x14] sm:$0xf]  ;;  %v311_v23 = vld [vmem:[%s546_s0 + $0x18] sm:$0xf0]  ;;  %v302_v24 = vor.u32 %v380_v17, %v301_v16 }
   0x9   :  { %v306_v26 = vor.u32 %v379_v20, %v303_v21  ;;  %v314_v27 = vor.u32 %v381_v22, %v311_v23  ;;  %v255_v19 = vld [vmem:[%s547_s2] sm:$0x1] }
   0xa   :  { %171 = vmatpush.bf16.msra.mxu0 %v388_v4  ;;  %401 = vmatpush.bf16.msra.mxu2 %v388_v4  ;;  %v257_v22 = vld [vmem:[%s548_s3] sm:$0x1] }
   0xb   :  { %190 = vmatpush.bf16.msra.mxu1 %v396_v5  ;;  %409 = vmatpush.bf16.msra.mxu3 %v396_v5 }
   0xe   :  { %172 = vmatpush.bf16.msra.mxu0 %v387_v6  ;;  %402 = vmatpush.bf16.msra.mxu2 %v387_v6 }
   0xf   :  { %191 = vmatpush.bf16.msra.mxu1 %v395_v7  ;;  %410 = vmatpush.bf16.msra.mxu3 %v395_v7 }
  0x12   :  { %173 = vmatpush.bf16.msra.mxu0 %v386_v8  ;;  %403 = vmatpush.bf16.msra.mxu2 %v386_v8 }
  0x13   :  { %192 = vmatpush.bf16.msra.mxu1 %v394_v9  ;;  %411 = vmatpush.bf16.msra.mxu3 %v394_v9 }
  0x16   :  { %174 = vmatpush.bf16.msra.mxu0 %v385_v10  ;;  %404 = vmatpush.bf16.msra.mxu2 %v385_v10 }
  0x17   :  { %193 = vmatpush.bf16.msra.mxu1 %v393_v11  ;;  %412 = vmatpush.bf16.msra.mxu3 %v393_v11 }
  0x1a   :  { %175 = vmatpush.bf16.msra.mxu0 %v384_v12  ;;  %405 = vmatpush.bf16.msra.mxu2 %v384_v12 }
  0x1b   :  { %194 = vmatpush.bf16.msra.mxu1 %v392_v13  ;;  %413 = vmatpush.bf16.msra.mxu3 %v392_v13 }
  0x1e   :  { %176 = vmatpush.bf16.msra.mxu0 %v383_v14  ;;  %406 = vmatpush.bf16.msra.mxu2 %v383_v14 }
  0x1f   :  { %195 = vmatpush.bf16.msra.mxu1 %v391_v15  ;;  %414 = vmatpush.bf16.msra.mxu3 %v391_v15 }
  0x21   :  { %177 = vmatmul.bf16.vlgmr.msra.gmra.mxu0 %v302_v24  ;;  %182 = vmatmul.bf16.vlgmr.msra.gmra.mxu2 %v310_v25 }
  0x22   :  { %196 = vmatmul.bf16.vlgmr.msra.gmra.mxu1 %v306_v26  ;;  %201 = vmatmul.bf16.vlgmr.msra.gmra.mxu3 %v314_v27 }
  0x9e   :  { %v178_v28 = vpop.f32.mrf.mxu0 }
  0x9f   :  { %v197_v29 = vpop.f32.mrf.mxu1 }
  0xa0   :  { %v514_v32 = vadd.f32 %v197_v29, %v178_v28 }
  0xa2   :  { %v208_v36 = vsel %vm207_vm0, %v514_v32, 0.0 }
  0xa4   :  { %v183_v30 = vpop.f32.mrf.mxu2 }
  0xa5   :  { %v202_v31 = vpop.f32.mrf.mxu3 }
  0xa6   :  { %v180_v33 = vpop.f32.mrf.mxu0  ;;  %v203_v37 = vadd.f32 %v202_v31, %v183_v30 }
  0xa7   :  { %v199_v34 = vpop.f32.mrf.mxu1 }
  0xa8   :  { %v200_v35 = vadd.f32 %v199_v34, %v180_v33  ;;  %v211_v42 = vsel %vm207_vm0, %v203_v37, 0.0 }
  0xaa   :  { %v209_v38 = vsel %vm207_vm0, %v200_v35, 0.0 }
  0xab   :  { %v210_v39 = vadd.f32 %v209_v38, %v208_v36 }
  0xac   :  { %v185_v40 = vpop.f32.mrf.mxu2 }
  0xad   :  { %v204_v41 = vpop.f32.mrf.mxu3  ;;  %v212_v44 = vadd.f32 %v211_v42, %v210_v39 }
  0xae   :  { %v205_v43 = vadd.f32 %v204_v41, %v185_v40 }
  0xb0   :  { %v213_v45 = vsel %vm207_vm0, %v205_v43, 0.0 }
  0xb1   :  { %v214_v46 = vadd.f32 %v213_v45, %v212_v44 }
  0xb3   :  { %v215_v47 = vrot.slane %v214_v46, 4 }
  0xb5   :  { %v216_v48 = vadd.f32 %v215_v47, %v214_v46 }
  0xb7   :  { %v217_v49 = vrot.slane %v216_v48, 2 }
  0xb9   :  { %v218_v50 = vadd.f32 %v217_v49, %v216_v48 }
  0xbb   :  { %v219_v51 = vrot.slane %v218_v50, 1 }
  0xbd   :  { %v220_v52 = vadd.f32 %v219_v51, %v218_v50 }
  0xbf   :  { %v221_v53 = vmul.f32 0.03125, %v220_v52 }
  0xc1   :  { %v222_v54 = vsub.f32 %v514_v32, %v221_v53  ;;  %v223_v55 = vsub.f32 %v200_v35, %v221_v53  ;;  %v224_v56 = vsub.f32 %v203_v37, %v221_v53  ;;  %v225_v57 = vsub.f32 %v205_v43, %v221_v53 }
  0xc3   :  { %v226_v58 = vmul.f32 %v222_v54, %v222_v54  ;;  %v227_v59 = vmul.f32 %v223_v55, %v223_v55  ;;  %v228_v60 = vmul.f32 %v224_v56, %v224_v56  ;;  %v229_v61 = vmul.f32 %v225_v57, %v225_v57 }
  0xc5   :  { %v230_v62 = vsel %vm207_vm0, %v226_v58, 0.0  ;;  %v231_v63 = vsel %vm207_vm0, %v227_v59, 0.0  ;;  %v233_v1 = vsel %vm207_vm0, %v228_v60, 0.0  ;;  %v235_v3 = vsel %vm207_vm0, %v229_v61, 0.0 }
  0xc6   :  { %v232_v0 = vadd.f32 %v231_v63, %v230_v62 }
  0xc8   :  { %v234_v2 = vadd.f32 %v233_v1, %v232_v0 }
  0xca   :  { %v236_v4 = vadd.f32 %v235_v3, %v234_v2 }
  0xcc   :  { %v237_v5 = vrot.slane %v236_v4, 4 }
  0xce   :  { %v238_v6 = vadd.f32 %v237_v5, %v236_v4 }
  0xd0   :  { %v239_v7 = vrot.slane %v238_v6, 2 }
  0xd2   :  { %v240_v8 = vadd.f32 %v239_v7, %v238_v6 }
  0xd4   :  { %v241_v9 = vrot.slane %v240_v8, 1 }
  0xd6   :  { %v242_v10 = vadd.f32 %v241_v9, %v240_v8 }
  0xd8   :  { %v243_v11 = vmul.f32 0.03125, %v242_v10 }
  0xda   :  { %v244_v12 = vadd.f32 1e-05, %v243_v11 }
  0xdc   :  { %415 = vrsqrt.f32 %v244_v12  ;;  %vm251_vm2 = vweird.f32 %v244_v12 }
  0xe2   :  { %v416_v13 = vpop.eup %415 }
  0xe3   :  { %v246_v14 = vmul.f32 %v416_v13, %v244_v12  ;;  %vm252_vm1 = vweird.f32 %v416_v13 }
  0xe4   :  { %vm253_vm3 = vmor %vm251_vm2, %vm252_vm1 }
  0xe5   :  { %v247_v15 = vmul.f32 %v416_v13, %v246_v14 }
  0xe7   :  { %v248_v16 = vmul.f32 0.5, %v247_v15 }
  0xe9   :  { %v249_v17 = vsub.f32 1.5, %v248_v16 }
  0xeb   :  { %v250_v18 = vmul.f32 %v416_v13, %v249_v17 }
  0xed   :  { %v254_v20 = vsel %vm253_vm3, %v416_v13, %v250_v18 }
  0xee   :  { %v256_v21 = vmul.f32 %v255_v19, %v254_v20 }
  0xf0   :  { %v258_v23 = vmul.f32 %v256_v21, %v221_v53  ;;  %v261_v24 = vperm.slane %v256_v21, 0 }
  0xf2   :  { %v259_v25 = vsub.f32 %v257_v22, %v258_v23  ;;  %v263_v26 = vmul.f32 %v261_v24, %v514_v32  ;;  %v264_v27 = vmul.f32 %v261_v24, %v200_v35  ;;  %v265_v28 = vmul.f32 %v261_v24, %v203_v37 }
  0xf3   :  { %v266_v29 = vmul.f32 %v261_v24, %v205_v43 }
  0xf4   :  { %v268_v30 = vperm.slane %v259_v25, 0 }
  0xf6   :  { %v270_v31 = vadd.f32 %v268_v30, %v263_v26  ;;  %v271_v33 = vadd.f32 %v268_v30, %v264_v27  ;;  %v272_v34 = vadd.f32 %v268_v30, %v265_v28  ;;  %v273_v36 = vadd.f32 %v268_v30, %v266_v29 }
  0xf8   :  { %vm274_vm4 = vcmp.gt.f32.partialorder %v270_v31, 0.0  ;;  %vm275_vm5 = vcmp.gt.f32.partialorder %v271_v33, 0.0  ;;  %vm276_vm6 = vcmp.gt.f32.partialorder %v272_v34, 0.0  ;;  %vm277_vm7 = vcmp.gt.f32.partialorder %v273_v36, 0.0 }
  0xf9   :  { %v278_v38 = vmul.f32 0.2, %v270_v31  ;;  %v279_v39 = vmul.f32 0.2, %v271_v33  ;;  %v280_v40 = vmul.f32 0.2, %v272_v34 }
  0xfa   :  { %v281_v41 = vmul.f32 0.2, %v273_v36 }
  0xfb   :  { %v282_v42 = vsel %vm274_vm4, %v270_v31, %v278_v38  ;;  %v283_v44 = vsel %vm275_vm5, %v271_v33, %v279_v39  ;;  %v284_v45 = vsel %vm276_vm6, %v272_v34, %v280_v40 }
  0xfc   :  { %v285_v32 = vsel %vm277_vm7, %v273_v36, %v281_v41  ;;  %v286_v35 = vpack.c.bf16 %v282_v42, %v282_v42  ;;  %v287_v37 = vpack.c.bf16 %v283_v44, %v283_v44  ;;  %v288_v43 = vpack.c.bf16 %v284_v45, %v284_v45 }
  0xfd   :  { %v289_v46 = vpack.c.bf16 %v285_v32, %v285_v32 }
  0xfe   :  { %291 = vst.msk [vmem:[%s549_s4] sm:$0xf] %vm290_vm8, %v286_v35 }
  0xff   :  { %292 = vst.msk [vmem:[%s549_s4 + $0x4] sm:$0xf] %vm290_vm8, %v287_v37 }
 0x100   :  { %293 = vst.msk [vmem:[%s549_s4 + $0x8] sm:$0xf] %vm290_vm8, %v288_v43 }
 0x101   :  { %294 = vst.msk [vmem:[%s549_s4 + $0xc] sm:$0xf] %vm290_vm8, %v289_v46 }

// kernel: dagan_generator.10
= control target key start
LH: loop header
LB: loop body
LE: loop exit
PB: predicated region body
PF: predicated region fallthrough
CT: control target
= control target key end

     0   :  { %vm640_vm0 = vcmask 517120   ;;  %vm649_vm1 = vcmask 523264   ;;  %vm1076_vm5 = vcmask 130048   ;;  %vm2110_vm15 = vcmask 254976   ;;  %s5509_s2 = inlined_call_operand.vmem [shape: bf16[512,256], index: 2, kind: input, shape index: {}]   ;;  %s5510_s0 = inlined_call_operand.vmem [shape: bf16[2,512], index: 0, kind: input, shape index: {}]   ;;  %s5511_s10 = inlined_call_operand.vmem [shape: f32[256,64], index: 10, kind: input, shape index: {}]   ;;  %s5512_s11 = inlined_call_operand.vmem [shape: f32[64,256], index: 11, kind: input, shape index: {}]   ;;  %s5513_s3 = inlined_call_operand.vmem [shape: bf16[256,64], index: 3, kind: input, shape index: {}]   ;;  %s5514_s14 = inlined_call_operand.vmem [shape: f32[8,64], index: 14, kind: input, shape index: {}]   ;;  %s5515_s4 = inlined_call_operand.vmem [shape: bf16[16,64], index: 4, kind: input, shape index: {}]   ;;  %s5516_s5 = inlined_call_operand.vmem [shape: bf16[16,64], index: 5, kind: input, shape index: {}]   ;;  %s5517_s1 = inlined_call_operand.vmem [shape: bf16[2,16], index: 1, kind: input, shape index: {}]   ;;  %s5518_s6 = inlined_call_operand.vmem [shape: f32[1,64], index: 6, kind: input, shape index: {}]   ;;  %s5519_s7 = inlined_call_operand.vmem [shape: f32[1,64], index: 7, kind: input, shape index: {}]   ;;  %s5520_s8 = inlined_call_operand.vmem [shape: bf16[64,256], index: 8, kind: input, shape index: {}]   ;;  %s5521_s9 = inlined_call_operand.vmem [shape: bf16[256,512], index: 9, kind: input, shape index: {}]   ;;  %s5522_s12 = inlined_call_operand.vmem [shape: f32[512,32], index: 12, kind: input, shape index: {}]   ;;  %s5523_s13 = inlined_call_operand.vmem [shape: f32[32,512], index: 13, kind: input, shape index: {}]   ;;  %s5524_s15 = inlined_call_operand.vmem [shape: bf16[2,512], index: 15, kind: output, shape index: {}]  }
   0x1   :  { %v2599_v0 = vld [vmem:[%s5509_s2 + $0x70] sm:$0xf]  ;;  %v3200_v1 = vld [vmem:[%s5509_s2 + $0x74] sm:$0xf0]  ;;  %v2591_v11 = vld [vmem:[%s5509_s2 + $0x60] sm:$0xf] }
   0x2   :  { %v2663_v2 = vld [vmem:[%s5509_s2 + $0xf0] sm:$0xf]  ;;  %v2600_v3 = vor.u32 %v3200_v1, %v2599_v0  ;;  %v3216_v4 = vld [vmem:[%s5509_s2 + $0xf4] sm:$0xf0]  ;;  %v3198_v13 = vld [vmem:[%s5509_s2 + $0x64] sm:$0xf0] }
   0x3   :  { %v2727_v5 = vld [vmem:[%s5509_s2 + $0x170] sm:$0xf]  ;;  %v3232_v6 = vld [vmem:[%s5509_s2 + $0x174] sm:$0xf0]  ;;  %v2664_v7 = vor.u32 %v3216_v4, %v2663_v2  ;;  %v2655_v14 = vld [vmem:[%s5509_s2 + $0xe0] sm:$0xf]  ;;  %v2592_v16 = vor.u32 %v3198_v13, %v2591_v11 }
   0x4   :  { %v2728_v8 = vor.u32 %v3232_v6, %v2727_v5  ;;  %v2791_v9 = vld [vmem:[%s5509_s2 + $0x1f0] sm:$0xf]  ;;  %v3248_v10 = vld [vmem:[%s5509_s2 + $0x1f4] sm:$0xf0]  ;;  %446 = vmatpush.bf16.msra.mxu0 %v2600_v3  ;;  %v3214_v15 = vld [vmem:[%s5509_s2 + $0xe4] sm:$0xf0] }
   0x5   :  { %v2792_v12 = vor.u32 %v3248_v10, %v2791_v9  ;;  %459 = vmatpush.bf16.msra.mxu1 %v2664_v7  ;;  %v2656_v17 = vor.u32 %v3214_v15, %v2655_v14  ;;  %v2719_v18 = vld [vmem:[%s5509_s2 + $0x160] sm:$0xf]  ;;  %v3230_v19 = vld [vmem:[%s5509_s2 + $0x164] sm:$0xf0]  ;;  %v2583_v23 = vld [vmem:[%s5509_s2 + $0x50] sm:$0xf] }
   0x6   :  { %472 = vmatpush.bf16.msra.mxu2 %v2728_v8  ;;  %v2783_v20 = vld [vmem:[%s5509_s2 + $0x1e0] sm:$0xf]  ;;  %v2720_v21 = vor.u32 %v3230_v19, %v2719_v18  ;;  %v3246_v22 = vld [vmem:[%s5509_s2 + $0x1e4] sm:$0xf0]  ;;  %v3196_v24 = vld [vmem:[%s5509_s2 + $0x54] sm:$0xf0] }
   0x7   :  { %485 = vmatpush.bf16.msra.mxu3 %v2792_v12  ;;  %v2784_v25 = vor.u32 %v3246_v22, %v2783_v20  ;;  %v2647_v26 = vld [vmem:[%s5509_s2 + $0xd0] sm:$0xf]  ;;  %v3212_v27 = vld [vmem:[%s5509_s2 + $0xd4] sm:$0xf0]  ;;  %v2584_v29 = vor.u32 %v3196_v24, %v2583_v23  ;;  %v2575_v35 = vld [vmem:[%s5509_s2 + $0x40] sm:$0xf] }
   0x8   :  { %v2711_v28 = vld [vmem:[%s5509_s2 + $0x150] sm:$0xf]  ;;  %447 = vmatpush.bf16.msra.mxu0 %v2592_v16  ;;  %v3228_v30 = vld [vmem:[%s5509_s2 + $0x154] sm:$0xf0]  ;;  %v2648_v33 = vor.u32 %v3212_v27, %v2647_v26  ;;  %v3194_v36 = vld [vmem:[%s5509_s2 + $0x44] sm:$0xf0] }
   0x9   :  { %v2775_v31 = vld [vmem:[%s5509_s2 + $0x1d0] sm:$0xf]  ;;  %v3244_v32 = vld [vmem:[%s5509_s2 + $0x1d4] sm:$0xf0]  ;;  %460 = vmatpush.bf16.msra.mxu1 %v2656_v17  ;;  %v2712_v34 = vor.u32 %v3228_v30, %v2711_v28  ;;  %v2639_v37 = vld [vmem:[%s5509_s2 + $0xc0] sm:$0xf]  ;;  %v2576_v44 = vor.u32 %v3194_v36, %v2575_v35 }
   0xa   :  { %473 = vmatpush.bf16.msra.mxu2 %v2720_v21  ;;  %v2776_v38 = vor.u32 %v3244_v32, %v2775_v31  ;;  %v3210_v39 = vld [vmem:[%s5509_s2 + $0xc4] sm:$0xf0]  ;;  %v2703_v40 = vld [vmem:[%s5509_s2 + $0x140] sm:$0xf]  ;;  %v2567_v47 = vld [vmem:[%s5509_s2 + $0x30] sm:$0xf] }
   0xb   :  { %486 = vmatpush.bf16.msra.mxu3 %v2784_v25  ;;  %v3226_v41 = vld [vmem:[%s5509_s2 + $0x144] sm:$0xf0]  ;;  %v2767_v42 = vld [vmem:[%s5509_s2 + $0x1c0] sm:$0xf]  ;;  %v2640_v45 = vor.u32 %v3210_v39, %v2639_v37  ;;  %v3192_v48 = vld [vmem:[%s5509_s2 + $0x34] sm:$0xf0] }
   0xc   :  { %v3242_v43 = vld [vmem:[%s5509_s2 + $0x1c4] sm:$0xf0]  ;;  %448 = vmatpush.bf16.msra.mxu0 %v2584_v29  ;;  %v2704_v46 = vor.u32 %v3226_v41, %v2703_v40  ;;  %v2631_v49 = vld [vmem:[%s5509_s2 + $0xb0] sm:$0xf]  ;;  %v3208_v51 = vld [vmem:[%s5509_s2 + $0xb4] sm:$0xf0]  ;;  %v2568_v56 = vor.u32 %v3192_v48, %v2567_v47 }
   0xd   :  { %461 = vmatpush.bf16.msra.mxu1 %v2648_v33  ;;  %v2768_v50 = vor.u32 %v3242_v43, %v2767_v42  ;;  %v2695_v52 = vld [vmem:[%s5509_s2 + $0x130] sm:$0xf]  ;;  %v3224_v53 = vld [vmem:[%s5509_s2 + $0x134] sm:$0xf0]  ;;  %v2632_v57 = vor.u32 %v3208_v51, %v2631_v49  ;;  %v2559_v59 = vld [vmem:[%s5509_s2 + $0x20] sm:$0xf] }
   0xe   :  { %474 = vmatpush.bf16.msra.mxu2 %v2712_v34  ;;  %v2759_v54 = vld [vmem:[%s5509_s2 + $0x1b0] sm:$0xf]  ;;  %v3240_v55 = vld [vmem:[%s5509_s2 + $0x1b4] sm:$0xf0]  ;;  %v2696_v58 = vor.u32 %v3224_v53, %v2695_v52  ;;  %v3190_v60 = vld [vmem:[%s5509_s2 + $0x24] sm:$0xf0] }
   0xf   :  { %487 = vmatpush.bf16.msra.mxu3 %v2776_v38  ;;  %v2623_v61 = vld [vmem:[%s5509_s2 + $0xa0] sm:$0xf]  ;;  %v2760_v62 = vor.u32 %v3240_v55, %v2759_v54  ;;  %v3206_v63 = vld [vmem:[%s5509_s2 + $0xa4] sm:$0xf0]  ;;  %v2560_v4 = vor.u32 %v3190_v60, %v2559_v59  ;;  %v2551_v7 = vld [vmem:[%s5509_s2 + $0x10] sm:$0xf] }
  0x10   :  { %449 = vmatpush.bf16.msra.mxu0 %v2576_v44  ;;  %v2687_v0 = vld [vmem:[%s5509_s2 + $0x120] sm:$0xf]  ;;  %v3222_v1 = vld [vmem:[%s5509_s2 + $0x124] sm:$0xf0]  ;;  %v2624_v5 = vor.u32 %v3206_v63, %v2623_v61  ;;  %v3188_v8 = vld [vmem:[%s5509_s2 + $0x14] sm:$0xf0] }
  0x11   :  { %462 = vmatpush.bf16.msra.mxu1 %v2640_v45  ;;  %v2751_v2 = vld [vmem:[%s5509_s2 + $0x1a0] sm:$0xf]  ;;  %v3238_v3 = vld [vmem:[%s5509_s2 + $0x1a4] sm:$0xf0]  ;;  %v2688_v6 = vor.u32 %v3222_v1, %v2687_v0  ;;  %v2615_v9 = vld [vmem:[%s5509_s2 + $0x90] sm:$0xf]  ;;  %v2552_v17 = vor.u32 %v3188_v8, %v2551_v7 }
  0x12   :  { %475 = vmatpush.bf16.msra.mxu2 %v2704_v46  ;;  %v2752_v10 = vor.u32 %v3238_v3, %v2751_v2  ;;  %v3204_v11 = vld [vmem:[%s5509_s2 + $0x94] sm:$0xf0]  ;;  %v2679_v12 = vld [vmem:[%s5509_s2 + $0x110] sm:$0xf]  ;;  %v2543_v16 = vld [vmem:[%s5509_s2] sm:$0xf] }
  0x13   :  { %488 = vmatpush.bf16.msra.mxu3 %v2768_v50  ;;  %v3220_v13 = vld [vmem:[%s5509_s2 + $0x114] sm:$0xf0]  ;;  %v2743_v14 = vld [vmem:[%s5509_s2 + $0x190] sm:$0xf]  ;;  %v3186_v18 = vld [vmem:[%s5509_s2 + $0x4] sm:$0xf0]  ;;  %v2616_v21 = vor.u32 %v3204_v11, %v2615_v9 }
  0x14   :  { %450 = vmatpush.bf16.msra.mxu0 %v2568_v56  ;;  %v3236_v15 = vld [vmem:[%s5509_s2 + $0x194] sm:$0xf0]  ;;  %v2607_v19 = vld [vmem:[%s5509_s2 + $0x80] sm:$0xf]  ;;  %v3202_v20 = vld [vmem:[%s5509_s2 + $0x84] sm:$0xf0]  ;;  %v2680_v22 = vor.u32 %v3220_v13, %v2679_v12  ;;  %v2544_v33 = vor.u32 %v3186_v18, %v2543_v16 }
  0x15   :  { %463 = vmatpush.bf16.msra.mxu1 %v2632_v57  ;;  %v2671_v23 = vld [vmem:[%s5509_s2 + $0x100] sm:$0xf]  ;;  %v3218_v24 = vld [vmem:[%s5509_s2 + $0x104] sm:$0xf0]  ;;  %v2744_v26 = vor.u32 %v3236_v15, %v2743_v14  ;;  %v3199_v28 = vld [vmem:[%s5509_s2 + $0x74] sm:$0xf]  ;;  %v2608_v36 = vor.u32 %v3202_v20, %v2607_v19 }
  0x16   :  { %476 = vmatpush.bf16.msra.mxu2 %v2696_v58  ;;  %v2735_v25 = vld [vmem:[%s5509_s2 + $0x180] sm:$0xf]  ;;  %v3234_v27 = vld [vmem:[%s5509_s2 + $0x184] sm:$0xf0]  ;;  %v2601_v29 = vld [vmem:[%s5509_s2 + $0x78] sm:$0xf0]  ;;  %v2672_v37 = vor.u32 %v3218_v24, %v2671_v23 }
  0x17   :  { %489 = vmatpush.bf16.msra.mxu3 %v2760_v62  ;;  %v3215_v30 = vld [vmem:[%s5509_s2 + $0xf4] sm:$0xf]  ;;  %v2665_v31 = vld [vmem:[%s5509_s2 + $0xf8] sm:$0xf0]  ;;  %v51_v32 = vld [vmem:[%s5510_s0] sm:$0xf]  ;;  %v2736_v40 = vor.u32 %v3234_v27, %v2735_v25  ;;  %v2604_v41 = vor.u32 %v3199_v28, %v2601_v29 }
  0x18   :  { %451 = vmatpush.bf16.msra.mxu0 %v2560_v4  ;;  %v3231_v34 = vld [vmem:[%s5509_s2 + $0x174] sm:$0xf]  ;;  %v2729_v35 = vld [vmem:[%s5509_s2 + $0x178] sm:$0xf0]  ;;  %117 = vst [vmem:[#allocation1] ss:$9 sm:$0xff] %v51_v32  ;;  %v2668_v42 = vor.u32 %v3215_v30, %v2665_v31  ;;  %v2503_v54 = vunpack.c.l.bf16 %v51_v32 }
  0x19   :  { %464 = vmatpush.bf16.msra.mxu1 %v2624_v5  ;;  %v3247_v38 = vld [vmem:[%s5509_s2 + $0x1f4] sm:$0xf]  ;;  %v2793_v39 = vld [vmem:[%s5509_s2 + $0x1f8] sm:$0xf0]  ;;  %v2732_v43 = vor.u32 %v3231_v34, %v2729_v35  ;;  %v3197_v44 = vld [vmem:[%s5509_s2 + $0x64] sm:$0xf] }
  0x1a   :  { %477 = vmatpush.bf16.msra.mxu2 %v2688_v6  ;;  %v2593_v45 = vld [vmem:[%s5509_s2 + $0x68] sm:$0xf0]  ;;  %v3213_v46 = vld [vmem:[%s5509_s2 + $0xe4] sm:$0xf]  ;;  %v2796_v47 = vor.u32 %v3247_v38, %v2793_v39  ;;  %v3195_v53 = vld [vmem:[%s5509_s2 + $0x54] sm:$0xf] }
  0x1b   :  { %490 = vmatpush.bf16.msra.mxu3 %v2752_v10  ;;  %v2657_v48 = vld [vmem:[%s5509_s2 + $0xe8] sm:$0xf0]  ;;  %v3229_v49 = vld [vmem:[%s5509_s2 + $0x164] sm:$0xf]  ;;  %v2596_v55 = vor.u32 %v3197_v44, %v2593_v45  ;;  %v2585_v56 = vld [vmem:[%s5509_s2 + $0x58] sm:$0xf0] }
  0x1c   :  { %452 = vmatpush.bf16.msra.mxu0 %v2552_v17  ;;  %v2721_v50 = vld [vmem:[%s5509_s2 + $0x168] sm:$0xf0]  ;;  %v3245_v51 = vld [vmem:[%s5509_s2 + $0x1e4] sm:$0xf]  ;;  %v3211_v57 = vld [vmem:[%s5509_s2 + $0xd4] sm:$0xf]  ;;  %v2660_v59 = vor.u32 %v3213_v46, %v2657_v48  ;;  %v2588_v6 = vor.u32 %v3195_v53, %v2585_v56 }
  0x1d   :  { %465 = vmatpush.bf16.msra.mxu1 %v2616_v21  ;;  %v2785_v52 = vld [vmem:[%s5509_s2 + $0x1e8] sm:$0xf0]  ;;  %v2649_v58 = vld [vmem:[%s5509_s2 + $0xd8] sm:$0xf0]  ;;  %v2724_v60 = vor.u32 %v3229_v49, %v2721_v50  ;;  %v3227_v1 = vld [vmem:[%s5509_s2 + $0x154] sm:$0xf] }
  0x1e   :  { %478 = vmatpush.bf16.msra.mxu2 %v2680_v22  ;;  %v2788_v0 = vor.u32 %v3245_v51, %v2785_v52  ;;  %v2713_v2 = vld [vmem:[%s5509_s2 + $0x158] sm:$0xf0]  ;;  %v3243_v4 = vld [vmem:[%s5509_s2 + $0x1d4] sm:$0xf]  ;;  %v2652_v7 = vor.u32 %v3211_v57, %v2649_v58  ;;  %v3193_v9 = vld [vmem:[%s5509_s2 + $0x44] sm:$0xf] }
  0x1f   :  { %491 = vmatpush.bf16.msra.mxu3 %v2744_v26  ;;  %v3688_v61 = vld [vmem:[#allocation1 + $0x12] sm:$0xff]  ;;  %v3690_v62 = vld [vmem:[#allocation1 + $0x1b] sm:$0xff]  ;;  %v3701_v3 = vld [vmem:[#allocation1 + $0x9] sm:$0xff]  ;;  %v2716_v8 = vor.u32 %v3227_v1, %v2713_v2 }
  0x20   :  { %453 = vmatpush.bf16.msra.mxu0 %v2544_v33  ;;  %v3692_v63 = vld [vmem:[#allocation1] sm:$0xff]  ;;  %v2777_v5 = vld [vmem:[%s5509_s2 + $0x1d8] sm:$0xf0]  ;;  %v2577_v10 = vld [vmem:[%s5509_s2 + $0x48] sm:$0xf0] }
  0x21   :  { %466 = vmatpush.bf16.msra.mxu1 %v2608_v36  ;;  %2505 = vst [vmem:[#allocation1] ss:$4 sm:$0xff] %v2503_v54  ;;  %v3209_v11 = vld [vmem:[%s5509_s2 + $0xc4] sm:$0xf]  ;;  %v2780_v12 = vor.u32 %v3243_v4, %v2777_v5  ;;  %v2641_v13 = vld [vmem:[%s5509_s2 + $0xc8] sm:$0xf0]  ;;  %v2580_v18 = vor.u32 %v3193_v9, %v2577_v10 }
  0x22   :  { %479 = vmatpush.bf16.msra.mxu2 %v2672_v37  ;;  %v3225_v14 = vld [vmem:[%s5509_s2 + $0x144] sm:$0xf]  ;;  %v2705_v15 = vld [vmem:[%s5509_s2 + $0x148] sm:$0xf0]  ;;  %v2644_v19 = vor.u32 %v3209_v11, %v2641_v13  ;;  %v3191_v21 = vld [vmem:[%s5509_s2 + $0x34] sm:$0xf] }
  0x23   :  { %492 = vmatpush.bf16.msra.mxu3 %v2736_v40  ;;  %454 = vmatmul.bf16.vlgmr.msra.gmra.mxu0 %v3692_v63  ;;  %v3241_v16 = vld [vmem:[%s5509_s2 + $0x1c4] sm:$0xf]  ;;  %v2769_v17 = vld [vmem:[%s5509_s2 + $0x1c8] sm:$0xf0]  ;;  %v2708_v20 = vor.u32 %v3225_v14, %v2705_v15  ;;  %v2569_v22 = vld [vmem:[%s5509_s2 + $0x38] sm:$0xf0] }
  0x24   :  { %498 = vmatpush.bf16.msrb.mxu0 %v2604_v41  ;;  %467 = vmatmul.bf16.vlgmr.msra.gmra.mxu1 %v3701_v3  ;;  %v3207_v23 = vld [vmem:[%s5509_s2 + $0xb4] sm:$0xf]  ;;  %v2772_v24 = vor.u32 %v3241_v16, %v2769_v17  ;;  %v2633_v25 = vld [vmem:[%s5509_s2 + $0xb8] sm:$0xf0]  ;;  %v2572_v30 = vor.u32 %v3191_v21, %v2569_v22  ;;  %v3189_v33 = vld [vmem:[%s5509_s2 + $0x24] sm:$0xf] }
  0x25   :  { %511 = vmatpush.bf16.msrb.mxu1 %v2668_v42  ;;  %480 = vmatmul.bf16.vlgmr.msra.gmra.mxu2 %v3688_v61  ;;  %v3223_v26 = vld [vmem:[%s5509_s2 + $0x134] sm:$0xf]  ;;  %v2697_v27 = vld [vmem:[%s5509_s2 + $0x138] sm:$0xf0]  ;;  %v2636_v31 = vor.u32 %v3207_v23, %v2633_v25  ;;  %v2561_v34 = vld [vmem:[%s5509_s2 + $0x28] sm:$0xf0] }
  0x26   :  { %524 = vmatpush.bf16.msrb.mxu2 %v2732_v43  ;;  %493 = vmatmul.bf16.vlgmr.msra.gmra.mxu3 %v3690_v62  ;;  %v3239_v28 = vld [vmem:[%s5509_s2 + $0x1b4] sm:$0xf]  ;;  %v2761_v29 = vld [vmem:[%s5509_s2 + $0x1b8] sm:$0xf0]  ;;  %v2700_v32 = vor.u32 %v3223_v26, %v2697_v27  ;;  %v3205_v35 = vld [vmem:[%s5509_s2 + $0xa4] sm:$0xf]  ;;  %v2564_v42 = vor.u32 %v3189_v33, %v2561_v34 }
  0x27   :  { %537 = vmatpush.bf16.msrb.mxu3 %v2796_v47  ;;  %v2764_v36 = vor.u32 %v3239_v28, %v2761_v29  ;;  %v2625_v37 = vld [vmem:[%s5509_s2 + $0xa8] sm:$0xf0]  ;;  %v3221_v38 = vld [vmem:[%s5509_s2 + $0x124] sm:$0xf]  ;;  %v3187_v45 = vld [vmem:[%s5509_s2 + $0x14] sm:$0xf] }
  0x28   :  { %499 = vmatpush.bf16.msrb.mxu0 %v2596_v55  ;;  %v2689_v39 = vld [vmem:[%s5509_s2 + $0x128] sm:$0xf0]  ;;  %v3237_v40 = vld [vmem:[%s5509_s2 + $0x1a4] sm:$0xf]  ;;  %v2628_v43 = vor.u32 %v3205_v35, %v2625_v37  ;;  %v2553_v46 = vld [vmem:[%s5509_s2 + $0x18] sm:$0xf0] }
  0x29   :  { %512 = vmatpush.bf16.msrb.mxu1 %v2660_v59  ;;  %v2753_v41 = vld [vmem:[%s5509_s2 + $0x1a8] sm:$0xf0]  ;;  %v2692_v44 = vor.u32 %v3221_v38, %v2689_v39  ;;  %v3203_v47 = vld [vmem:[%s5509_s2 + $0x94] sm:$0xf]  ;;  %v2617_v49 = vld [vmem:[%s5509_s2 + $0x98] sm:$0xf0]  ;;  %v2556_v54 = vor.u32 %v3187_v45, %v2553_v46 }
  0x2a   :  { %525 = vmatpush.bf16.msrb.mxu2 %v2724_v60  ;;  %v2756_v48 = vor.u32 %v3237_v40, %v2753_v41  ;;  %v3219_v50 = vld [vmem:[%s5509_s2 + $0x114] sm:$0xf]  ;;  %v2681_v51 = vld [vmem:[%s5509_s2 + $0x118] sm:$0xf0]  ;;  %v2620_v55 = vor.u32 %v3203_v47, %v2617_v49  ;;  %v3185_v57 = vld [vmem:[%s5509_s2 + $0x4] sm:$0xf] }
  0x2b   :  { %538 = vmatpush.bf16.msrb.mxu3 %v2788_v0  ;;  %v3235_v52 = vld [vmem:[%s5509_s2 + $0x194] sm:$0xf]  ;;  %v2745_v53 = vld [vmem:[%s5509_s2 + $0x198] sm:$0xf0]  ;;  %v2684_v56 = vor.u32 %v3219_v50, %v2681_v51  ;;  %v2545_v58 = vld [vmem:[%s5509_s2 + $0x8] sm:$0xf0] }
  0x2c   :  { %500 = vmatpush.bf16.msrb.mxu0 %v2588_v6  ;;  %v3201_v59 = vld [vmem:[%s5509_s2 + $0x84] sm:$0xf]  ;;  %v2748_v60 = vor.u32 %v3235_v52, %v2745_v53  ;;  %v2609_v0 = vld [vmem:[%s5509_s2 + $0x88] sm:$0xf0]  ;;  %v2548_v6 = vor.u32 %v3185_v57, %v2545_v58  ;;  %v3835_v10 = vld [vmem:[%s5511_s10 + $0x78] sm:$0xff] }
  0x2d   :  { %513 = vmatpush.bf16.msrb.mxu1 %v2652_v7  ;;  %v3217_v1 = vld [vmem:[%s5509_s2 + $0x104] sm:$0xf]  ;;  %v2673_v2 = vld [vmem:[%s5509_s2 + $0x108] sm:$0xf0]  ;;  %v2612_v7 = vor.u32 %v3201_v59, %v2609_v0  ;;  %v3841_v11 = vld [vmem:[%s5511_s10 + $0x70] sm:$0xff] }
  0x2e   :  { %526 = vmatpush.bf16.msrb.mxu2 %v2716_v8  ;;  %v3233_v4 = vld [vmem:[%s5509_s2 + $0x184] sm:$0xf]  ;;  %v2737_v5 = vld [vmem:[%s5509_s2 + $0x188] sm:$0xf0]  ;;  %v2676_v8 = vor.u32 %v3217_v1, %v2673_v2  ;;  %v3887_v14 = vld [vmem:[%s5511_s10 + $0x38] sm:$0xff] }
  0x2f   :  { %539 = vmatpush.bf16.msrb.mxu3 %v2780_v12  ;;  %v2740_v9 = vor.u32 %v3233_v4, %v2737_v5  ;;  %v3849_v12 = vld [vmem:[%s5511_s10 + $0x68] sm:$0xff]  ;;  %v3856_v13 = vld [vmem:[%s5511_s10 + $0x60] sm:$0xff]  ;;  %v3892_v15 = vld [vmem:[%s5511_s10 + $0xf8] sm:$0xff] }
  0x30   :  { %501 = vmatpush.bf16.msrb.mxu0 %v2580_v18  ;;  %v3899_v16 = vld [vmem:[%s5511_s10 + $0x30] sm:$0xff]  ;;  %v3911_v18 = vld [vmem:[%s5511_s10 + $0x28] sm:$0xff]  ;;  %v3928_v21 = vld [vmem:[%s5511_s10 + $0xe0] sm:$0xff] }
  0x31   :  { %514 = vmatpush.bf16.msrb.mxu1 %v2644_v19  ;;  %v3904_v17 = vld [vmem:[%s5511_s10 + $0xf0] sm:$0xff]  ;;  %v3916_v19 = vld [vmem:[%s5511_s10 + $0xe8] sm:$0xff]  ;;  %v3933_v22 = vld [vmem:[%s5511_s10 + $0x18] sm:$0xff] }
  0x32   :  { %527 = vmatpush.bf16.msrb.mxu2 %v2708_v20  ;;  %v3921_v20 = vld [vmem:[%s5511_s10 + $0x20] sm:$0xff]  ;;  %v3938_v23 = vld [vmem:[%s5511_s10 + $0xd8] sm:$0xff]  ;;  %v3952_v25 = vld [vmem:[%s5511_s10 + $0xd0] sm:$0xff] }
  0x33   :  { %540 = vmatpush.bf16.msrb.mxu3 %v2772_v24  ;;  %v3947_v24 = vld [vmem:[%s5511_s10 + $0x10] sm:$0xff]  ;;  %v3957_v26 = vld [vmem:[%s5511_s10 + $0x8] sm:$0xff]  ;;  %v3969_v28 = vld [vmem:[%s5511_s10] sm:$0xff] }
  0x34   :  { %502 = vmatpush.bf16.msrb.mxu0 %v2572_v30  ;;  %5543 = vst [vmem:[#allocation2_spill] sm:$0xff] %v3957_v26  ;;  %v3962_v27 = vld [vmem:[%s5511_s10 + $0xc8] sm:$0xff]  ;;  %v3974_v29 = vld [vmem:[%s5511_s10 + $0xc0] sm:$0xff]  ;;  %v3981_v30 = vld [vmem:[%s5511_s10 + $0xb8] sm:$0xff] }
  0x35   :  { %515 = vmatpush.bf16.msrb.mxu1 %v2636_v31  ;;  %5544 = vst [vmem:[#allocation3_spill] sm:$0xff] %v3969_v28  ;;  %v3988_v31 = vld [vmem:[%s5511_s10 + $0xb0] sm:$0xff]  ;;  %v4001_v33 = vld [vmem:[%s5511_s10 + $0xa0] sm:$0xff]  ;;  %v4006_v34 = vld [vmem:[%s5511_s10 + $0x98] sm:$0xff] }
  0x36   :  { %528 = vmatpush.bf16.msrb.mxu2 %v2700_v32  ;;  %v3995_v32 = vld [vmem:[%s5511_s10 + $0xa8] sm:$0xff]  ;;  %v4013_v38 = vld [vmem:[%s5511_s10 + $0x90] sm:$0xff]  ;;  %v4042_v0 = vld [vmem:[%s5512_s11 + $0x78] sm:$0xff] }
  0x37   :  { %541 = vmatpush.bf16.msrb.mxu3 %v2764_v36  ;;  %v4019_v40 = vld [vmem:[%s5511_s10 + $0x88] sm:$0xff]  ;;  %v4049_v1 = vld [vmem:[%s5512_s11 + $0x60] sm:$0xff]  ;;  %v4063_v4 = vld [vmem:[%s5512_s11 + $0x50] sm:$0xff] }
  0x38   :  { %503 = vmatpush.bf16.msrb.mxu0 %v2564_v42  ;;  %5545 = vst [vmem:[#allocation4_spill] sm:$0xff] %v4019_v40  ;;  %v4054_v2 = vld [vmem:[%s5512_s11 + $0x68] sm:$0xff]  ;;  %v4068_v5 = vld [vmem:[%s5512_s11 + $0x58] sm:$0xff] }
  0x39   :  { %516 = vmatpush.bf16.msrb.mxu1 %v2628_v43  ;;  %v4025_v43 = vld [vmem:[%s5511_s10 + $0x80] sm:$0xff] }
  0x3a   :  { %529 = vmatpush.bf16.msrb.mxu2 %v2692_v44  ;;  %5546 = vst [vmem:[#allocation5_spill] sm:$0xff] %v4025_v43 }
  0x3b   :  { %542 = vmatpush.bf16.msrb.mxu3 %v2756_v48 }
  0x3c   :  { %504 = vmatpush.bf16.msrb.mxu0 %v2556_v54 }
  0x3d   :  { %517 = vmatpush.bf16.msrb.mxu1 %v2620_v55 }
  0x3e   :  { %530 = vmatpush.bf16.msrb.mxu2 %v2684_v56 }
  0x3f   :  { %543 = vmatpush.bf16.msrb.mxu3 %v2748_v60  ;;  %v4037_v60 = vld [vmem:[%s5512_s11 + $0x70] sm:$0xff] }
  0x40   :  { %505 = vmatpush.bf16.msrb.mxu0 %v2548_v6  ;;  %v4077_v6 = vld [vmem:[%s5512_s11 + $0x40] sm:$0xff] }
  0x41   :  { %518 = vmatpush.bf16.msrb.mxu1 %v2612_v7  ;;  %v4082_v7 = vld [vmem:[%s5512_s11 + $0x48] sm:$0xff] }
  0x42   :  { %531 = vmatpush.bf16.msrb.mxu2 %v2676_v8  ;;  %v4091_v8 = vld [vmem:[%s5512_s11 + $0x30] sm:$0xff] }
  0x43   :  { %544 = vmatpush.bf16.msrb.mxu3 %v2740_v9  ;;  %506 = vmatmul.bf16.vlgmr.msrb.gmra.mxu0 %v3692_v63  ;;  %v3874_v63 = vld [vmem:[%s5511_s10 + $0x48] sm:$0xff]  ;;  %v4096_v9 = vld [vmem:[%s5512_s11 + $0x38] sm:$0xff] }
  0x44   :  { %600 = vmatpush.msra.mxu0 %v3835_v10  ;;  %519 = vmatmul.bf16.vlgmr.msrb.gmra.mxu1 %v3701_v3  ;;  %v3880_v3 = vld [vmem:[%s5511_s10 + $0x40] sm:$0xff] }
  0x45   :  { %532 = vmatmul.bf16.vlgmr.msrb.gmra.mxu2 %v3688_v61  ;;  %v3862_v61 = vld [vmem:[%s5511_s10 + $0x58] sm:$0xff]  ;;  %620 = vmatpush.msra.mxu1 %v3892_v15 }
  0x46   :  { %545 = vmatmul.bf16.vlgmr.msrb.gmra.mxu3 %v3690_v62  ;;  %601 = vmatpush.msra.mxu0 %v3841_v11  ;;  %v3868_v62 = vld [vmem:[%s5511_s10 + $0x50] sm:$0xff] }
  0x47   :  { %621 = vmatpush.msra.mxu1 %v3904_v17  ;;  %661 = vmatpush.msra.mxu2 %v4037_v60 }
  0x48   :  { %602 = vmatpush.msra.mxu0 %v3849_v12  ;;  %681 = vmatpush.msra.mxu3 %v4042_v0 }
  0x49   :  { %622 = vmatpush.msra.mxu1 %v3916_v19  ;;  %662 = vmatpush.msra.mxu2 %v4049_v1 }
  0x4a   :  { %603 = vmatpush.msra.mxu0 %v3856_v13  ;;  %682 = vmatpush.msra.mxu3 %v4054_v2 }
  0x4b   :  { %623 = vmatpush.msra.mxu1 %v3928_v21  ;;  %663 = vmatpush.msra.mxu2 %v4063_v4 }
  0x4c   :  { %604 = vmatpush.msra.mxu0 %v3862_v61  ;;  %683 = vmatpush.msra.mxu3 %v4068_v5 }
  0x4d   :  { %624 = vmatpush.msra.mxu1 %v3938_v23  ;;  %664 = vmatpush.msra.mxu2 %v4077_v6 }
  0x4e   :  { %605 = vmatpush.msra.mxu0 %v3868_v62  ;;  %684 = vmatpush.msra.mxu3 %v4082_v7 }
  0x4f   :  { %625 = vmatpush.msra.mxu1 %v3952_v25  ;;  %665 = vmatpush.msra.mxu2 %v4091_v8 }
  0x50   :  { %606 = vmatpush.msra.mxu0 %v3874_v63  ;;  %685 = vmatpush.msra.mxu3 %v4096_v9 }
  0x51   :  { %626 = vmatpush.msra.mxu1 %v3962_v27 }
  0x52   :  { %607 = vmatpush.msra.mxu0 %v3880_v3 }
  0x53   :  { %627 = vmatpush.msra.mxu1 %v3974_v29 }
  0x54   :  { %608 = vmatpush.msra.mxu0 %v3887_v14 }
  0x55   :  { %628 = vmatpush.msra.mxu1 %v3981_v30 }
  0x56   :  { %609 = vmatpush.msra.mxu0 %v3899_v16 }
  0x57   :  { %629 = vmatpush.msra.mxu1 %v3988_v31 }
  0x58   :  { %610 = vmatpush.msra.mxu0 %v3911_v18 }
  0x59   :  { %630 = vmatpush.msra.mxu1 %v3995_v32 }
  0x5a   :  { %611 = vmatpush.msra.mxu0 %v3921_v20 }
  0x5b   :  { %631 = vmatpush.msra.mxu1 %v4001_v33 }
  0x5c   :  { %612 = vmatpush.msra.mxu0 %v3933_v22 }
  0x5d   :  { %632 = vmatpush.msra.mxu1 %v4006_v34 }
  0x5e   :  { %613 = vmatpush.msra.mxu0 %v3947_v24 }
  0x5f   :  { %633 = vmatpush.msra.mxu1 %v4013_v38 }
  0x60   :  { %614 = vmatpush.msra.mxu0 %v3957_v26 }
  0x61   :  { %634 = vmatpush.msra.mxu1 %v4019_v40 }
  0x62   :  { %615 = vmatpush.msra.mxu0 %v3969_v28 }
  0x63   :  { %635 = vmatpush.msra.mxu1 %v4025_v43 }
  0x64   :  { %772 = vmatpush.msrb.mxu0 %v4037_v60 }
  0x65   :  { %792 = vmatpush.msrb.mxu1 %v4042_v0 }
  0x66   :  { %773 = vmatpush.msrb.mxu0 %v4049_v1 }
  0x67   :  { %793 = vmatpush.msrb.mxu1 %v4054_v2 }
  0x68   :  { %774 = vmatpush.msrb.mxu0 %v4063_v4 }
  0x69   :  { %794 = vmatpush.msrb.mxu1 %v4068_v5 }
  0x6a   :  { %775 = vmatpush.msrb.mxu0 %v4077_v6 }
  0x6b   :  { %795 = vmatpush.msrb.mxu1 %v4082_v7 }
  0x6c   :  { %776 = vmatpush.msrb.mxu0 %v4091_v8 }
  0x6d   :  { %796 = vmatpush.msrb.mxu1 %v4096_v9 }
  0xa0   :  { %v455_v35 = vpop.f32.mrf.mxu0 }
  0xa1   :  { %v468_v36 = vpop.f32.mrf.mxu1 }
  0xa2   :  { %v469_v37 = vadd.f32 %v468_v36, %v455_v35  ;;  %v4105_v35 = vld [vmem:[%s5512_s11 + $0x20] sm:$0xff]  ;;  %v4110_v36 = vld [vmem:[%s5512_s11 + $0x28] sm:$0xff] }
  0xa3   :  { %666 = vmatpush.msra.mxu2 %v4105_v35  ;;  %686 = vmatpush.msra.mxu3 %v4110_v36 }
  0xa4   :  { %777 = vmatpush.msrb.mxu0 %v4105_v35  ;;  %797 = vmatpush.msrb.mxu1 %v4110_v36 }
  0xa8   :  { %v481_v39 = vpop.f32.mrf.mxu2  ;;  %v457_v45 = vpop.f32.mrf.mxu0 }
  0xa9   :  { %v482_v41 = vadd.f32 %v481_v39, %v469_v37  ;;  %v494_v42 = vpop.f32.mrf.mxu3  ;;  %v470_v46 = vpop.f32.mrf.mxu1  ;;  %v4119_v37 = vld [vmem:[%s5512_s11 + $0x10] sm:$0xff]  ;;  %v4124_v39 = vld [vmem:[%s5512_s11 + $0x18] sm:$0xff] }
  0xaa   :  { %5547 = vst [vmem:[#allocation6_spill] sm:$0xff] %v4119_v37  ;;  %667 = vmatpush.msra.mxu2 %v4119_v37  ;;  %687 = vmatpush.msra.mxu3 %v4124_v39 }
  0xab   :  { %v4027_v44 = vadd.f32 %v494_v42, %v482_v41  ;;  %5548 = vst [vmem:[#allocation7_spill] sm:$0xff] %v4124_v39  ;;  %v4133_v41 = vld [vmem:[%s5512_s11] sm:$0xff]  ;;  %v4138_v42 = vld [vmem:[%s5512_s11 + $0x8] sm:$0xff]  ;;  %778 = vmatpush.msrb.mxu0 %v4119_v37  ;;  %798 = vmatpush.msrb.mxu1 %v4124_v39 }
  0xac   :  { %5549 = vst [vmem:[#allocation8_spill] sm:$0xff] %v4133_v41  ;;  %668 = vmatpush.msra.mxu2 %v4133_v41  ;;  %688 = vmatpush.msra.mxu3 %v4138_v42 }
  0xad   :  { %616 = vmatmul.f32.vlgmr.msra.gmra.mxu0 %v4027_v44  ;;  %5550 = vst [vmem:[#allocation9_spill] sm:$0xff] %v4138_v42  ;;  %799 = vmatpush.msrb.mxu1 %v4138_v42 }
  0xae   :  { %699 = vmatpush.msrb.mxu2 %v3835_v10  ;;  %719 = vmatpush.msrb.mxu3 %v3892_v15 }
  0xaf   :  { %779 = vmatpush.msrb.mxu0 %v4133_v41 }
  0xb0   :  { %v483_v47 = vpop.f32.mrf.mxu2  ;;  %700 = vmatpush.msrb.mxu2 %v3841_v11  ;;  %720 = vmatpush.msrb.mxu3 %v3904_v17 }
  0xb1   :  { %v496_v48 = vpop.f32.mrf.mxu3  ;;  %815 = vmatpush.msra.mxu0 %v4037_v60 }
  0xb2   :  { %701 = vmatpush.msrb.mxu2 %v3849_v12  ;;  %721 = vmatpush.msrb.mxu3 %v3916_v19 }
  0xb3   :  { %816 = vmatpush.msra.mxu0 %v4049_v1 }
  0xb4   :  { %702 = vmatpush.msrb.mxu2 %v3856_v13  ;;  %722 = vmatpush.msrb.mxu3 %v3928_v21 }
  0xb5   :  { %817 = vmatpush.msra.mxu0 %v4063_v4 }
  0xb6   :  { %703 = vmatpush.msrb.mxu2 %v3862_v61  ;;  %723 = vmatpush.msrb.mxu3 %v3938_v23 }
  0xb7   :  { %818 = vmatpush.msra.mxu0 %v4077_v6 }
  0xb8   :  { %704 = vmatpush.msrb.mxu2 %v3868_v62  ;;  %724 = vmatpush.msrb.mxu3 %v3952_v25 }
  0xb9   :  { %819 = vmatpush.msra.mxu0 %v4091_v8 }
  0xba   :  { %705 = vmatpush.msrb.mxu2 %v3874_v63  ;;  %725 = vmatpush.msrb.mxu3 %v3962_v27 }
  0xbb   :  { %820 = vmatpush.msra.mxu0 %v4105_v35 }
  0xbc   :  { %706 = vmatpush.msrb.mxu2 %v3880_v3  ;;  %726 = vmatpush.msrb.mxu3 %v3974_v29 }
  0xbd   :  { %821 = vmatpush.msra.mxu0 %v4119_v37 }
  0xbe   :  { %707 = vmatpush.msrb.mxu2 %v3887_v14  ;;  %727 = vmatpush.msrb.mxu3 %v3981_v30 }
  0xbf   :  { %822 = vmatpush.msra.mxu0 %v4133_v41 }
  0xc0   :  { %v507_v49 = vpop.f32.mrf.mxu0  ;;  %708 = vmatpush.msrb.mxu2 %v3899_v16  ;;  %728 = vmatpush.msrb.mxu3 %v3988_v31 }
  0xc1   :  { %v520_v50 = vpop.f32.mrf.mxu1 }
  0xc2   :  { %v521_v51 = vadd.f32 %v520_v50, %v507_v49  ;;  %709 = vmatpush.msrb.mxu2 %v3911_v18  ;;  %729 = vmatpush.msrb.mxu3 %v3995_v32 }
  0xc4   :  { %710 = vmatpush.msrb.mxu2 %v3921_v20  ;;  %730 = vmatpush.msrb.mxu3 %v4001_v33 }
  0xc6   :  { %711 = vmatpush.msrb.mxu2 %v3933_v22  ;;  %731 = vmatpush.msrb.mxu3 %v4006_v34 }
  0xc8   :  { %v533_v52 = vpop.f32.mrf.mxu2  ;;  %v509_v55 = vpop.f32.mrf.mxu0  ;;  %712 = vmatpush.msrb.mxu2 %v3947_v24  ;;  %732 = vmatpush.msrb.mxu3 %v4013_v38 }
  0xc9   :  { %v534_v53 = vadd.f32 %v533_v52, %v521_v51  ;;  %v546_v54 = vpop.f32.mrf.mxu3  ;;  %v522_v56 = vpop.f32.mrf.mxu1 }
  0xca   :  { %713 = vmatpush.msrb.mxu2 %v3957_v26  ;;  %733 = vmatpush.msrb.mxu3 %v4019_v40 }
  0xcb   :  { %v4031_v57 = vadd.f32 %v546_v54, %v534_v53 }
  0xcc   :  { %714 = vmatpush.msrb.mxu2 %v3969_v28  ;;  %734 = vmatpush.msrb.mxu3 %v4025_v43 }
  0xcd   :  { %636 = vmatmul.f32.vlgmr.msra.gmra.mxu1 %v4031_v57 }
  0xce   :  { %835 = vmatpush.msra.mxu1 %v4042_v0 }
  0xd0   :  { %v535_v58 = vpop.f32.mrf.mxu2  ;;  %836 = vmatpush.msra.mxu1 %v4054_v2 }
  0xd1   :  { %v548_v59 = vpop.f32.mrf.mxu3 }
  0xd2   :  { %837 = vmatpush.msra.mxu1 %v4068_v5 }
  0xd4   :  { %838 = vmatpush.msra.mxu1 %v4082_v7 }
  0xd6   :  { %839 = vmatpush.msra.mxu1 %v4096_v9 }
  0xd8   :  { %840 = vmatpush.msra.mxu1 %v4110_v36 }
  0xda   :  { %841 = vmatpush.msra.mxu1 %v4124_v39 }
  0xdc   :  { %842 = vmatpush.msra.mxu1 %v4138_v42 }
 0x12a   :  { %v617_v45 = vpop.f32.mrf.mxu0 }
 0x14a   :  { %v637_v46 = vpop.f32.mrf.mxu1 }
 0x14b   :  { %v638_v47 = vadd.f32 %v637_v46, %v617_v45 }
 0x14d   :  { %v641_v48 = vsel %vm640_vm0, %v638_v47, 0.0 }
 0x14e   :  { %v642_v49 = vrot.slane %v641_v48, 4 }
 0x150   :  { %v643_v50 = vadd.f32 %v642_v49, %v641_v48 }
 0x152   :  { %v644_v51 = vrot.slane %v643_v50, 2 }
 0x154   :  { %v645_v52 = vadd.f32 %v644_v51, %v643_v50 }
 0x156   :  { %v646_v53 = vrot.slane %v645_v52, 1 }
 0x158   :  { %v647_v54 = vadd.f32 %v646_v53, %v645_v52 }
 0x15a   :  { %v648_v55 = vmul.f32 0.125, %v647_v54 }
 0x15c   :  { %2797 = vmatmul.msk.f32.vlgmr.msra.gmra.mxu2 %vm649_vm1, %v648_v55  ;;  %2798 = vmatmul.msk.f32.vlgmr.msra.gmra.mxu3 %vm649_vm1, %v648_v55 }
 0x1df   :  { %v670_v56 = vpop.f32.mrf.mxu2  ;;  %v690_v58 = vpop.f32.mrf.mxu3 }
 0x1e0   :  { %v693_v59 = vperm.slane %v670_v56, 0  ;;  %v694_v45 = vperm.slane %v690_v58, 0 }
 0x1e2   :  { %v695_v46 = vsub.f32 %v4027_v44, %v693_v59  ;;  %v696_v47 = vsub.f32 %v4031_v57, %v694_v45  ;;  %v3256_v59 = vld [vmem:[%s5513_s3 + $0x38] sm:$0xff] }
 0x1e3   :  { %v3264_v45 = vld [vmem:[%s5513_s3 + $0x78] sm:$0xff]  ;;  %991 = vmatpush.bf16.msra.mxu2 %v3256_v59 }
 0x1e4   :  { %v697_v48 = vmul.f32 %v695_v46, %v695_v46  ;;  %v698_v49 = vmul.f32 %v696_v47, %v696_v47  ;;  %1004 = vmatpush.bf16.msra.mxu3 %v3264_v45  ;;  %v3255_v47 = vld [vmem:[%s5513_s3 + $0x30] sm:$0xff] }
 0x1e6   :  { %715 = vmatmul.f32.vlgmr.msrb.gmra.mxu2 %v697_v48  ;;  %735 = vmatmul.f32.vlgmr.msrb.gmra.mxu3 %v698_v49  ;;  %v3253_v48 = vld [vmem:[%s5513_s3 + $0x20] sm:$0xff] }
 0x1e7   :  { %992 = vmatpush.bf16.msra.mxu2 %v3255_v47  ;;  %v3261_v49 = vld [vmem:[%s5513_s3 + $0x60] sm:$0xff] }
 0x1e8   :  { %v551_v47 = vld [vmem:[%s5514_s14 + $0x1] sm:$0x1] }
 0x269   :  { %v716_v50 = vpop.f32.mrf.mxu2  ;;  %v736_v51 = vpop.f32.mrf.mxu3 }
 0x26a   :  { %v737_v52 = vadd.f32 %v736_v51, %v716_v50 }
 0x26c   :  { %v739_v53 = vsel %vm640_vm0, %v737_v52, 0.0 }
 0x26d   :  { %v740_v54 = vrot.slane %v739_v53, 4 }
 0x26f   :  { %v741_v42 = vadd.f32 %v740_v54, %v739_v53  ;;  %v550_v54 = vld [vmem:[%s5514_s14] sm:$0x1] }
 0x271   :  { %v742_v41 = vrot.slane %v741_v42, 2 }
 0x273   :  { %v743_v39 = vadd.f32 %v742_v41, %v741_v42  ;;  %v3262_v41 = vld [vmem:[%s5513_s3 + $0x68] sm:$0xff] }
 0x275   :  { %v744_v37 = vrot.slane %v743_v39, 1 }
 0x277   :  { %v745_v56 = vadd.f32 %v744_v37, %v743_v39  ;;  %v3263_v37 = vld [vmem:[%s5513_s3 + $0x70] sm:$0xff]  ;;  %v3254_v39 = vld [vmem:[%s5513_s3 + $0x28] sm:$0xff] }
 0x278   :  { %1005 = vmatpush.bf16.msra.mxu3 %v3263_v37  ;;  %993 = vmatpush.bf16.msra.mxu2 %v3254_v39  ;;  %v3260_v39 = vld [vmem:[%s5513_s3 + $0x58] sm:$0xff] }
 0x279   :  { %v746_v58 = vmul.f32 0.125, %v745_v56 }
 0x27b   :  { %v747_v46 = vadd.f32 1e-05, %v746_v58 }
 0x27c   :  { %1006 = vmatpush.bf16.msra.mxu3 %v3262_v41  ;;  %994 = vmatpush.bf16.msra.mxu2 %v3253_v48  ;;  %v3259_v41 = vld [vmem:[%s5513_s3 + $0x50] sm:$0xff]  ;;  %v3258_v48 = vld [vmem:[%s5513_s3 + $0x48] sm:$0xff] }
 0x27d   :  { %3342 = vrsqrt.f32 %v747_v46  ;;  %vm754_vm3 = vweird.f32 %v747_v46 }
 0x280   :  { %1007 = vmatpush.bf16.msra.mxu3 %v3261_v49  ;;  %v3249_v49 = vld [vmem:[%s5513_s3] sm:$0xff] }
 0x283   :  { %v3343_v42 = vpop.eup %3342 }
 0x284   :  { %v749_v50 = vmul.f32 %v3343_v42, %v747_v46  ;;  %vm755_vm2 = vweird.f32 %v3343_v42  ;;  %v3252_v46 = vld [vmem:[%s5513_s3 + $0x18] sm:$0xff]  ;;  %1008 = vmatpush.bf16.msra.mxu3 %v3260_v39 }
 0x285   :  { %vm756_vm4 = vmor %vm754_vm3, %vm755_vm2  ;;  %995 = vmatpush.bf16.msra.mxu2 %v3252_v46 }
 0x286   :  { %v750_v51 = vmul.f32 %v3343_v42, %v749_v50  ;;  %v3257_v50 = vld [vmem:[%s5513_s3 + $0x40] sm:$0xff] }
 0x288   :  { %v751_v52 = vmul.f32 0.5, %v750_v51  ;;  %1009 = vmatpush.bf16.msra.mxu3 %v3259_v41  ;;  %v3265_v51 = vld [vmem:[%s5515_s4] sm:$0xff] }
 0x28a   :  { %v752_v53 = vsub.f32 1.5, %v751_v52  ;;  %v3266_v52 = vld [vmem:[%s5516_s5] sm:$0xff] }
 0x28c   :  { %v753_v56 = vmul.f32 %v3343_v42, %v752_v53  ;;  %1010 = vmatpush.bf16.msra.mxu3 %v3258_v48  ;;  %v1063_v53 = vld [vmem:[%s5517_s1] sm:$0x1] }
 0x28e   :  { %v757_v58 = vsel %vm756_vm4, %v3343_v42, %v753_v56  ;;  %v3250_v42 = vld [vmem:[%s5513_s3 + $0x8] sm:$0xff]  ;;  %vm2529_vm4 = vcmask 1042434  }
 0x28f   :  { %v758_v59 = vmul.f32 %v757_v58, %v550_v54 }
 0x290   :  { %1011 = vmatpush.bf16.msra.mxu3 %v3257_v50 }
 0x291   :  { %2799 = vmatmul.msk.f32.vlgmr.msrb.gmra.mxu0 %vm649_vm1, %v758_v59  ;;  %2800 = vmatmul.msk.f32.vlgmr.msrb.gmra.mxu1 %vm649_vm1, %v758_v59  ;;  %v759_v45 = vmul.f32 %v758_v59, %v648_v55  ;;  %v3251_v55 = vld [vmem:[%s5513_s3 + $0x10] sm:$0xff] }
 0x292   :  { %996 = vmatpush.bf16.msra.mxu2 %v3251_v55  ;;  %1087 = vmatpush.bf16.msrb.mxu0 %v3265_v51 }
 0x293   :  { %v760_v37 = vsub.f32 %v551_v47, %v759_v45  ;;  %1112 = vmatpush.bf16.msrb.mxu1 %v3266_v52  ;;  %v5553_v52 = vld [vmem:[#allocation6_spill] sm:$0xff] }
 0x294   :  { %1221 = vmatpush.msrb.mxu3 %v3892_v15 }
 0x296   :  { %997 = vmatpush.bf16.msra.mxu2 %v3250_v42  ;;  %1222 = vmatpush.msrb.mxu3 %v3904_v17 }
 0x298   :  { %1223 = vmatpush.msrb.mxu3 %v3916_v19 }
 0x299   :  { %2801 = vmatmul.msk.f32.vlgmr.msra.gmra.mxu0 %vm649_vm1, %v760_v37  ;;  %2802 = vmatmul.msk.f32.vlgmr.msra.gmra.mxu1 %vm649_vm1, %v760_v37 }
 0x29a   :  { %998 = vmatpush.bf16.msra.mxu2 %v3249_v49  ;;  %1224 = vmatpush.msrb.mxu3 %v3928_v21 }
 0x29c   :  { %1225 = vmatpush.msrb.mxu3 %v3938_v23 }
 0x29e   :  { %1201 = vmatpush.msrb.mxu2 %v3835_v10  ;;  %1226 = vmatpush.msrb.mxu3 %v3952_v25 }
 0x2a0   :  { %1202 = vmatpush.msrb.mxu2 %v3841_v11  ;;  %1227 = vmatpush.msrb.mxu3 %v3962_v27 }
 0x2a1   :  { %2871 = vmatmul.msk.bf16.vlgmr.msrb.gmra.mxu0 %vm1076_vm5, %v1063_v53  ;;  %2876 = vmatmul.msk.bf16.vlgmr.msrb.gmra.mxu1 %vm1076_vm5, %v1063_v53  ;;  %v5554_v53 = vld [vmem:[#allocation7_spill] sm:$0xff]  ;;  %vm2525_vm5 = vcmask 1040384  }
 0x2a2   :  { %1203 = vmatpush.msrb.mxu2 %v3849_v12  ;;  %1228 = vmatpush.msrb.mxu3 %v3974_v29 }
 0x2a4   :  { %1204 = vmatpush.msrb.mxu2 %v3856_v13  ;;  %1229 = vmatpush.msrb.mxu3 %v3981_v30 }
 0x2a6   :  { %1205 = vmatpush.msrb.mxu2 %v3862_v61  ;;  %1230 = vmatpush.msrb.mxu3 %v3988_v31 }
 0x2a8   :  { %1206 = vmatpush.msrb.mxu2 %v3868_v62  ;;  %1231 = vmatpush.msrb.mxu3 %v3995_v32 }
 0x2aa   :  { %1207 = vmatpush.msrb.mxu2 %v3874_v63  ;;  %1232 = vmatpush.msrb.mxu3 %v4001_v33 }
 0x2ac   :  { %1208 = vmatpush.msrb.mxu2 %v3880_v3  ;;  %1233 = vmatpush.msrb.mxu3 %v4006_v34 }
 0x2ae   :  { %1209 = vmatpush.msrb.mxu2 %v3887_v14  ;;  %1234 = vmatpush.msrb.mxu3 %v4013_v38 }
 0x2b0   :  { %1210 = vmatpush.msrb.mxu2 %v3899_v16  ;;  %1235 = vmatpush.msrb.mxu3 %v4019_v40 }
 0x2b2   :  { %1211 = vmatpush.msrb.mxu2 %v3911_v18  ;;  %1236 = vmatpush.msrb.mxu3 %v4025_v43 }
 0x2b4   :  { %1212 = vmatpush.msrb.mxu2 %v3921_v20 }
 0x2b6   :  { %1213 = vmatpush.msrb.mxu2 %v3933_v22 }
 0x2b8   :  { %1214 = vmatpush.msrb.mxu2 %v3947_v24 }
 0x2ba   :  { %1215 = vmatpush.msrb.mxu2 %v3957_v26 }
 0x2bc   :  { %1216 = vmatpush.msrb.mxu2 %v3969_v28 }
 0x30e   :  { %v781_v54 = vpop.f32.mrf.mxu0  ;;  %v801_v56 = vpop.f32.mrf.mxu1 }
 0x30f   :  { %v847_v58 = vperm.slane %v781_v54, 0  ;;  %v848_v59 = vperm.slane %v801_v56, 0  ;;  %v5555_v54 = vld [vmem:[#allocation8_spill] sm:$0xff]  ;;  %v5556_v56 = vld [vmem:[#allocation9_spill] sm:$0xff] }
 0x311   :  { %v849_v37 = vmul.f32 %v847_v58, %v4027_v44  ;;  %v850_v46 = vmul.f32 %v848_v59, %v4031_v57  ;;  %v3352_v58 = vmov 2.0  }
 0x312   :  { %3344 = vrcp.f32 %v3352_v58 }
 0x316   :  { %v824_v45 = vpop.f32.mrf.mxu0  ;;  %v844_v47 = vpop.f32.mrf.mxu1 }
 0x317   :  { %v851_v39 = vperm.slane %v824_v45, 0  ;;  %v852_v55 = vperm.slane %v844_v47, 0 }
 0x318   :  { %v3345_v59 = vpop.eup %3344 }
 0x319   :  { %v853_v41 = vadd.f32 %v851_v39, %v849_v37  ;;  %v854_v42 = vadd.f32 %v852_v55, %v850_v46  ;;  %v1025_v45 = vmul.f32 2.0, %v3345_v59  ;;  %vm1029_vm8 = vweird.f32 %v3345_v59 }
 0x31b   :  { %vm855_vm6 = vcmp.gt.f32.partialorder %v853_v41, 0.0  ;;  %v857_v48 = vmul.f32 0.2, %v853_v41  ;;  %vm856_vm7 = vcmp.gt.f32.partialorder %v854_v42, 0.0  ;;  %v858_v49 = vmul.f32 0.2, %v854_v42 }
 0x31c   :  { %v1026_v39 = vsub.f32 1.0, %v1025_v45 }
 0x31d   :  { %v4299_v44 = vsel %vm855_vm6, %v853_v41, %v857_v48  ;;  %v4301_v57 = vsel %vm856_vm7, %v854_v42, %v858_v49  ;;  %vm2533_vm6 = vcmask 1041408  }
 0x31e   :  { %5551 = vst [vmem:[#allocation10_spill] sm:$0xff] %v4299_v44  ;;  %v861_v50 = vpack.c.bf16 %v4299_v44, %v4299_v44  ;;  %v862_v51 = vpack.c.bf16 %v4301_v57, %v4301_v57  ;;  %v1027_v42 = vmul.f32 %v3345_v59, %v1026_v39 }
 0x31f   :  { %5552 = vst [vmem:[#allocation11_spill] sm:$0xff] %v4301_v57 }
 0x320   :  { %999 = vmatmul.bf16.vlgmr.msra.gmra.mxu2 %v861_v50  ;;  %1012 = vmatmul.bf16.vlgmr.msra.gmra.mxu3 %v862_v51  ;;  %v1028_v57 = vadd.f32 %v3345_v59, %v1027_v42 }
 0x321   :  { %1371 = vmatpush.msra.mxu2 %v4037_v60  ;;  %1391 = vmatpush.msra.mxu3 %v4042_v0 }
 0x322   :  { %v1030_v43 = vsel %vm1029_vm8, %v3345_v59, %v1028_v57 }
 0x323   :  { %1372 = vmatpush.msra.mxu2 %v4049_v1  ;;  %1392 = vmatpush.msra.mxu3 %v4054_v2 }
 0x325   :  { %1373 = vmatpush.msra.mxu2 %v4063_v4  ;;  %1393 = vmatpush.msra.mxu3 %v4068_v5 }
 0x327   :  { %1374 = vmatpush.msra.mxu2 %v4077_v6  ;;  %1394 = vmatpush.msra.mxu3 %v4082_v7 }
 0x329   :  { %1375 = vmatpush.msra.mxu2 %v4091_v8  ;;  %1395 = vmatpush.msra.mxu3 %v4096_v9 }
 0x32b   :  { %1376 = vmatpush.msra.mxu2 %v4105_v35  ;;  %1396 = vmatpush.msra.mxu3 %v4110_v36 }
 0x32d   :  { %1377 = vmatpush.msra.mxu2 %v5553_v52  ;;  %1397 = vmatpush.msra.mxu3 %v5554_v53 }
 0x32f   :  { %1378 = vmatpush.msra.mxu2 %v5555_v54  ;;  %1398 = vmatpush.msra.mxu3 %v5556_v56 }
 0x3a3   :  { %v1000_v47 = vpop.f32.mrf.mxu2  ;;  %v1013_v37 = vpop.f32.mrf.mxu3 }
 0x3a4   :  { %v4325_v46 = vadd.f32 %v1013_v37, %v1000_v47 }
 0x3a6   :  { %v1017_v55 = vsel %vm640_vm0, %v4325_v46, 0.0 }
 0x3a7   :  { %v1018_v41 = vrot.slane %v1017_v55, 4 }
 0x3a9   :  { %v1019_v48 = vadd.f32 %v1018_v41, %v1017_v55  ;;  %v4334_v55 = vpop.f32.mrf.mxu0  ;;  %v2903_v41 = vld [vmem:[%s5520_s8 + $0x30] sm:$0xf] }
 0x3ab   :  { %v1020_v49 = vrot.slane %v1019_v48, 2  ;;  %v1002_v50 = vpop.f32.mrf.mxu2  ;;  %v1015_v51 = vpop.f32.mrf.mxu3 }
 0x3ac   :  { %v2895_v50 = vld [vmem:[%s5520_s8 + $0x20] sm:$0xf]  ;;  %v3272_v51 = vld [vmem:[%s5520_s8 + $0x24] sm:$0xf0] }
 0x3ad   :  { %v1021_v44 = vadd.f32 %v1020_v49, %v1019_v48  ;;  %v4348_v49 = vpop.f32.mrf.mxu1 }
 0x3af   :  { %v1022_v58 = vrot.slane %v1021_v44, 1 }
 0x3b1   :  { %v1023_v28 = vadd.f32 %v1022_v58, %v1021_v44  ;;  %v3274_v44 = vld [vmem:[%s5520_s8 + $0x34] sm:$0xf0]  ;;  %v3271_v58 = vld [vmem:[%s5520_s8 + $0x24] sm:$0xf] }
 0x3b2   :  { %v2904_v59 = vor.u32 %v3274_v44, %v2903_v41  ;;  %v1091_v44 = vpop.f32.mrf.mxu0 }
 0x3b3   :  { %v4329_v40 = vmul.f32 %v1030_v43, %v1023_v28  ;;  %v3273_v28 = vld [vmem:[%s5520_s8 + $0x34] sm:$0xf] }
 0x3b4   :  { %1177 = vmatpush.bf16.msra.mxu0 %v2904_v59  ;;  %v3269_v59 = vld [vmem:[%s5520_s8 + $0x14] sm:$0xf] }
 0x3b5   :  { %v1032_v45 = vsub.f32 %v4325_v46, %v4329_v40 }
 0x3b7   :  { %v1033_v47 = vmul.f32 %v1032_v45, %v1032_v45 }
 0x3b9   :  { %v1034_v37 = vsel %vm640_vm0, %v1033_v47, 0.0  ;;  %v2896_v47 = vor.u32 %v3272_v51, %v2895_v50 }
 0x3ba   :  { %v1035_v26 = vrot.slane %v1034_v37, 4 }
 0x3bb   :  { %1178 = vmatpush.bf16.msra.mxu0 %v2896_v47  ;;  %v3268_v47 = vld [vmem:[%s5520_s8 + $0x4] sm:$0xf0] }
 0x3bc   :  { %v1036_v39 = vadd.f32 %v1035_v26, %v1034_v37  ;;  %v2905_v26 = vld [vmem:[%s5520_s8 + $0x38] sm:$0xf0]  ;;  %v2897_v37 = vld [vmem:[%s5520_s8 + $0x28] sm:$0xf0] }
 0x3bd   :  { %v2908_v42 = vor.u32 %v3273_v28, %v2905_v26  ;;  %v2887_v28 = vld [vmem:[%s5520_s8 + $0x10] sm:$0xf] }
 0x3be   :  { %v1037_v57 = vrot.slane %v1036_v39, 2 }
 0x3bf   :  { %1190 = vmatpush.bf16.msra.mxu1 %v2908_v42 }
 0x3c0   :  { %v1038_v48 = vadd.f32 %v1037_v57, %v1036_v39  ;;  %v2900_v39 = vor.u32 %v3271_v58, %v2897_v37  ;;  %v3270_v57 = vld [vmem:[%s5520_s8 + $0x14] sm:$0xf0]  ;;  %v1116_v58 = vpop.f32.mrf.mxu1 }
 0x3c1   :  { %v2888_v42 = vor.u32 %v3270_v57, %v2887_v28 }
 0x3c2   :  { %v1039_v45 = vrot.slane %v1038_v48, 1 }
 0x3c3   :  { %1191 = vmatpush.bf16.msra.mxu1 %v2900_v39  ;;  %1179 = vmatpush.bf16.msra.mxu0 %v2888_v42  ;;  %v2881_v39 = vld [vmem:[%s5520_s8 + $0x8] sm:$0xf0] }
 0x3c4   :  { %v1040_v41 = vadd.f32 %v1039_v45, %v1038_v48  ;;  %v2889_v48 = vld [vmem:[%s5520_s8 + $0x18] sm:$0xf0]  ;;  %v2879_v45 = vld [vmem:[%s5520_s8] sm:$0xf] }
 0x3c5   :  { %v2892_v50 = vor.u32 %v3269_v59, %v2889_v48  ;;  %v2880_v37 = vor.u32 %v3268_v47, %v2879_v45  ;;  %v1053_v48 = vld [vmem:[%s5514_s14 + $0x2] sm:$0x1]  ;;  %v3340_v45 = vld [vmem:[%s5518_s6] ss:$0 sm:$0xff] }
 0x3c6   :  { %v1041_v26 = vmul.f32 %v1040_v41, %v1030_v43  ;;  %v3267_v43 = vld [vmem:[%s5520_s8 + $0x4] sm:$0xf] }
 0x3c7   :  { %1192 = vmatpush.bf16.msra.mxu1 %v2892_v50  ;;  %v2884_v41 = vor.u32 %v3267_v43, %v2881_v39  ;;  %1180 = vmatpush.bf16.msra.mxu0 %v2880_v37  ;;  %v1090_v39 = vadd.f32 %v3340_v45, %v4334_v55  ;;  %v3015_v55 = vld [vmem:[%s5521_s9 + $0xc0] sm:$0xf] }
 0x3c8   :  { %v1042_v51 = vadd.f32 1e-05, %v1041_v26  ;;  %v3143_v45 = vld [vmem:[%s5521_s9 + $0x1c0] sm:$0xf] }
 0x3ca   :  { %3346 = vrsqrt.f32 %v1042_v51  ;;  %vm1049_vm10 = vweird.f32 %v1042_v51 }
 0x3cb   :  { %1193 = vmatpush.bf16.msra.mxu1 %v2884_v41  ;;  %1260 = vmatpush.msrb.mxu0 %v4037_v60 }
 0x3cd   :  { %1261 = vmatpush.msrb.mxu0 %v4049_v1 }
 0x3cf   :  { %1280 = vmatpush.msrb.mxu1 %v4042_v0  ;;  %1262 = vmatpush.msrb.mxu0 %v4063_v4 }
 0x3d0   :  { %v3347_v44 = vpop.eup %3346 }
 0x3d1   :  { %1281 = vmatpush.msrb.mxu1 %v4054_v2  ;;  %v1044_v28 = vmul.f32 %v3347_v44, %v1042_v51  ;;  %1263 = vmatpush.msrb.mxu0 %v4077_v6  ;;  %vm1050_vm9 = vweird.f32 %v3347_v44  ;;  %v1055_v51 = vld [vmem:[%s5514_s14 + $0x3] sm:$0x1] }
 0x3d2   :  { %vm1051_vm11 = vmor %vm1049_vm10, %vm1050_vm9 }
 0x3d3   :  { %1282 = vmatpush.msrb.mxu1 %v4068_v5  ;;  %v1045_v57 = vmul.f32 %v3347_v44, %v1044_v28  ;;  %1264 = vmatpush.msrb.mxu0 %v4091_v8  ;;  %v3341_v28 = vld [vmem:[%s5519_s7] ss:$0 sm:$0xff] }
 0x3d5   :  { %1283 = vmatpush.msrb.mxu1 %v4082_v7  ;;  %v1046_v59 = vmul.f32 0.5, %v1045_v57  ;;  %1265 = vmatpush.msrb.mxu0 %v4105_v35 }
 0x3d7   :  { %1284 = vmatpush.msrb.mxu1 %v4096_v9  ;;  %v1047_v26 = vsub.f32 1.5, %v1046_v59  ;;  %1266 = vmatpush.msrb.mxu0 %v5553_v52  ;;  %v1118_v59 = vadd.f32 1.0, %v1090_v39  ;;  %v3127_v39 = vld [vmem:[%s5521_s9 + $0x1a0] sm:$0xf] }
 0x3d9   :  { %1285 = vmatpush.msrb.mxu1 %v4110_v36  ;;  %v1048_v42 = vmul.f32 %v3347_v44, %v1047_v26  ;;  %1267 = vmatpush.msrb.mxu0 %v5555_v54 }
 0x3db   :  { %1286 = vmatpush.msrb.mxu1 %v5554_v53  ;;  %v1052_v50 = vsel %vm1051_vm11, %v3347_v44, %v1048_v42  ;;  %v1115_v42 = vadd.f32 %v3341_v28, %v4348_v49  ;;  %v3301_v49 = vld [vmem:[%s5521_s9 + $0xcc] sm:$0xf0] }
 0x3dc   :  { %v1054_v58 = vmul.f32 %v1053_v48, %v1052_v50 }
 0x3dd   :  { %1287 = vmatpush.msrb.mxu1 %v5556_v56 }
 0x3de   :  { %v1056_v47 = vmul.f32 %v1054_v58, %v4329_v40  ;;  %v1058_v43 = vperm.slane %v1054_v58, 0  ;;  %v3016_v58 = vor.u32 %v3301_v49, %v3015_v55  ;;  %v1200_v49 = vld [vmem:[%s5514_s14 + $0x5] sm:$0x1] }
 0x3e0   :  { %v1057_v37 = vsub.f32 %v1055_v51, %v1056_v47  ;;  %v1059_v41 = vmul.f32 %v1058_v43, %v4325_v46  ;;  %v3333_v51 = vld [vmem:[%s5521_s9 + $0x1cc] sm:$0xf0]  ;;  %v2999_v43 = vld [vmem:[%s5521_s9 + $0xa0] sm:$0xf] }
 0x3e1   :  { %v3144_v47 = vor.u32 %v3333_v51, %v3143_v45  ;;  %v3291_v45 = vld [vmem:[%s5521_s9 + $0x84] sm:$0xf] }
 0x3e2   :  { %v1060_v44 = vperm.slane %v1057_v37, 0  ;;  %v3297_v37 = vld [vmem:[%s5521_s9 + $0xac] sm:$0xf0] }
 0x3e4   :  { %v1061_v57 = vadd.f32 %v1060_v44, %v1059_v41  ;;  %v3000_v41 = vor.u32 %v3297_v37, %v2999_v43  ;;  %v3329_v44 = vld [vmem:[%s5521_s9 + $0x1ac] sm:$0xf0]  ;;  %v3323_v43 = vld [vmem:[%s5521_s9 + $0x184] sm:$0xf]  ;;  %v3113_v37 = vld [vmem:[%s5521_s9 + $0x190] sm:$0xf0] }
 0x3e5   :  { %v3128_v28 = vor.u32 %v3329_v44, %v3127_v39  ;;  %v3287_v44 = vld [vmem:[%s5521_s9 + $0x64] sm:$0xf] }
 0x3e6   :  { %v1062_v26 = vmax.f32 %v1061_v57, 0.0  ;;  %v2983_v57 = vld [vmem:[%s5521_s9 + $0x80] sm:$0xf] }
 0x3e8   :  { %v1119_v48 = vmul.f32 %v1118_v59, %v1062_v26  ;;  %v3293_v59 = vld [vmem:[%s5521_s9 + $0x8c] sm:$0xf0]  ;;  %v3111_v26 = vld [vmem:[%s5521_s9 + $0x180] sm:$0xf] }
 0x3ea   :  { %v1120_v50 = vadd.f32 %v1119_v48, %v1115_v42  ;;  %v3325_v42 = vld [vmem:[%s5521_s9 + $0x18c] sm:$0xf0] }
 0x3ec   :  { %v1121_v56 = vpack.c.bf16 %v1120_v50, %v1120_v50 }
 0x3ee   :  { %2909 = vmatmul.msk.bf16.vlgmr.msra.gmra.mxu0 %vm649_vm1, %v1121_v56  ;;  %2910 = vmatmul.msk.bf16.vlgmr.msra.gmra.mxu1 %vm649_vm1, %v1121_v56 }
 0x3ef   :  { %1298 = vmatpush.msra.mxu0 %v3835_v10  ;;  %1318 = vmatpush.msra.mxu1 %v3892_v15  ;;  %v5557_v10 = vld [vmem:[#allocation2_spill] sm:$0xff] }
 0x3f1   :  { %1299 = vmatpush.msra.mxu0 %v3841_v11  ;;  %1319 = vmatpush.msra.mxu1 %v3904_v17  ;;  %v5558_v11 = vld [vmem:[#allocation4_spill] sm:$0xff] }
 0x3f3   :  { %1300 = vmatpush.msra.mxu0 %v3849_v12  ;;  %1320 = vmatpush.msra.mxu1 %v3916_v19  ;;  %v5559_v12 = vld [vmem:[#allocation3_spill] sm:$0xff] }
 0x3f5   :  { %1301 = vmatpush.msra.mxu0 %v3856_v13  ;;  %1321 = vmatpush.msra.mxu1 %v3928_v21  ;;  %v5560_v13 = vld [vmem:[#allocation5_spill] sm:$0xff] }
 0x3f7   :  { %1302 = vmatpush.msra.mxu0 %v3862_v61  ;;  %1322 = vmatpush.msra.mxu1 %v3938_v23 }
 0x3f9   :  { %1303 = vmatpush.msra.mxu0 %v3868_v62  ;;  %1323 = vmatpush.msra.mxu1 %v3952_v25 }
 0x3fb   :  { %1304 = vmatpush.msra.mxu0 %v3874_v63  ;;  %1324 = vmatpush.msra.mxu1 %v3962_v27 }
 0x3fd   :  { %1305 = vmatpush.msra.mxu0 %v3880_v3  ;;  %1325 = vmatpush.msra.mxu1 %v3974_v29 }
 0x3ff   :  { %1306 = vmatpush.msra.mxu0 %v3887_v14  ;;  %1326 = vmatpush.msra.mxu1 %v3981_v30  ;;  %v5561_v14 = vld [vmem:[#allocation9_spill] sm:$0xff] }
 0x401   :  { %1307 = vmatpush.msra.mxu0 %v3899_v16  ;;  %1327 = vmatpush.msra.mxu1 %v3988_v31 }
 0x403   :  { %1308 = vmatpush.msra.mxu0 %v3911_v18  ;;  %1328 = vmatpush.msra.mxu1 %v3995_v32 }
 0x405   :  { %1309 = vmatpush.msra.mxu0 %v3921_v20  ;;  %1329 = vmatpush.msra.mxu1 %v4001_v33 }
 0x407   :  { %1310 = vmatpush.msra.mxu0 %v3933_v22  ;;  %1330 = vmatpush.msra.mxu1 %v4006_v34 }
 0x409   :  { %1311 = vmatpush.msra.mxu0 %v3947_v24  ;;  %1331 = vmatpush.msra.mxu1 %v4013_v38 }
 0x40b   :  { %1312 = vmatpush.msra.mxu0 %v5557_v10  ;;  %1332 = vmatpush.msra.mxu1 %v5558_v11  ;;  %v2984_v10 = vor.u32 %v3293_v59, %v2983_v57  ;;  %v3112_v11 = vor.u32 %v3325_v42, %v3111_v26  ;;  %v3319_v57 = vld [vmem:[%s5521_s9 + $0x164] sm:$0xf]  ;;  %v3097_v59 = vld [vmem:[%s5521_s9 + $0x170] sm:$0xf0] }
 0x40c   :  { %v3100_v42 = vor.u32 %v3319_v57, %v3097_v59  ;;  %v3137_v57 = vld [vmem:[%s5521_s9 + $0x1b8] sm:$0xf0] }
 0x40d   :  { %1313 = vmatpush.msra.mxu0 %v5559_v12  ;;  %1333 = vmatpush.msra.mxu1 %v5560_v13  ;;  %v2967_v12 = vld [vmem:[%s5521_s9 + $0x60] sm:$0xf]  ;;  %v3289_v13 = vld [vmem:[%s5521_s9 + $0x6c] sm:$0xf0] }
 0x46b   :  { %v4452_v61 = vpop.f32.mrf.mxu0  ;;  %v4454_v62 = vpop.f32.mrf.mxu1 }
 0x46c   :  { %1217 = vmatmul.f32.vlgmr.msrb.gmra.mxu2 %v4452_v61  ;;  %1237 = vmatmul.f32.vlgmr.msrb.gmra.mxu3 %v4454_v62 }
 0x46d   :  { %1414 = vmatpush.msrb.mxu2 %v4037_v60  ;;  %1434 = vmatpush.msrb.mxu3 %v4042_v0 }
 0x46f   :  { %1415 = vmatpush.msrb.mxu2 %v4049_v1  ;;  %1435 = vmatpush.msrb.mxu3 %v4054_v2 }
 0x471   :  { %1416 = vmatpush.msrb.mxu2 %v4063_v4  ;;  %1436 = vmatpush.msrb.mxu3 %v4068_v5 }
 0x473   :  { %v1184_v63 = vpop.f32.mrf.mxu0  ;;  %v1197_v3 = vpop.f32.mrf.mxu1  ;;  %1417 = vmatpush.msrb.mxu2 %v4077_v6  ;;  %1437 = vmatpush.msrb.mxu3 %v4082_v7 }
 0x474   :  { %v3095_v3 = vld [vmem:[%s5521_s9 + $0x160] sm:$0xf] }
 0x475   :  { %1418 = vmatpush.msrb.mxu2 %v4091_v8  ;;  %1438 = vmatpush.msrb.mxu3 %v4096_v9 }
 0x477   :  { %1419 = vmatpush.msrb.mxu2 %v4105_v35  ;;  %1439 = vmatpush.msrb.mxu3 %v4110_v36  ;;  %v3031_v35 = vld [vmem:[%s5521_s9 + $0xe0] sm:$0xf]  ;;  %v3305_v36 = vld [vmem:[%s5521_s9 + $0xec] sm:$0xf0] }
 0x479   :  { %1420 = vmatpush.msrb.mxu2 %v5553_v52  ;;  %1440 = vmatpush.msrb.mxu3 %v5554_v53  ;;  %v3032_v52 = vor.u32 %v3305_v36, %v3031_v35  ;;  %v3159_v53 = vld [vmem:[%s5521_s9 + $0x1e0] sm:$0xf] }
 0x47b   :  { %1421 = vmatpush.msrb.mxu2 %v5555_v54  ;;  %1441 = vmatpush.msrb.mxu3 %v5561_v14  ;;  %v3337_v54 = vld [vmem:[%s5521_s9 + $0x1ec] sm:$0xf0] }
 0x47c   :  { %v3160_v46 = vor.u32 %v3337_v54, %v3159_v53  ;;  %v3321_v14 = vld [vmem:[%s5521_s9 + $0x16c] sm:$0xf0]  ;;  %v3001_v54 = vld [vmem:[%s5521_s9 + $0xb0] sm:$0xf0] }
 0x4ef   :  { %v1218_v15 = vpop.f32.mrf.mxu2  ;;  %v1238_v16 = vpop.f32.mrf.mxu3 }
 0x4f0   :  { %v1239_v17 = vadd.f32 %v1238_v16, %v1218_v15  ;;  %v2968_v16 = vor.u32 %v3289_v13, %v2967_v12 }
 0x4f2   :  { %v1241_v18 = vsel %vm640_vm0, %v1239_v17, 0.0  ;;  %v3096_v17 = vor.u32 %v3321_v14, %v3095_v3  ;;  %v2937_v3 = vld [vmem:[%s5521_s9 + $0x30] sm:$0xf0]  ;;  %v3311_v14 = vld [vmem:[%s5521_s9 + $0x124] sm:$0xf] }
 0x4f3   :  { %v1242_v19 = vrot.slane %v1241_v18, 4 }
 0x4f5   :  { %v1243_v20 = vadd.f32 %v1242_v19, %v1241_v18  ;;  %v2951_v18 = vld [vmem:[%s5521_s9 + $0x40] sm:$0xf]  ;;  %v3285_v19 = vld [vmem:[%s5521_s9 + $0x4c] sm:$0xf0] }
 0x4f7   :  { %v1244_v21 = vrot.slane %v1243_v20, 2 }
 0x4f9   :  { %v1245_v22 = vadd.f32 %v1244_v21, %v1243_v20  ;;  %v3303_v21 = vld [vmem:[%s5521_s9 + $0xe4] sm:$0xf] }
 0x4fb   :  { %v1246_v23 = vrot.slane %v1245_v22, 1 }
 0x4fd   :  { %v1247_v24 = vadd.f32 %v1246_v23, %v1245_v22  ;;  %v3033_v22 = vld [vmem:[%s5521_s9 + $0xf0] sm:$0xf0]  ;;  %v3335_v23 = vld [vmem:[%s5521_s9 + $0x1e4] sm:$0xf] }
 0x4ff   :  { %v4475_v25 = vmul.f32 0.125, %v1247_v24  ;;  %v3161_v24 = vld [vmem:[%s5521_s9 + $0x1f0] sm:$0xf0] }
 0x501   :  { %2911 = vmatmul.msk.f32.vlgmr.msrb.gmra.mxu0 %vm649_vm1, %v4475_v25  ;;  %2912 = vmatmul.msk.f32.vlgmr.msrb.gmra.mxu1 %vm649_vm1, %v4475_v25 }
 0x502   :  { %1844 = vmatpush.bf16.msrb.mxu0 %v3032_v52  ;;  %1857 = vmatpush.bf16.msrb.mxu1 %v3160_v46  ;;  %v3295_v52 = vld [vmem:[%s5521_s9 + $0xa4] sm:$0xf]  ;;  %v3129_v46 = vld [vmem:[%s5521_s9 + $0x1b0] sm:$0xf0] }
 0x506   :  { %1845 = vmatpush.bf16.msrb.mxu0 %v3016_v58  ;;  %1858 = vmatpush.bf16.msrb.mxu1 %v3144_v47  ;;  %v2985_v47 = vld [vmem:[%s5521_s9 + $0x90] sm:$0xf0] }
 0x507   :  { %v2988_v39 = vor.u32 %v3291_v45, %v2985_v47  ;;  %v3298_v45 = vld [vmem:[%s5521_s9 + $0xb4] sm:$0xf0] }
 0x50a   :  { %1846 = vmatpush.bf16.msrb.mxu0 %v3000_v41  ;;  %1859 = vmatpush.bf16.msrb.mxu1 %v3128_v28  ;;  %v3116_v41 = vor.u32 %v3323_v43, %v3113_v37  ;;  %v2969_v28 = vld [vmem:[%s5521_s9 + $0x70] sm:$0xf0]  ;;  %v3330_v43 = vld [vmem:[%s5521_s9 + $0x1b4] sm:$0xf0]  ;;  %v3296_v37 = vld [vmem:[%s5521_s9 + $0xac] sm:$0xf] }
 0x50b   :  { %v2972_v26 = vor.u32 %v3287_v44, %v2969_v28  ;;  %v3328_v28 = vld [vmem:[%s5521_s9 + $0x1ac] sm:$0xf] }
 0x50c   :  { %v3140_v59 = vor.u32 %v3328_v28, %v3137_v57 }
 0x50e   :  { %1847 = vmatpush.bf16.msrb.mxu0 %v2984_v10  ;;  %1860 = vmatpush.bf16.msrb.mxu1 %v3112_v11  ;;  %v3315_v10 = vld [vmem:[%s5521_s9 + $0x144] sm:$0xf]  ;;  %v3081_v11 = vld [vmem:[%s5521_s9 + $0x150] sm:$0xf0] }
 0x50f   :  { %v3084_v13 = vor.u32 %v3315_v10, %v3081_v11  ;;  %v3326_v10 = vld [vmem:[%s5521_s9 + $0x194] sm:$0xf0]  ;;  %v3292_v11 = vld [vmem:[%s5521_s9 + $0x8c] sm:$0xf] }
 0x512   :  { %1848 = vmatpush.bf16.msrb.mxu0 %v2968_v16  ;;  %1861 = vmatpush.bf16.msrb.mxu1 %v3096_v17 }
 0x57e   :  { %v1269_v27 = vpop.f32.mrf.mxu0  ;;  %v1289_v29 = vpop.f32.mrf.mxu1 }
 0x57f   :  { %v1292_v30 = vperm.slane %v1269_v27, 0  ;;  %v1293_v31 = vperm.slane %v1289_v29, 0  ;;  %v1199_v27 = vld [vmem:[%s5514_s14 + $0x4] sm:$0x1] }
 0x581   :  { %v1294_v32 = vsub.f32 %v4452_v61, %v1292_v30  ;;  %v1295_v33 = vsub.f32 %v4454_v62, %v1293_v31  ;;  %v2952_v30 = vor.u32 %v3285_v19, %v2951_v18  ;;  %v3079_v31 = vld [vmem:[%s5521_s9 + $0x140] sm:$0xf]  ;;  %v3277_v19 = vld [vmem:[%s5521_s9 + $0xc] sm:$0xf0] }
 0x582   :  { %v2919_v18 = vld [vmem:[%s5521_s9] sm:$0xf] }
 0x583   :  { %v1296_v34 = vmul.f32 %v1294_v32, %v1294_v32  ;;  %v1297_v38 = vmul.f32 %v1295_v33, %v1295_v33  ;;  %v3317_v32 = vld [vmem:[%s5521_s9 + $0x14c] sm:$0xf0]  ;;  %v2935_v33 = vld [vmem:[%s5521_s9 + $0x20] sm:$0xf]  ;;  %1849 = vmatpush.bf16.msrb.mxu0 %v2952_v30  ;;  %v3307_v30 = vld [vmem:[%s5521_s9 + $0x104] sm:$0xf] }
 0x585   :  { %1314 = vmatmul.f32.vlgmr.msra.gmra.mxu0 %v1296_v34  ;;  %1334 = vmatmul.f32.vlgmr.msra.gmra.mxu1 %v1297_v38  ;;  %v3281_v34 = vld [vmem:[%s5521_s9 + $0x2c] sm:$0xf0] }
 0x602   :  { %v1315_v40 = vpop.f32.mrf.mxu0  ;;  %v1335_v60 = vpop.f32.mrf.mxu1 }
 0x603   :  { %v1336_v0 = vadd.f32 %v1335_v60, %v1315_v40  ;;  %v3036_v40 = vor.u32 %v3303_v21, %v3033_v22  ;;  %v3164_v60 = vor.u32 %v3335_v23, %v3161_v24  ;;  %v2920_v21 = vor.u32 %v3277_v19, %v2919_v18  ;;  %v3309_v22 = vld [vmem:[%s5521_s9 + $0x10c] sm:$0xf0]  ;;  %v3275_v23 = vld [vmem:[%s5521_s9 + $0x4] sm:$0xf]  ;;  %v2921_v24 = vld [vmem:[%s5521_s9 + $0x10] sm:$0xf0] }
 0x604   :  { %v3103_v18 = vld [vmem:[%s5521_s9 + $0x168] sm:$0xf] }
 0x605   :  { %v1338_v1 = vsel %vm640_vm0, %v1336_v0, 0.0  ;;  %v3299_v0 = vld [vmem:[%s5521_s9 + $0xc4] sm:$0xf]  ;;  %vm2119_vm0 = vcmask 261120  }
 0x606   :  { %v1339_v2 = vrot.slane %v1338_v1, 4 }
 0x608   :  { %v1340_v4 = vadd.f32 %v1339_v2, %v1338_v1  ;;  %v3017_v2 = vld [vmem:[%s5521_s9 + $0xd0] sm:$0xf0] }
 0x609   :  { %v3020_v35 = vor.u32 %v3299_v0, %v3017_v2  ;;  %v3041_v2 = vld [vmem:[%s5521_s9 + $0xf8] sm:$0xf0] }
 0x60a   :  { %v1341_v5 = vrot.slane %v1340_v4, 2 }
 0x60c   :  { %v1342_v6 = vadd.f32 %v1341_v5, %v1340_v4  ;;  %v3331_v4 = vld [vmem:[%s5521_s9 + $0x1c4] sm:$0xf]  ;;  %v3145_v5 = vld [vmem:[%s5521_s9 + $0x1d0] sm:$0xf0] }
 0x60d   :  { %v3148_v36 = vor.u32 %v3331_v4, %v3145_v5  ;;  %v3336_v4 = vld [vmem:[%s5521_s9 + $0x1ec] sm:$0xf] }
 0x60e   :  { %v1343_v7 = vrot.slane %v1342_v6, 1 }
 0x610   :  { %v1344_v8 = vadd.f32 %v1343_v7, %v1342_v6  ;;  %v3080_v6 = vor.u32 %v3317_v32, %v3079_v31  ;;  %v2936_v7 = vor.u32 %v3281_v34, %v2935_v33  ;;  %v3049_v31 = vld [vmem:[%s5521_s9 + $0x110] sm:$0xf0]  ;;  %v3039_v32 = vld [vmem:[%s5521_s9 + $0xe8] sm:$0xf]  ;;  %v3306_v34 = vld [vmem:[%s5521_s9 + $0xf4] sm:$0xf0] }
 0x611   :  { %v3052_v33 = vor.u32 %v3307_v30, %v3049_v31  ;;  %v2959_v30 = vld [vmem:[%s5521_s9 + $0x48] sm:$0xf] }
 0x612   :  { %v1345_v9 = vmul.f32 0.125, %v1344_v8  ;;  %v3063_v8 = vld [vmem:[%s5521_s9 + $0x120] sm:$0xf]  ;;  %1862 = vmatpush.bf16.msrb.mxu1 %v3080_v6  ;;  %1850 = vmatpush.bf16.msrb.mxu0 %v2936_v7  ;;  %v3169_v6 = vld [vmem:[%s5521_s9 + $0x1f8] sm:$0xf0] }
 0x613   :  { %v3023_v7 = vld [vmem:[%s5521_s9 + $0xc8] sm:$0xf] }
 0x614   :  { %v1346_v56 = vadd.f32 1e-05, %v1345_v9  ;;  %v3313_v9 = vld [vmem:[%s5521_s9 + $0x12c] sm:$0xf0] }
 0x615   :  { %v3064_v55 = vor.u32 %v3313_v9, %v3063_v8  ;;  %v3302_v8 = vld [vmem:[%s5521_s9 + $0xd4] sm:$0xf0]  ;;  %v3172_v9 = vor.u32 %v3336_v4, %v3169_v6  ;;  %v2943_v4 = vld [vmem:[%s5521_s9 + $0x28] sm:$0xf] }
 0x616   :  { %3348 = vrsqrt.f32 %v1346_v56  ;;  %vm1353_vm13 = vweird.f32 %v1346_v56  ;;  %1851 = vmatpush.bf16.msrb.mxu0 %v2920_v21  ;;  %v3288_v21 = vld [vmem:[%s5521_s9 + $0x6c] sm:$0xf]  ;;  %v3282_v6 = vld [vmem:[%s5521_s9 + $0x34] sm:$0xf0] }
 0x617   :  { %1863 = vmatpush.bf16.msrb.mxu1 %v3064_v55  ;;  %v3153_v55 = vld [vmem:[%s5521_s9 + $0x1d8] sm:$0xf0] }
 0x61c   :  { %v3349_v48 = vpop.eup %3348 }
 0x61d   :  { %v1348_v50 = vmul.f32 %v3349_v48, %v1346_v56  ;;  %vm1354_vm12 = vweird.f32 %v3349_v48  ;;  %v3327_v56 = vld [vmem:[%s5521_s9 + $0x1a4] sm:$0xf] }
 0x61e   :  { %vm1355_vm14 = vmor %vm1353_vm13, %vm1354_vm12  ;;  %v3132_v58 = vor.u32 %v3327_v56, %v3129_v46  ;;  %v3025_v56 = vld [vmem:[%s5521_s9 + $0xd8] sm:$0xf0]  ;;  %v3332_v46 = vld [vmem:[%s5521_s9 + $0x1cc] sm:$0xf] }
 0x61f   :  { %v1349_v63 = vmul.f32 %v3349_v48, %v1348_v50  ;;  %v2953_v50 = vld [vmem:[%s5521_s9 + $0x50] sm:$0xf0] }
 0x621   :  { %v1350_v15 = vmul.f32 0.5, %v1349_v63  ;;  %v3279_v63 = vld [vmem:[%s5521_s9 + $0x24] sm:$0xf] }
 0x622   :  { %v2940_v16 = vor.u32 %v3279_v63, %v2937_v3  ;;  %v3324_v3 = vld [vmem:[%s5521_s9 + $0x18c] sm:$0xf] }
 0x623   :  { %v1351_v20 = vsub.f32 1.5, %v1350_v15  ;;  %v3065_v15 = vld [vmem:[%s5521_s9 + $0x130] sm:$0xf0] }
 0x624   :  { %v3068_v17 = vor.u32 %v3311_v14, %v3065_v15  ;;  %v3121_v14 = vld [vmem:[%s5521_s9 + $0x198] sm:$0xf0] }
 0x625   :  { %v1352_v29 = vmul.f32 %v3349_v48, %v1351_v20  ;;  %v3047_v20 = vld [vmem:[%s5521_s9 + $0x100] sm:$0xf]  ;;  %v3124_v15 = vor.u32 %v3324_v3, %v3121_v14 }
 0x627   :  { %v1356_v38 = vsel %vm1355_vm14, %v3349_v48, %v1352_v29  ;;  %v3283_v48 = vld [vmem:[%s5521_s9 + $0x44] sm:$0xf]  ;;  %v2924_v29 = vor.u32 %v3275_v23, %v2921_v24 }
 0x628   :  { %v1357_v1 = vmul.f32 %v1356_v38, %v1199_v27  ;;  %v2956_v12 = vor.u32 %v3283_v48, %v2953_v50  ;;  %v3048_v27 = vor.u32 %v3309_v22, %v3047_v20  ;;  %v3167_v38 = vld [vmem:[%s5521_s9 + $0x1e8] sm:$0xf]  ;;  %v3322_v20 = vld [vmem:[%s5521_s9 + $0x174] sm:$0xf0]  ;;  %v2977_v22 = vld [vmem:[%s5521_s9 + $0x78] sm:$0xf0] }
 0x629   :  { %v3119_v48 = vld [vmem:[%s5521_s9 + $0x188] sm:$0xf]  ;;  %v3104_v23 = vor.u32 %v3322_v20, %v3103_v18  ;;  %v2980_v24 = vor.u32 %v3288_v21, %v2977_v22  ;;  %v5563_v18 = vld [vmem:[#allocation11_spill] sm:$0xff]  ;;  %v4886_v22 = vld [vmem:[%s5522_s12 + $0x78] sm:$0xff] }
 0x62a   :  { %2913 = vmatmul.msk.f32.vlgmr.msra.gmra.mxu2 %vm649_vm1, %v1357_v1  ;;  %2914 = vmatmul.msk.f32.vlgmr.msra.gmra.mxu3 %vm649_vm1, %v1357_v1  ;;  %v1358_v53 = vmul.f32 %v1357_v1, %v4475_v25  ;;  %v3004_v25 = vor.u32 %v3295_v52, %v3001_v54  ;;  %v3304_v1 = vld [vmem:[%s5521_s9 + $0xec] sm:$0xf]  ;;  %v3334_v52 = vld [vmem:[%s5521_s9 + $0x1d4] sm:$0xf0] }
 0x62b   :  { %1870 = vmatpush.bf16.msra.mxu2 %v3036_v40  ;;  %1883 = vmatpush.bf16.msra.mxu3 %v3164_v60  ;;  %v3338_v40 = vld [vmem:[%s5521_s9 + $0x1f4] sm:$0xf0]  ;;  %v3040_v60 = vor.u32 %v3306_v34, %v3039_v32  ;;  %v3044_v5 = vor.u32 %v3304_v1, %v3041_v2  ;;  %v3089_v2 = vld [vmem:[%s5521_s9 + $0x158] sm:$0xf0] }
 0x62c   :  { %v1359_v51 = vsub.f32 %v1200_v49, %v1358_v53  ;;  %1864 = vmatpush.bf16.msrb.mxu1 %v3048_v27  ;;  %v3168_v0 = vor.u32 %v3338_v40, %v3167_v38  ;;  %v3300_v53 = vld [vmem:[%s5521_s9 + $0xcc] sm:$0xf]  ;;  %v3286_v32 = vld [vmem:[%s5521_s9 + $0x54] sm:$0xf0]  ;;  %v2961_v40 = vld [vmem:[%s5521_s9 + $0x58] sm:$0xf0] }
 0x62d   :  { %1896 = vmatpush.bf16.msra.mxu0 %v3040_v60  ;;  %v3028_v49 = vor.u32 %v3300_v53, %v3025_v56  ;;  %v3320_v27 = vld [vmem:[%s5521_s9 + $0x16c] sm:$0xf]  ;;  %v3318_v34 = vld [vmem:[%s5521_s9 + $0x154] sm:$0xf0]  ;;  %v3073_v53 = vld [vmem:[%s5521_s9 + $0x138] sm:$0xf0] }
 0x62e   :  { %v3284_v38 = vld [vmem:[%s5521_s9 + $0x4c] sm:$0xf] }
 0x62f   :  { %1871 = vmatpush.bf16.msra.mxu2 %v3020_v35  ;;  %1884 = vmatpush.bf16.msra.mxu3 %v3148_v36  ;;  %v3024_v35 = vor.u32 %v3302_v8, %v3023_v7  ;;  %v3151_v36 = vld [vmem:[%s5521_s9 + $0x1c8] sm:$0xf]  ;;  %v3316_v60 = vld [vmem:[%s5521_s9 + $0x14c] sm:$0xf]  ;;  %v3314_v8 = vld [vmem:[%s5521_s9 + $0x134] sm:$0xf0] }
 0x630   :  { %1909 = vmatpush.bf16.msra.mxu1 %v3168_v0  ;;  %v3152_v54 = vor.u32 %v3334_v52, %v3151_v36  ;;  %v2960_v0 = vor.u32 %v3286_v32, %v2959_v30  ;;  %v3071_v7 = vld [vmem:[%s5521_s9 + $0x128] sm:$0xf]  ;;  %v2945_v36 = vld [vmem:[%s5521_s9 + $0x38] sm:$0xf0]  ;;  %v3312_v52 = vld [vmem:[%s5521_s9 + $0x12c] sm:$0xf] }
 0x631   :  { %1897 = vmatpush.bf16.msra.mxu0 %v3024_v35  ;;  %v3280_v35 = vld [vmem:[%s5521_s9 + $0x2c] sm:$0xf]  ;;  %v3072_v56 = vor.u32 %v3314_v8, %v3071_v7  ;;  %v4923_v30 = vld [vmem:[%s5522_s12 + $0x1f0] sm:$0xff] }
 0x632   :  { %2915 = vmatmul.msk.f32.vlgmr.msrb.gmra.mxu2 %vm649_vm1, %v1359_v51  ;;  %2916 = vmatmul.msk.f32.vlgmr.msrb.gmra.mxu3 %vm649_vm1, %v1359_v51  ;;  %v3135_v51 = vld [vmem:[%s5521_s9 + $0x1a8] sm:$0xf] }
 0x633   :  { %1872 = vmatpush.bf16.msra.mxu2 %v3004_v25  ;;  %1885 = vmatpush.bf16.msra.mxu3 %v3132_v58  ;;  %v3156_v25 = vor.u32 %v3332_v46, %v3153_v55  ;;  %v3007_v58 = vld [vmem:[%s5521_s9 + $0xa8] sm:$0xf]  ;;  %v2948_v55 = vor.u32 %v3280_v35, %v2945_v36  ;;  %v5029_v35 = vld [vmem:[%s5522_s12 + $0xc0] sm:$0xff]  ;;  %v5034_v36 = vld [vmem:[%s5522_s12 + $0x38] sm:$0xff] }
 0x634   :  { %1910 = vmatpush.bf16.msra.mxu1 %v3152_v54  ;;  %v3008_v47 = vor.u32 %v3298_v45, %v3007_v58  ;;  %v2944_v54 = vor.u32 %v3282_v6, %v2943_v4  ;;  %v2927_v46 = vld [vmem:[%s5521_s9 + $0x8] sm:$0xf]  ;;  %v3310_v58 = vld [vmem:[%s5521_s9 + $0x114] sm:$0xf0]  ;;  %v3076_v45 = vor.u32 %v3312_v52, %v3073_v53  ;;  %v4990_v4 = vld [vmem:[%s5522_s12 + $0x50] sm:$0xff] }
 0x635   :  { %v4933_v32 = vld [vmem:[%s5522_s12 + $0xe8] sm:$0xff]  ;;  %v5003_v6 = vld [vmem:[%s5522_s12 + $0x150] sm:$0xff]  ;;  %v5039_v52 = vld [vmem:[%s5522_s12 + $0xb8] sm:$0xff] }
 0x636   :  { %1898 = vmatpush.bf16.msra.mxu0 %v3008_v47  ;;  %v2929_v47 = vld [vmem:[%s5521_s9 + $0x18] sm:$0xf0]  ;;  %v5008_v7 = vld [vmem:[%s5522_s12 + $0x48] sm:$0xff]  ;;  %v5046_v53 = vld [vmem:[%s5522_s12 + $0x30] sm:$0xff] }
 0x637   :  { %1873 = vmatpush.bf16.msra.mxu2 %v2988_v39  ;;  %1886 = vmatpush.bf16.msra.mxu3 %v3116_v41  ;;  %v3009_v39 = vld [vmem:[%s5521_s9 + $0xb8] sm:$0xf0]  ;;  %v3136_v41 = vor.u32 %v3330_v43, %v3135_v51  ;;  %v3276_v51 = vld [vmem:[%s5521_s9 + $0xc] sm:$0xf] }
 0x638   :  { %v3012_v44 = vor.u32 %v3296_v37, %v3009_v39  ;;  %v3308_v43 = vld [vmem:[%s5521_s9 + $0x10c] sm:$0xf]  ;;  %v3057_v37 = vld [vmem:[%s5521_s9 + $0x118] sm:$0xf0]  ;;  %v2932_v57 = vor.u32 %v3276_v51, %v2929_v47  ;;  %v5107_v47 = vld [vmem:[%s5522_s12 + $0x1e0] sm:$0xff] }
 0x639   :  { %1911 = vmatpush.bf16.msra.mxu1 %v3136_v41  ;;  %v5013_v8 = vld [vmem:[%s5522_s12 + $0xc8] sm:$0xff] }
 0x63a   :  { %v5100_v51 = vld [vmem:[%s5522_s12 + $0x148] sm:$0xff] }
 0x63b   :  { %1874 = vmatpush.bf16.msra.mxu2 %v2972_v26  ;;  %1887 = vmatpush.bf16.msra.mxu3 %v3100_v42  ;;  %v2991_v26 = vld [vmem:[%s5521_s9 + $0x88] sm:$0xf]  ;;  %v3294_v42 = vld [vmem:[%s5521_s9 + $0x94] sm:$0xf0] }
 0x63c   :  { %v2992_v50 = vor.u32 %v3294_v42, %v2991_v26 }
 0x63e   :  { %1899 = vmatpush.bf16.msra.mxu0 %v2992_v50 }
 0x63f   :  { %1875 = vmatpush.bf16.msra.mxu2 %v2956_v12  ;;  %1888 = vmatpush.bf16.msra.mxu3 %v3084_v13  ;;  %v2993_v12 = vld [vmem:[%s5521_s9 + $0x98] sm:$0xf0]  ;;  %v3120_v13 = vor.u32 %v3326_v10, %v3119_v48 }
 0x640   :  { %v2996_v63 = vor.u32 %v3292_v11, %v2993_v12 }
 0x641   :  { %1912 = vmatpush.bf16.msra.mxu1 %v3120_v13 }
 0x643   :  { %1876 = vmatpush.bf16.msra.mxu2 %v2940_v16  ;;  %1889 = vmatpush.bf16.msra.mxu3 %v3068_v17  ;;  %v2975_v16 = vld [vmem:[%s5521_s9 + $0x68] sm:$0xf]  ;;  %v3290_v17 = vld [vmem:[%s5521_s9 + $0x74] sm:$0xf0] }
 0x644   :  { %v2976_v19 = vor.u32 %v3290_v17, %v2975_v16  ;;  %v5562_v16 = vld [vmem:[#allocation10_spill] sm:$0xff] }
 0x645   :  { %1913 = vmatpush.bf16.msra.mxu1 %v3104_v23  ;;  %v4901_v23 = vld [vmem:[%s5522_s12 + $0x1f8] sm:$0xff] }
 0x646   :  { %1900 = vmatpush.bf16.msra.mxu0 %v2976_v19 }
 0x647   :  { %1877 = vmatpush.bf16.msra.mxu2 %v2924_v29  ;;  %1890 = vmatpush.bf16.msra.mxu3 %v3052_v33  ;;  %v3105_v29 = vld [vmem:[%s5521_s9 + $0x178] sm:$0xf0]  ;;  %v3087_v33 = vld [vmem:[%s5521_s9 + $0x148] sm:$0xf] }
 0x648   :  { %v3108_v31 = vor.u32 %v3320_v27, %v3105_v29  ;;  %v3088_v1 = vor.u32 %v3318_v34, %v3087_v33  ;;  %v4911_v27 = vld [vmem:[%s5522_s12 + $0xf0] sm:$0xff]  ;;  %v4942_v33 = vld [vmem:[%s5522_s12 + $0x168] sm:$0xff] }
 0x649   :  { %v4918_v29 = vld [vmem:[%s5522_s12 + $0x170] sm:$0xff]  ;;  %v4947_v34 = vld [vmem:[%s5522_s12 + $0x1e8] sm:$0xff] }
 0x64a   :  { %1901 = vmatpush.bf16.msra.mxu0 %v2960_v0  ;;  %1914 = vmatpush.bf16.msra.mxu1 %v3088_v1  ;;  %v4971_v0 = vld [vmem:[%s5522_s12 + $0x58] sm:$0xff] }
 0x64b   :  { %1922 = vmatpush.bf16.msrb.mxu2 %v3044_v5  ;;  %1935 = vmatpush.bf16.msrb.mxu3 %v3172_v9  ;;  %v2964_v5 = vor.u32 %v3284_v38, %v2961_v40  ;;  %v3092_v9 = vor.u32 %v3316_v60, %v3089_v2  ;;  %v4952_v38 = vld [vmem:[%s5522_s12 + $0x60] sm:$0xff]  ;;  %v4976_v1 = vld [vmem:[%s5522_s12 + $0xd8] sm:$0xff] }
 0x64c   :  { %v4957_v40 = vld [vmem:[%s5522_s12 + $0xe0] sm:$0xff]  ;;  %v4985_v2 = vld [vmem:[%s5522_s12 + $0x158] sm:$0xff] }
 0x64d   :  { %v4966_v60 = vld [vmem:[%s5522_s12 + $0x160] sm:$0xff] }
 0x64e   :  { %1902 = vmatpush.bf16.msra.mxu0 %v2944_v54  ;;  %1915 = vmatpush.bf16.msra.mxu1 %v3072_v56  ;;  %v5051_v54 = vld [vmem:[%s5522_s12 + $0xb0] sm:$0xff]  ;;  %v5058_v56 = vld [vmem:[%s5522_s12 + $0x28] sm:$0xff] }
 0x64f   :  { %1923 = vmatpush.bf16.msrb.mxu2 %v3028_v49  ;;  %1936 = vmatpush.bf16.msrb.mxu3 %v3156_v25  ;;  %v3278_v49 = vld [vmem:[%s5521_s9 + $0x14] sm:$0xf0]  ;;  %v3055_v25 = vld [vmem:[%s5521_s9 + $0x108] sm:$0xf] }
 0x650   :  { %v2928_v39 = vor.u32 %v3278_v49, %v2927_v46  ;;  %v3056_v41 = vor.u32 %v3310_v58, %v3055_v25  ;;  %v5063_v46 = vld [vmem:[%s5522_s12 + $0xa8] sm:$0xff]  ;;  %v5077_v49 = vld [vmem:[%s5522_s12 + $0x18] sm:$0xff]  ;;  %v5083_v25 = vld [vmem:[%s5522_s12 + $0x10] sm:$0xff] }
 0x651   :  { %v5090_v58 = vld [vmem:[%s5522_s12 + $0x8] sm:$0xff] }
 0x652   :  { %1903 = vmatpush.bf16.msra.mxu0 %v2928_v39  ;;  %1916 = vmatpush.bf16.msra.mxu1 %v3056_v41  ;;  %v5124_v39 = vld [vmem:[%s5522_s12 + $0x140] sm:$0xff]  ;;  %v5129_v41 = vld [vmem:[%s5522_s12 + $0x1d8] sm:$0xff] }
 0x653   :  { %1924 = vmatpush.bf16.msrb.mxu2 %v3012_v44  ;;  %1937 = vmatpush.bf16.msrb.mxu3 %v3140_v59  ;;  %v3060_v59 = vor.u32 %v3308_v43, %v3057_v37  ;;  %v5112_v43 = vld [vmem:[%s5522_s12] sm:$0xff]  ;;  %v5117_v37 = vld [vmem:[%s5522_s12 + $0x98] sm:$0xff] }
 0x657   :  { %1925 = vmatpush.bf16.msrb.mxu2 %v2996_v63  ;;  %1938 = vmatpush.bf16.msrb.mxu3 %v3124_v15 }
 0x65b   :  { %1926 = vmatpush.bf16.msrb.mxu2 %v2980_v24  ;;  %1939 = vmatpush.bf16.msrb.mxu3 %v3108_v31  ;;  %v4906_v24 = vld [vmem:[%s5522_s12 + $0x70] sm:$0xff]  ;;  %v4928_v31 = vld [vmem:[%s5522_s12 + $0x68] sm:$0xff] }
 0x65f   :  { %1927 = vmatpush.bf16.msrb.mxu2 %v2964_v5  ;;  %1940 = vmatpush.bf16.msrb.mxu3 %v3092_v9  ;;  %v4995_v5 = vld [vmem:[%s5522_s12 + $0xd0] sm:$0xff]  ;;  %v5024_v9 = vld [vmem:[%s5522_s12 + $0x40] sm:$0xff] }
 0x663   :  { %1928 = vmatpush.bf16.msrb.mxu2 %v2948_v55  ;;  %1941 = vmatpush.bf16.msrb.mxu3 %v3076_v45  ;;  %v5070_v55 = vld [vmem:[%s5522_s12 + $0x20] sm:$0xff] }
 0x664   :  { %v5095_v45 = vld [vmem:[%s5522_s12 + $0xa0] sm:$0xff] }
 0x667   :  { %1929 = vmatpush.bf16.msrb.mxu2 %v2932_v57  ;;  %1942 = vmatpush.bf16.msrb.mxu3 %v3060_v59  ;;  %v5146_v57 = vld [vmem:[%s5522_s12 + $0x1d0] sm:$0xff]  ;;  %v5156_v59 = vld [vmem:[%s5522_s12 + $0x88] sm:$0xff] }
 0x6ad   :  { %v1380_v44 = vpop.f32.mrf.mxu2  ;;  %v1400_v28 = vpop.f32.mrf.mxu3 }
 0x6ae   :  { %v1446_v26 = vperm.slane %v1380_v44, 0  ;;  %v1447_v42 = vperm.slane %v1400_v28, 0  ;;  %v5136_v44 = vld [vmem:[%s5522_s12 + $0x90] sm:$0xff]  ;;  %v5141_v28 = vld [vmem:[%s5522_s12 + $0x138] sm:$0xff] }
 0x6b0   :  { %v1448_v10 = vmul.f32 %v1446_v26, %v4452_v61  ;;  %v1449_v11 = vmul.f32 %v1447_v42, %v4454_v62  ;;  %v4891_v61 = vld [vmem:[%s5522_s12 + $0xf8] sm:$0xff]  ;;  %v5161_v26 = vld [vmem:[%s5522_s12 + $0x130] sm:$0xff]  ;;  %v5166_v42 = vld [vmem:[%s5522_s12 + $0x1c8] sm:$0xff] }
 0x6b1   :  { %v4896_v62 = vld [vmem:[%s5522_s12 + $0x178] sm:$0xff] }
 0x6b5   :  { %v1423_v48 = vpop.f32.mrf.mxu2  ;;  %v1443_v50 = vpop.f32.mrf.mxu3 }
 0x6b6   :  { %v1450_v12 = vperm.slane %v1423_v48, 0  ;;  %v1451_v13 = vperm.slane %v1443_v50, 0  ;;  %v5174_v48 = vld [vmem:[%s5522_s12 + $0x80] sm:$0xff]  ;;  %v5179_v50 = vld [vmem:[%s5522_s12 + $0x128] sm:$0xff] }
 0x6b8   :  { %v1452_v63 = vadd.f32 %v1450_v12, %v1448_v10  ;;  %v1453_v3 = vadd.f32 %v1451_v13, %v1449_v11  ;;  %v5184_v10 = vld [vmem:[%s5522_s12 + $0x1c0] sm:$0xff]  ;;  %v5197_v12 = vld [vmem:[%s5522_s12 + $0x1b8] sm:$0xff] }
 0x6b9   :  { %v5192_v11 = vld [vmem:[%s5522_s12 + $0x120] sm:$0xff]  ;;  %v5202_v13 = vld [vmem:[%s5522_s12 + $0x118] sm:$0xff] }
 0x6ba   :  { %v1454_v14 = vmax.f32 %v1452_v63, 0.0  ;;  %v1455_v15 = vmax.f32 %v1453_v3, 0.0  ;;  %v5207_v63 = vld [vmem:[%s5522_s12 + $0x1b0] sm:$0xff] }
 0x6bb   :  { %v5216_v3 = vld [vmem:[%s5522_s12 + $0x110] sm:$0xff] }
 0x6bc   :  { %v1456_v17 = vadd.f32 %v1454_v14, %v5562_v16  ;;  %v1457_v19 = vadd.f32 %v1455_v15, %v5563_v18  ;;  %v5221_v14 = vld [vmem:[%s5522_s12 + $0x1a8] sm:$0xff]  ;;  %v5233_v16 = vld [vmem:[%s5522_s12 + $0x1a0] sm:$0xff]  ;;  %v5243_v18 = vld [vmem:[%s5522_s12 + $0x198] sm:$0xff] }
 0x6bd   :  { %v5228_v15 = vld [vmem:[%s5522_s12 + $0x108] sm:$0xff] }
 0x6be   :  { %v1458_v20 = vpack.c.bf16 %v1456_v17, %v1456_v17  ;;  %v1459_v21 = vpack.c.bf16 %v1457_v19, %v1457_v19  ;;  %v5238_v17 = vld [vmem:[%s5522_s12 + $0x100] sm:$0xff]  ;;  %v5250_v19 = vld [vmem:[%s5522_s12 + $0x190] sm:$0xff] }
 0x6bf   :  { %5564 = vst [vmem:[#allocation6_spill] sm:$0xff] %v5238_v17 }
 0x6c0   :  { %1852 = vmatmul.bf16.vlgmr.msrb.gmra.mxu0 %v1458_v20  ;;  %1865 = vmatmul.bf16.vlgmr.msrb.gmra.mxu1 %v1459_v21 }
 0x6c1   :  { %1878 = vmatmul.bf16.vlgmr.msra.gmra.mxu2 %v1458_v20  ;;  %1891 = vmatmul.bf16.vlgmr.msra.gmra.mxu3 %v1459_v21 }
 0x6c2   :  { %2030 = vmatpush.msrb.mxu0 %v4886_v22  ;;  %2050 = vmatpush.msrb.mxu1 %v4891_v61 }
 0x6c3   :  { %2070 = vmatpush.msra.mxu2 %v4896_v62  ;;  %2090 = vmatpush.msra.mxu3 %v4901_v23 }
 0x6c4   :  { %2031 = vmatpush.msrb.mxu0 %v4906_v24  ;;  %2051 = vmatpush.msrb.mxu1 %v4911_v27 }
 0x6c5   :  { %2071 = vmatpush.msra.mxu2 %v4918_v29  ;;  %2091 = vmatpush.msra.mxu3 %v4923_v30 }
 0x6c6   :  { %2032 = vmatpush.msrb.mxu0 %v4928_v31  ;;  %2052 = vmatpush.msrb.mxu1 %v4933_v32 }
 0x6c7   :  { %2072 = vmatpush.msra.mxu2 %v4942_v33  ;;  %2092 = vmatpush.msra.mxu3 %v4947_v34 }
 0x6c8   :  { %2033 = vmatpush.msrb.mxu0 %v4952_v38  ;;  %2053 = vmatpush.msrb.mxu1 %v4957_v40 }
 0x6c9   :  { %2073 = vmatpush.msra.mxu2 %v4966_v60  ;;  %2093 = vmatpush.msra.mxu3 %v5107_v47 }
 0x6ca   :  { %2034 = vmatpush.msrb.mxu0 %v4971_v0  ;;  %2054 = vmatpush.msrb.mxu1 %v4976_v1 }
 0x6cb   :  { %2074 = vmatpush.msra.mxu2 %v4985_v2  ;;  %2094 = vmatpush.msra.mxu3 %v5129_v41 }
 0x6cc   :  { %2035 = vmatpush.msrb.mxu0 %v4990_v4  ;;  %2055 = vmatpush.msrb.mxu1 %v4995_v5 }
 0x6cd   :  { %2075 = vmatpush.msra.mxu2 %v5003_v6  ;;  %2095 = vmatpush.msra.mxu3 %v5146_v57 }
 0x6ce   :  { %2036 = vmatpush.msrb.mxu0 %v5008_v7  ;;  %2056 = vmatpush.msrb.mxu1 %v5013_v8 }
 0x6cf   :  { %2076 = vmatpush.msra.mxu2 %v5100_v51  ;;  %2096 = vmatpush.msra.mxu3 %v5166_v42 }
 0x6d0   :  { %1904 = vmatmul.bf16.vlgmr.msra.gmra.mxu0 %v1458_v20  ;;  %1917 = vmatmul.bf16.vlgmr.msra.gmra.mxu1 %v1459_v21 }
 0x6d1   :  { %1930 = vmatmul.bf16.vlgmr.msrb.gmra.mxu2 %v1458_v20  ;;  %1943 = vmatmul.bf16.vlgmr.msrb.gmra.mxu3 %v1459_v21  ;;  %v5259_v20 = vld [vmem:[%s5522_s12 + $0x188] sm:$0xff]  ;;  %v5266_v21 = vld [vmem:[%s5522_s12 + $0x180] sm:$0xff] }
 0x6d2   :  { %2037 = vmatpush.msrb.mxu0 %v5024_v9  ;;  %2057 = vmatpush.msrb.mxu1 %v5029_v35 }
 0x6d3   :  { %2077 = vmatpush.msra.mxu2 %v5124_v39  ;;  %2097 = vmatpush.msra.mxu3 %v5184_v10 }
 0x6d4   :  { %2038 = vmatpush.msrb.mxu0 %v5034_v36  ;;  %2058 = vmatpush.msrb.mxu1 %v5039_v52 }
 0x6d5   :  { %2078 = vmatpush.msra.mxu2 %v5141_v28  ;;  %2098 = vmatpush.msra.mxu3 %v5197_v12 }
 0x6d6   :  { %2039 = vmatpush.msrb.mxu0 %v5046_v53  ;;  %2059 = vmatpush.msrb.mxu1 %v5051_v54 }
 0x6d7   :  { %2079 = vmatpush.msra.mxu2 %v5161_v26  ;;  %2099 = vmatpush.msra.mxu3 %v5207_v63 }
 0x6d8   :  { %2040 = vmatpush.msrb.mxu0 %v5058_v56  ;;  %2060 = vmatpush.msrb.mxu1 %v5063_v46 }
 0x6d9   :  { %2080 = vmatpush.msra.mxu2 %v5179_v50  ;;  %2100 = vmatpush.msra.mxu3 %v5221_v14 }
 0x6da   :  { %2041 = vmatpush.msrb.mxu0 %v5070_v55  ;;  %2061 = vmatpush.msrb.mxu1 %v5095_v45 }
 0x6db   :  { %2081 = vmatpush.msra.mxu2 %v5192_v11  ;;  %2101 = vmatpush.msra.mxu3 %v5233_v16 }
 0x6dc   :  { %2042 = vmatpush.msrb.mxu0 %v5077_v49  ;;  %2062 = vmatpush.msrb.mxu1 %v5117_v37 }
 0x6dd   :  { %2082 = vmatpush.msra.mxu2 %v5202_v13  ;;  %2102 = vmatpush.msra.mxu3 %v5243_v18 }
 0x6de   :  { %2043 = vmatpush.msrb.mxu0 %v5083_v25  ;;  %2063 = vmatpush.msrb.mxu1 %v5136_v44 }
 0x6df   :  { %2083 = vmatpush.msra.mxu2 %v5216_v3  ;;  %2103 = vmatpush.msra.mxu3 %v5250_v19 }
 0x6e0   :  { %2044 = vmatpush.msrb.mxu0 %v5090_v58  ;;  %2064 = vmatpush.msrb.mxu1 %v5156_v59 }
 0x6e1   :  { %2084 = vmatpush.msra.mxu2 %v5228_v15  ;;  %2104 = vmatpush.msra.mxu3 %v5259_v20 }
 0x6e2   :  { %2045 = vmatpush.msrb.mxu0 %v5112_v43  ;;  %2065 = vmatpush.msrb.mxu1 %v5174_v48 }
 0x6e3   :  { %2085 = vmatpush.msra.mxu2 %v5238_v17  ;;  %2105 = vmatpush.msra.mxu3 %v5266_v21 }
 0x6e5   :  { %2215 = vmatpush.msrb.mxu2 %v4886_v22  ;;  %2235 = vmatpush.msrb.mxu3 %v4891_v61 }
 0x6e7   :  { %2216 = vmatpush.msrb.mxu2 %v4906_v24  ;;  %2236 = vmatpush.msrb.mxu3 %v4911_v27 }
 0x6e9   :  { %2217 = vmatpush.msrb.mxu2 %v4928_v31  ;;  %2237 = vmatpush.msrb.mxu3 %v4933_v32 }
 0x6eb   :  { %2218 = vmatpush.msrb.mxu2 %v4952_v38  ;;  %2238 = vmatpush.msrb.mxu3 %v4957_v40 }
 0x6ed   :  { %2219 = vmatpush.msrb.mxu2 %v4971_v0  ;;  %2239 = vmatpush.msrb.mxu3 %v4976_v1 }
 0x6ef   :  { %2220 = vmatpush.msrb.mxu2 %v4990_v4  ;;  %2240 = vmatpush.msrb.mxu3 %v4995_v5 }
 0x6f1   :  { %2221 = vmatpush.msrb.mxu2 %v5008_v7  ;;  %2241 = vmatpush.msrb.mxu3 %v5013_v8 }
 0x6f3   :  { %2222 = vmatpush.msrb.mxu2 %v5024_v9  ;;  %2242 = vmatpush.msrb.mxu3 %v5029_v35 }
 0x6f5   :  { %2223 = vmatpush.msrb.mxu2 %v5034_v36  ;;  %2243 = vmatpush.msrb.mxu3 %v5039_v52 }
 0x6f7   :  { %2224 = vmatpush.msrb.mxu2 %v5046_v53  ;;  %2244 = vmatpush.msrb.mxu3 %v5051_v54  ;;  %v5314_v54 = vld [vmem:[%s5523_s13 + $0x60] sm:$0xff] }
 0x6f8   :  { %2135 = vmatpush.msra.mxu0 %v5314_v54 }
 0x6f9   :  { %2225 = vmatpush.msrb.mxu2 %v5058_v56  ;;  %2245 = vmatpush.msrb.mxu3 %v5063_v46  ;;  %v5319_v56 = vld [vmem:[%s5523_s13 + $0x68] sm:$0xff]  ;;  %v5326_v46 = vld [vmem:[%s5523_s13 + $0x40] sm:$0xff] }
 0x6fa   :  { %2155 = vmatpush.msra.mxu1 %v5319_v56  ;;  %2136 = vmatpush.msra.mxu0 %v5326_v46 }
 0x6fb   :  { %2226 = vmatpush.msrb.mxu2 %v5070_v55  ;;  %2246 = vmatpush.msrb.mxu3 %v5095_v45  ;;  %v5331_v55 = vld [vmem:[%s5523_s13 + $0x48] sm:$0xff] }
 0x6fc   :  { %2156 = vmatpush.msra.mxu1 %v5331_v55  ;;  %v5359_v45 = vld [vmem:[%s5523_s13 + $0x8] sm:$0xff] }
 0x6fd   :  { %2227 = vmatpush.msrb.mxu2 %v5077_v49  ;;  %2247 = vmatpush.msrb.mxu3 %v5117_v37  ;;  %v5340_v49 = vld [vmem:[%s5523_s13 + $0x20] sm:$0xff]  ;;  %5566 = vst [vmem:[#allocation8_spill] sm:$0xff] %v5359_v45  ;;  %v5373_v37 = vld [vmem:[%s5523_s13 + $0x78] sm:$0xff] }
 0x6fe   :  { %2137 = vmatpush.msra.mxu0 %v5340_v49 }
 0x6ff   :  { %2228 = vmatpush.msrb.mxu2 %v5083_v25  ;;  %2248 = vmatpush.msrb.mxu3 %v5136_v44  ;;  %v5345_v25 = vld [vmem:[%s5523_s13 + $0x28] sm:$0xff]  ;;  %v5378_v44 = vld [vmem:[%s5523_s13 + $0x50] sm:$0xff] }
 0x700   :  { %2157 = vmatpush.msra.mxu1 %v5345_v25 }
 0x701   :  { %2229 = vmatpush.msrb.mxu2 %v5090_v58  ;;  %2249 = vmatpush.msrb.mxu3 %v5156_v59  ;;  %v5354_v58 = vld [vmem:[%s5523_s13] sm:$0xff]  ;;  %v5387_v59 = vld [vmem:[%s5523_s13 + $0x58] sm:$0xff] }
 0x702   :  { %5565 = vst [vmem:[#allocation7_spill] sm:$0xff] %v5354_v58  ;;  %2138 = vmatpush.msra.mxu0 %v5354_v58  ;;  %2158 = vmatpush.msra.mxu1 %v5359_v45 }
 0x703   :  { %2230 = vmatpush.msrb.mxu2 %v5112_v43  ;;  %2250 = vmatpush.msrb.mxu3 %v5174_v48  ;;  %v5368_v43 = vld [vmem:[%s5523_s13 + $0x70] sm:$0xff] }
 0x704   :  { %v5392_v48 = vld [vmem:[%s5523_s13 + $0x30] sm:$0xff] }
 0x73d   :  { %v1853_v22 = vpop.f32.mrf.mxu0  ;;  %v1866_v24 = vpop.f32.mrf.mxu1 }
 0x73e   :  { %v5276_v17 = vadd.f32 %v1866_v24, %v1853_v22  ;;  %v5397_v22 = vld [vmem:[%s5523_s13 + $0x38] sm:$0xff]  ;;  %v5404_v24 = vld [vmem:[%s5523_s13 + $0x10] sm:$0xff] }
 0x740   :  { %2046 = vmatmul.f32.vlgmr.msrb.gmra.mxu0 %v5276_v17 }
 0x741   :  { %2175 = vmatpush.msrb.mxu0 %v5368_v43 }
 0x743   :  { %2176 = vmatpush.msrb.mxu0 %v5378_v44 }
 0x744   :  { %v1879_v61 = vpop.f32.mrf.mxu2  ;;  %v1892_v27 = vpop.f32.mrf.mxu3 }
 0x745   :  { %v5286_v31 = vadd.f32 %v1892_v27, %v1879_v61  ;;  %v1855_v32 = vpop.f32.mrf.mxu0  ;;  %v1868_v38 = vpop.f32.mrf.mxu1  ;;  %v5409_v61 = vld [vmem:[%s5523_s13 + $0x18] sm:$0xff]  ;;  %2177 = vmatpush.msrb.mxu0 %v5392_v48 }
 0x747   :  { %2066 = vmatmul.f32.vlgmr.msrb.gmra.mxu1 %v5286_v31  ;;  %2178 = vmatpush.msrb.mxu0 %v5404_v24 }
 0x748   :  { %2195 = vmatpush.msrb.mxu1 %v5373_v37 }
 0x74a   :  { %2196 = vmatpush.msrb.mxu1 %v5387_v59 }
 0x74c   :  { %v1881_v40 = vpop.f32.mrf.mxu2  ;;  %v1894_v0 = vpop.f32.mrf.mxu3  ;;  %2197 = vmatpush.msrb.mxu1 %v5397_v22 }
 0x74d   :  { %v1905_v1 = vpop.f32.mrf.mxu0  ;;  %v1918_v4 = vpop.f32.mrf.mxu1 }
 0x74e   :  { %v5298_v5 = vadd.f32 %v1918_v4, %v1905_v1  ;;  %2198 = vmatpush.msrb.mxu1 %v5409_v61 }
 0x750   :  { %2086 = vmatmul.f32.vlgmr.msra.gmra.mxu2 %v5298_v5 }
 0x751   :  { %2332 = vmatpush.msra.mxu2 %v5314_v54 }
 0x753   :  { %2333 = vmatpush.msra.mxu2 %v5326_v46 }
 0x754   :  { %v1931_v7 = vpop.f32.mrf.mxu2  ;;  %v1944_v8 = vpop.f32.mrf.mxu3 }
 0x755   :  { %v5307_v9 = vadd.f32 %v1944_v8, %v1931_v7  ;;  %v1907_v35 = vpop.f32.mrf.mxu0  ;;  %v1920_v36 = vpop.f32.mrf.mxu1  ;;  %2334 = vmatpush.msra.mxu2 %v5340_v49 }
 0x757   :  { %2106 = vmatmul.f32.vlgmr.msra.gmra.mxu3 %v5307_v9  ;;  %2335 = vmatpush.msra.mxu2 %v5354_v58 }
 0x758   :  { %2352 = vmatpush.msra.mxu3 %v5319_v56 }
 0x75a   :  { %2353 = vmatpush.msra.mxu3 %v5331_v55 }
 0x75c   :  { %v1933_v52 = vpop.f32.mrf.mxu2  ;;  %v1946_v53 = vpop.f32.mrf.mxu3  ;;  %2354 = vmatpush.msra.mxu3 %v5345_v25 }
 0x75e   :  { %2355 = vmatpush.msra.mxu3 %v5359_v45 }
 0x7bd   :  { %v2047_v32 = vpop.f32.mrf.mxu0 }
 0x7c4   :  { %v2067_v27 = vpop.f32.mrf.mxu1 }
 0x7c5   :  { %v2068_v40 = vadd.f32 %v2067_v27, %v2047_v32 }
 0x7d3   :  { %v2087_v38 = vpop.f32.mrf.mxu2 }
 0x7d4   :  { %v2088_v0 = vadd.f32 %v2087_v38, %v2068_v40 }
 0x7da   :  { %v2107_v1 = vpop.f32.mrf.mxu3 }
 0x7db   :  { %v2108_v4 = vadd.f32 %v2107_v1, %v2088_v0 }
 0x7dd   :  { %v2111_v7 = vsel %vm2110_vm15, %v2108_v4, 0.0 }
 0x7de   :  { %v2112_v8 = vrot.slane %v2111_v7, 4 }
 0x7e0   :  { %v2113_v35 = vadd.f32 %v2112_v8, %v2111_v7 }
 0x7e2   :  { %v2114_v36 = vrot.slane %v2113_v35, 2 }
 0x7e4   :  { %v2115_v52 = vadd.f32 %v2114_v36, %v2113_v35 }
 0x7e6   :  { %v2116_v53 = vrot.slane %v2115_v52, 1 }
 0x7e8   :  { %v2117_v45 = vadd.f32 %v2116_v53, %v2115_v52 }
 0x7ea   :  { %v5416_v58 = vmul.f32 0.03125, %v2117_v45 }
 0x7ec   :  { %3173 = vmatmul.msk.f32.vlgmr.msra.gmra.mxu0 %vm2119_vm0, %v5416_v58  ;;  %3174 = vmatmul.msk.f32.vlgmr.msra.gmra.mxu1 %vm2119_vm0, %v5416_v58 }
 0x7ed   :  { %2255 = vmatpush.msra.mxu0 %v4896_v62  ;;  %2275 = vmatpush.msra.mxu1 %v4901_v23  ;;  %v5567_v62 = vld [vmem:[#allocation6_spill] sm:$0xff] }
 0x7ef   :  { %2256 = vmatpush.msra.mxu0 %v4918_v29  ;;  %2276 = vmatpush.msra.mxu1 %v4923_v30 }
 0x7f1   :  { %2257 = vmatpush.msra.mxu0 %v4942_v33  ;;  %2277 = vmatpush.msra.mxu1 %v4947_v34 }
 0x7f3   :  { %2258 = vmatpush.msra.mxu0 %v4966_v60  ;;  %2278 = vmatpush.msra.mxu1 %v5107_v47 }
 0x7f4   :  { %3175 = vmatmul.msk.f32.vlgmr.msrb.gmra.mxu0 %vm2119_vm0, %v5416_v58  ;;  %3176 = vmatmul.msk.f32.vlgmr.msrb.gmra.mxu1 %vm2119_vm0, %v5416_v58 }
 0x7f5   :  { %2259 = vmatpush.msra.mxu0 %v4985_v2  ;;  %2279 = vmatpush.msra.mxu1 %v5129_v41 }
 0x7f7   :  { %2260 = vmatpush.msra.mxu0 %v5003_v6  ;;  %2280 = vmatpush.msra.mxu1 %v5146_v57 }
 0x7f9   :  { %2261 = vmatpush.msra.mxu0 %v5100_v51  ;;  %2281 = vmatpush.msra.mxu1 %v5166_v42 }
 0x7fb   :  { %2262 = vmatpush.msra.mxu0 %v5124_v39  ;;  %2282 = vmatpush.msra.mxu1 %v5184_v10  ;;  %v5569_v10 = vld [vmem:[#allocation8_spill] sm:$0xff] }
 0x7fd   :  { %2263 = vmatpush.msra.mxu0 %v5141_v28  ;;  %2283 = vmatpush.msra.mxu1 %v5197_v12 }
 0x7ff   :  { %2264 = vmatpush.msra.mxu0 %v5161_v26  ;;  %2284 = vmatpush.msra.mxu1 %v5207_v63 }
 0x801   :  { %2265 = vmatpush.msra.mxu0 %v5179_v50  ;;  %2285 = vmatpush.msra.mxu1 %v5221_v14  ;;  %v5568_v50 = vld [vmem:[#allocation7_spill] sm:$0xff] }
 0x803   :  { %2266 = vmatpush.msra.mxu0 %v5192_v11  ;;  %2286 = vmatpush.msra.mxu1 %v5233_v16 }
 0x805   :  { %2267 = vmatpush.msra.mxu0 %v5202_v13  ;;  %2287 = vmatpush.msra.mxu1 %v5243_v18 }
 0x807   :  { %2268 = vmatpush.msra.mxu0 %v5216_v3  ;;  %2288 = vmatpush.msra.mxu1 %v5250_v19 }
 0x809   :  { %2269 = vmatpush.msra.mxu0 %v5228_v15  ;;  %2289 = vmatpush.msra.mxu1 %v5259_v20 }
 0x80b   :  { %2270 = vmatpush.msra.mxu0 %v5567_v62  ;;  %2290 = vmatpush.msra.mxu1 %v5266_v21 }
 0x80d   :  { %2372 = vmatpush.msrb.mxu0 %v5368_v43  ;;  %2392 = vmatpush.msrb.mxu1 %v5373_v37 }
 0x80f   :  { %2373 = vmatpush.msrb.mxu0 %v5378_v44  ;;  %2393 = vmatpush.msrb.mxu1 %v5387_v59 }
 0x811   :  { %2374 = vmatpush.msrb.mxu0 %v5392_v48  ;;  %2394 = vmatpush.msrb.mxu1 %v5397_v22 }
 0x813   :  { %2375 = vmatpush.msrb.mxu0 %v5404_v24  ;;  %2395 = vmatpush.msrb.mxu1 %v5409_v61 }
 0x869   :  { %v2140_v23 = vpop.f32.mrf.mxu0  ;;  %v2160_v29 = vpop.f32.mrf.mxu1 }
 0x86a   :  { %v2203_v30 = vperm.slane %v2140_v23, 0  ;;  %v2204_v33 = vperm.slane %v2160_v29, 0 }
 0x86c   :  { %v2207_v34 = vsub.f32 %v5276_v17, %v2203_v30  ;;  %v2208_v60 = vsub.f32 %v5286_v31, %v2204_v33  ;;  %v2508_v30 = vld.sshfl [vmem:[#allocation1 + $0x10] sm:$0xff pattern:$0x73625140]  ;;  %v2509_v33 = vld.sshfl [vmem:[#allocation1 + $0x18] sm:$0xff pattern:$0x73625140] }
 0x86e   :  { %v2211_v2 = vmul.f32 %v2207_v34, %v2207_v34  ;;  %v2212_v6 = vmul.f32 %v2208_v60, %v2208_v60 }
 0x870   :  { %2231 = vmatmul.f32.vlgmr.msrb.gmra.mxu2 %v2211_v2  ;;  %2251 = vmatmul.f32.vlgmr.msrb.gmra.mxu3 %v2212_v6 }
 0x871   :  { %v2180_v51 = vpop.f32.mrf.mxu0  ;;  %v2200_v47 = vpop.f32.mrf.mxu1  ;;  %2415 = vmatpush.msrb.mxu2 %v5314_v54  ;;  %2435 = vmatpush.msrb.mxu3 %v5319_v56 }
 0x872   :  { %v2205_v39 = vperm.slane %v2180_v51, 0  ;;  %v2206_v41 = vperm.slane %v2200_v47, 0 }
 0x873   :  { %2416 = vmatpush.msrb.mxu2 %v5326_v46  ;;  %2436 = vmatpush.msrb.mxu3 %v5331_v55 }
 0x874   :  { %v2209_v28 = vsub.f32 %v5298_v5, %v2205_v39  ;;  %v2210_v57 = vsub.f32 %v5307_v9, %v2206_v41 }
 0x875   :  { %2417 = vmatpush.msrb.mxu2 %v5340_v49  ;;  %2437 = vmatpush.msrb.mxu3 %v5345_v25 }
 0x876   :  { %v2213_v26 = vmul.f32 %v2209_v28, %v2209_v28  ;;  %v2214_v42 = vmul.f32 %v2210_v57, %v2210_v57 }
 0x877   :  { %2418 = vmatpush.msrb.mxu2 %v5568_v50  ;;  %2438 = vmatpush.msrb.mxu3 %v5569_v10 }
 0x878   :  { %2271 = vmatmul.f32.vlgmr.msra.gmra.mxu0 %v2213_v26  ;;  %2291 = vmatmul.f32.vlgmr.msra.gmra.mxu1 %v2214_v42  ;;  %v2506_v26 = vld.sshfl [vmem:[#allocation1] sm:$0xff pattern:$0x73625140]  ;;  %v2507_v42 = vld.sshfl [vmem:[#allocation1 + $0x8] sm:$0xff pattern:$0x73625140] }
 0x879   :  { %2455 = vmatpush.msra.mxu0 %v5368_v43  ;;  %2475 = vmatpush.msra.mxu1 %v5373_v37 }
 0x87b   :  { %2456 = vmatpush.msra.mxu0 %v5378_v44  ;;  %2476 = vmatpush.msra.mxu1 %v5387_v59  ;;  %v1948_v44 = vld [vmem:[%s5514_s14 + $0x6] sm:$0x1] }
 0x87d   :  { %2457 = vmatpush.msra.mxu0 %v5392_v48  ;;  %2477 = vmatpush.msra.mxu1 %v5397_v22 }
 0x87f   :  { %2458 = vmatpush.msra.mxu0 %v5404_v24  ;;  %2478 = vmatpush.msra.mxu1 %v5409_v61  ;;  %v1949_v61 = vld [vmem:[%s5514_s14 + $0x7] sm:$0x1] }
 0x8f3   :  { %v2232_v11 = vpop.f32.mrf.mxu2  ;;  %v2252_v12 = vpop.f32.mrf.mxu3 }
 0x8f4   :  { %v2253_v13 = vadd.f32 %v2252_v12, %v2232_v11 }
 0x8f5   :  { %v2272_v63 = vpop.f32.mrf.mxu0  ;;  %v2292_v14 = vpop.f32.mrf.mxu1 }
 0x8f6   :  { %v2273_v3 = vadd.f32 %v2272_v63, %v2253_v13 }
 0x8f8   :  { %v2293_v15 = vadd.f32 %v2292_v14, %v2273_v3 }
 0x8fa   :  { %v2295_v16 = vsel %vm2110_vm15, %v2293_v15, 0.0 }
 0x8fb   :  { %v2296_v18 = vrot.slane %v2295_v16, 4 }
 0x8fd   :  { %v2297_v19 = vadd.f32 %v2296_v18, %v2295_v16 }
 0x8ff   :  { %v2298_v20 = vrot.slane %v2297_v19, 2 }
 0x901   :  { %v2299_v21 = vadd.f32 %v2298_v20, %v2297_v19 }
 0x903   :  { %v2300_v54 = vrot.slane %v2299_v21, 1 }
 0x905   :  { %v2301_v56 = vadd.f32 %v2300_v54, %v2299_v21 }
 0x907   :  { %v2302_v46 = vmul.f32 0.03125, %v2301_v56 }
 0x909   :  { %v2303_v55 = vadd.f32 1e-05, %v2302_v46 }
 0x90b   :  { %3350 = vrsqrt.f32 %v2303_v55  ;;  %vm2310_vm2 = vweird.f32 %v2303_v55 }
 0x911   :  { %v3351_v49 = vpop.eup %3350 }
 0x912   :  { %v2305_v25 = vmul.f32 %v3351_v49, %v2303_v55  ;;  %vm2311_vm1 = vweird.f32 %v3351_v49 }
 0x913   :  { %vm2312_vm3 = vmor %vm2310_vm2, %vm2311_vm1 }
 0x914   :  { %v2306_v45 = vmul.f32 %v3351_v49, %v2305_v25 }
 0x916   :  { %v2307_v43 = vmul.f32 0.5, %v2306_v45 }
 0x918   :  { %v2308_v37 = vsub.f32 1.5, %v2307_v43 }
 0x91a   :  { %v2309_v59 = vmul.f32 %v3351_v49, %v2308_v37 }
 0x91c   :  { %v2313_v48 = vsel %vm2312_vm3, %v3351_v49, %v2309_v59 }
 0x91d   :  { %v2314_v22 = vmul.f32 %v2313_v48, %v1948_v44 }
 0x91f   :  { %3177 = vmatmul.msk.f32.vlgmr.msra.gmra.mxu2 %vm2119_vm0, %v2314_v22  ;;  %3178 = vmatmul.msk.f32.vlgmr.msra.gmra.mxu3 %vm2119_vm0, %v2314_v22  ;;  %v2315_v24 = vmul.f32 %v2314_v22, %v5416_v58 }
 0x920   :  { %3179 = vmatmul.msk.f32.vlgmr.msrb.gmra.mxu0 %vm2119_vm0, %v2314_v22  ;;  %3180 = vmatmul.msk.f32.vlgmr.msrb.gmra.mxu1 %vm2119_vm0, %v2314_v22 }
 0x921   :  { %v2316_v27 = vsub.f32 %v1949_v61, %v2315_v24 }
 0x927   :  { %3181 = vmatmul.msk.f32.vlgmr.msrb.gmra.mxu2 %vm2119_vm0, %v2316_v27  ;;  %3182 = vmatmul.msk.f32.vlgmr.msrb.gmra.mxu3 %vm2119_vm0, %v2316_v27 }
 0x928   :  { %3183 = vmatmul.msk.f32.vlgmr.msra.gmra.mxu0 %vm2119_vm0, %v2316_v27  ;;  %3184 = vmatmul.msk.f32.vlgmr.msra.gmra.mxu1 %vm2119_vm0, %v2316_v27 }
 0x99d   :  { %v2377_v32 = vpop.f32.mrf.mxu0  ;;  %v2397_v38 = vpop.f32.mrf.mxu1 }
 0x99e   :  { %v2485_v40 = vperm.slane %v2377_v32, 0  ;;  %v2486_v0 = vperm.slane %v2397_v38, 0 }
 0x9a0   :  { %v2489_v8 = vmul.f32 %v2485_v40, %v5298_v5  ;;  %v2490_v35 = vmul.f32 %v2486_v0, %v5307_v9 }
 0x9a2   :  { %v2337_v1 = vpop.f32.mrf.mxu2  ;;  %v2357_v4 = vpop.f32.mrf.mxu3 }
 0x9a3   :  { %v2483_v53 = vperm.slane %v2337_v1, 0  ;;  %v2484_v62 = vperm.slane %v2357_v4, 0 }
 0x9a5   :  { %v2460_v58 = vpop.f32.mrf.mxu0  ;;  %v2480_v7 = vpop.f32.mrf.mxu1  ;;  %v2487_v51 = vmul.f32 %v2483_v53, %v5276_v17  ;;  %v2488_v47 = vmul.f32 %v2484_v62, %v5286_v31 }
 0x9a6   :  { %v2493_v36 = vperm.slane %v2460_v58, 0  ;;  %v2494_v52 = vperm.slane %v2480_v7, 0 }
 0x9a8   :  { %v2497_v23 = vadd.f32 %v2493_v36, %v2489_v8  ;;  %v2498_v29 = vadd.f32 %v2494_v52, %v2490_v35 }
 0x9aa   :  { %v2501_v34 = vmax.f32 %v2497_v23, 0.0  ;;  %v2502_v60 = vmax.f32 %v2498_v29, 0.0  ;;  %v2420_v2 = vpop.f32.mrf.mxu2  ;;  %v2440_v6 = vpop.f32.mrf.mxu3 }
 0x9ab   :  { %v2491_v39 = vperm.slane %v2420_v2, 0  ;;  %v2492_v5 = vperm.slane %v2440_v6, 0 }
 0x9ac   :  { %v2516_v41 = vadd.f32 %v2508_v30, %v2501_v34  ;;  %v2517_v9 = vadd.f32 %v2509_v33, %v2502_v60 }
 0x9ad   :  { %v2495_v28 = vadd.f32 %v2491_v39, %v2487_v51  ;;  %v2496_v57 = vadd.f32 %v2492_v5, %v2488_v47 }
 0x9ae   :  { %v2519_v50 = vpack.c.bf16 %v2517_v9, %v2516_v41 }
 0x9af   :  { %v2499_v10 = vmax.f32 %v2495_v28, 0.0  ;;  %v2500_v11 = vmax.f32 %v2496_v57, 0.0 }
 0x9b0   :  { %v2523_v63 = vrot.slane %v2519_v50, 6  ;;  %v2524_v3 = vrot.slane %v2519_v50, 1 }
 0x9b1   :  { %v2514_v12 = vadd.f32 %v2506_v26, %v2499_v10  ;;  %v2515_v13 = vadd.f32 %v2507_v42, %v2500_v11 }
 0x9b2   :  { %v2532_v31 = vsel %vm2529_vm4, %v2523_v63, %v2524_v3 }
 0x9b3   :  { %v2518_v14 = vpack.c.bf16 %v2515_v13, %v2514_v12 }
 0x9b5   :  { %v2522_v17 = vrot.slane %v2518_v14, 3 }
 0x9b7   :  { %v2528_v15 = vsel %vm2525_vm5, %v2518_v14, %v2522_v17 }
 0x9b8   :  { %v2534_v16 = vsel %vm2533_vm6, %v2528_v15, %v2532_v31 }
 0x9b9   :  { %2536 = vst [vmem:[%s5524_s15] sm:$0xf] %v2534_v16 }

// kernel: dagan_generator.11
= control target key start
LH: loop header
LB: loop body
LE: loop exit
PB: predicated region body
PF: predicated region fallthrough
CT: control target
= control target key end

     0   :  { %vm664_vm0 = vcmask 130048   ;;  %vm907_vm4 = vcmask 125952   ;;  %s1850_s1 = inlined_call_operand.vmem [shape: bf16[512,16], index: 1, kind: input, shape index: {}]   ;;  %s1851_s0 = inlined_call_operand.vmem [shape: bf16[128,512], index: 0, kind: input, shape index: {}]   ;;  %s1852_s2 = inlined_call_operand.vmem [shape: f32[1,16], index: 2, kind: input, shape index: {}]   ;;  %s1853_s3 = inlined_call_operand.vmem [shape: f32[1,16], index: 3, kind: input, shape index: {}]   ;;  %s1854_s4 = inlined_call_operand.vmem [shape: bf16[128,16], index: 4, kind: input, shape index: {}]   ;;  %s1855_s5 = inlined_call_operand.vmem [shape: bf16[128,16], index: 5, kind: output, shape index: {}]  }
   0x1   :  { %v1223_v0 = vld [vmem:[%s1850_s1 + $0x38] sm:$0xff]  ;;  %v1222_v4 = vld [vmem:[%s1850_s1 + $0x30] sm:$0xff]  ;;  %v1221_v8 = vld [vmem:[%s1850_s1 + $0x28] sm:$0xff] }
   0x2   :  { %v1231_v1 = vld [vmem:[%s1850_s1 + $0x78] sm:$0xff]  ;;  %468 = vmatpush.bf16.msra.mxu0 %v1223_v0  ;;  %v1230_v5 = vld [vmem:[%s1850_s1 + $0x70] sm:$0xff]  ;;  %v1229_v9 = vld [vmem:[%s1850_s1 + $0x68] sm:$0xff] }
   0x3   :  { %v1239_v2 = vld [vmem:[%s1850_s1 + $0xb8] sm:$0xff]  ;;  %517 = vmatpush.bf16.msra.mxu1 %v1231_v1  ;;  %v1238_v6 = vld [vmem:[%s1850_s1 + $0xb0] sm:$0xff]  ;;  %v1237_v10 = vld [vmem:[%s1850_s1 + $0xa8] sm:$0xff] }
   0x4   :  { %v1247_v3 = vld [vmem:[%s1850_s1 + $0xf8] sm:$0xff]  ;;  %566 = vmatpush.bf16.msra.mxu2 %v1239_v2  ;;  %v1246_v7 = vld [vmem:[%s1850_s1 + $0xf0] sm:$0xff]  ;;  %v1245_v11 = vld [vmem:[%s1850_s1 + $0xe8] sm:$0xff] }
   0x5   :  { %615 = vmatpush.bf16.msra.mxu3 %v1247_v3  ;;  %v1220_v12 = vld [vmem:[%s1850_s1 + $0x20] sm:$0xff]  ;;  %v1219_v16 = vld [vmem:[%s1850_s1 + $0x18] sm:$0xff]  ;;  %v1218_v20 = vld [vmem:[%s1850_s1 + $0x10] sm:$0xff] }
   0x6   :  { %469 = vmatpush.bf16.msra.mxu0 %v1222_v4  ;;  %v1228_v13 = vld [vmem:[%s1850_s1 + $0x60] sm:$0xff]  ;;  %v1227_v17 = vld [vmem:[%s1850_s1 + $0x58] sm:$0xff]  ;;  %v1226_v21 = vld [vmem:[%s1850_s1 + $0x50] sm:$0xff] }
   0x7   :  { %518 = vmatpush.bf16.msra.mxu1 %v1230_v5  ;;  %v1236_v14 = vld [vmem:[%s1850_s1 + $0xa0] sm:$0xff]  ;;  %v1235_v18 = vld [vmem:[%s1850_s1 + $0x98] sm:$0xff]  ;;  %v1234_v22 = vld [vmem:[%s1850_s1 + $0x90] sm:$0xff] }
   0x8   :  { %567 = vmatpush.bf16.msra.mxu2 %v1238_v6  ;;  %v1244_v15 = vld [vmem:[%s1850_s1 + $0xe0] sm:$0xff]  ;;  %v1243_v19 = vld [vmem:[%s1850_s1 + $0xd8] sm:$0xff]  ;;  %v1242_v23 = vld [vmem:[%s1850_s1 + $0xd0] sm:$0xff] }
   0x9   :  { %616 = vmatpush.bf16.msra.mxu3 %v1246_v7  ;;  %v1217_v24 = vld [vmem:[%s1850_s1 + $0x8] sm:$0xff]  ;;  %v1216_v28 = vld [vmem:[%s1850_s1] sm:$0xff]  ;;  %v1186_v33 = vld [vmem:[%s1851_s0 + $0xc] sm:$0xf0] }
   0xa   :  { %470 = vmatpush.bf16.msra.mxu0 %v1221_v8  ;;  %v1225_v25 = vld [vmem:[%s1850_s1 + $0x48] sm:$0xff]  ;;  %v1224_v29 = vld [vmem:[%s1850_s1 + $0x40] sm:$0xff]  ;;  %v932_v35 = vld [vmem:[%s1851_s0 + $0x10] sm:$0xf0] }
   0xb   :  { %519 = vmatpush.bf16.msra.mxu1 %v1229_v9  ;;  %v1233_v26 = vld [vmem:[%s1850_s1 + $0x88] sm:$0xff]  ;;  %v1232_v30 = vld [vmem:[%s1850_s1 + $0x80] sm:$0xff]  ;;  %v1187_v37 = vld [vmem:[%s1851_s0 + $0x14] sm:$0xf0] }
   0xc   :  { %568 = vmatpush.bf16.msra.mxu2 %v1237_v10  ;;  %v1241_v27 = vld [vmem:[%s1850_s1 + $0xc8] sm:$0xff]  ;;  %v1240_v31 = vld [vmem:[%s1850_s1 + $0xc0] sm:$0xff]  ;;  %v940_v39 = vld [vmem:[%s1851_s0 + $0x18] sm:$0xf0] }
   0xd   :  { %617 = vmatpush.bf16.msra.mxu3 %v1245_v11  ;;  %v930_v32 = vld [vmem:[%s1851_s0] sm:$0xf]  ;;  %v1184_v34 = vld [vmem:[%s1851_s0 + $0x4] sm:$0xf]  ;;  %v938_v36 = vld [vmem:[%s1851_s0 + $0x8] sm:$0xf] }
   0xe   :  { %471 = vmatpush.bf16.msra.mxu0 %v1220_v12  ;;  %v1185_v38 = vld [vmem:[%s1851_s0 + $0xc] sm:$0xf]  ;;  %v931_v40 = vor.u32 %v1186_v33, %v930_v32  ;;  %v935_v41 = vor.u32 %v1184_v34, %v932_v35  ;;  %v939_v42 = vor.u32 %v1187_v37, %v938_v36  ;;  %v946_v44 = vld [vmem:[%s1851_s0 + $0x20] sm:$0xf]  ;;  %v1190_v45 = vld [vmem:[%s1851_s0 + $0x2c] sm:$0xf0] }
   0xf   :  { %520 = vmatpush.bf16.msra.mxu1 %v1228_v13  ;;  %v943_v43 = vor.u32 %v1185_v38, %v940_v39  ;;  %v1188_v46 = vld [vmem:[%s1851_s0 + $0x24] sm:$0xf]  ;;  %v948_v47 = vld [vmem:[%s1851_s0 + $0x30] sm:$0xf0]  ;;  %v954_v48 = vld [vmem:[%s1851_s0 + $0x28] sm:$0xf]  ;;  %v947_v52 = vor.u32 %v1190_v45, %v946_v44 }
  0x10   :  { %569 = vmatpush.bf16.msra.mxu2 %v1236_v14  ;;  %v1191_v49 = vld [vmem:[%s1851_s0 + $0x34] sm:$0xf0]  ;;  %v1189_v50 = vld [vmem:[%s1851_s0 + $0x2c] sm:$0xf]  ;;  %v956_v51 = vld [vmem:[%s1851_s0 + $0x38] sm:$0xf0]  ;;  %v951_v53 = vor.u32 %v1188_v46, %v948_v47 }
  0x11   :  { %618 = vmatpush.bf16.msra.mxu3 %v1244_v15  ;;  %v955_v54 = vor.u32 %v1191_v49, %v954_v48  ;;  %v959_v55 = vor.u32 %v1189_v50, %v956_v51  ;;  %v962_v56 = vld [vmem:[%s1851_s0 + $0x40] sm:$0xf]  ;;  %v1194_v57 = vld [vmem:[%s1851_s0 + $0x4c] sm:$0xf0]  ;;  %v1192_v58 = vld [vmem:[%s1851_s0 + $0x44] sm:$0xf] }
  0x12   :  { %472 = vmatpush.bf16.msra.mxu0 %v1219_v16  ;;  %v964_v59 = vld [vmem:[%s1851_s0 + $0x50] sm:$0xf0]  ;;  %v970_v60 = vld [vmem:[%s1851_s0 + $0x48] sm:$0xf]  ;;  %v1195_v61 = vld [vmem:[%s1851_s0 + $0x54] sm:$0xf0]  ;;  %v963_v0 = vor.u32 %v1194_v57, %v962_v56 }
  0x13   :  { %521 = vmatpush.bf16.msra.mxu1 %v1227_v17  ;;  %v1193_v62 = vld [vmem:[%s1851_s0 + $0x4c] sm:$0xf]  ;;  %v972_v63 = vld [vmem:[%s1851_s0 + $0x58] sm:$0xf0]  ;;  %v967_v1 = vor.u32 %v1192_v58, %v964_v59  ;;  %v971_v2 = vor.u32 %v1195_v61, %v970_v60  ;;  %v978_v4 = vld [vmem:[%s1851_s0 + $0x60] sm:$0xf] }
  0x14   :  { %570 = vmatpush.bf16.msra.mxu2 %v1235_v18  ;;  %v975_v3 = vor.u32 %v1193_v62, %v972_v63  ;;  %v1198_v5 = vld [vmem:[%s1851_s0 + $0x6c] sm:$0xf0]  ;;  %v1196_v6 = vld [vmem:[%s1851_s0 + $0x64] sm:$0xf]  ;;  %v980_v7 = vld [vmem:[%s1851_s0 + $0x70] sm:$0xf0] }
  0x15   :  { %619 = vmatpush.bf16.msra.mxu3 %v1243_v19  ;;  %v986_v8 = vld [vmem:[%s1851_s0 + $0x68] sm:$0xf]  ;;  %v1199_v9 = vld [vmem:[%s1851_s0 + $0x74] sm:$0xf0]  ;;  %v1197_v10 = vld [vmem:[%s1851_s0 + $0x6c] sm:$0xf]  ;;  %v979_v12 = vor.u32 %v1198_v5, %v978_v4  ;;  %v983_v13 = vor.u32 %v1196_v6, %v980_v7 }
  0x16   :  { %473 = vmatpush.bf16.msra.mxu0 %v1218_v20  ;;  %v988_v11 = vld [vmem:[%s1851_s0 + $0x78] sm:$0xf0]  ;;  %v987_v14 = vor.u32 %v1199_v9, %v986_v8  ;;  %v994_v16 = vld [vmem:[%s1851_s0 + $0x80] sm:$0xf]  ;;  %v1202_v17 = vld [vmem:[%s1851_s0 + $0x8c] sm:$0xf0] }
  0x17   :  { %522 = vmatpush.bf16.msra.mxu1 %v1226_v21  ;;  %v991_v15 = vor.u32 %v1197_v10, %v988_v11  ;;  %v1200_v18 = vld [vmem:[%s1851_s0 + $0x84] sm:$0xf]  ;;  %v996_v19 = vld [vmem:[%s1851_s0 + $0x90] sm:$0xf0]  ;;  %v1002_v20 = vld [vmem:[%s1851_s0 + $0x88] sm:$0xf] }
  0x18   :  { %571 = vmatpush.bf16.msra.mxu2 %v1234_v22  ;;  %v1203_v21 = vld [vmem:[%s1851_s0 + $0x94] sm:$0xf0]  ;;  %v1201_v22 = vld [vmem:[%s1851_s0 + $0x8c] sm:$0xf]  ;;  %v1018_v32 = vld [vmem:[%s1851_s0 + $0xa8] sm:$0xf] }
  0x19   :  { %620 = vmatpush.bf16.msra.mxu3 %v1242_v23  ;;  %v1004_v23 = vld [vmem:[%s1851_s0 + $0x98] sm:$0xf0]  ;;  %v1207_v33 = vld [vmem:[%s1851_s0 + $0xb4] sm:$0xf0]  ;;  %v1205_v34 = vld [vmem:[%s1851_s0 + $0xac] sm:$0xf] }
  0x1a   :  { %474 = vmatpush.bf16.msra.mxu0 %v1217_v24  ;;  %v995_v24 = vor.u32 %v1202_v17, %v994_v16  ;;  %v1020_v35 = vld [vmem:[%s1851_s0 + $0xb8] sm:$0xf0]  ;;  %v1019_v38 = vor.u32 %v1207_v33, %v1018_v32  ;;  %v1034_v44 = vld [vmem:[%s1851_s0 + $0xc8] sm:$0xf]  ;;  %v1211_v45 = vld [vmem:[%s1851_s0 + $0xd4] sm:$0xf0] }
  0x1b   :  { %523 = vmatpush.bf16.msra.mxu1 %v1225_v25  ;;  %v999_v25 = vor.u32 %v1200_v18, %v996_v19  ;;  %v1023_v39 = vor.u32 %v1205_v34, %v1020_v35  ;;  %v1209_v46 = vld [vmem:[%s1851_s0 + $0xcc] sm:$0xf]  ;;  %v1036_v47 = vld [vmem:[%s1851_s0 + $0xd8] sm:$0xf0]  ;;  %v1035_v50 = vor.u32 %v1211_v45, %v1034_v44  ;;  %v1050_v56 = vld [vmem:[%s1851_s0 + $0xe8] sm:$0xf] }
  0x1c   :  { %572 = vmatpush.bf16.msra.mxu2 %v1233_v26  ;;  %v1003_v26 = vor.u32 %v1203_v21, %v1002_v20  ;;  %v1039_v51 = vor.u32 %v1209_v46, %v1036_v47  ;;  %v1215_v57 = vld [vmem:[%s1851_s0 + $0xf4] sm:$0xf0]  ;;  %v1213_v58 = vld [vmem:[%s1851_s0 + $0xec] sm:$0xf]  ;;  %v1052_v59 = vld [vmem:[%s1851_s0 + $0xf8] sm:$0xf0] }
  0x1d   :  { %621 = vmatpush.bf16.msra.mxu3 %v1241_v27  ;;  %v1007_v27 = vor.u32 %v1201_v22, %v1004_v23  ;;  %v1051_v62 = vor.u32 %v1215_v57, %v1050_v56  ;;  %v1055_v63 = vor.u32 %v1213_v58, %v1052_v59 }
  0x1e   :  { %475 = vmatpush.bf16.msra.mxu0 %v1216_v28  ;;  %v1010_v28 = vld [vmem:[%s1851_s0 + $0xa0] sm:$0xf] }
  0x1f   :  { %524 = vmatpush.bf16.msra.mxu1 %v1224_v29  ;;  %v1206_v29 = vld [vmem:[%s1851_s0 + $0xac] sm:$0xf0] }
  0x20   :  { %573 = vmatpush.bf16.msra.mxu2 %v1232_v30  ;;  %v1204_v30 = vld [vmem:[%s1851_s0 + $0xa4] sm:$0xf]  ;;  %v1011_v36 = vor.u32 %v1206_v29, %v1010_v28 }
  0x21   :  { %622 = vmatpush.bf16.msra.mxu3 %v1240_v31  ;;  %476 = vmatmul.bf16.vlgmr.msra.gmra.mxu0 %v931_v40  ;;  %v1012_v31 = vld [vmem:[%s1851_s0 + $0xb0] sm:$0xf0]  ;;  %v1026_v40 = vld [vmem:[%s1851_s0 + $0xc0] sm:$0xf] }
  0x22   :  { %525 = vmatmul.bf16.vlgmr.msra.gmra.mxu1 %v935_v41  ;;  %v1015_v37 = vor.u32 %v1204_v30, %v1012_v31  ;;  %v1210_v41 = vld [vmem:[%s1851_s0 + $0xcc] sm:$0xf0] }
  0x23   :  { %574 = vmatmul.bf16.vlgmr.msra.gmra.mxu2 %v939_v42  ;;  %v1208_v42 = vld [vmem:[%s1851_s0 + $0xc4] sm:$0xf]  ;;  %v1027_v48 = vor.u32 %v1210_v41, %v1026_v40 }
  0x24   :  { %623 = vmatmul.bf16.vlgmr.msra.gmra.mxu3 %v943_v43  ;;  %v1028_v43 = vld [vmem:[%s1851_s0 + $0xd0] sm:$0xf0] }
  0x25   :  { %v1031_v49 = vor.u32 %v1208_v42, %v1028_v43 }
  0x31   :  { %481 = vmatmul.bf16.gmra.mxu0 %v947_v52  ;;  %v1042_v52 = vld [vmem:[%s1851_s0 + $0xe0] sm:$0xf] }
  0x32   :  { %530 = vmatmul.bf16.gmra.mxu1 %v951_v53  ;;  %v1214_v53 = vld [vmem:[%s1851_s0 + $0xec] sm:$0xf0] }
  0x33   :  { %579 = vmatmul.bf16.gmra.mxu2 %v955_v54  ;;  %v1212_v54 = vld [vmem:[%s1851_s0 + $0xe4] sm:$0xf]  ;;  %v1043_v60 = vor.u32 %v1214_v53, %v1042_v52 }
  0x34   :  { %628 = vmatmul.bf16.gmra.mxu3 %v959_v55  ;;  %v1044_v55 = vld [vmem:[%s1851_s0 + $0xf0] sm:$0xf0] }
  0x35   :  { %v1047_v61 = vor.u32 %v1212_v54, %v1044_v55 }
  0x41   :  { %486 = vmatmul.bf16.gmra.mxu0 %v963_v0 }
  0x42   :  { %535 = vmatmul.bf16.gmra.mxu1 %v967_v1 }
  0x43   :  { %584 = vmatmul.bf16.gmra.mxu2 %v971_v2 }
  0x44   :  { %633 = vmatmul.bf16.gmra.mxu3 %v975_v3 }
  0x51   :  { %491 = vmatmul.bf16.gmra.mxu0 %v979_v12 }
  0x52   :  { %540 = vmatmul.bf16.gmra.mxu1 %v983_v13 }
  0x53   :  { %589 = vmatmul.bf16.gmra.mxu2 %v987_v14 }
  0x54   :  { %638 = vmatmul.bf16.gmra.mxu3 %v991_v15 }
  0x61   :  { %496 = vmatmul.bf16.gmra.mxu0 %v995_v24 }
  0x62   :  { %545 = vmatmul.bf16.gmra.mxu1 %v999_v25 }
  0x63   :  { %594 = vmatmul.bf16.gmra.mxu2 %v1003_v26 }
  0x64   :  { %643 = vmatmul.bf16.gmra.mxu3 %v1007_v27 }
  0x71   :  { %501 = vmatmul.bf16.gmra.mxu0 %v1011_v36 }
  0x72   :  { %550 = vmatmul.bf16.gmra.mxu1 %v1015_v37 }
  0x73   :  { %599 = vmatmul.bf16.gmra.mxu2 %v1019_v38 }
  0x74   :  { %648 = vmatmul.bf16.gmra.mxu3 %v1023_v39 }
  0x81   :  { %506 = vmatmul.bf16.gmra.mxu0 %v1027_v48 }
  0x82   :  { %555 = vmatmul.bf16.gmra.mxu1 %v1031_v49 }
  0x83   :  { %604 = vmatmul.bf16.gmra.mxu2 %v1035_v50 }
  0x84   :  { %653 = vmatmul.bf16.gmra.mxu3 %v1039_v51 }
  0x91   :  { %511 = vmatmul.bf16.gmra.mxu0 %v1043_v60 }
  0x92   :  { %560 = vmatmul.bf16.gmra.mxu1 %v1047_v61 }
  0x93   :  { %609 = vmatmul.bf16.gmra.mxu2 %v1051_v62 }
  0x94   :  { %658 = vmatmul.bf16.gmra.mxu3 %v1055_v63 }
  0x9e   :  { %v477_v0 = vpop.f32.mrf.mxu0 }
  0x9f   :  { %v526_v1 = vpop.f32.mrf.mxu1 }
  0xa0   :  { %v527_v2 = vadd.f32 %v526_v1, %v477_v0 }
  0xa6   :  { %v575_v3 = vpop.f32.mrf.mxu2  ;;  %v479_v6 = vpop.f32.mrf.mxu0 }
  0xa7   :  { %v624_v4 = vpop.f32.mrf.mxu3  ;;  %v576_v5 = vadd.f32 %v575_v3, %v527_v2  ;;  %v528_v7 = vpop.f32.mrf.mxu1 }
  0xa8   :  { %v529_v8 = vadd.f32 %v528_v7, %v479_v6 }
  0xa9   :  { %v1607_v9 = vadd.f32 %v624_v4, %v576_v5 }
  0xae   :  { %v577_v10 = vpop.f32.mrf.mxu2  ;;  %v482_v13 = vpop.f32.mrf.mxu0 }
  0xaf   :  { %v626_v11 = vpop.f32.mrf.mxu3  ;;  %v578_v12 = vadd.f32 %v577_v10, %v529_v8  ;;  %v531_v14 = vpop.f32.mrf.mxu1  ;;  %v665_v8 = vsel %vm664_vm0, %v1607_v9, 0.0 }
  0xb0   :  { %v532_v15 = vadd.f32 %v531_v14, %v482_v13 }
  0xb1   :  { %v1609_v16 = vadd.f32 %v626_v11, %v578_v12 }
  0xb3   :  { %v666_v3 = vsel %vm664_vm0, %v1609_v16, 0.0 }
  0xb6   :  { %v580_v17 = vpop.f32.mrf.mxu2  ;;  %v484_v20 = vpop.f32.mrf.mxu0 }
  0xb7   :  { %v629_v18 = vpop.f32.mrf.mxu3  ;;  %v581_v19 = vadd.f32 %v580_v17, %v532_v15  ;;  %v533_v21 = vpop.f32.mrf.mxu1  ;;  %v667_v15 = vadd.f32 %v666_v3, %v665_v8 }
  0xb8   :  { %v534_v22 = vadd.f32 %v533_v21, %v484_v20 }
  0xb9   :  { %v1611_v23 = vadd.f32 %v629_v18, %v581_v19 }
  0xbb   :  { %v668_v10 = vsel %vm664_vm0, %v1611_v23, 0.0 }
  0xbc   :  { %v669_v20 = vadd.f32 %v668_v10, %v667_v15 }
  0xbe   :  { %v582_v24 = vpop.f32.mrf.mxu2  ;;  %v487_v27 = vpop.f32.mrf.mxu0 }
  0xbf   :  { %v631_v25 = vpop.f32.mrf.mxu3  ;;  %v583_v26 = vadd.f32 %v582_v24, %v534_v22  ;;  %v536_v28 = vpop.f32.mrf.mxu1 }
  0xc0   :  { %v537_v29 = vadd.f32 %v536_v28, %v487_v27 }
  0xc1   :  { %v1613_v30 = vadd.f32 %v631_v25, %v583_v26 }
  0xc3   :  { %v670_v17 = vsel %vm664_vm0, %v1613_v30, 0.0 }
  0xc4   :  { %v671_v27 = vadd.f32 %v670_v17, %v669_v20 }
  0xc6   :  { %v585_v31 = vpop.f32.mrf.mxu2  ;;  %v489_v34 = vpop.f32.mrf.mxu0 }
  0xc7   :  { %v634_v32 = vpop.f32.mrf.mxu3  ;;  %v586_v33 = vadd.f32 %v585_v31, %v537_v29  ;;  %v538_v35 = vpop.f32.mrf.mxu1 }
  0xc8   :  { %v539_v1 = vadd.f32 %v538_v35, %v489_v34 }
  0xc9   :  { %v1615_v36 = vadd.f32 %v634_v32, %v586_v33 }
  0xcb   :  { %v672_v22 = vsel %vm664_vm0, %v1615_v36, 0.0 }
  0xcc   :  { %v673_v32 = vadd.f32 %v672_v22, %v671_v27 }
  0xce   :  { %v587_v37 = vpop.f32.mrf.mxu2  ;;  %v492_v39 = vpop.f32.mrf.mxu0 }
  0xcf   :  { %v636_v38 = vpop.f32.mrf.mxu3  ;;  %v541_v40 = vpop.f32.mrf.mxu1  ;;  %v588_v4 = vadd.f32 %v587_v37, %v539_v1 }
  0xd0   :  { %v542_v2 = vadd.f32 %v541_v40, %v492_v39 }
  0xd1   :  { %v1625_v18 = vadd.f32 %v636_v38, %v588_v4 }
  0xd3   :  { %v674_v28 = vsel %vm664_vm0, %v1625_v18, 0.0 }
  0xd6   :  { %v590_v41 = vpop.f32.mrf.mxu2  ;;  %v494_v43 = vpop.f32.mrf.mxu0 }
  0xd7   :  { %v639_v42 = vpop.f32.mrf.mxu3  ;;  %v543_v44 = vpop.f32.mrf.mxu1  ;;  %v591_v11 = vadd.f32 %v590_v41, %v542_v2  ;;  %v675_v41 = vadd.f32 %v674_v28, %v673_v32 }
  0xd8   :  { %v544_v12 = vadd.f32 %v543_v44, %v494_v43 }
  0xd9   :  { %v1629_v24 = vadd.f32 %v639_v42, %v591_v11 }
  0xdb   :  { %v676_v37 = vsel %vm664_vm0, %v1629_v24, 0.0 }
  0xde   :  { %v592_v45 = vpop.f32.mrf.mxu2  ;;  %v497_v47 = vpop.f32.mrf.mxu0 }
  0xdf   :  { %v641_v46 = vpop.f32.mrf.mxu3  ;;  %v546_v48 = vpop.f32.mrf.mxu1  ;;  %v593_v19 = vadd.f32 %v592_v45, %v544_v12 }
  0xe0   :  { %v547_v5 = vadd.f32 %v546_v48, %v497_v47  ;;  %v677_v47 = vadd.f32 %v676_v37, %v675_v41 }
  0xe1   :  { %v1633_v29 = vadd.f32 %v641_v46, %v593_v19 }
  0xe3   :  { %v678_v44 = vsel %vm664_vm0, %v1633_v29, 0.0 }
  0xe6   :  { %v595_v49 = vpop.f32.mrf.mxu2  ;;  %v499_v51 = vpop.f32.mrf.mxu0 }
  0xe7   :  { %v644_v50 = vpop.f32.mrf.mxu3  ;;  %v548_v52 = vpop.f32.mrf.mxu1  ;;  %v596_v21 = vadd.f32 %v595_v49, %v547_v5 }
  0xe8   :  { %v549_v25 = vadd.f32 %v548_v52, %v499_v51 }
  0xe9   :  { %v1635_v33 = vadd.f32 %v644_v50, %v596_v21 }
  0xeb   :  { %v680_v48 = vsel %vm664_vm0, %v1635_v33, 0.0 }
  0xee   :  { %v597_v53 = vpop.f32.mrf.mxu2  ;;  %v502_v55 = vpop.f32.mrf.mxu0 }
  0xef   :  { %v646_v54 = vpop.f32.mrf.mxu3  ;;  %v551_v56 = vpop.f32.mrf.mxu1  ;;  %v598_v31 = vadd.f32 %v597_v53, %v549_v25  ;;  %v679_v53 = vadd.f32 %v678_v44, %v677_v47 }
  0xf0   :  { %v552_v26 = vadd.f32 %v551_v56, %v502_v55 }
  0xf1   :  { %v1641_v45 = vadd.f32 %v646_v54, %v598_v31 }
  0xf3   :  { %v682_v55 = vsel %vm664_vm0, %v1641_v45, 0.0 }
  0xf6   :  { %v600_v57 = vpop.f32.mrf.mxu2  ;;  %v504_v59 = vpop.f32.mrf.mxu0 }
  0xf7   :  { %v649_v58 = vpop.f32.mrf.mxu3  ;;  %v553_v60 = vpop.f32.mrf.mxu1  ;;  %v601_v38 = vadd.f32 %v600_v57, %v552_v26 }
  0xf8   :  { %v554_v39 = vadd.f32 %v553_v60, %v504_v59  ;;  %v681_v59 = vadd.f32 %v680_v48, %v679_v53 }
  0xf9   :  { %v1645_v49 = vadd.f32 %v649_v58, %v601_v38 }
  0xfe   :  { %v602_v61 = vpop.f32.mrf.mxu2  ;;  %v507_v63 = vpop.f32.mrf.mxu0 }
  0xff   :  { %v651_v62 = vpop.f32.mrf.mxu3  ;;  %v556_v0 = vpop.f32.mrf.mxu1  ;;  %v603_v46 = vadd.f32 %v602_v61, %v554_v39  ;;  %v684_v61 = vsel %vm664_vm0, %v1645_v49, 0.0 }
 0x100   :  { %v557_v40 = vadd.f32 %v556_v0, %v507_v63  ;;  %v683_v0 = vadd.f32 %v682_v55, %v681_v59 }
 0x101   :  { %v1649_v56 = vadd.f32 %v651_v62, %v603_v46 }
 0x102   :  { %v685_v3 = vadd.f32 %v684_v61, %v683_v0 }
 0x103   :  { %v686_v1 = vsel %vm664_vm0, %v1649_v56, 0.0 }
 0x104   :  { %v687_v8 = vadd.f32 %v686_v1, %v685_v3 }
 0x106   :  { %v605_v6 = vpop.f32.mrf.mxu2  ;;  %v509_v13 = vpop.f32.mrf.mxu0 }
 0x107   :  { %v654_v7 = vpop.f32.mrf.mxu3  ;;  %v558_v14 = vpop.f32.mrf.mxu1  ;;  %v606_v50 = vadd.f32 %v605_v6, %v557_v40 }
 0x108   :  { %v559_v51 = vadd.f32 %v558_v14, %v509_v13 }
 0x109   :  { %v1653_v63 = vadd.f32 %v654_v7, %v606_v50 }
 0x10b   :  { %v688_v5 = vsel %vm664_vm0, %v1653_v63, 0.0 }
 0x10c   :  { %v689_v11 = vadd.f32 %v688_v5, %v687_v8 }
 0x10e   :  { %v607_v34 = vpop.f32.mrf.mxu2  ;;  %v512_v42 = vpop.f32.mrf.mxu0 }
 0x10f   :  { %v656_v35 = vpop.f32.mrf.mxu3  ;;  %v561_v43 = vpop.f32.mrf.mxu1  ;;  %v608_v57 = vadd.f32 %v607_v34, %v559_v51 }
 0x110   :  { %v562_v52 = vadd.f32 %v561_v43, %v512_v42 }
 0x111   :  { %v1657_v2 = vadd.f32 %v656_v35, %v608_v57 }
 0x113   :  { %v690_v7 = vsel %vm664_vm0, %v1657_v2, 0.0 }
 0x114   :  { %v691_v15 = vadd.f32 %v690_v7, %v689_v11 }
 0x116   :  { %v610_v54 = vpop.f32.mrf.mxu2  ;;  %v514_v4 = vpop.f32.mrf.mxu0 }
 0x117   :  { %v659_v60 = vpop.f32.mrf.mxu3  ;;  %v611_v58 = vadd.f32 %v610_v54, %v562_v52  ;;  %v563_v62 = vpop.f32.mrf.mxu1 }
 0x118   :  { %v564_v10 = vadd.f32 %v563_v62, %v514_v4 }
 0x119   :  { %v1661_v6 = vadd.f32 %v659_v60, %v611_v58 }
 0x11b   :  { %v692_v13 = vsel %vm664_vm0, %v1661_v6, 0.0 }
 0x11c   :  { %v693_v20 = vadd.f32 %v692_v13, %v691_v15 }
 0x11e   :  { %v612_v12 = vpop.f32.mrf.mxu2 }
 0x11f   :  { %v613_v14 = vadd.f32 %v612_v12, %v564_v10  ;;  %v661_v17 = vpop.f32.mrf.mxu3 }
 0x121   :  { %v1667_v19 = vadd.f32 %v661_v17, %v613_v14 }
 0x123   :  { %v694_v21 = vsel %vm664_vm0, %v1667_v19, 0.0 }
 0x124   :  { %v695_v22 = vadd.f32 %v694_v21, %v693_v20 }
 0x126   :  { %v696_v25 = vrot.slane %v695_v22, 4 }
 0x128   :  { %v697_v26 = vadd.f32 %v696_v25, %v695_v22 }
 0x12a   :  { %v698_v27 = vrot.slane %v697_v26, 2 }
 0x12c   :  { %v699_v28 = vadd.f32 %v698_v27, %v697_v26 }
 0x12e   :  { %v700_v31 = vrot.slane %v699_v28, 1 }
 0x130   :  { %v701_v32 = vadd.f32 %v700_v31, %v699_v28 }
 0x132   :  { %v1671_v34 = vmul.f32 0.0078125, %v701_v32 }
 0x134   :  { %v703_v35 = vsub.f32 %v1607_v9, %v1671_v34  ;;  %v704_v37 = vsub.f32 %v1609_v16, %v1671_v34  ;;  %v705_v38 = vsub.f32 %v1611_v23, %v1671_v34  ;;  %v706_v39 = vsub.f32 %v1613_v30, %v1671_v34 }
 0x135   :  { %v707_v42 = vsub.f32 %v1615_v36, %v1671_v34  ;;  %v708_v44 = vsub.f32 %v1625_v18, %v1671_v34  ;;  %v709_v51 = vsub.f32 %v1629_v24, %v1671_v34  ;;  %v710_v57 = vsub.f32 %v1633_v29, %v1671_v34 }
 0x136   :  { %v719_v40 = vmul.f32 %v703_v35, %v703_v35  ;;  %v720_v41 = vmul.f32 %v704_v37, %v704_v37  ;;  %v721_v43 = vmul.f32 %v705_v38, %v705_v38  ;;  %v722_v46 = vmul.f32 %v706_v39, %v706_v39 }
 0x137   :  { %v723_v52 = vmul.f32 %v707_v42, %v707_v42  ;;  %v724_v59 = vmul.f32 %v708_v44, %v708_v44  ;;  %v711_v61 = vsub.f32 %v1635_v33, %v1671_v34  ;;  %v725_v58 = vmul.f32 %v709_v51, %v709_v51 }
 0x138   :  { %v735_v47 = vsel %vm664_vm0, %v719_v40, 0.0  ;;  %v736_v48 = vsel %vm664_vm0, %v720_v41, 0.0  ;;  %v738_v53 = vsel %vm664_vm0, %v721_v43, 0.0  ;;  %v740_v54 = vsel %vm664_vm0, %v722_v46, 0.0 }
 0x139   :  { %v737_v50 = vadd.f32 %v736_v48, %v735_v47  ;;  %v742_v0 = vsel %vm664_vm0, %v723_v52, 0.0  ;;  %v712_v3 = vsub.f32 %v1641_v45, %v1671_v34  ;;  %v726_v4 = vmul.f32 %v710_v57, %v710_v57 }
 0x13a   :  { %v744_v62 = vsel %vm664_vm0, %v724_v59, 0.0  ;;  %v713_v8 = vsub.f32 %v1645_v49, %v1671_v34  ;;  %v727_v7 = vmul.f32 %v711_v61, %v711_v61  ;;  %v746_v10 = vsel %vm664_vm0, %v725_v58, 0.0 }
 0x13b   :  { %v739_v55 = vadd.f32 %v738_v53, %v737_v50  ;;  %v714_v12 = vsub.f32 %v1649_v56, %v1671_v34  ;;  %v728_v13 = vmul.f32 %v712_v3, %v712_v3  ;;  %v748_v14 = vsel %vm664_vm0, %v726_v4, 0.0 }
 0x13c   :  { %v715_v17 = vsub.f32 %v1653_v63, %v1671_v34  ;;  %v729_v20 = vmul.f32 %v713_v8, %v713_v8  ;;  %v750_v21 = vsel %vm664_vm0, %v727_v7, 0.0  ;;  %v716_v25 = vsub.f32 %v1657_v2, %v1671_v34  ;;  %v784_v7 = vld [vmem:[%s1852_s2] sm:$0x1] }
 0x13d   :  { %v741_v60 = vadd.f32 %v740_v54, %v739_v55  ;;  %v730_v26 = vmul.f32 %v714_v12, %v714_v12  ;;  %v752_v27 = vsel %vm664_vm0, %v728_v13, 0.0  ;;  %v717_v31 = vsub.f32 %v1661_v6, %v1671_v34  ;;  %v786_v12 = vld [vmem:[%s1853_s3] sm:$0x1] }
 0x13e   :  { %v731_v32 = vmul.f32 %v715_v17, %v715_v17  ;;  %v754_v35 = vsel %vm664_vm0, %v729_v20, 0.0  ;;  %v718_v38 = vsub.f32 %v1667_v19, %v1671_v34  ;;  %v732_v39 = vmul.f32 %v716_v25, %v716_v25  ;;  %v1280_v20 = vld [vmem:[%s1854_s4 + $0x8] sm:$0xff]  }
 0x13f   :  { %v743_v1 = vadd.f32 %v742_v0, %v741_v60  ;;  %v756_v40 = vsel %vm664_vm0, %v730_v26, 0.0  ;;  %v733_v42 = vmul.f32 %v717_v31, %v717_v31  ;;  %v1254_v26 = vunpack.c.l.bf16 %v1280_v20 }
 0x140   :  { %v758_v43 = vsel %vm664_vm0, %v731_v32, 0.0  ;;  %v734_v46 = vmul.f32 %v718_v38, %v718_v38  ;;  %v760_v47 = vsel %vm664_vm0, %v732_v39, 0.0  ;;  %v1751_v38 = vld [vmem:[%s1854_s4 + $0x20] sm:$0xff]  }
 0x141   :  { %v745_v5 = vadd.f32 %v744_v62, %v743_v1  ;;  %v762_v50 = vsel %vm664_vm0, %v733_v42, 0.0 }
 0x142   :  { %v764_v52 = vsel %vm664_vm0, %v734_v46, 0.0 }
 0x143   :  { %v747_v11 = vadd.f32 %v746_v10, %v745_v5 }
 0x145   :  { %v749_v15 = vadd.f32 %v748_v14, %v747_v11  ;;  %v1249_v14 = vld [vmem:[%s1854_s4] sm:$0xff]  }
 0x146   :  { %v1251_v25 = vunpack.c.h.bf16 %v1249_v14 }
 0x147   :  { %v751_v22 = vadd.f32 %v750_v21, %v749_v15  ;;  %v1737_v21 = vld [vmem:[%s1854_s4 + $0x10] sm:$0xff]  }
 0x149   :  { %v753_v28 = vadd.f32 %v752_v27, %v751_v22  ;;  %v1250_v22 = vunpack.c.l.bf16 %v1249_v14  ;;  %v1255_v27 = vunpack.c.h.bf16 %v1280_v20 }
 0x14b   :  { %v755_v37 = vadd.f32 %v754_v35, %v753_v28  ;;  %v1258_v28 = vunpack.c.l.bf16 %v1737_v21 }
 0x14d   :  { %v757_v41 = vadd.f32 %v756_v40, %v755_v37  ;;  %v1259_v40 = vunpack.c.h.bf16 %v1737_v21 }
 0x14f   :  { %v759_v44 = vadd.f32 %v758_v43, %v757_v41 }
 0x151   :  { %v761_v48 = vadd.f32 %v760_v47, %v759_v44 }
 0x153   :  { %v763_v51 = vadd.f32 %v762_v50, %v761_v48  ;;  %v1267_v48 = vunpack.c.h.bf16 %v1751_v38 }
 0x155   :  { %v765_v53 = vadd.f32 %v764_v52, %v763_v51 }
 0x157   :  { %v766_v55 = vrot.slane %v765_v53, 4 }
 0x159   :  { %v767_v57 = vadd.f32 %v766_v55, %v765_v53 }
 0x15b   :  { %v768_v59 = vrot.slane %v767_v57, 2 }
 0x15d   :  { %v769_v54 = vadd.f32 %v768_v59, %v767_v57 }
 0x15f   :  { %v770_v60 = vrot.slane %v769_v54, 1 }
 0x161   :  { %v771_v61 = vadd.f32 %v770_v60, %v769_v54 }
 0x163   :  { %v772_v58 = vmul.f32 0.0078125, %v771_v61 }
 0x165   :  { %v773_v0 = vadd.f32 1e-05, %v772_v58 }
 0x167   :  { %1287 = vrsqrt.f32 %v773_v0  ;;  %vm780_vm2 = vweird.f32 %v773_v0 }
 0x16d   :  { %v1288_v1 = vpop.eup %1287 }
 0x16e   :  { %v775_v3 = vmul.f32 %v1288_v1, %v773_v0  ;;  %vm781_vm1 = vweird.f32 %v1288_v1 }
 0x16f   :  { %vm782_vm3 = vmor %vm780_vm2, %vm781_vm1 }
 0x170   :  { %v776_v4 = vmul.f32 %v1288_v1, %v775_v3 }
 0x172   :  { %v777_v62 = vmul.f32 0.5, %v776_v4 }
 0x174   :  { %v778_v5 = vsub.f32 1.5, %v777_v62 }
 0x176   :  { %v779_v8 = vmul.f32 %v1288_v1, %v778_v5 }
 0x178   :  { %v783_v10 = vsel %vm782_vm3, %v1288_v1, %v779_v8 }
 0x179   :  { %v785_v11 = vmul.f32 %v784_v7, %v783_v10 }
 0x17b   :  { %v787_v13 = vmul.f32 %v785_v11, %v1671_v34  ;;  %v790_v17 = vperm.slane %v785_v11, 0  ;;  %v1742_v34 = vld [vmem:[%s1854_s4 + $0x18] sm:$0xff]  }
 0x17c   :  { %v1262_v41 = vunpack.c.l.bf16 %v1742_v34  ;;  %v1263_v42 = vunpack.c.h.bf16 %v1742_v34 }
 0x17d   :  { %v788_v15 = vsub.f32 %v786_v12, %v787_v13  ;;  %v792_v31 = vmul.f32 %v790_v17, %v1607_v9  ;;  %v793_v32 = vmul.f32 %v790_v17, %v1609_v16  ;;  %v794_v35 = vmul.f32 %v790_v17, %v1611_v23  ;;  %v1760_v9 = vld [vmem:[%s1854_s4 + $0x28] sm:$0xff]  }
 0x17e   :  { %v795_v39 = vmul.f32 %v790_v17, %v1613_v30  ;;  %v796_v16 = vmul.f32 %v790_v17, %v1615_v36  ;;  %v797_v46 = vmul.f32 %v790_v17, %v1625_v18  ;;  %v1266_v30 = vunpack.c.l.bf16 %v1751_v38 }
 0x17f   :  { %v809_v37 = vperm.slane %v788_v15, 0  ;;  %v798_v50 = vmul.f32 %v790_v17, %v1629_v24  ;;  %v1270_v52 = vunpack.c.l.bf16 %v1760_v9  ;;  %v1271_v53 = vunpack.c.h.bf16 %v1760_v9 }
 0x180   :  { %v799_v55 = vmul.f32 %v790_v17, %v1633_v29  ;;  %v800_v36 = vmul.f32 %v790_v17, %v1635_v33  ;;  %v801_v57 = vmul.f32 %v790_v17, %v1641_v45  ;;  %v802_v58 = vmul.f32 %v790_v17, %v1645_v49 }
 0x181   :  { %v811_v23 = vadd.f32 %v809_v37, %v792_v31  ;;  %v812_v43 = vadd.f32 %v809_v37, %v793_v32  ;;  %v813_v44 = vadd.f32 %v809_v37, %v794_v35  ;;  %v814_v47 = vadd.f32 %v809_v37, %v795_v39 }
 0x182   :  { %v815_v51 = vadd.f32 %v809_v37, %v796_v16  ;;  %v816_v59 = vadd.f32 %v809_v37, %v797_v46  ;;  %v817_v18 = vadd.f32 %v809_v37, %v798_v50  ;;  %v803_v24 = vmul.f32 %v790_v17, %v1649_v56 }
 0x183   :  { %v827_v54 = vmax.f32 %v811_v23, 0.0  ;;  %v828_v60 = vmax.f32 %v812_v43, 0.0  ;;  %v829_v61 = vmax.f32 %v813_v44, 0.0  ;;  %v818_v0 = vadd.f32 %v809_v37, %v799_v55 }
 0x184   :  { %v830_v1 = vmax.f32 %v814_v47, 0.0  ;;  %v804_v3 = vmul.f32 %v790_v17, %v1653_v63  ;;  %v805_v29 = vmul.f32 %v790_v17, %v1657_v2  ;;  %v819_v4 = vadd.f32 %v809_v37, %v800_v36 }
 0x185   :  { %v831_v33 = vmax.f32 %v815_v51, 0.0  ;;  %v806_v45 = vmul.f32 %v790_v17, %v1661_v6  ;;  %v820_v62 = vadd.f32 %v809_v37, %v801_v57  ;;  %v821_v5 = vadd.f32 %v809_v37, %v802_v58  ;;  %v1285_v6 = vld [vmem:[%s1854_s4 + $0x30] sm:$0xff]  }
 0x186   :  { %v832_v8 = vmax.f32 %v816_v59, 0.0  ;;  %v833_v7 = vmax.f32 %v817_v18, 0.0  ;;  %v875_v10 = vadd.f32 %v1250_v22, %v827_v54  ;;  %v876_v11 = vadd.f32 %v1251_v25, %v828_v60 }
 0x187   :  { %v877_v12 = vadd.f32 %v1254_v26, %v829_v61  ;;  %v807_v49 = vmul.f32 %v790_v17, %v1667_v19  ;;  %v822_v56 = vadd.f32 %v809_v37, %v803_v24  ;;  %v834_v13 = vmax.f32 %v818_v0, 0.0 }
 0x188   :  { %v878_v14 = vadd.f32 %v1255_v27, %v830_v1  ;;  %v823_v15 = vadd.f32 %v809_v37, %v804_v3  ;;  %v824_v63 = vadd.f32 %v809_v37, %v805_v29  ;;  %v835_v20 = vmax.f32 %v819_v4, 0.0  ;;  %v1286_v27 = vld [vmem:[%s1854_s4 + $0x38] sm:$0xff]  }
 0x189   :  { %v879_v2 = vadd.f32 %v1258_v28, %v831_v33  ;;  %v825_v21 = vadd.f32 %v809_v37, %v806_v45  ;;  %v836_v34 = vmax.f32 %v820_v62, 0.0  ;;  %v837_v31 = vmax.f32 %v821_v5, 0.0 }
 0x18a   :  { %v880_v32 = vadd.f32 %v1259_v40, %v832_v8  ;;  %v881_v22 = vadd.f32 %v1262_v41, %v833_v7  ;;  %v891_v25 = vpack.c.bf16 %v875_v10, %v875_v10  ;;  %v892_v26 = vpack.c.bf16 %v876_v11, %v876_v11 }
 0x18b   :  { %v893_v35 = vpack.c.bf16 %v877_v12, %v877_v12  ;;  %v826_v19 = vadd.f32 %v809_v37, %v807_v49  ;;  %v838_v17 = vmax.f32 %v822_v56, 0.0  ;;  %v882_v38 = vadd.f32 %v1263_v42, %v834_v13 }
 0x18c   :  { %v894_v28 = vpack.c.bf16 %v878_v14, %v878_v14  ;;  %v839_v39 = vmax.f32 %v823_v15, 0.0  ;;  %v1274_v16 = vunpack.c.l.bf16 %v1285_v6  ;;  %v883_v23 = vadd.f32 %v1266_v30, %v835_v20  ;;  %908 = vst.msk [vmem:[%s1855_s5] sm:$0xf] %vm907_vm4, %v891_v25 }
 0x18d   :  { %v895_v43 = vpack.c.bf16 %v879_v2, %v879_v2  ;;  %v840_v40 = vmax.f32 %v824_v63, 0.0  ;;  %v1275_v41 = vunpack.c.h.bf16 %v1285_v6  ;;  %v884_v44 = vadd.f32 %v1267_v48, %v836_v34  ;;  %909 = vst.msk [vmem:[%s1855_s5 + $0x4] sm:$0xf] %vm907_vm4, %v892_v26 }
 0x18e   :  { %v896_v37 = vpack.c.bf16 %v880_v32, %v880_v32  ;;  %v841_v42 = vmax.f32 %v825_v21, 0.0  ;;  %v1278_v46 = vunpack.c.l.bf16 %v1286_v27  ;;  %v885_v47 = vadd.f32 %v1270_v52, %v837_v31  ;;  %910 = vst.msk [vmem:[%s1855_s5 + $0x8] sm:$0xf] %vm907_vm4, %v893_v35 }
 0x18f   :  { %v897_v50 = vpack.c.bf16 %v881_v22, %v881_v22  ;;  %v842_v30 = vmax.f32 %v826_v19, 0.0  ;;  %v1279_v51 = vunpack.c.h.bf16 %v1286_v27  ;;  %v886_v48 = vadd.f32 %v1271_v53, %v838_v17  ;;  %911 = vst.msk [vmem:[%s1855_s5 + $0xc] sm:$0xf] %vm907_vm4, %v894_v28 }
 0x190   :  { %v898_v55 = vpack.c.bf16 %v882_v38, %v882_v38  ;;  %v887_v36 = vadd.f32 %v1274_v16, %v839_v39  ;;  %v899_v57 = vpack.c.bf16 %v883_v23, %v883_v23  ;;  %912 = vst.msk [vmem:[%s1855_s5 + $0x10] sm:$0xf] %vm907_vm4, %v895_v43  ;;  %v888_v52 = vadd.f32 %v1275_v41, %v840_v40 }
 0x191   :  { %v900_v59 = vpack.c.bf16 %v884_v44, %v884_v44  ;;  %913 = vst.msk [vmem:[%s1855_s5 + $0x14] sm:$0xf] %vm907_vm4, %v896_v37  ;;  %v889_v9 = vadd.f32 %v1278_v46, %v841_v42  ;;  %v901_v53 = vpack.c.bf16 %v885_v47, %v885_v47  ;;  %v890_v18 = vadd.f32 %v1279_v51, %v842_v30 }
 0x192   :  { %914 = vst.msk [vmem:[%s1855_s5 + $0x18] sm:$0xf] %vm907_vm4, %v897_v50  ;;  %v902_v54 = vpack.c.bf16 %v886_v48, %v886_v48  ;;  %v903_v60 = vpack.c.bf16 %v887_v36, %v887_v36  ;;  %v904_v61 = vpack.c.bf16 %v888_v52, %v888_v52 }
 0x193   :  { %915 = vst.msk [vmem:[%s1855_s5 + $0x1c] sm:$0xf] %vm907_vm4, %v898_v55  ;;  %v905_v58 = vpack.c.bf16 %v889_v9, %v889_v9  ;;  %v906_v24 = vpack.c.bf16 %v890_v18, %v890_v18 }
 0x194   :  { %916 = vst.msk [vmem:[%s1855_s5 + $0x20] sm:$0xf] %vm907_vm4, %v899_v57 }
 0x195   :  { %917 = vst.msk [vmem:[%s1855_s5 + $0x24] sm:$0xf] %vm907_vm4, %v900_v59 }
 0x196   :  { %918 = vst.msk [vmem:[%s1855_s5 + $0x28] sm:$0xf] %vm907_vm4, %v901_v53 }
 0x197   :  { %919 = vst.msk [vmem:[%s1855_s5 + $0x2c] sm:$0xf] %vm907_vm4, %v902_v54 }
 0x198   :  { %920 = vst.msk [vmem:[%s1855_s5 + $0x30] sm:$0xf] %vm907_vm4, %v903_v60 }
 0x199   :  { %921 = vst.msk [vmem:[%s1855_s5 + $0x34] sm:$0xf] %vm907_vm4, %v904_v61 }
 0x19a   :  { %922 = vst.msk [vmem:[%s1855_s5 + $0x38] sm:$0xf] %vm907_vm4, %v905_v58 }
 0x19b   :  { %923 = vst.msk [vmem:[%s1855_s5 + $0x3c] sm:$0xf] %vm907_vm4, %v906_v24 }

// kernel: dagan_generator.12
= control target key start
LH: loop header
LB: loop body
LE: loop exit
PB: predicated region body
PF: predicated region fallthrough
CT: control target
= control target key end

     0   :  { %vm870_vm0 = vcmask 64512   ;;  %vm1737_vm4 = vcmask 60416   ;;  %s4286_s1 = inlined_call_operand.vmem [shape: bf16[256,8], index: 1, kind: input, shape index: {}]   ;;  %s4287_s0 = inlined_call_operand.vmem [shape: bf16[512,256], index: 0, kind: input, shape index: {}]   ;;  %s4288_s2 = inlined_call_operand.vmem [shape: f32[1,8], index: 2, kind: input, shape index: {}]   ;;  %s4289_s3 = inlined_call_operand.vmem [shape: f32[1,8], index: 3, kind: input, shape index: {}]   ;;  %s4290_s4 = inlined_call_operand.vmem [shape: bf16[512,8], index: 4, kind: input, shape index: {}]   ;;  %s4291_s5 = inlined_call_operand.vmem [shape: bf16[512,8], index: 5, kind: output, shape index: {}]  }
   0x1   :  { %v2197_v0 = vld [vmem:[%s4286_s1 + $0x38] sm:$0xff]  ;;  %v2196_v2 = vld [vmem:[%s4286_s1 + $0x30] sm:$0xff]  ;;  %v2195_v4 = vld [vmem:[%s4286_s1 + $0x28] sm:$0xff] }
   0x2   :  { %v2205_v1 = vld [vmem:[%s4286_s1 + $0x78] sm:$0xff]  ;;  %532 = vmatpush.bf16.msra.mxu0 %v2197_v0  ;;  %v2204_v3 = vld [vmem:[%s4286_s1 + $0x70] sm:$0xff]  ;;  %2365 = vmatpush.bf16.msra.mxu2 %v2197_v0  ;;  %v2203_v5 = vld [vmem:[%s4286_s1 + $0x68] sm:$0xff] }
   0x3   :  { %701 = vmatpush.bf16.msra.mxu1 %v2205_v1  ;;  %2373 = vmatpush.bf16.msra.mxu3 %v2205_v1  ;;  %v2194_v6 = vld [vmem:[%s4286_s1 + $0x20] sm:$0xff]  ;;  %v2193_v8 = vld [vmem:[%s4286_s1 + $0x18] sm:$0xff]  ;;  %v2192_v10 = vld [vmem:[%s4286_s1 + $0x10] sm:$0xff] }
   0x4   :  { %v2202_v7 = vld [vmem:[%s4286_s1 + $0x60] sm:$0xff]  ;;  %v2201_v9 = vld [vmem:[%s4286_s1 + $0x58] sm:$0xff]  ;;  %v2200_v11 = vld [vmem:[%s4286_s1 + $0x50] sm:$0xff] }
   0x5   :  { %v2191_v12 = vld [vmem:[%s4286_s1 + $0x8] sm:$0xff]  ;;  %v2190_v14 = vld [vmem:[%s4286_s1] sm:$0xff]  ;;  %v1816_v22 = vld [vmem:[%s4287_s0 + $0x10] sm:$0xf] }
   0x6   :  { %533 = vmatpush.bf16.msra.mxu0 %v2196_v2  ;;  %2366 = vmatpush.bf16.msra.mxu2 %v2196_v2  ;;  %v2199_v13 = vld [vmem:[%s4286_s1 + $0x48] sm:$0xff]  ;;  %v2198_v15 = vld [vmem:[%s4286_s1 + $0x40] sm:$0xff]  ;;  %v2129_v23 = vld [vmem:[%s4287_s0 + $0x14] sm:$0xf0] }
   0x7   :  { %702 = vmatpush.bf16.msra.mxu1 %v2204_v3  ;;  %2374 = vmatpush.bf16.msra.mxu3 %v2204_v3  ;;  %v1808_v16 = vld [vmem:[%s4287_s0] sm:$0xf]  ;;  %v2127_v17 = vld [vmem:[%s4287_s0 + $0x4] sm:$0xf0]  ;;  %v2126_v18 = vld [vmem:[%s4287_s0 + $0x4] sm:$0xf]  ;;  %v1817_v26 = vor.u32 %v2129_v23, %v1816_v22 }
   0x8   :  { %v1810_v19 = vld [vmem:[%s4287_s0 + $0x8] sm:$0xf0]  ;;  %v1809_v20 = vor.u32 %v2127_v17, %v1808_v16  ;;  %v2128_v24 = vld [vmem:[%s4287_s0 + $0x14] sm:$0xf]  ;;  %v1818_v25 = vld [vmem:[%s4287_s0 + $0x18] sm:$0xf0] }
   0x9   :  { %v1813_v21 = vor.u32 %v2126_v18, %v1810_v19  ;;  %v1821_v27 = vor.u32 %v2128_v24, %v1818_v25  ;;  %v1936_v28 = vld [vmem:[%s4287_s0 + $0x100] sm:$0xf]  ;;  %v2159_v29 = vld [vmem:[%s4287_s0 + $0x104] sm:$0xf0]  ;;  %v2158_v30 = vld [vmem:[%s4287_s0 + $0x104] sm:$0xf] }
   0xa   :  { %534 = vmatpush.bf16.msra.mxu0 %v2195_v4  ;;  %2367 = vmatpush.bf16.msra.mxu2 %v2195_v4  ;;  %v1937_v31 = vor.u32 %v2159_v29, %v1936_v28  ;;  %v1938_v32 = vld [vmem:[%s4287_s0 + $0x108] sm:$0xf0]  ;;  %v1824_v34 = vld [vmem:[%s4287_s0 + $0x20] sm:$0xf]  ;;  %v2131_v35 = vld [vmem:[%s4287_s0 + $0x24] sm:$0xf0] }
   0xb   :  { %703 = vmatpush.bf16.msra.mxu1 %v2203_v5  ;;  %2375 = vmatpush.bf16.msra.mxu3 %v2203_v5  ;;  %v1941_v33 = vor.u32 %v2158_v30, %v1938_v32  ;;  %v2130_v36 = vld [vmem:[%s4287_s0 + $0x24] sm:$0xf]  ;;  %v1826_v37 = vld [vmem:[%s4287_s0 + $0x28] sm:$0xf0]  ;;  %v1825_v38 = vor.u32 %v2131_v35, %v1824_v34  ;;  %v1944_v40 = vld [vmem:[%s4287_s0 + $0x110] sm:$0xf] }
   0xc   :  { %v1829_v39 = vor.u32 %v2130_v36, %v1826_v37  ;;  %v2161_v41 = vld [vmem:[%s4287_s0 + $0x114] sm:$0xf0]  ;;  %v2160_v42 = vld [vmem:[%s4287_s0 + $0x114] sm:$0xf]  ;;  %v1946_v44 = vld [vmem:[%s4287_s0 + $0x118] sm:$0xf0] }
   0xd   :  { %v1945_v43 = vor.u32 %v2161_v41, %v1944_v40  ;;  %v1949_v45 = vor.u32 %v2160_v42, %v1946_v44  ;;  %v1832_v46 = vld [vmem:[%s4287_s0 + $0x30] sm:$0xf]  ;;  %v2133_v47 = vld [vmem:[%s4287_s0 + $0x34] sm:$0xf0]  ;;  %v2132_v48 = vld [vmem:[%s4287_s0 + $0x34] sm:$0xf] }
   0xe   :  { %535 = vmatpush.bf16.msra.mxu0 %v2194_v6  ;;  %2368 = vmatpush.bf16.msra.mxu2 %v2194_v6  ;;  %v1834_v49 = vld [vmem:[%s4287_s0 + $0x38] sm:$0xf0]  ;;  %v1833_v50 = vor.u32 %v2133_v47, %v1832_v46  ;;  %v1952_v52 = vld [vmem:[%s4287_s0 + $0x120] sm:$0xf]  ;;  %v2163_v53 = vld [vmem:[%s4287_s0 + $0x124] sm:$0xf0] }
   0xf   :  { %704 = vmatpush.bf16.msra.mxu1 %v2202_v7  ;;  %2376 = vmatpush.bf16.msra.mxu3 %v2202_v7  ;;  %v1837_v51 = vor.u32 %v2132_v48, %v1834_v49  ;;  %v2162_v54 = vld [vmem:[%s4287_s0 + $0x124] sm:$0xf]  ;;  %v1953_v55 = vor.u32 %v2163_v53, %v1952_v52  ;;  %v1954_v56 = vld [vmem:[%s4287_s0 + $0x128] sm:$0xf0]  ;;  %v1840_v58 = vld [vmem:[%s4287_s0 + $0x40] sm:$0xf] }
  0x10   :  { %v1957_v57 = vor.u32 %v2162_v54, %v1954_v56  ;;  %v2135_v59 = vld [vmem:[%s4287_s0 + $0x44] sm:$0xf0]  ;;  %v2134_v60 = vld [vmem:[%s4287_s0 + $0x44] sm:$0xf]  ;;  %v1842_v61 = vld [vmem:[%s4287_s0 + $0x48] sm:$0xf0] }
  0x11   :  { %v1841_v62 = vor.u32 %v2135_v59, %v1840_v58  ;;  %v1845_v63 = vor.u32 %v2134_v60, %v1842_v61  ;;  %v1960_v0 = vld [vmem:[%s4287_s0 + $0x130] sm:$0xf]  ;;  %v2165_v1 = vld [vmem:[%s4287_s0 + $0x134] sm:$0xf0]  ;;  %v2164_v2 = vld [vmem:[%s4287_s0 + $0x134] sm:$0xf] }
  0x12   :  { %536 = vmatpush.bf16.msra.mxu0 %v2193_v8  ;;  %2369 = vmatpush.bf16.msra.mxu2 %v2193_v8  ;;  %v1961_v3 = vor.u32 %v2165_v1, %v1960_v0  ;;  %v1962_v4 = vld [vmem:[%s4287_s0 + $0x138] sm:$0xf0]  ;;  %v1848_v6 = vld [vmem:[%s4287_s0 + $0x50] sm:$0xf]  ;;  %v2137_v7 = vld [vmem:[%s4287_s0 + $0x54] sm:$0xf0] }
  0x13   :  { %705 = vmatpush.bf16.msra.mxu1 %v2201_v9  ;;  %2377 = vmatpush.bf16.msra.mxu3 %v2201_v9  ;;  %v1965_v5 = vor.u32 %v2164_v2, %v1962_v4  ;;  %v2136_v8 = vld [vmem:[%s4287_s0 + $0x54] sm:$0xf]  ;;  %v1850_v9 = vld [vmem:[%s4287_s0 + $0x58] sm:$0xf0]  ;;  %v1970_v16 = vld [vmem:[%s4287_s0 + $0x148] sm:$0xf0] }
  0x14   :  { %v1856_v18 = vld [vmem:[%s4287_s0 + $0x60] sm:$0xf]  ;;  %v2139_v19 = vld [vmem:[%s4287_s0 + $0x64] sm:$0xf0]  ;;  %v1976_v24 = vld [vmem:[%s4287_s0 + $0x150] sm:$0xf] }
  0x15   :  { %v1857_v22 = vor.u32 %v2139_v19, %v1856_v18  ;;  %v2169_v25 = vld [vmem:[%s4287_s0 + $0x154] sm:$0xf0]  ;;  %v1978_v28 = vld [vmem:[%s4287_s0 + $0x158] sm:$0xf0]  ;;  %v1864_v30 = vld [vmem:[%s4287_s0 + $0x70] sm:$0xf] }
  0x16   :  { %537 = vmatpush.bf16.msra.mxu0 %v2192_v10  ;;  %2370 = vmatpush.bf16.msra.mxu2 %v2192_v10  ;;  %v1849_v10 = vor.u32 %v2137_v7, %v1848_v6  ;;  %v2140_v32 = vld [vmem:[%s4287_s0 + $0x74] sm:$0xf]  ;;  %v1984_v36 = vld [vmem:[%s4287_s0 + $0x160] sm:$0xf]  ;;  %v2171_v37 = vld [vmem:[%s4287_s0 + $0x164] sm:$0xf0] }
  0x17   :  { %706 = vmatpush.bf16.msra.mxu1 %v2200_v11  ;;  %2378 = vmatpush.bf16.msra.mxu3 %v2200_v11  ;;  %v1853_v11 = vor.u32 %v2136_v8, %v1850_v9  ;;  %v1986_v40 = vld [vmem:[%s4287_s0 + $0x168] sm:$0xf0]  ;;  %v1872_v42 = vld [vmem:[%s4287_s0 + $0x80] sm:$0xf]  ;;  %v2142_v44 = vld [vmem:[%s4287_s0 + $0x84] sm:$0xf] }
  0x18   :  { %v2173_v52 = vld [vmem:[%s4287_s0 + $0x174] sm:$0xf0]  ;;  %v2172_v53 = vld [vmem:[%s4287_s0 + $0x174] sm:$0xf]  ;;  %v1880_v60 = vld [vmem:[%s4287_s0 + $0x90] sm:$0xf] }
  0x19   :  { %v2145_v61 = vld [vmem:[%s4287_s0 + $0x94] sm:$0xf0]  ;;  %v2175_v6 = vld [vmem:[%s4287_s0 + $0x184] sm:$0xf0]  ;;  %v2174_v7 = vld [vmem:[%s4287_s0 + $0x184] sm:$0xf] }
  0x1a   :  { %538 = vmatpush.bf16.msra.mxu0 %v2191_v12  ;;  %2371 = vmatpush.bf16.msra.mxu2 %v2191_v12  ;;  %v1968_v12 = vld [vmem:[%s4287_s0 + $0x140] sm:$0xf]  ;;  %v1881_v0 = vor.u32 %v2145_v61, %v1880_v60  ;;  %v2002_v9 = vld [vmem:[%s4287_s0 + $0x188] sm:$0xf0]  ;;  %v2146_v18 = vld [vmem:[%s4287_s0 + $0xa4] sm:$0xf] }
  0x1b   :  { %707 = vmatpush.bf16.msra.mxu1 %v2199_v13  ;;  %2379 = vmatpush.bf16.msra.mxu3 %v2199_v13  ;;  %v2167_v13 = vld [vmem:[%s4287_s0 + $0x144] sm:$0xf0]  ;;  %v1890_v19 = vld [vmem:[%s4287_s0 + $0xa8] sm:$0xf0] }
  0x1e   :  { %539 = vmatpush.bf16.msra.mxu0 %v2190_v14  ;;  %2372 = vmatpush.bf16.msra.mxu2 %v2190_v14  ;;  %v2166_v14 = vld [vmem:[%s4287_s0 + $0x144] sm:$0xf] }
  0x1f   :  { %708 = vmatpush.bf16.msra.mxu1 %v2198_v15  ;;  %2380 = vmatpush.bf16.msra.mxu3 %v2198_v15  ;;  %v1969_v15 = vor.u32 %v2167_v13, %v1968_v12  ;;  %v1973_v17 = vor.u32 %v2166_v14, %v1970_v16  ;;  %v1888_v16 = vld [vmem:[%s4287_s0 + $0xa0] sm:$0xf] }
  0x21   :  { %540 = vmatmul.bf16.vlgmr.msra.gmra.mxu0 %v1809_v20  ;;  %620 = vmatmul.bf16.vlgmr.msra.gmra.mxu2 %v1937_v31  ;;  %v2138_v20 = vld [vmem:[%s4287_s0 + $0x64] sm:$0xf]  ;;  %v2141_v31 = vld [vmem:[%s4287_s0 + $0x74] sm:$0xf0] }
  0x22   :  { %709 = vmatmul.bf16.vlgmr.msra.gmra.mxu1 %v1813_v21  ;;  %789 = vmatmul.bf16.vlgmr.msra.gmra.mxu3 %v1941_v33  ;;  %v1858_v21 = vld [vmem:[%s4287_s0 + $0x68] sm:$0xf0]  ;;  %v1866_v33 = vld [vmem:[%s4287_s0 + $0x78] sm:$0xf0]  ;;  %v1865_v34 = vor.u32 %v2141_v31, %v1864_v30  ;;  %v2177_v30 = vld [vmem:[%s4287_s0 + $0x194] sm:$0xf0] }
  0x23   :  { %v1861_v23 = vor.u32 %v2138_v20, %v1858_v21  ;;  %v1869_v35 = vor.u32 %v2140_v32, %v1866_v33  ;;  %v2176_v31 = vld [vmem:[%s4287_s0 + $0x194] sm:$0xf]  ;;  %v2010_v33 = vld [vmem:[%s4287_s0 + $0x198] sm:$0xf0] }
  0x31   :  { %545 = vmatmul.bf16.gmra.mxu0 %v1817_v26  ;;  %625 = vmatmul.bf16.gmra.mxu2 %v1945_v43  ;;  %v2168_v26 = vld [vmem:[%s4287_s0 + $0x154] sm:$0xf]  ;;  %v2143_v43 = vld [vmem:[%s4287_s0 + $0x84] sm:$0xf0] }
  0x32   :  { %714 = vmatmul.bf16.gmra.mxu1 %v1821_v27  ;;  %794 = vmatmul.bf16.gmra.mxu3 %v1949_v45  ;;  %v1977_v27 = vor.u32 %v2169_v25, %v1976_v24  ;;  %v1981_v29 = vor.u32 %v2168_v26, %v1978_v28  ;;  %v1874_v45 = vld [vmem:[%s4287_s0 + $0x88] sm:$0xf0]  ;;  %v1873_v46 = vor.u32 %v2143_v43, %v1872_v42  ;;  %v2148_v42 = vld [vmem:[%s4287_s0 + $0xb4] sm:$0xf]  ;;  %v1898_v43 = vld [vmem:[%s4287_s0 + $0xb8] sm:$0xf0] }
  0x33   :  { %v1877_v47 = vor.u32 %v2142_v44, %v1874_v45 }
  0x41   :  { %550 = vmatmul.bf16.gmra.mxu0 %v1825_v38  ;;  %630 = vmatmul.bf16.gmra.mxu2 %v1953_v55  ;;  %v2170_v38 = vld [vmem:[%s4287_s0 + $0x164] sm:$0xf]  ;;  %v1994_v55 = vld [vmem:[%s4287_s0 + $0x178] sm:$0xf0] }
  0x42   :  { %719 = vmatmul.bf16.gmra.mxu1 %v1829_v39  ;;  %799 = vmatmul.bf16.gmra.mxu3 %v1957_v57  ;;  %v1985_v39 = vor.u32 %v2171_v37, %v1984_v36  ;;  %v1989_v41 = vor.u32 %v2170_v38, %v1986_v40  ;;  %v1997_v56 = vor.u32 %v2172_v53, %v1994_v55  ;;  %v1896_v40 = vld [vmem:[%s4287_s0 + $0xb0] sm:$0xf]  ;;  %v2179_v55 = vld [vmem:[%s4287_s0 + $0x1a4] sm:$0xf0] }
  0x51   :  { %555 = vmatmul.bf16.gmra.mxu0 %v1833_v50  ;;  %635 = vmatmul.bf16.gmra.mxu2 %v1961_v3 }
  0x52   :  { %724 = vmatmul.bf16.gmra.mxu1 %v1837_v51  ;;  %804 = vmatmul.bf16.gmra.mxu3 %v1965_v5  ;;  %v1992_v51 = vld [vmem:[%s4287_s0 + $0x170] sm:$0xf]  ;;  %v2000_v5 = vld [vmem:[%s4287_s0 + $0x180] sm:$0xf] }
  0x53   :  { %v1993_v54 = vor.u32 %v2173_v52, %v1992_v51  ;;  %v2001_v8 = vor.u32 %v2175_v6, %v2000_v5  ;;  %v2150_v5 = vld [vmem:[%s4287_s0 + $0xc4] sm:$0xf]  ;;  %v1906_v6 = vld [vmem:[%s4287_s0 + $0xc8] sm:$0xf0] }
  0x61   :  { %560 = vmatmul.bf16.gmra.mxu0 %v1841_v62  ;;  %640 = vmatmul.bf16.gmra.mxu2 %v1969_v15  ;;  %v2144_v62 = vld [vmem:[%s4287_s0 + $0x94] sm:$0xf] }
  0x62   :  { %729 = vmatmul.bf16.gmra.mxu1 %v1845_v63  ;;  %809 = vmatmul.bf16.gmra.mxu3 %v1973_v17  ;;  %v1882_v63 = vld [vmem:[%s4287_s0 + $0x98] sm:$0xf0]  ;;  %v2147_v17 = vld [vmem:[%s4287_s0 + $0xa4] sm:$0xf0] }
  0x63   :  { %v1885_v1 = vor.u32 %v2144_v62, %v1882_v63  ;;  %v1889_v21 = vor.u32 %v2147_v17, %v1888_v16  ;;  %v2024_v17 = vld [vmem:[%s4287_s0 + $0x1b0] sm:$0xf] }
  0x71   :  { %565 = vmatmul.bf16.gmra.mxu0 %v1849_v10  ;;  %645 = vmatmul.bf16.gmra.mxu2 %v1977_v27  ;;  %v2005_v10 = vor.u32 %v2174_v7, %v2002_v9  ;;  %v1909_v9 = vor.u32 %v2150_v5, %v1906_v6 }
  0x72   :  { %734 = vmatmul.bf16.gmra.mxu1 %v1853_v11  ;;  %814 = vmatmul.bf16.gmra.mxu3 %v1981_v29  ;;  %v2008_v29 = vld [vmem:[%s4287_s0 + $0x190] sm:$0xf] }
  0x73   :  { %v2009_v32 = vor.u32 %v2177_v30, %v2008_v29 }
  0x81   :  { %570 = vmatmul.bf16.gmra.mxu0 %v1857_v22  ;;  %650 = vmatmul.bf16.gmra.mxu2 %v1985_v39  ;;  %v1893_v22 = vor.u32 %v2146_v18, %v1890_v19  ;;  %v2181_v18 = vld [vmem:[%s4287_s0 + $0x1b4] sm:$0xf0]  ;;  %v2180_v19 = vld [vmem:[%s4287_s0 + $0x1b4] sm:$0xf] }
  0x82   :  { %739 = vmatmul.bf16.gmra.mxu1 %v1861_v23  ;;  %819 = vmatmul.bf16.gmra.mxu3 %v1989_v41  ;;  %v2149_v41 = vld [vmem:[%s4287_s0 + $0xb4] sm:$0xf0] }
  0x83   :  { %v1897_v45 = vor.u32 %v2149_v41, %v1896_v40 }
  0x91   :  { %575 = vmatmul.bf16.gmra.mxu0 %v1865_v34  ;;  %655 = vmatmul.bf16.gmra.mxu2 %v1993_v54  ;;  %v2013_v34 = vor.u32 %v2176_v31, %v2010_v33  ;;  %v2016_v54 = vld [vmem:[%s4287_s0 + $0x1a0] sm:$0xf]  ;;  %v1912_v31 = vld [vmem:[%s4287_s0 + $0xd0] sm:$0xf]  ;;  %v2152_v33 = vld [vmem:[%s4287_s0 + $0xd4] sm:$0xf] }
  0x92   :  { %744 = vmatmul.bf16.gmra.mxu1 %v1869_v35  ;;  %824 = vmatmul.bf16.gmra.mxu3 %v1997_v56  ;;  %v2178_v56 = vld [vmem:[%s4287_s0 + $0x1a4] sm:$0xf] }
  0x9e   :  { %v541_v48 = vpop.f32.mrf.mxu0 }
  0x9f   :  { %v710_v49 = vpop.f32.mrf.mxu1 }
  0xa0   :  { %v2653_v50 = vadd.f32 %v710_v49, %v541_v48 }
  0xa1   :  { %580 = vmatmul.bf16.gmra.mxu0 %v1873_v46  ;;  %660 = vmatmul.bf16.gmra.mxu2 %v2001_v8  ;;  %v1901_v46 = vor.u32 %v2148_v42, %v1898_v43 }
  0xa2   :  { %749 = vmatmul.bf16.gmra.mxu1 %v1877_v47  ;;  %829 = vmatmul.bf16.gmra.mxu3 %v2005_v10 }
  0xa4   :  { %v621_v14 = vpop.f32.mrf.mxu2 }
  0xa5   :  { %v790_v15 = vpop.f32.mrf.mxu3 }
  0xa6   :  { %v543_v57 = vpop.f32.mrf.mxu0  ;;  %v2709_v20 = vadd.f32 %v790_v15, %v621_v14 }
  0xa7   :  { %v712_v58 = vpop.f32.mrf.mxu1 }
  0xa8   :  { %v2667_v59 = vadd.f32 %v712_v58, %v543_v57  ;;  %v2017_v57 = vor.u32 %v2179_v55, %v2016_v54  ;;  %v2018_v58 = vld [vmem:[%s4287_s0 + $0x1a8] sm:$0xf0] }
  0xa9   :  { %v2021_v60 = vor.u32 %v2178_v56, %v2018_v58 }
  0xaa   :  { %4341 = vst [vmem:[#allocation2_spill] sm:$0xff] %v2667_v59 }
  0xac   :  { %v623_v26 = vpop.f32.mrf.mxu2 }
  0xad   :  { %v792_v27 = vpop.f32.mrf.mxu3 }
  0xae   :  { %v546_v2 = vpop.f32.mrf.mxu0  ;;  %v2713_v28 = vadd.f32 %v792_v27, %v623_v26 }
  0xaf   :  { %v715_v3 = vpop.f32.mrf.mxu1 }
  0xb0   :  { %v2681_v4 = vadd.f32 %v715_v3, %v546_v2  ;;  %v1904_v2 = vld [vmem:[%s4287_s0 + $0xc0] sm:$0xf]  ;;  %v2151_v3 = vld [vmem:[%s4287_s0 + $0xc4] sm:$0xf0] }
  0xb1   :  { %585 = vmatmul.bf16.gmra.mxu0 %v1881_v0  ;;  %665 = vmatmul.bf16.gmra.mxu2 %v2009_v32  ;;  %v1905_v8 = vor.u32 %v2151_v3, %v1904_v2  ;;  %v2153_v32 = vld [vmem:[%s4287_s0 + $0xd4] sm:$0xf0] }
  0xb2   :  { %4342 = vst [vmem:[#allocation3_spill] sm:$0xff] %v2681_v4  ;;  %754 = vmatmul.bf16.gmra.mxu1 %v1885_v1  ;;  %834 = vmatmul.bf16.gmra.mxu3 %v2013_v34  ;;  %v1914_v34 = vld [vmem:[%s4287_s0 + $0xd8] sm:$0xf0] }
  0xb4   :  { %v626_v38 = vpop.f32.mrf.mxu2 }
  0xb5   :  { %v795_v39 = vpop.f32.mrf.mxu3 }
  0xb6   :  { %v548_v11 = vpop.f32.mrf.mxu0  ;;  %v2741_v44 = vadd.f32 %v795_v39, %v626_v38  ;;  %v1917_v38 = vor.u32 %v2152_v33, %v1914_v34  ;;  %v2156_v33 = vld [vmem:[%s4287_s0 + $0xf4] sm:$0xf]  ;;  %v1930_v34 = vld [vmem:[%s4287_s0 + $0xf8] sm:$0xf0] }
  0xb7   :  { %v717_v12 = vpop.f32.mrf.mxu1 }
  0xb8   :  { %v2695_v13 = vadd.f32 %v717_v12, %v548_v11  ;;  %4346 = vst [vmem:[#allocation7_spill] sm:$0xff] %v2741_v44 }
  0xba   :  { %4343 = vst [vmem:[#allocation4_spill] sm:$0xff] %v2695_v13 }
  0xbc   :  { %v628_v51 = vpop.f32.mrf.mxu2 }
  0xbd   :  { %v797_v52 = vpop.f32.mrf.mxu3 }
  0xbe   :  { %v551_v23 = vpop.f32.mrf.mxu0  ;;  %v2745_v53 = vadd.f32 %v797_v52, %v628_v51  ;;  %v2034_v52 = vld [vmem:[%s4287_s0 + $0x1c8] sm:$0xf0] }
  0xbf   :  { %v720_v24 = vpop.f32.mrf.mxu1 }
  0xc0   :  { %v2711_v25 = vadd.f32 %v720_v24, %v551_v23  ;;  %4348 = vst [vmem:[#allocation9_spill] sm:$0xff] %v2745_v53 }
  0xc1   :  { %590 = vmatmul.bf16.gmra.mxu0 %v1889_v21  ;;  %670 = vmatmul.bf16.gmra.mxu2 %v2017_v57  ;;  %v2025_v21 = vor.u32 %v2181_v18, %v2024_v17  ;;  %v2185_v17 = vld [vmem:[%s4287_s0 + $0x1d4] sm:$0xf0]  ;;  %v2184_v18 = vld [vmem:[%s4287_s0 + $0x1d4] sm:$0xf] }
  0xc2   :  { %4344 = vst [vmem:[#allocation5_spill] sm:$0xff] %v2711_v25  ;;  %759 = vmatmul.bf16.gmra.mxu1 %v1893_v22  ;;  %839 = vmatmul.bf16.gmra.mxu3 %v2021_v60  ;;  %v2026_v22 = vld [vmem:[%s4287_s0 + $0x1b8] sm:$0xf0] }
  0xc3   :  { %v2029_v23 = vor.u32 %v2180_v19, %v2026_v22 }
  0xc4   :  { %v631_v0 = vpop.f32.mrf.mxu2 }
  0xc5   :  { %v800_v1 = vpop.f32.mrf.mxu3 }
  0xc6   :  { %v553_v35 = vpop.f32.mrf.mxu0  ;;  %v2773_v7 = vadd.f32 %v800_v1, %v631_v0  ;;  %v2154_v0 = vld [vmem:[%s4287_s0 + $0xe4] sm:$0xf]  ;;  %v1922_v1 = vld [vmem:[%s4287_s0 + $0xe8] sm:$0xf0] }
  0xc7   :  { %v722_v36 = vpop.f32.mrf.mxu1  ;;  %v1925_v5 = vor.u32 %v2154_v0, %v1922_v1 }
  0xc8   :  { %v2727_v37 = vadd.f32 %v722_v36, %v553_v35  ;;  %v1913_v36 = vor.u32 %v2153_v32, %v1912_v31  ;;  %v1928_v31 = vld [vmem:[%s4287_s0 + $0xf0] sm:$0xf]  ;;  %v2157_v32 = vld [vmem:[%s4287_s0 + $0xf4] sm:$0xf0] }
  0xca   :  { %4345 = vst [vmem:[#allocation6_spill] sm:$0xff] %v2727_v37 }
  0xcc   :  { %v633_v14 = vpop.f32.mrf.mxu2 }
  0xcd   :  { %v802_v15 = vpop.f32.mrf.mxu3 }
  0xce   :  { %v556_v47 = vpop.f32.mrf.mxu0  ;;  %v2777_v16 = vadd.f32 %v802_v15, %v633_v14  ;;  %v2040_v15 = vld [vmem:[%s4287_s0 + $0x1d0] sm:$0xf] }
  0xcf   :  { %v725_v48 = vpop.f32.mrf.mxu1  ;;  %v2041_v19 = vor.u32 %v2185_v17, %v2040_v15  ;;  %v2056_v17 = vld [vmem:[%s4287_s0 + $0x1f0] sm:$0xf] }
  0xd0   :  { %v2743_v49 = vadd.f32 %v725_v48, %v556_v47  ;;  %4350 = vst [vmem:[#allocation11_spill] sm:$0xff] %v2777_v16  ;;  %v2183_v47 = vld [vmem:[%s4287_s0 + $0x1c4] sm:$0xf0]  ;;  %v2182_v48 = vld [vmem:[%s4287_s0 + $0x1c4] sm:$0xf] }
  0xd1   :  { %595 = vmatmul.bf16.gmra.mxu0 %v1897_v45  ;;  %675 = vmatmul.bf16.gmra.mxu2 %v2025_v21  ;;  %v2037_v54 = vor.u32 %v2182_v48, %v2034_v52  ;;  %v2042_v21 = vld [vmem:[%s4287_s0 + $0x1d8] sm:$0xf0]  ;;  %v2187_v52 = vld [vmem:[%s4287_s0 + $0x1e4] sm:$0xf0] }
  0xd2   :  { %4347 = vst [vmem:[#allocation8_spill] sm:$0xff] %v2743_v49  ;;  %764 = vmatmul.bf16.gmra.mxu1 %v1901_v46  ;;  %844 = vmatmul.bf16.gmra.mxu3 %v2029_v23  ;;  %v2032_v46 = vld [vmem:[%s4287_s0 + $0x1c0] sm:$0xf]  ;;  %v2045_v22 = vor.u32 %v2184_v18, %v2042_v21  ;;  %v2189_v18 = vld [vmem:[%s4287_s0 + $0x1f4] sm:$0xf0] }
  0xd3   :  { %v2033_v51 = vor.u32 %v2183_v47, %v2032_v46  ;;  %v2057_v21 = vor.u32 %v2189_v18, %v2056_v17 }
  0xd4   :  { %v636_v29 = vpop.f32.mrf.mxu2 }
  0xd5   :  { %v805_v30 = vpop.f32.mrf.mxu3 }
  0xd6   :  { %v558_v61 = vpop.f32.mrf.mxu0  ;;  %v2805_v35 = vadd.f32 %v805_v30, %v636_v29 }
  0xd7   :  { %v727_v62 = vpop.f32.mrf.mxu1 }
  0xd8   :  { %v2759_v63 = vadd.f32 %v727_v62, %v558_v61  ;;  %4352 = vst [vmem:[#allocation13_spill] sm:$0xff] %v2805_v35  ;;  %v1920_v61 = vld [vmem:[%s4287_s0 + $0xe0] sm:$0xf]  ;;  %v2155_v62 = vld [vmem:[%s4287_s0 + $0xe4] sm:$0xf0] }
  0xd9   :  { %v1921_v3 = vor.u32 %v2155_v62, %v1920_v61 }
  0xda   :  { %4349 = vst [vmem:[#allocation10_spill] sm:$0xff] %v2759_v63 }
  0xdc   :  { %v638_v42 = vpop.f32.mrf.mxu2 }
  0xdd   :  { %v807_v43 = vpop.f32.mrf.mxu3 }
  0xde   :  { %v561_v10 = vpop.f32.mrf.mxu0  ;;  %v2809_v45 = vadd.f32 %v807_v43, %v638_v42 }
  0xdf   :  { %v730_v11 = vpop.f32.mrf.mxu1 }
  0xe0   :  { %v2775_v12 = vadd.f32 %v730_v11, %v561_v10  ;;  %4354 = vst [vmem:[#allocation15_spill] sm:$0xff] %v2809_v45 }
  0xe1   :  { %600 = vmatmul.bf16.gmra.mxu0 %v1905_v8  ;;  %680 = vmatmul.bf16.gmra.mxu2 %v2033_v51  ;;  %v2048_v51 = vld [vmem:[%s4287_s0 + $0x1e0] sm:$0xf] }
  0xe2   :  { %769 = vmatmul.bf16.gmra.mxu1 %v1909_v9  ;;  %849 = vmatmul.bf16.gmra.mxu3 %v2037_v54  ;;  %v2186_v54 = vld [vmem:[%s4287_s0 + $0x1e4] sm:$0xf] }
  0xe4   :  { %v641_v58 = vpop.f32.mrf.mxu2 }
  0xe5   :  { %v810_v60 = vpop.f32.mrf.mxu3 }
  0xe6   :  { %v563_v24 = vpop.f32.mrf.mxu0  ;;  %v2837_v2 = vadd.f32 %v810_v60, %v641_v58 }
  0xe7   :  { %v732_v26 = vpop.f32.mrf.mxu1 }
  0xe8   :  { %v2791_v27 = vadd.f32 %v732_v26, %v563_v24  ;;  %4356 = vst [vmem:[#allocation17_spill] sm:$0xff] %v2837_v2 }
  0xea   :  { %4351 = vst [vmem:[#allocation12_spill] sm:$0xff] %v2791_v27 }
  0xec   :  { %v643_v10 = vpop.f32.mrf.mxu2 }
  0xed   :  { %v812_v11 = vpop.f32.mrf.mxu3 }
  0xee   :  { %v566_v39 = vpop.f32.mrf.mxu0  ;;  %v2841_v14 = vadd.f32 %v812_v11, %v643_v10 }
  0xef   :  { %v735_v40 = vpop.f32.mrf.mxu1 }
  0xf0   :  { %v2807_v41 = vadd.f32 %v735_v40, %v566_v39  ;;  %v1933_v39 = vor.u32 %v2156_v33, %v1930_v34 }
  0xf1   :  { %605 = vmatmul.bf16.gmra.mxu0 %v1913_v36  ;;  %685 = vmatmul.bf16.gmra.mxu2 %v2041_v19  ;;  %v2188_v19 = vld [vmem:[%s4287_s0 + $0x1f4] sm:$0xf] }
  0xf2   :  { %4353 = vst [vmem:[#allocation14_spill] sm:$0xff] %v2807_v41  ;;  %774 = vmatmul.bf16.gmra.mxu1 %v1917_v38  ;;  %854 = vmatmul.bf16.gmra.mxu3 %v2045_v22  ;;  %v1929_v38 = vor.u32 %v2157_v32, %v1928_v31  ;;  %v2058_v22 = vld [vmem:[%s4287_s0 + $0x1f8] sm:$0xf0] }
  0xf4   :  { %v646_v29 = vpop.f32.mrf.mxu2 }
  0xf5   :  { %v815_v30 = vpop.f32.mrf.mxu3 }
  0xf6   :  { %v568_v55 = vpop.f32.mrf.mxu0  ;;  %v2869_v36 = vadd.f32 %v815_v30, %v646_v29 }
  0xf7   :  { %v737_v56 = vpop.f32.mrf.mxu1 }
  0xf8   :  { %v2823_v57 = vadd.f32 %v737_v56, %v568_v55  ;;  %4359 = vst [vmem:[#allocation20_spill] sm:$0xff] %v2869_v36  ;;  %v2049_v55 = vor.u32 %v2187_v52, %v2048_v51  ;;  %v2050_v56 = vld [vmem:[%s4287_s0 + $0x1e8] sm:$0xf0] }
  0xf9   :  { %v2053_v58 = vor.u32 %v2186_v54, %v2050_v56 }
  0xfa   :  { %4355 = vst [vmem:[#allocation16_spill] sm:$0xff] %v2823_v57 }
  0xfc   :  { %v648_v46 = vpop.f32.mrf.mxu2 }
  0xfd   :  { %v817_v47 = vpop.f32.mrf.mxu3 }
  0xfe   :  { %v571_v6 = vpop.f32.mrf.mxu0  ;;  %v2873_v48 = vadd.f32 %v817_v47, %v648_v46 }
  0xff   :  { %v740_v8 = vpop.f32.mrf.mxu1 }
 0x100   :  { %v2839_v9 = vadd.f32 %v740_v8, %v571_v6  ;;  %4361 = vst [vmem:[#allocation22_spill] sm:$0xff] %v2873_v48 }
 0x101   :  { %610 = vmatmul.bf16.gmra.mxu0 %v1921_v3  ;;  %690 = vmatmul.bf16.gmra.mxu2 %v2049_v55 }
 0x102   :  { %4357 = vst [vmem:[#allocation18_spill] sm:$0xff] %v2839_v9  ;;  %779 = vmatmul.bf16.gmra.mxu1 %v1925_v5  ;;  %859 = vmatmul.bf16.gmra.mxu3 %v2053_v58 }
 0x104   :  { %v651_v0 = vpop.f32.mrf.mxu2 }
 0x105   :  { %v820_v1 = vpop.f32.mrf.mxu3 }
 0x106   :  { %v573_v23 = vpop.f32.mrf.mxu0  ;;  %v2889_v3 = vadd.f32 %v820_v1, %v651_v0 }
 0x107   :  { %v742_v24 = vpop.f32.mrf.mxu1 }
 0x108   :  { %v2855_v26 = vadd.f32 %v742_v24, %v573_v23  ;;  %v2061_v23 = vor.u32 %v2188_v19, %v2058_v22 }
 0x10a   :  { %4358 = vst [vmem:[#allocation19_spill] sm:$0xff] %v2855_v26 }
 0x10c   :  { %v653_v10 = vpop.f32.mrf.mxu2 }
 0x10d   :  { %v822_v11 = vpop.f32.mrf.mxu3 }
 0x10e   :  { %v576_v40 = vpop.f32.mrf.mxu0  ;;  %v2893_v15 = vadd.f32 %v822_v11, %v653_v10 }
 0x10f   :  { %v745_v42 = vpop.f32.mrf.mxu1 }
 0x110   :  { %v2871_v43 = vadd.f32 %v745_v42, %v576_v40 }
 0x111   :  { %615 = vmatmul.bf16.gmra.mxu0 %v1929_v38  ;;  %695 = vmatmul.bf16.gmra.mxu2 %v2057_v21 }
 0x112   :  { %4360 = vst [vmem:[#allocation21_spill] sm:$0xff] %v2871_v43  ;;  %784 = vmatmul.bf16.gmra.mxu1 %v1933_v39  ;;  %864 = vmatmul.bf16.gmra.mxu3 %v2061_v23 }
 0x114   :  { %v656_v31 = vpop.f32.mrf.mxu2 }
 0x115   :  { %v825_v32 = vpop.f32.mrf.mxu3 }
 0x116   :  { %v578_v60 = vpop.f32.mrf.mxu0  ;;  %v2909_v33 = vadd.f32 %v825_v32, %v656_v31 }
 0x117   :  { %v747_v61 = vpop.f32.mrf.mxu1 }
 0x118   :  { %v2887_v62 = vadd.f32 %v747_v61, %v578_v60 }
 0x11c   :  { %v658_v40 = vpop.f32.mrf.mxu2 }
 0x11d   :  { %v827_v42 = vpop.f32.mrf.mxu3 }
 0x11e   :  { %v581_v5 = vpop.f32.mrf.mxu0  ;;  %v2913_v46 = vadd.f32 %v827_v42, %v658_v40  ;;  %v872_v40 = vsel %vm870_vm0, %v2667_v59, 0.0  ;;  %v871_v42 = vsel %vm870_vm0, %v2653_v50, 0.0 }
 0x11f   :  { %v750_v6 = vpop.f32.mrf.mxu1 }
 0x120   :  { %v2891_v8 = vadd.f32 %v750_v6, %v581_v5 }
 0x122   :  { %4362 = vst [vmem:[#allocation23_spill] sm:$0xff] %v2891_v8 }
 0x124   :  { %v661_v54 = vpop.f32.mrf.mxu2 }
 0x125   :  { %v830_v55 = vpop.f32.mrf.mxu3 }
 0x126   :  { %v583_v24 = vpop.f32.mrf.mxu0  ;;  %v2917_v56 = vadd.f32 %v830_v55, %v661_v54 }
 0x127   :  { %v752_v29 = vpop.f32.mrf.mxu1 }
 0x128   :  { %v2907_v30 = vadd.f32 %v752_v29, %v583_v24 }
 0x12a   :  { %4363 = vst [vmem:[#allocation24_spill] sm:$0xff] %v2907_v30 }
 0x12c   :  { %v663_v0 = vpop.f32.mrf.mxu2 }
 0x12d   :  { %v832_v1 = vpop.f32.mrf.mxu3 }
 0x12e   :  { %v586_v34 = vpop.f32.mrf.mxu0  ;;  %v2921_v5 = vadd.f32 %v832_v1, %v663_v0  ;;  %v878_v0 = vsel %vm870_vm0, %v2711_v25, 0.0 }
 0x12f   :  { %v755_v38 = vpop.f32.mrf.mxu1 }
 0x130   :  { %v2911_v39 = vadd.f32 %v755_v38, %v586_v34 }
 0x134   :  { %v666_v11 = vpop.f32.mrf.mxu2 }
 0x135   :  { %v835_v17 = vpop.f32.mrf.mxu3 }
 0x136   :  { %v588_v47 = vpop.f32.mrf.mxu0  ;;  %v2927_v18 = vadd.f32 %v835_v17, %v666_v11  ;;  %v880_v11 = vsel %vm870_vm0, %v2727_v37, 0.0 }
 0x137   :  { %v757_v51 = vpop.f32.mrf.mxu1 }
 0x138   :  { %v2915_v52 = vadd.f32 %v757_v51, %v588_v47  ;;  %v874_v47 = vsel %vm870_vm0, %v2681_v4, 0.0  ;;  %v873_v51 = vadd.f32 %v872_v40, %v871_v42  ;;  %v884_v40 = vsel %vm870_vm0, %v2759_v63, 0.0 }
 0x13a   :  { %4364 = vst [vmem:[#allocation25_spill] sm:$0xff] %v2915_v52 }
 0x13c   :  { %v668_v22 = vpop.f32.mrf.mxu2 }
 0x13d   :  { %v837_v23 = vpop.f32.mrf.mxu3 }
 0x13e   :  { %v591_v58 = vpop.f32.mrf.mxu0  ;;  %v2933_v24 = vadd.f32 %v837_v23, %v668_v22  ;;  %v882_v22 = vsel %vm870_vm0, %v2743_v49, 0.0 }
 0x13f   :  { %v760_v60 = vpop.f32.mrf.mxu1 }
 0x140   :  { %v2919_v61 = vadd.f32 %v760_v60, %v591_v58  ;;  %v876_v58 = vsel %vm870_vm0, %v2695_v13, 0.0  ;;  %v875_v60 = vadd.f32 %v874_v47, %v873_v51  ;;  %v886_v47 = vsel %vm870_vm0, %v2775_v12, 0.0 }
 0x142   :  { %4365 = vst [vmem:[#allocation26_spill] sm:$0xff] %v2919_v61  ;;  %v877_v1 = vadd.f32 %v876_v58, %v875_v60  ;;  %v888_v58 = vsel %vm870_vm0, %v2791_v27, 0.0 }
 0x144   :  { %v671_v32 = vpop.f32.mrf.mxu2  ;;  %v879_v17 = vadd.f32 %v878_v0, %v877_v1  ;;  %v890_v0 = vsel %vm870_vm0, %v2807_v41, 0.0 }
 0x145   :  { %v840_v34 = vpop.f32.mrf.mxu3 }
 0x146   :  { %v2923_v6 = vpop.f32.mrf.mxu0  ;;  %v2937_v38 = vadd.f32 %v840_v34, %v671_v32  ;;  %v881_v23 = vadd.f32 %v880_v11, %v879_v17  ;;  %v892_v17 = vsel %vm870_vm0, %v2823_v57, 0.0 }
 0x147   :  { %v2925_v10 = vpop.f32.mrf.mxu1 }
 0x148   :  { %v883_v42 = vadd.f32 %v882_v22, %v881_v23  ;;  %v894_v22 = vsel %vm870_vm0, %v2839_v9, 0.0 }
 0x14a   :  { %v885_v51 = vadd.f32 %v884_v40, %v883_v42  ;;  %v896_v40 = vsel %vm870_vm0, %v2855_v26, 0.0 }
 0x14c   :  { %v887_v60 = vadd.f32 %v886_v47, %v885_v51  ;;  %v898_v47 = vsel %vm870_vm0, %v2871_v43, 0.0  ;;  %v2969_v51 = vpop.f32.mrf.mxu2  ;;  %v906_v43 = vsel %vm870_vm0, %v2911_v39, 0.0 }
 0x14e   :  { %v2929_v19 = vpop.f32.mrf.mxu0  ;;  %v889_v1 = vadd.f32 %v888_v58, %v887_v60  ;;  %v2971_v58 = vpop.f32.mrf.mxu3 }
 0x14f   :  { %v2931_v21 = vpop.f32.mrf.mxu1 }
 0x150   :  { %v891_v37 = vadd.f32 %v890_v0, %v889_v1  ;;  %v900_v0 = vsel %vm870_vm0, %v2887_v62, 0.0 }
 0x152   :  { %v893_v23 = vadd.f32 %v892_v17, %v891_v37  ;;  %v902_v37 = vsel %vm870_vm0, %v2891_v8, 0.0 }
 0x154   :  { %v895_v42 = vadd.f32 %v894_v22, %v893_v23  ;;  %v904_v22 = vsel %vm870_vm0, %v2907_v30, 0.0  ;;  %v2987_v8 = vpop.f32.mrf.mxu2 }
 0x156   :  { %v2935_v29 = vpop.f32.mrf.mxu0  ;;  %v897_v60 = vadd.f32 %v896_v40, %v895_v42  ;;  %v908_v42 = vsel %vm870_vm0, %v2915_v52, 0.0 }
 0x157   :  { %v767_v31 = vpop.f32.mrf.mxu1 }
 0x158   :  { %v899_v1 = vadd.f32 %v898_v47, %v897_v60  ;;  %v2985_v47 = vadd.f32 %v2925_v10, %v2923_v6 }
 0x15a   :  { %v901_v17 = vadd.f32 %v900_v0, %v899_v1  ;;  %v2989_v0 = vpop.f32.mrf.mxu3  ;;  %v910_v1 = vsel %vm870_vm0, %v2919_v61, 0.0 }
 0x15c   :  { %v903_v23 = vadd.f32 %v902_v37, %v901_v17  ;;  %v2995_v37 = vadd.f32 %v2931_v21, %v2929_v19 }
 0x15e   :  { %v601_v54 = vpop.f32.mrf.mxu0  ;;  %v905_v26 = vadd.f32 %v904_v22, %v903_v23  ;;  %v912_v22 = vsel %vm870_vm0, %v2985_v47, 0.0  ;;  %v3000_v23 = vadd.f32 %v767_v31, %v2935_v29 }
 0x15f   :  { %v770_v55 = vpop.f32.mrf.mxu1 }
 0x160   :  { %v907_v60 = vadd.f32 %v906_v43, %v905_v26  ;;  %v914_v26 = vsel %vm870_vm0, %v2995_v37, 0.0  ;;  %v3004_v43 = vadd.f32 %v770_v55, %v601_v54  ;;  %v916_v19 = vsel %vm870_vm0, %v3000_v23, 0.0 }
 0x162   :  { %v909_v17 = vadd.f32 %v908_v42, %v907_v60  ;;  %v918_v60 = vsel %vm870_vm0, %v3004_v43, 0.0 }
 0x164   :  { %v911_v6 = vadd.f32 %v910_v1, %v909_v17  ;;  %v3014_v1 = vpop.f32.mrf.mxu2  ;;  %v3016_v17 = vpop.f32.mrf.mxu3 }
 0x166   :  { %v603_v32 = vpop.f32.mrf.mxu0  ;;  %v913_v10 = vadd.f32 %v912_v22, %v911_v6 }
 0x167   :  { %v772_v34 = vpop.f32.mrf.mxu1 }
 0x168   :  { %v3008_v21 = vadd.f32 %v772_v34, %v603_v32  ;;  %v915_v42 = vadd.f32 %v914_v26, %v913_v10 }
 0x16a   :  { %v917_v31 = vadd.f32 %v916_v19, %v915_v42  ;;  %v920_v54 = vsel %vm870_vm0, %v3008_v21, 0.0 }
 0x16c   :  { %v919_v22 = vadd.f32 %v918_v60, %v917_v31  ;;  %v3038_v31 = vpop.f32.mrf.mxu3 }
 0x16e   :  { %v606_v49 = vpop.f32.mrf.mxu0  ;;  %v921_v6 = vadd.f32 %v920_v54, %v919_v22 }
 0x16f   :  { %v775_v11 = vpop.f32.mrf.mxu1 }
 0x170   :  { %v3012_v29 = vadd.f32 %v775_v11, %v606_v49 }
 0x172   :  { %4366 = vst [vmem:[#allocation27_spill] sm:$0xff] %v3012_v29  ;;  %v922_v32 = vsel %vm870_vm0, %v3012_v29, 0.0 }
 0x173   :  { %v923_v19 = vadd.f32 %v922_v32, %v921_v6 }
 0x176   :  { %v608_v41 = vpop.f32.mrf.mxu0 }
 0x177   :  { %v777_v27 = vpop.f32.mrf.mxu1 }
 0x178   :  { %v3020_v55 = vadd.f32 %v777_v27, %v608_v41 }
 0x17a   :  { %4367 = vst [vmem:[#allocation28_spill] sm:$0xff] %v3020_v55  ;;  %v924_v11 = vsel %vm870_vm0, %v3020_v55, 0.0 }
 0x17b   :  { %v925_v41 = vadd.f32 %v924_v11, %v923_v19  ;;  %v934_v11 = vsel %vm870_vm0, %v2709_v20, 0.0 }
 0x17e   :  { %v611_v9 = vpop.f32.mrf.mxu0 }
 0x17f   :  { %v780_v40 = vpop.f32.mrf.mxu1 }
 0x180   :  { %v3024_v34 = vadd.f32 %v780_v40, %v611_v9  ;;  %v3036_v40 = vpop.f32.mrf.mxu2 }
 0x182   :  { %v926_v42 = vsel %vm870_vm0, %v3024_v34, 0.0 }
 0x183   :  { %v927_v9 = vadd.f32 %v926_v42, %v925_v41  ;;  %v936_v42 = vsel %vm870_vm0, %v2713_v28, 0.0 }
 0x186   :  { %v613_v52 = vpop.f32.mrf.mxu0 }
 0x187   :  { %v782_v61 = vpop.f32.mrf.mxu1 }
 0x188   :  { %v3028_v10 = vadd.f32 %v782_v61, %v613_v52 }
 0x18a   :  { %4368 = vst [vmem:[#allocation29_spill] sm:$0xff] %v3028_v10  ;;  %v928_v60 = vsel %vm870_vm0, %v3028_v10, 0.0  ;;  %v683_v10 = vpop.f32.mrf.mxu2 }
 0x18b   :  { %v929_v52 = vadd.f32 %v928_v60, %v927_v9  ;;  %v938_v60 = vsel %vm870_vm0, %v2741_v44, 0.0 }
 0x18e   :  { %v616_v26 = vpop.f32.mrf.mxu0 }
 0x18f   :  { %v785_v49 = vpop.f32.mrf.mxu1 }
 0x190   :  { %v3032_v27 = vadd.f32 %v785_v49, %v616_v26 }
 0x192   :  { %4369 = vst [vmem:[#allocation30_spill] sm:$0xff] %v3032_v27  ;;  %v930_v54 = vsel %vm870_vm0, %v3032_v27, 0.0  ;;  %v852_v27 = vpop.f32.mrf.mxu3 }
 0x193   :  { %v931_v6 = vadd.f32 %v930_v54, %v929_v52  ;;  %v940_v54 = vsel %vm870_vm0, %v2745_v53, 0.0 }
 0x196   :  { %v618_v61 = vpop.f32.mrf.mxu0 }
 0x197   :  { %v787_v22 = vpop.f32.mrf.mxu1 }
 0x198   :  { %v3042_v32 = vadd.f32 %v787_v22, %v618_v61  ;;  %v942_v61 = vsel %vm870_vm0, %v2773_v7, 0.0 }
 0x19a   :  { %v932_v26 = vsel %vm870_vm0, %v3042_v32, 0.0 }
 0x19b   :  { %v933_v49 = vadd.f32 %v932_v26, %v931_v6  ;;  %v944_v6 = vsel %vm870_vm0, %v2777_v16, 0.0 }
 0x19d   :  { %v935_v19 = vadd.f32 %v934_v11, %v933_v49  ;;  %v946_v49 = vsel %vm870_vm0, %v2805_v35, 0.0 }
 0x19f   :  { %v937_v41 = vadd.f32 %v936_v42, %v935_v19  ;;  %v686_v19 = vpop.f32.mrf.mxu2  ;;  %v855_v42 = vpop.f32.mrf.mxu3 }
 0x1a1   :  { %v939_v9 = vadd.f32 %v938_v60, %v937_v41  ;;  %v948_v41 = vsel %vm870_vm0, %v2809_v45, 0.0 }
 0x1a3   :  { %v941_v52 = vadd.f32 %v940_v54, %v939_v9  ;;  %v950_v9 = vsel %vm870_vm0, %v2837_v2, 0.0 }
 0x1a5   :  { %v943_v22 = vadd.f32 %v942_v61, %v941_v52  ;;  %v952_v52 = vsel %vm870_vm0, %v2841_v14, 0.0 }
 0x1a7   :  { %v945_v26 = vadd.f32 %v944_v6, %v943_v22  ;;  %v954_v22 = vsel %vm870_vm0, %v2869_v36, 0.0  ;;  %v688_v35 = vpop.f32.mrf.mxu2  ;;  %v857_v16 = vpop.f32.mrf.mxu3 }
 0x1a9   :  { %v947_v11 = vadd.f32 %v946_v49, %v945_v26  ;;  %v956_v26 = vsel %vm870_vm0, %v2873_v48, 0.0 }
 0x1ab   :  { %v949_v60 = vadd.f32 %v948_v41, %v947_v11  ;;  %v958_v11 = vsel %vm870_vm0, %v2889_v3, 0.0 }
 0x1ad   :  { %v951_v54 = vadd.f32 %v950_v9, %v949_v60  ;;  %v960_v60 = vsel %vm870_vm0, %v2893_v15, 0.0 }
 0x1af   :  { %v953_v61 = vadd.f32 %v952_v52, %v951_v54  ;;  %v962_v54 = vsel %vm870_vm0, %v2909_v33, 0.0  ;;  %v691_v48 = vpop.f32.mrf.mxu2  ;;  %v860_v36 = vpop.f32.mrf.mxu3 }
 0x1b1   :  { %v955_v6 = vadd.f32 %v954_v22, %v953_v61  ;;  %v964_v61 = vsel %vm870_vm0, %v2913_v46, 0.0 }
 0x1b3   :  { %v957_v49 = vadd.f32 %v956_v26, %v955_v6  ;;  %v966_v6 = vsel %vm870_vm0, %v2917_v56, 0.0 }
 0x1b5   :  { %v959_v41 = vadd.f32 %v958_v11, %v957_v49  ;;  %v968_v49 = vsel %vm870_vm0, %v2921_v5, 0.0 }
 0x1b7   :  { %v961_v9 = vadd.f32 %v960_v60, %v959_v41  ;;  %v970_v41 = vsel %vm870_vm0, %v2927_v18, 0.0 }
 0x1b9   :  { %v963_v52 = vadd.f32 %v962_v54, %v961_v9  ;;  %v972_v9 = vsel %vm870_vm0, %v2933_v24, 0.0  ;;  %v3088_v54 = vadd.f32 %v2971_v58, %v2969_v51  ;;  %v862_v51 = vpop.f32.mrf.mxu3 }
 0x1bb   :  { %v965_v22 = vadd.f32 %v964_v61, %v963_v52  ;;  %v974_v61 = vsel %vm870_vm0, %v2937_v38, 0.0 }
 0x1bd   :  { %v967_v26 = vadd.f32 %v966_v6, %v965_v22  ;;  %v3094_v22 = vadd.f32 %v2989_v0, %v2987_v8 }
 0x1bf   :  { %v969_v11 = vadd.f32 %v968_v49, %v967_v26  ;;  %v976_v26 = vsel %vm870_vm0, %v3088_v54, 0.0  ;;  %v3100_v49 = vadd.f32 %v3016_v17, %v3014_v1  ;;  %v978_v58 = vsel %vm870_vm0, %v3094_v22, 0.0 }
 0x1c0   :  { %v3114_v17 = vadd.f32 %v855_v42, %v686_v19 }
 0x1c1   :  { %v971_v60 = vadd.f32 %v970_v41, %v969_v11  ;;  %v693_v41 = vpop.f32.mrf.mxu2  ;;  %v980_v0 = vsel %vm870_vm0, %v3100_v49, 0.0 }
 0x1c3   :  { %v973_v52 = vadd.f32 %v972_v9, %v971_v60  ;;  %v3106_v60 = vadd.f32 %v3038_v31, %v3036_v40  ;;  %v3110_v9 = vadd.f32 %v852_v27, %v683_v10  ;;  %v986_v31 = vsel %vm870_vm0, %v3114_v17, 0.0  ;;  %v865_v10 = vpop.f32.mrf.mxu3 }
 0x1c5   :  { %v975_v6 = vadd.f32 %v974_v61, %v973_v52  ;;  %v982_v1 = vsel %vm870_vm0, %v3106_v60, 0.0 }
 0x1c7   :  { %v977_v11 = vadd.f32 %v976_v26, %v975_v6  ;;  %v984_v6 = vsel %vm870_vm0, %v3110_v9, 0.0  ;;  %v3118_v26 = vadd.f32 %v857_v16, %v688_v35 }
 0x1c9   :  { %v979_v8 = vadd.f32 %v978_v58, %v977_v11  ;;  %4370 = vst [vmem:[#allocation31_spill] sm:$0xff] %v3118_v26  ;;  %v696_v58 = vpop.f32.mrf.mxu2  ;;  %v988_v27 = vsel %vm870_vm0, %v3118_v26, 0.0 }
 0x1cb   :  { %v981_v52 = vadd.f32 %v980_v0, %v979_v8  ;;  %v3124_v8 = vadd.f32 %v860_v36, %v691_v48  ;;  %v3128_v0 = vadd.f32 %v862_v51, %v693_v41 }
 0x1cd   :  { %v983_v61 = vadd.f32 %v982_v1, %v981_v52  ;;  %4371 = vst [vmem:[#allocation32_spill] sm:$0xff] %v3124_v8  ;;  %v990_v42 = vsel %vm870_vm0, %v3124_v8, 0.0  ;;  %v992_v35 = vsel %vm870_vm0, %v3128_v0, 0.0  ;;  %v3132_v52 = vadd.f32 %v865_v10, %v696_v58 }
 0x1ce   :  { %4372 = vst [vmem:[#allocation33_spill] sm:$0xff] %v3128_v0 }
 0x1cf   :  { %v985_v40 = vadd.f32 %v984_v6, %v983_v61  ;;  %4373 = vst [vmem:[#allocation34_spill] sm:$0xff] %v3132_v52  ;;  %v867_v6 = vpop.f32.mrf.mxu3 }
 0x1d1   :  { %v987_v11 = vadd.f32 %v986_v31, %v985_v40  ;;  %v698_v61 = vpop.f32.mrf.mxu2  ;;  %v994_v40 = vsel %vm870_vm0, %v3132_v52, 0.0 }
 0x1d2   :  { %v3136_v36 = vadd.f32 %v867_v6, %v698_v61 }
 0x1d3   :  { %v989_v19 = vadd.f32 %v988_v27, %v987_v11 }
 0x1d4   :  { %v996_v31 = vsel %vm870_vm0, %v3136_v36, 0.0 }
 0x1d5   :  { %v991_v16 = vadd.f32 %v990_v42, %v989_v19 }
 0x1d7   :  { %v993_v1 = vadd.f32 %v992_v35, %v991_v16 }
 0x1d9   :  { %v995_v48 = vadd.f32 %v994_v40, %v993_v1 }
 0x1db   :  { %v997_v41 = vadd.f32 %v996_v31, %v995_v48 }
 0x1dd   :  { %v998_v51 = vrot.slane %v997_v41, 4 }
 0x1df   :  { %v999_v11 = vadd.f32 %v998_v51, %v997_v41  ;;  %v4374_v41 = vld [vmem:[#allocation6_spill] sm:$0xff] }
 0x1e1   :  { %v1000_v27 = vrot.slane %v999_v11, 2 }
 0x1e3   :  { %v1001_v19 = vadd.f32 %v1000_v27, %v999_v11 }
 0x1e5   :  { %v1002_v42 = vrot.slane %v1001_v19, 1 }
 0x1e7   :  { %v1003_v58 = vadd.f32 %v1002_v42, %v1001_v19 }
 0x1e9   :  { %v3140_v10 = vmul.f32 0.001953125, %v1003_v58  ;;  %v4375_v58 = vld [vmem:[#allocation8_spill] sm:$0xff] }
 0x1eb   :  { %v1005_v16 = vsub.f32 %v2653_v50, %v3140_v10  ;;  %v1006_v35 = vsub.f32 %v2667_v59, %v3140_v10  ;;  %v1007_v1 = vsub.f32 %v2681_v4, %v3140_v10  ;;  %v1008_v61 = vsub.f32 %v2695_v13, %v3140_v10 }
 0x1ec   :  { %v1009_v48 = vsub.f32 %v2711_v25, %v3140_v10  ;;  %v1010_v51 = vsub.f32 %v4374_v41, %v3140_v10  ;;  %v1011_v4 = vsub.f32 %v4375_v58, %v3140_v10  ;;  %v1012_v25 = vsub.f32 %v2759_v63, %v3140_v10 }
 0x1ed   :  { %v1069_v6 = vmul.f32 %v1005_v16, %v1005_v16  ;;  %v1070_v40 = vmul.f32 %v1006_v35, %v1006_v35  ;;  %v1071_v31 = vmul.f32 %v1007_v1, %v1007_v1  ;;  %v1072_v11 = vmul.f32 %v1008_v61, %v1008_v61 }
 0x1ee   :  { %v1073_v59 = vmul.f32 %v1009_v48, %v1009_v48  ;;  %v1074_v1 = vmul.f32 %v1010_v51, %v1010_v51  ;;  %v1013_v61 = vsub.f32 %v2775_v12, %v3140_v10  ;;  %v1076_v58 = vmul.f32 %v1012_v25, %v1012_v25 }
 0x1ef   :  { %v1133_v27 = vsel %vm870_vm0, %v1069_v6, 0.0  ;;  %v1134_v19 = vsel %vm870_vm0, %v1070_v40, 0.0  ;;  %v1136_v16 = vsel %vm870_vm0, %v1071_v31, 0.0  ;;  %v1138_v13 = vsel %vm870_vm0, %v1072_v11, 0.0 }
 0x1f0   :  { %v1135_v42 = vadd.f32 %v1134_v19, %v1133_v27  ;;  %v1075_v6 = vmul.f32 %v1011_v4, %v1011_v4  ;;  %v1140_v40 = vsel %vm870_vm0, %v1073_v59, 0.0  ;;  %v4376_v19 = vld [vmem:[#allocation12_spill] sm:$0xff]  ;;  %v1142_v31 = vsel %vm870_vm0, %v1074_v1, 0.0 }
 0x1f1   :  { %v1014_v48 = vsub.f32 %v4376_v19, %v3140_v10  ;;  %v1077_v63 = vmul.f32 %v1013_v61, %v1013_v61  ;;  %v1016_v4 = vsub.f32 %v2823_v57, %v3140_v10  ;;  %v1146_v59 = vsel %vm870_vm0, %v1076_v58, 0.0 }
 0x1f2   :  { %v1137_v35 = vadd.f32 %v1136_v16, %v1135_v42  ;;  %v4377_v16 = vld [vmem:[#allocation14_spill] sm:$0xff] }
 0x1f3   :  { %v1015_v51 = vsub.f32 %v4377_v16, %v3140_v10  ;;  %v1148_v1 = vsel %vm870_vm0, %v1077_v63, 0.0  ;;  %v1080_v16 = vmul.f32 %v1016_v4, %v1016_v4 }
 0x1f4   :  { %v1139_v41 = vadd.f32 %v1138_v13, %v1137_v35  ;;  %v1144_v13 = vsel %vm870_vm0, %v1075_v6, 0.0  ;;  %v1078_v35 = vmul.f32 %v1014_v48, %v1014_v48 }
 0x1f5   :  { %v1079_v19 = vmul.f32 %v1015_v51, %v1015_v51  ;;  %v1020_v51 = vsub.f32 %v2887_v62, %v3140_v10  ;;  %v1154_v63 = vsel %vm870_vm0, %v1080_v16, 0.0 }
 0x1f6   :  { %v1141_v27 = vadd.f32 %v1140_v40, %v1139_v41  ;;  %v4378_v40 = vld [vmem:[#allocation18_spill] sm:$0xff]  ;;  %v1150_v6 = vsel %vm870_vm0, %v1078_v35, 0.0 }
 0x1f7   :  { %v1017_v25 = vsub.f32 %v4378_v40, %v3140_v10  ;;  %v1152_v58 = vsel %vm870_vm0, %v1079_v19, 0.0 }
 0x1f8   :  { %v1143_v42 = vadd.f32 %v1142_v31, %v1141_v27  ;;  %v4379_v31 = vld [vmem:[#allocation19_spill] sm:$0xff] }
 0x1f9   :  { %v1018_v61 = vsub.f32 %v4379_v31, %v3140_v10  ;;  %v1081_v57 = vmul.f32 %v1017_v25, %v1017_v25  ;;  %v1022_v25 = vsub.f32 %v2907_v30, %v3140_v10 }
 0x1fa   :  { %v1145_v11 = vadd.f32 %v1144_v13, %v1143_v42  ;;  %v4380_v13 = vld [vmem:[#allocation21_spill] sm:$0xff] }
 0x1fb   :  { %v1019_v48 = vsub.f32 %v4380_v13, %v3140_v10  ;;  %v1156_v35 = vsel %vm870_vm0, %v1081_v57, 0.0 }
 0x1fc   :  { %v1147_v41 = vadd.f32 %v1146_v59, %v1145_v11  ;;  %v1082_v59 = vmul.f32 %v1018_v61, %v1018_v61  ;;  %v1023_v61 = vsub.f32 %v2911_v39, %v3140_v10 }
 0x1fd   :  { %v1083_v31 = vmul.f32 %v1019_v48, %v1019_v48 }
 0x1fe   :  { %v1149_v27 = vadd.f32 %v1148_v1, %v1147_v41  ;;  %v4381_v1 = vld [vmem:[#allocation23_spill] sm:$0xff]  ;;  %v1158_v19 = vsel %vm870_vm0, %v1082_v59, 0.0  ;;  %v1087_v30 = vmul.f32 %v1023_v61, %v1023_v61  ;;  %v1028_v61 = vsub.f32 %v3000_v23, %v3140_v10 }
 0x1ff   :  { %v1021_v4 = vsub.f32 %v4381_v1, %v3140_v10  ;;  %v1160_v16 = vsel %vm870_vm0, %v1083_v31, 0.0  ;;  %v1086_v1 = vmul.f32 %v1022_v25, %v1022_v25  ;;  %v1027_v25 = vsub.f32 %v2995_v37, %v3140_v10 }
 0x200   :  { %v1151_v42 = vadd.f32 %v1150_v6, %v1149_v27  ;;  %v1084_v6 = vmul.f32 %v1020_v51, %v1020_v51 }
 0x201   :  { %v1166_v31 = vsel %vm870_vm0, %v1086_v1, 0.0 }
 0x202   :  { %v1153_v11 = vadd.f32 %v1152_v58, %v1151_v42  ;;  %v1085_v58 = vmul.f32 %v1021_v4, %v1021_v4  ;;  %v1162_v57 = vsel %vm870_vm0, %v1084_v6, 0.0  ;;  %v1026_v4 = vsub.f32 %v2985_v47, %v3140_v10 }
 0x203   :  { %v1168_v6 = vsel %vm870_vm0, %v1087_v30, 0.0 }
 0x204   :  { %v1155_v41 = vadd.f32 %v1154_v63, %v1153_v11  ;;  %v4382_v63 = vld [vmem:[#allocation25_spill] sm:$0xff]  ;;  %v1164_v59 = vsel %vm870_vm0, %v1085_v58, 0.0 }
 0x205   :  { %v1024_v48 = vsub.f32 %v4382_v63, %v3140_v10 }
 0x206   :  { %v1157_v27 = vadd.f32 %v1156_v35, %v1155_v41  ;;  %v4383_v35 = vld [vmem:[#allocation26_spill] sm:$0xff] }
 0x207   :  { %v1025_v51 = vsub.f32 %v4383_v35, %v3140_v10 }
 0x208   :  { %v1159_v42 = vadd.f32 %v1158_v19, %v1157_v27  ;;  %v1088_v19 = vmul.f32 %v1024_v48, %v1024_v48  ;;  %v1029_v48 = vsub.f32 %v3004_v43, %v3140_v10 }
 0x20a   :  { %v1161_v11 = vadd.f32 %v1160_v16, %v1159_v42  ;;  %v1089_v16 = vmul.f32 %v1025_v51, %v1025_v51  ;;  %v1170_v58 = vsel %vm870_vm0, %v1088_v19, 0.0  ;;  %v1030_v51 = vsub.f32 %v3008_v21, %v3140_v10 }
 0x20c   :  { %v1163_v41 = vadd.f32 %v1162_v57, %v1161_v11  ;;  %v1090_v57 = vmul.f32 %v1026_v4, %v1026_v4  ;;  %v1172_v1 = vsel %vm870_vm0, %v1089_v16, 0.0  ;;  %v1031_v4 = vsub.f32 %v3012_v29, %v3140_v10 }
 0x20e   :  { %v1165_v27 = vadd.f32 %v1164_v59, %v1163_v41  ;;  %v1091_v59 = vmul.f32 %v1027_v25, %v1027_v25  ;;  %v1174_v30 = vsel %vm870_vm0, %v1090_v57, 0.0  ;;  %v1032_v25 = vsub.f32 %v3020_v55, %v3140_v10 }
 0x210   :  { %v1167_v42 = vadd.f32 %v1166_v31, %v1165_v27  ;;  %v1092_v31 = vmul.f32 %v1028_v61, %v1028_v61  ;;  %v1176_v19 = vsel %vm870_vm0, %v1091_v59, 0.0  ;;  %v1033_v61 = vsub.f32 %v3024_v34, %v3140_v10 }
 0x211   :  { %v1096_v29 = vmul.f32 %v1032_v25, %v1032_v25  ;;  %v1037_v25 = vsub.f32 %v2709_v20, %v3140_v10 }
 0x212   :  { %v1169_v11 = vadd.f32 %v1168_v6, %v1167_v42  ;;  %v1093_v6 = vmul.f32 %v1029_v48, %v1029_v48  ;;  %v1178_v16 = vsel %vm870_vm0, %v1092_v31, 0.0  ;;  %v1097_v55 = vmul.f32 %v1033_v61, %v1033_v61 }
 0x213   :  { %v1038_v61 = vsub.f32 %v2713_v28, %v3140_v10 }
 0x214   :  { %v1171_v41 = vadd.f32 %v1170_v58, %v1169_v11  ;;  %v1094_v58 = vmul.f32 %v1030_v51, %v1030_v51  ;;  %v1180_v57 = vsel %vm870_vm0, %v1093_v6, 0.0  ;;  %v1186_v6 = vsel %vm870_vm0, %v1096_v29, 0.0 }
 0x216   :  { %v1173_v27 = vadd.f32 %v1172_v1, %v1171_v41  ;;  %v1095_v1 = vmul.f32 %v1031_v4, %v1031_v4  ;;  %v1182_v59 = vsel %vm870_vm0, %v1094_v58, 0.0  ;;  %v1036_v4 = vsub.f32 %v3042_v32, %v3140_v10 }
 0x217   :  { %v1188_v58 = vsel %vm870_vm0, %v1097_v55, 0.0 }
 0x218   :  { %v1175_v42 = vadd.f32 %v1174_v30, %v1173_v27  ;;  %v4384_v30 = vld [vmem:[#allocation29_spill] sm:$0xff]  ;;  %v1184_v31 = vsel %vm870_vm0, %v1095_v1, 0.0 }
 0x219   :  { %v1034_v48 = vsub.f32 %v4384_v30, %v3140_v10 }
 0x21a   :  { %v1177_v11 = vadd.f32 %v1176_v19, %v1175_v42  ;;  %v4385_v19 = vld [vmem:[#allocation30_spill] sm:$0xff] }
 0x21b   :  { %v1035_v51 = vsub.f32 %v4385_v19, %v3140_v10 }
 0x21c   :  { %v1179_v41 = vadd.f32 %v1178_v16, %v1177_v11  ;;  %v1098_v16 = vmul.f32 %v1034_v48, %v1034_v48  ;;  %v1039_v48 = vsub.f32 %v2741_v44, %v3140_v10 }
 0x21e   :  { %v1181_v27 = vadd.f32 %v1180_v57, %v1179_v41  ;;  %v1099_v57 = vmul.f32 %v1035_v51, %v1035_v51  ;;  %v1190_v1 = vsel %vm870_vm0, %v1098_v16, 0.0  ;;  %v1040_v51 = vsub.f32 %v2745_v53, %v3140_v10 }
 0x220   :  { %v1183_v42 = vadd.f32 %v1182_v59, %v1181_v27  ;;  %v1100_v59 = vmul.f32 %v1036_v4, %v1036_v4  ;;  %v1192_v29 = vsel %vm870_vm0, %v1099_v57, 0.0  ;;  %v1041_v4 = vsub.f32 %v2773_v7, %v3140_v10 }
 0x221   :  { %v1104_v44 = vmul.f32 %v1040_v51, %v1040_v51  ;;  %v1045_v51 = vsub.f32 %v2837_v2, %v3140_v10 }
 0x222   :  { %v1185_v11 = vadd.f32 %v1184_v31, %v1183_v42  ;;  %v1101_v31 = vmul.f32 %v1037_v25, %v1037_v25  ;;  %v1194_v55 = vsel %vm870_vm0, %v1100_v59, 0.0  ;;  %v1105_v53 = vmul.f32 %v1041_v4, %v1041_v4 }
 0x223   :  { %v1046_v4 = vsub.f32 %v2841_v14, %v3140_v10 }
 0x224   :  { %v1187_v41 = vadd.f32 %v1186_v6, %v1185_v11  ;;  %v1102_v6 = vmul.f32 %v1038_v61, %v1038_v61  ;;  %v1196_v16 = vsel %vm870_vm0, %v1101_v31, 0.0  ;;  %v1202_v31 = vsel %vm870_vm0, %v1104_v44, 0.0 }
 0x225   :  { %v1110_v2 = vmul.f32 %v1046_v4, %v1046_v4  ;;  %v1051_v4 = vsub.f32 %v2909_v33, %v3140_v10 }
 0x226   :  { %v1189_v27 = vadd.f32 %v1188_v58, %v1187_v41  ;;  %v1103_v58 = vmul.f32 %v1039_v48, %v1039_v48  ;;  %v1198_v57 = vsel %vm870_vm0, %v1102_v6, 0.0  ;;  %v1044_v48 = vsub.f32 %v2809_v45, %v3140_v10 }
 0x227   :  { %v1204_v6 = vsel %vm870_vm0, %v1105_v53, 0.0  ;;  %v1109_v45 = vmul.f32 %v1045_v51, %v1045_v51  ;;  %v1050_v51 = vsub.f32 %v2893_v15, %v3140_v10 }
 0x228   :  { %v1191_v42 = vadd.f32 %v1190_v1, %v1189_v27  ;;  %v4386_v1 = vld [vmem:[#allocation11_spill] sm:$0xff]  ;;  %v1200_v59 = vsel %vm870_vm0, %v1103_v58, 0.0 }
 0x229   :  { %v1042_v25 = vsub.f32 %v4386_v1, %v3140_v10 }
 0x22a   :  { %v1193_v11 = vadd.f32 %v1192_v29, %v1191_v42  ;;  %v4387_v29 = vld [vmem:[#allocation13_spill] sm:$0xff] }
 0x22b   :  { %v1043_v61 = vsub.f32 %v4387_v29, %v3140_v10 }
 0x22c   :  { %v1195_v41 = vadd.f32 %v1194_v55, %v1193_v11  ;;  %v1106_v55 = vmul.f32 %v1042_v25, %v1042_v25 }
 0x22e   :  { %v1197_v27 = vadd.f32 %v1196_v16, %v1195_v41  ;;  %v1107_v16 = vmul.f32 %v1043_v61, %v1043_v61  ;;  %v1206_v58 = vsel %vm870_vm0, %v1106_v55, 0.0  ;;  %v1212_v55 = vsel %vm870_vm0, %v1109_v45, 0.0 }
 0x230   :  { %v1199_v42 = vadd.f32 %v1198_v57, %v1197_v27  ;;  %v1108_v57 = vmul.f32 %v1044_v48, %v1044_v48  ;;  %v1208_v44 = vsel %vm870_vm0, %v1107_v16, 0.0  ;;  %v1049_v48 = vsub.f32 %v2889_v3, %v3140_v10 }
 0x231   :  { %v1214_v16 = vsel %vm870_vm0, %v1110_v2, 0.0 }
 0x232   :  { %v1201_v11 = vadd.f32 %v1200_v59, %v1199_v42  ;;  %v4388_v59 = vld [vmem:[#allocation20_spill] sm:$0xff]  ;;  %v1210_v53 = vsel %vm870_vm0, %v1108_v57, 0.0 }
 0x233   :  { %v1047_v25 = vsub.f32 %v4388_v59, %v3140_v10 }
 0x234   :  { %v1203_v41 = vadd.f32 %v1202_v31, %v1201_v11  ;;  %v4389_v31 = vld [vmem:[#allocation22_spill] sm:$0xff] }
 0x235   :  { %v1048_v61 = vsub.f32 %v4389_v31, %v3140_v10 }
 0x236   :  { %v1205_v27 = vadd.f32 %v1204_v6, %v1203_v41  ;;  %v1111_v6 = vmul.f32 %v1047_v25, %v1047_v25  ;;  %v1052_v25 = vsub.f32 %v2913_v46, %v3140_v10 }
 0x238   :  { %v1207_v42 = vadd.f32 %v1206_v58, %v1205_v27  ;;  %v1112_v58 = vmul.f32 %v1048_v61, %v1048_v61  ;;  %v1216_v57 = vsel %vm870_vm0, %v1111_v6, 0.0  ;;  %v1053_v61 = vsub.f32 %v2917_v56, %v3140_v10 }
 0x23a   :  { %v1209_v11 = vadd.f32 %v1208_v44, %v1207_v42  ;;  %v1113_v44 = vmul.f32 %v1049_v48, %v1049_v48  ;;  %v1218_v45 = vsel %vm870_vm0, %v1112_v58, 0.0  ;;  %v1054_v48 = vsub.f32 %v2921_v5, %v3140_v10 }
 0x23c   :  { %v1211_v41 = vadd.f32 %v1210_v53, %v1209_v11  ;;  %v1114_v53 = vmul.f32 %v1050_v51, %v1050_v51  ;;  %v1220_v2 = vsel %vm870_vm0, %v1113_v44, 0.0  ;;  %v1055_v51 = vsub.f32 %v2927_v18, %v3140_v10 }
 0x23e   :  { %v1213_v27 = vadd.f32 %v1212_v55, %v1211_v41  ;;  %v1115_v55 = vmul.f32 %v1051_v4, %v1051_v4  ;;  %v1222_v6 = vsel %vm870_vm0, %v1114_v53, 0.0  ;;  %v1056_v4 = vsub.f32 %v2933_v24, %v3140_v10 }
 0x240   :  { %v1215_v42 = vadd.f32 %v1214_v16, %v1213_v27  ;;  %v1116_v16 = vmul.f32 %v1052_v25, %v1052_v25  ;;  %v1224_v58 = vsel %vm870_vm0, %v1115_v55, 0.0  ;;  %v1057_v25 = vsub.f32 %v2937_v38, %v3140_v10 }
 0x242   :  { %v1217_v11 = vadd.f32 %v1216_v57, %v1215_v42  ;;  %v1117_v57 = vmul.f32 %v1053_v61, %v1053_v61  ;;  %v1226_v44 = vsel %vm870_vm0, %v1116_v16, 0.0  ;;  %v1058_v61 = vsub.f32 %v3088_v54, %v3140_v10 }
 0x244   :  { %v1219_v41 = vadd.f32 %v1218_v45, %v1217_v11  ;;  %v1118_v45 = vmul.f32 %v1054_v48, %v1054_v48  ;;  %v1228_v53 = vsel %vm870_vm0, %v1117_v57, 0.0  ;;  %v1059_v48 = vsub.f32 %v3094_v22, %v3140_v10 }
 0x246   :  { %v1221_v27 = vadd.f32 %v1220_v2, %v1219_v41  ;;  %v1119_v2 = vmul.f32 %v1055_v51, %v1055_v51  ;;  %v1230_v55 = vsel %vm870_vm0, %v1118_v45, 0.0  ;;  %v1060_v51 = vsub.f32 %v3100_v49, %v3140_v10 }
 0x248   :  { %v1223_v42 = vadd.f32 %v1222_v6, %v1221_v27  ;;  %v1120_v6 = vmul.f32 %v1056_v4, %v1056_v4  ;;  %v1232_v16 = vsel %vm870_vm0, %v1119_v2, 0.0  ;;  %v1061_v4 = vsub.f32 %v3106_v60, %v3140_v10 }
 0x24a   :  { %v1225_v11 = vadd.f32 %v1224_v58, %v1223_v42  ;;  %v1121_v58 = vmul.f32 %v1057_v25, %v1057_v25  ;;  %v1234_v57 = vsel %vm870_vm0, %v1120_v6, 0.0  ;;  %v1062_v25 = vsub.f32 %v3110_v9, %v3140_v10 }
 0x24c   :  { %v1227_v41 = vadd.f32 %v1226_v44, %v1225_v11  ;;  %v1122_v44 = vmul.f32 %v1058_v61, %v1058_v61  ;;  %v1236_v45 = vsel %vm870_vm0, %v1121_v58, 0.0  ;;  %v1063_v61 = vsub.f32 %v3114_v17, %v3140_v10 }
 0x24e   :  { %v1229_v27 = vadd.f32 %v1228_v53, %v1227_v41  ;;  %v1123_v53 = vmul.f32 %v1059_v48, %v1059_v48  ;;  %v1238_v2 = vsel %vm870_vm0, %v1122_v44, 0.0  ;;  %v1064_v48 = vsub.f32 %v3118_v26, %v3140_v10 }
 0x250   :  { %v1231_v42 = vadd.f32 %v1230_v55, %v1229_v27  ;;  %v1124_v55 = vmul.f32 %v1060_v51, %v1060_v51  ;;  %v1240_v6 = vsel %vm870_vm0, %v1123_v53, 0.0  ;;  %v1065_v51 = vsub.f32 %v3124_v8, %v3140_v10 }
 0x252   :  { %v1233_v11 = vadd.f32 %v1232_v16, %v1231_v42  ;;  %v1125_v16 = vmul.f32 %v1061_v4, %v1061_v4  ;;  %v1242_v58 = vsel %vm870_vm0, %v1124_v55, 0.0  ;;  %v1066_v4 = vsub.f32 %v3128_v0, %v3140_v10 }
 0x254   :  { %v1235_v41 = vadd.f32 %v1234_v57, %v1233_v11  ;;  %v1126_v57 = vmul.f32 %v1062_v25, %v1062_v25  ;;  %v1244_v44 = vsel %vm870_vm0, %v1125_v16, 0.0  ;;  %v1067_v25 = vsub.f32 %v3132_v52, %v3140_v10 }
 0x256   :  { %v1237_v27 = vadd.f32 %v1236_v45, %v1235_v41  ;;  %v1127_v45 = vmul.f32 %v1063_v61, %v1063_v61  ;;  %v1246_v53 = vsel %vm870_vm0, %v1126_v57, 0.0  ;;  %v1068_v61 = vsub.f32 %v3136_v36, %v3140_v10 }
 0x258   :  { %v1239_v42 = vadd.f32 %v1238_v2, %v1237_v27  ;;  %v1128_v2 = vmul.f32 %v1064_v48, %v1064_v48  ;;  %v1248_v55 = vsel %vm870_vm0, %v1127_v45, 0.0  ;;  %v1132_v57 = vmul.f32 %v1068_v61, %v1068_v61 }
 0x25a   :  { %v1241_v11 = vadd.f32 %v1240_v6, %v1239_v42  ;;  %v1129_v6 = vmul.f32 %v1065_v51, %v1065_v51  ;;  %v1250_v16 = vsel %vm870_vm0, %v1128_v2, 0.0  ;;  %v1258_v45 = vsel %vm870_vm0, %v1132_v57, 0.0  ;;  %v1280_v57 = vld [vmem:[%s4289_s3] sm:$0x1] }
 0x25c   :  { %v1243_v41 = vadd.f32 %v1242_v58, %v1241_v11  ;;  %v1130_v58 = vmul.f32 %v1066_v4, %v1066_v4  ;;  %v1252_v48 = vsel %vm870_vm0, %v1129_v6, 0.0 }
 0x25e   :  { %v1245_v27 = vadd.f32 %v1244_v44, %v1243_v41  ;;  %v1131_v44 = vmul.f32 %v1067_v25, %v1067_v25 }
 0x260   :  { %v1247_v42 = vadd.f32 %v1246_v53, %v1245_v27  ;;  %v1254_v27 = vsel %vm870_vm0, %v1130_v58, 0.0  ;;  %v1256_v51 = vsel %vm870_vm0, %v1131_v44, 0.0 }
 0x262   :  { %v1249_v11 = vadd.f32 %v1248_v55, %v1247_v42 }
 0x264   :  { %v1251_v41 = vadd.f32 %v1250_v16, %v1249_v11 }
 0x266   :  { %v1253_v0 = vadd.f32 %v1252_v48, %v1251_v41 }
 0x268   :  { %v1255_v53 = vadd.f32 %v1254_v27, %v1253_v0 }
 0x26a   :  { %v1257_v52 = vadd.f32 %v1256_v51, %v1255_v53 }
 0x26c   :  { %v1259_v42 = vadd.f32 %v1258_v45, %v1257_v52  ;;  %v1278_v52 = vld [vmem:[%s4288_s2] sm:$0x1] }
 0x26e   :  { %v1260_v55 = vrot.slane %v1259_v42, 4 }
 0x270   :  { %v1261_v8 = vadd.f32 %v1260_v55, %v1259_v42 }
 0x272   :  { %v1262_v4 = vrot.slane %v1261_v8, 2 }
 0x274   :  { %v1263_v26 = vadd.f32 %v1262_v4, %v1261_v8 }
 0x276   :  { %v1264_v2 = vrot.slane %v1263_v26, 1 }
 0x278   :  { %v1265_v11 = vadd.f32 %v1264_v2, %v1263_v26  ;;  %v4392_v2 = vld [vmem:[#allocation3_spill] sm:$0xff] }
 0x27a   :  { %v1266_v25 = vmul.f32 0.001953125, %v1265_v11 }
 0x27c   :  { %v1267_v16 = vadd.f32 1e-05, %v1266_v25  ;;  %v4393_v25 = vld [vmem:[#allocation4_spill] sm:$0xff] }
 0x27e   :  { %2381 = vrsqrt.f32 %v1267_v16  ;;  %vm1274_vm2 = vweird.f32 %v1267_v16 }
 0x284   :  { %v2382_v6 = vpop.eup %2381 }
 0x285   :  { %v1269_v61 = vmul.f32 %v2382_v6, %v1267_v16  ;;  %vm1275_vm1 = vweird.f32 %v2382_v6 }
 0x286   :  { %vm1276_vm3 = vmor %vm1274_vm2, %vm1275_vm1 }
 0x287   :  { %v1270_v41 = vmul.f32 %v2382_v6, %v1269_v61  ;;  %v4395_v61 = vld [vmem:[#allocation6_spill] sm:$0xff] }
 0x289   :  { %v1271_v58 = vmul.f32 0.5, %v1270_v41  ;;  %v4396_v41 = vld [vmem:[#allocation8_spill] sm:$0xff] }
 0x28b   :  { %v1272_v0 = vsub.f32 1.5, %v1271_v58 }
 0x28d   :  { %v1273_v48 = vmul.f32 %v2382_v6, %v1272_v0  ;;  %v4397_v0 = vld [vmem:[#allocation10_spill] sm:$0xff] }
 0x28f   :  { %v1277_v44 = vsel %vm1276_vm3, %v2382_v6, %v1273_v48 }
 0x290   :  { %v1279_v8 = vmul.f32 %v1278_v52, %v1277_v44  ;;  %v4398_v52 = vld [vmem:[#allocation12_spill] sm:$0xff] }
 0x292   :  { %v1281_v26 = vmul.f32 %v1279_v8, %v3140_v10  ;;  %v3341_v53 = vperm.slane %v1279_v8, 0  ;;  %v4391_v10 = vld [vmem:[#allocation2_spill] sm:$0xff] }
 0x294   :  { %v1282_v27 = vsub.f32 %v1280_v57, %v1281_v26  ;;  %v1349_v45 = vmul.f32 %v3341_v53, %v3136_v36  ;;  %v3352_v55 = vmul.f32 %v3341_v53, %v2653_v50  ;;  %v3356_v4 = vmul.f32 %v3341_v53, %v4391_v10  ;;  %v4394_v36 = vld [vmem:[#allocation5_spill] sm:$0xff]  ;;  %v4399_v26 = vld [vmem:[#allocation14_spill] sm:$0xff] }
 0x295   :  { %v3360_v11 = vmul.f32 %v3341_v53, %v4392_v2  ;;  %v3364_v16 = vmul.f32 %v3341_v53, %v4393_v25  ;;  %v3368_v6 = vmul.f32 %v3341_v53, %v4394_v36  ;;  %v3372_v50 = vmul.f32 %v3341_v53, %v4395_v61  ;;  %v4401_v2 = vld [vmem:[#allocation19_spill] sm:$0xff] }
 0x296   :  { %v3343_v51 = vperm.slane %v1282_v27, 0  ;;  %v3376_v58 = vmul.f32 %v3341_v53, %v4396_v41  ;;  %v3380_v48 = vmul.f32 %v3341_v53, %v4397_v0  ;;  %v3384_v44 = vmul.f32 %v3341_v53, %v2775_v12  ;;  %v4400_v27 = vld [vmem:[#allocation16_spill] sm:$0xff]  ;;  %v4402_v61 = vld [vmem:[#allocation23_spill] sm:$0xff] }
 0x297   :  { %v3388_v8 = vmul.f32 %v3341_v53, %v4398_v52  ;;  %v3392_v57 = vmul.f32 %v3341_v53, %v4399_v26  ;;  %v3400_v10 = vmul.f32 %v3341_v53, %v4378_v40  ;;  %v3404_v12 = vmul.f32 %v3341_v53, %v4401_v2  ;;  %v4403_v0 = vld [vmem:[#allocation24_spill] sm:$0xff]  ;;  %v4404_v2 = vld [vmem:[#allocation27_spill] sm:$0xff] }
 0x298   :  { %v3348_v42 = vadd.f32 %v3343_v51, %v1349_v45  ;;  %v3396_v45 = vmul.f32 %v3341_v53, %v4400_v27  ;;  %v3408_v25 = vmul.f32 %v3341_v53, %v4380_v13  ;;  %v3412_v36 = vmul.f32 %v3341_v53, %v2887_v62 }
 0x299   :  { %v3416_v41 = vmul.f32 %v3341_v53, %v4402_v61  ;;  %v3420_v40 = vmul.f32 %v3341_v53, %v4403_v0  ;;  %v3424_v52 = vmul.f32 %v3341_v53, %v2911_v39  ;;  %v3428_v13 = vmul.f32 %v3341_v53, %v4382_v63  ;;  %v4405_v61 = vld [vmem:[#allocation28_spill] sm:$0xff] }
 0x29a   :  { %4390 = vst [vmem:[#allocation18_spill] sm:$0xff] %v3348_v42  ;;  %v3432_v62 = vmul.f32 %v3341_v53, %v4383_v35  ;;  %v3436_v26 = vmul.f32 %v3341_v53, %v2985_v47  ;;  %v3440_v27 = vmul.f32 %v3341_v53, %v2995_v37  ;;  %v3444_v39 = vmul.f32 %v3341_v53, %v3000_v23  ;;  %v4409_v42 = vld [vmem:[#allocation9_spill] sm:$0xff] }
 0x29b   :  { %v3448_v63 = vmul.f32 %v3341_v53, %v3004_v43  ;;  %v3452_v35 = vmul.f32 %v3341_v53, %v3008_v21  ;;  %v3456_v47 = vmul.f32 %v3341_v53, %v4404_v2  ;;  %v3460_v37 = vmul.f32 %v3341_v53, %v4405_v61  ;;  %v4407_v61 = vld [vmem:[#allocation7_spill] sm:$0xff] }
 0x29c   :  { %v3464_v23 = vmul.f32 %v3341_v53, %v3024_v34  ;;  %v3468_v43 = vmul.f32 %v3341_v53, %v4384_v30  ;;  %v3472_v21 = vmul.f32 %v3341_v53, %v4385_v19  ;;  %v3476_v0 = vmul.f32 %v3341_v53, %v3042_v32 }
 0x29d   :  { %v3480_v2 = vmul.f32 %v3341_v53, %v2709_v20  ;;  %v3484_v34 = vmul.f32 %v3341_v53, %v2713_v28  ;;  %v3488_v30 = vmul.f32 %v3341_v53, %v4407_v61  ;;  %v3492_v19 = vmul.f32 %v3341_v53, %v4409_v42 }
 0x29e   :  { %v3496_v32 = vmul.f32 %v3341_v53, %v2773_v7  ;;  %v3500_v20 = vmul.f32 %v3341_v53, %v4386_v1  ;;  %v3504_v28 = vmul.f32 %v3341_v53, %v4387_v29  ;;  %v3516_v7 = vmul.f32 %v3341_v53, %v2841_v14 }
 0x29f   :  { %4406 = vst [vmem:[#allocation21_spill] sm:$0xff] %v3484_v34  ;;  %v4410_v34 = vld [vmem:[#allocation15_spill] sm:$0xff]  ;;  %v3520_v1 = vmul.f32 %v3341_v53, %v4388_v59  ;;  %v3524_v29 = vmul.f32 %v3341_v53, %v4389_v31  ;;  %v3536_v14 = vmul.f32 %v3341_v53, %v2909_v33  ;;  %v3540_v59 = vmul.f32 %v3341_v53, %v2913_v46 }
 0x2a0   :  { %4408 = vst [vmem:[#allocation25_spill] sm:$0xff] %v3488_v30  ;;  %v3508_v61 = vmul.f32 %v3341_v53, %v4410_v34  ;;  %v4411_v30 = vld [vmem:[#allocation17_spill] sm:$0xff]  ;;  %v3528_v34 = vmul.f32 %v3341_v53, %v2889_v3  ;;  %v3544_v31 = vmul.f32 %v3341_v53, %v2917_v56  ;;  %v3548_v3 = vmul.f32 %v3341_v53, %v2921_v5 }
 0x2a1   :  { %v3512_v42 = vmul.f32 %v3341_v53, %v4411_v30  ;;  %v3532_v30 = vmul.f32 %v3341_v53, %v2893_v15  ;;  %v3552_v15 = vmul.f32 %v3341_v53, %v2927_v18  ;;  %v3556_v33 = vmul.f32 %v3341_v53, %v2933_v24  ;;  %v3573_v18 = vld [vmem:[%s4290_s4] sm:$0xff]   ;;  %v3578_v24 = vld [vmem:[%s4290_s4 + $0x8] sm:$0xff]  }
 0x2a2   :  { %v3560_v46 = vmul.f32 %v3341_v53, %v2937_v38  ;;  %v3564_v56 = vmul.f32 %v3341_v53, %v3088_v54  ;;  %v3568_v5 = vmul.f32 %v3341_v53, %v3094_v22  ;;  %v3582_v38 = vmul.f32 %v3341_v53, %v3100_v49 }
 0x2a3   :  { %4412 = vst [vmem:[#allocation26_spill] sm:$0xff] %v3556_v33  ;;  %v3586_v54 = vmul.f32 %v3341_v53, %v3106_v60  ;;  %v3590_v22 = vmul.f32 %v3341_v53, %v3110_v9  ;;  %v4421_v33 = vld [vmem:[#allocation32_spill] sm:$0xff] }
 0x2a4   :  { %4413 = vst [vmem:[#allocation29_spill] sm:$0xff] %v3560_v46  ;;  %v3602_v49 = vmul.f32 %v3341_v53, %v4421_v33  ;;  %v3618_v33 = vadd.f32 %v3343_v51, %v3352_v55  ;;  %v3638_v55 = vadd.f32 %v3343_v51, %v3372_v50  ;;  %v3658_v50 = vadd.f32 %v3343_v51, %v3392_v57 }
 0x2a5   :  { %4414 = vst [vmem:[#allocation30_spill] sm:$0xff] %v3564_v56  ;;  %v4420_v56 = vld [vmem:[#allocation31_spill] sm:$0xff]  ;;  %v3678_v57 = vadd.f32 %v3343_v51, %v3412_v36  ;;  %v3698_v36 = vadd.f32 %v3343_v51, %v3432_v62  ;;  %v3718_v62 = vadd.f32 %v3343_v51, %v3452_v35  ;;  %v3738_v35 = vadd.f32 %v3343_v51, %v3472_v21 }
 0x2a6   :  { %4415 = vst [vmem:[#allocation11_spill] sm:$0xff] %v3568_v5  ;;  %v3594_v5 = vmul.f32 %v3341_v53, %v3114_v17  ;;  %v3598_v46 = vmul.f32 %v3341_v53, %v4420_v56  ;;  %v4424_v56 = vld [vmem:[#allocation21_spill] sm:$0xff]  ;;  %v3758_v21 = vadd.f32 %v3343_v51, %v3492_v19  ;;  %v3778_v19 = vadd.f32 %v3343_v51, %v3512_v42 }
 0x2a7   :  { %4416 = vst [vmem:[#allocation13_spill] sm:$0xff] %v3582_v38  ;;  %v4422_v38 = vld [vmem:[#allocation33_spill] sm:$0xff]  ;;  %v3798_v42 = vadd.f32 %v3343_v51, %v3532_v30  ;;  %v3818_v30 = vadd.f32 %v3343_v51, %v3552_v15  ;;  %v2335_v15 = vld [vmem:[%s4290_s4 + $0x10] sm:$0xff]  }
 0x2a8   :  { %4417 = vst [vmem:[#allocation20_spill] sm:$0xff] %v3586_v54  ;;  %v3606_v60 = vmul.f32 %v3341_v53, %v4422_v38  ;;  %v4423_v54 = vld [vmem:[#allocation34_spill] sm:$0xff]  ;;  %v3622_v38 = vadd.f32 %v3343_v51, %v3356_v4  ;;  %v3642_v4 = vadd.f32 %v3343_v51, %v3376_v58  ;;  %v3662_v58 = vadd.f32 %v3343_v51, %v3396_v45  ;;  %v4425_v17 = vld [vmem:[#allocation25_spill] sm:$0xff] }
 0x2a9   :  { %4418 = vst [vmem:[#allocation22_spill] sm:$0xff] %v3590_v22  ;;  %v3610_v9 = vmul.f32 %v3341_v53, %v4423_v54  ;;  %v3626_v53 = vadd.f32 %v3343_v51, %v3360_v11  ;;  %v3630_v54 = vadd.f32 %v3343_v51, %v3364_v16  ;;  %v3646_v11 = vadd.f32 %v3343_v51, %v3380_v48 }
 0x2aa   :  { %4419 = vst [vmem:[#allocation2_spill] sm:$0xff] %v3594_v5  ;;  %v3634_v5 = vadd.f32 %v3343_v51, %v3368_v6  ;;  %v3650_v16 = vadd.f32 %v3343_v51, %v3384_v44  ;;  %v3654_v6 = vadd.f32 %v3343_v51, %v3388_v8  ;;  %v3666_v48 = vadd.f32 %v3343_v51, %v3400_v10 }
 0x2ab   :  { %v3670_v44 = vadd.f32 %v3343_v51, %v3404_v12  ;;  %v3674_v8 = vadd.f32 %v3343_v51, %v3408_v25  ;;  %v3682_v45 = vadd.f32 %v3343_v51, %v3416_v41  ;;  %v3686_v10 = vadd.f32 %v3343_v51, %v3420_v40  ;;  %4428 = vst [vmem:[#allocation5_spill] sm:$0xff] %v3798_v42 }
 0x2ac   :  { %v3690_v12 = vadd.f32 %v3343_v51, %v3424_v52  ;;  %v3694_v25 = vadd.f32 %v3343_v51, %v3428_v13  ;;  %v3702_v41 = vadd.f32 %v3343_v51, %v3436_v26  ;;  %v3706_v40 = vadd.f32 %v3343_v51, %v3440_v27  ;;  %4433 = vst [vmem:[#allocation14_spill] sm:$0xff] %v3818_v30 }
 0x2ad   :  { %v3710_v52 = vadd.f32 %v3343_v51, %v3444_v39  ;;  %v3714_v13 = vadd.f32 %v3343_v51, %v3448_v63  ;;  %v3722_v26 = vadd.f32 %v3343_v51, %v3456_v47  ;;  %v3726_v27 = vadd.f32 %v3343_v51, %v3460_v37  ;;  %v4440_v30 = vld [vmem:[#allocation11_spill] sm:$0xff] }
 0x2ae   :  { %v3730_v39 = vadd.f32 %v3343_v51, %v3464_v23  ;;  %v3734_v63 = vadd.f32 %v3343_v51, %v3468_v43  ;;  %v3742_v47 = vadd.f32 %v3343_v51, %v3476_v0  ;;  %v3746_v37 = vadd.f32 %v3343_v51, %v3480_v2 }
 0x2af   :  { %v3750_v23 = vadd.f32 %v3343_v51, %v4424_v56  ;;  %v3754_v43 = vadd.f32 %v3343_v51, %v4425_v17  ;;  %v3762_v0 = vadd.f32 %v3343_v51, %v3496_v32  ;;  %v3766_v2 = vadd.f32 %v3343_v51, %v3500_v20 }
 0x2b0   :  { %v3770_v56 = vadd.f32 %v3343_v51, %v3504_v28  ;;  %v3774_v17 = vadd.f32 %v3343_v51, %v3508_v61  ;;  %v3782_v32 = vadd.f32 %v3343_v51, %v3516_v7  ;;  %v3786_v20 = vadd.f32 %v3343_v51, %v3520_v1 }
 0x2b1   :  { %v3790_v28 = vadd.f32 %v3343_v51, %v3524_v29  ;;  %v3794_v61 = vadd.f32 %v3343_v51, %v3528_v34  ;;  %v3802_v7 = vadd.f32 %v3343_v51, %v3536_v14  ;;  %v3806_v1 = vadd.f32 %v3343_v51, %v3540_v59  ;;  %v4434_v14 = vld [vmem:[#allocation26_spill] sm:$0xff]  ;;  %v4436_v59 = vld [vmem:[#allocation29_spill] sm:$0xff] }
 0x2b2   :  { %v3810_v29 = vadd.f32 %v3343_v51, %v3544_v31  ;;  %v3814_v34 = vadd.f32 %v3343_v51, %v3548_v3  ;;  %v1417_v22 = vmax.f32 %v3618_v33, 0.0  ;;  %v4438_v31 = vld [vmem:[#allocation30_spill] sm:$0xff]  ;;  %v1418_v3 = vmax.f32 %v3622_v38, 0.0 }
 0x2b3   :  { %4426 = vst [vmem:[#allocation3_spill] sm:$0xff] %v3790_v28  ;;  %v3839_v33 = vadd.f32 %v3343_v51, %v4440_v30  ;;  %v3860_v30 = vadd.f32 %v3343_v51, %v3598_v46  ;;  %v3875_v46 = vadd.f32 %v3343_v51, %v3606_v60  ;;  %v4456_v60 = vunpack.c.l.bf16 %v3578_v24 }
 0x2b4   :  { %4427 = vst [vmem:[#allocation4_spill] sm:$0xff] %v3794_v61 }
 0x2b5   :  { %4429 = vst [vmem:[#allocation6_spill] sm:$0xff] %v3802_v7  ;;  %v3823_v7 = vadd.f32 %v3343_v51, %v4434_v14  ;;  %v4442_v14 = vld [vmem:[#allocation13_spill] sm:$0xff] }
 0x2b6   :  { %4430 = vst [vmem:[#allocation8_spill] sm:$0xff] %v3806_v1  ;;  %v3827_v1 = vadd.f32 %v3343_v51, %v4436_v59  ;;  %v4444_v59 = vld [vmem:[#allocation20_spill] sm:$0xff] }
 0x2b7   :  { %4431 = vst [vmem:[#allocation10_spill] sm:$0xff] %v3810_v29  ;;  %v3831_v29 = vadd.f32 %v3343_v51, %v4438_v31  ;;  %v1419_v31 = vmax.f32 %v3626_v53, 0.0  ;;  %v3868_v53 = vadd.f32 %v3343_v51, %v3602_v49  ;;  %v4454_v49 = vunpack.c.h.bf16 %v3573_v18 }
 0x2b8   :  { %4432 = vst [vmem:[#allocation12_spill] sm:$0xff] %v3814_v34  ;;  %v4448_v34 = vld [vmem:[#allocation2_spill] sm:$0xff] }
 0x2b9   :  { %4435 = vst [vmem:[#allocation16_spill] sm:$0xff] %v3823_v7  ;;  %v3843_v7 = vadd.f32 %v3343_v51, %v4442_v14  ;;  %v3856_v42 = vadd.f32 %v3343_v51, %v4448_v34  ;;  %v1420_v14 = vmax.f32 %v3630_v54, 0.0  ;;  %v4452_v34 = vunpack.c.l.bf16 %v3573_v18  ;;  %v2338_v18 = vld [vmem:[%s4290_s4 + $0x28] sm:$0xff]  }
 0x2ba   :  { %4437 = vst [vmem:[#allocation19_spill] sm:$0xff] %v3827_v1  ;;  %v3847_v1 = vadd.f32 %v3343_v51, %v4444_v59  ;;  %v2336_v59 = vld [vmem:[%s4290_s4 + $0x18] sm:$0xff]   ;;  %v1422_v54 = vmax.f32 %v3638_v55, 0.0  ;;  %v1424_v55 = vmax.f32 %v3646_v11, 0.0  ;;  %v2339_v11 = vld [vmem:[%s4290_s4 + $0x30] sm:$0xff]   ;;  %v2228_v61 = vunpack.c.l.bf16 %v2338_v18 }
 0x2bb   :  { %4439 = vst [vmem:[#allocation23_spill] sm:$0xff] %v3831_v29  ;;  %v4446_v29 = vld [vmem:[#allocation22_spill] sm:$0xff] }
 0x2bc   :  { %4441 = vst [vmem:[#allocation24_spill] sm:$0xff] %v3839_v33  ;;  %v3852_v38 = vadd.f32 %v3343_v51, %v4446_v29  ;;  %v1421_v29 = vmax.f32 %v3634_v5, 0.0  ;;  %v3885_v5 = vadd.f32 %v3343_v51, %v3610_v9  ;;  %v1426_v51 = vmax.f32 %v3654_v6, 0.0  ;;  %v2340_v6 = vld [vmem:[%s4290_s4 + $0x38] sm:$0xff]  }
 0x2bd   :  { %4443 = vst [vmem:[#allocation27_spill] sm:$0xff] %v3843_v7  ;;  %v2221_v7 = vunpack.c.h.bf16 %v2336_v59  ;;  %v1427_v33 = vmax.f32 %v3658_v50, 0.0  ;;  %v1429_v50 = vmax.f32 %v3666_v48, 0.0  ;;  %v1431_v48 = vmax.f32 %v3674_v8, 0.0 }
 0x2be   :  { %4445 = vst [vmem:[#allocation28_spill] sm:$0xff] %v3847_v1  ;;  %v2337_v1 = vld [vmem:[%s4290_s4 + $0x20] sm:$0xff]   ;;  %v1433_v8 = vmax.f32 %v3682_v45, 0.0  ;;  %v1435_v45 = vmax.f32 %v3690_v12, 0.0  ;;  %v1437_v12 = vmax.f32 %v3698_v36, 0.0  ;;  %v1439_v36 = vmax.f32 %v3706_v40, 0.0 }
 0x2bf   :  { %4447 = vst [vmem:[#allocation7_spill] sm:$0xff] %v3852_v38  ;;  %v2216_v38 = vunpack.c.l.bf16 %v2335_v15  ;;  %v2224_v9 = vunpack.c.l.bf16 %v2337_v1  ;;  %v1441_v40 = vmax.f32 %v3714_v13, 0.0  ;;  %v1443_v13 = vmax.f32 %v3722_v26, 0.0 }
 0x2c0   :  { %4449 = vst [vmem:[#allocation9_spill] sm:$0xff] %v3856_v42  ;;  %v1609_v42 = vadd.f32 %v4452_v34, %v1417_v22  ;;  %v1423_v22 = vmax.f32 %v3642_v4, 0.0  ;;  %v2220_v34 = vunpack.c.l.bf16 %v2336_v59  ;;  %v1445_v26 = vmax.f32 %v3730_v39, 0.0 }
 0x2c1   :  { %4450 = vst [vmem:[#allocation15_spill] sm:$0xff] %v3860_v30  ;;  %v2217_v30 = vunpack.c.h.bf16 %v2335_v15  ;;  %v1425_v15 = vmax.f32 %v3650_v16, 0.0  ;;  %v1613_v4 = vadd.f32 %v2216_v38, %v1421_v29  ;;  %v1447_v39 = vmax.f32 %v3738_v35, 0.0 }
 0x2c2   :  { %4451 = vst [vmem:[#allocation17_spill] sm:$0xff] %v3868_v53  ;;  %v1610_v53 = vadd.f32 %v4454_v49, %v1418_v3  ;;  %v4457_v3 = vunpack.c.h.bf16 %v3578_v24  ;;  %v1615_v28 = vadd.f32 %v2220_v34, %v1423_v22  ;;  %v1619_v22 = vadd.f32 %v2228_v61, %v1427_v33 }
 0x2c3   :  { %4453 = vst [vmem:[#allocation31_spill] sm:$0xff] %v3875_v46  ;;  %v1611_v46 = vadd.f32 %v4456_v60, %v1419_v31  ;;  %v2225_v31 = vunpack.c.h.bf16 %v2337_v1  ;;  %v1614_v16 = vadd.f32 %v2217_v30, %v1422_v54  ;;  %v1428_v60 = vmax.f32 %v3662_v58, 0.0 }
 0x2c4   :  { %4455 = vst [vmem:[#allocation32_spill] sm:$0xff] %v3885_v5  ;;  %v1612_v49 = vadd.f32 %v4457_v3, %v1420_v14  ;;  %v1673_v5 = vpack.c.bf16 %v1609_v42, %v1609_v42  ;;  %v1674_v59 = vpack.c.bf16 %v1610_v53, %v1610_v53  ;;  %v2229_v14 = vunpack.c.h.bf16 %v2338_v18  ;;  %v2341_v53 = vld [vmem:[%s4290_s4 + $0x40] sm:$0xff]  }
 0x2c5   :  { %v1675_v24 = vpack.c.bf16 %v1611_v46, %v1611_v46  ;;  %v1616_v42 = vadd.f32 %v2221_v7, %v1424_v55  ;;  %v2232_v1 = vunpack.c.l.bf16 %v2339_v11  ;;  %v1617_v29 = vadd.f32 %v2224_v9, %v1425_v15  ;;  %v2342_v55 = vld [vmem:[%s4290_s4 + $0x48] sm:$0xff]  }
 0x2c6   :  { %v1676_v38 = vpack.c.bf16 %v1612_v49, %v1612_v49  ;;  %v1677_v3 = vpack.c.bf16 %v1613_v4, %v1613_v4  ;;  %1738 = vst.msk [vmem:[%s4291_s5] sm:$0xf] %vm1737_vm4, %v1673_v5  ;;  %v1430_v58 = vmax.f32 %v3670_v44, 0.0  ;;  %v2233_v30 = vunpack.c.h.bf16 %v2339_v11 }
 0x2c7   :  { %v1618_v7 = vadd.f32 %v2225_v31, %v1426_v51  ;;  %v1678_v46 = vpack.c.bf16 %v1614_v16, %v1614_v16  ;;  %1739 = vst.msk [vmem:[%s4291_s5 + $0x4] sm:$0xf] %vm1737_vm4, %v1674_v59  ;;  %v2236_v54 = vunpack.c.l.bf16 %v2340_v6  ;;  %v1679_v34 = vpack.c.bf16 %v1615_v28, %v1615_v28  ;;  %v2343_v51 = vld [vmem:[%s4290_s4 + $0x50] sm:$0xff]  }
 0x2c8   :  { %1740 = vst.msk [vmem:[%s4291_s5 + $0x8] sm:$0xf] %vm1737_vm4, %v1675_v24  ;;  %v1432_v44 = vmax.f32 %v3678_v57, 0.0  ;;  %v2237_v5 = vunpack.c.h.bf16 %v2340_v6  ;;  %v1620_v15 = vadd.f32 %v2229_v14, %v1428_v60  ;;  %v1680_v18 = vpack.c.bf16 %v1616_v42, %v1616_v42  ;;  %v2344_v60 = vld [vmem:[%s4290_s4 + $0x58] sm:$0xff]  }
 0x2c9   :  { %1741 = vst.msk [vmem:[%s4291_s5 + $0xc] sm:$0xf] %vm1737_vm4, %v1676_v38  ;;  %v2240_v28 = vunpack.c.l.bf16 %v2341_v53  ;;  %v1621_v61 = vadd.f32 %v2232_v1, %v1429_v50  ;;  %v1681_v33 = vpack.c.bf16 %v1617_v29, %v1617_v29  ;;  %v1434_v57 = vmax.f32 %v3686_v10, 0.0  ;;  %v2345_v1 = vld [vmem:[%s4290_s4 + $0x60] sm:$0xff]  }
 0x2ca   :  { %1742 = vst.msk [vmem:[%s4291_s5 + $0x10] sm:$0xf] %vm1737_vm4, %v1677_v3  ;;  %v2241_v49 = vunpack.c.h.bf16 %v2341_v53  ;;  %v1622_v9 = vadd.f32 %v2233_v30, %v1430_v58  ;;  %v1682_v4 = vpack.c.bf16 %v1618_v7, %v1618_v7  ;;  %v2244_v31 = vunpack.c.l.bf16 %v2342_v55 }
 0x2cb   :  { %1743 = vst.msk [vmem:[%s4291_s5 + $0x14] sm:$0xf] %vm1737_vm4, %v1678_v46  ;;  %v1623_v11 = vadd.f32 %v2236_v54, %v1431_v48  ;;  %v1683_v16 = vpack.c.bf16 %v1619_v22, %v1619_v22  ;;  %v1436_v10 = vmax.f32 %v3694_v25, 0.0  ;;  %v2245_v59 = vunpack.c.h.bf16 %v2342_v55  ;;  %v2346_v46 = vld [vmem:[%s4290_s4 + $0x68] sm:$0xff]   ;;  %v2347_v55 = vld [vmem:[%s4290_s4 + $0x70] sm:$0xff]  }
 0x2cc   :  { %1744 = vst.msk [vmem:[%s4291_s5 + $0x18] sm:$0xf] %vm1737_vm4, %v1679_v34  ;;  %v1624_v24 = vadd.f32 %v2237_v5, %v1432_v44  ;;  %v1684_v14 = vpack.c.bf16 %v1620_v15, %v1620_v15  ;;  %v2248_v6 = vunpack.c.l.bf16 %v2343_v51  ;;  %v1625_v42 = vadd.f32 %v2240_v28, %v1433_v8 }
 0x2cd   :  { %1745 = vst.msk [vmem:[%s4291_s5 + $0x1c] sm:$0xf] %vm1737_vm4, %v1680_v18  ;;  %v1685_v38 = vpack.c.bf16 %v1621_v61, %v1621_v61  ;;  %v1438_v25 = vmax.f32 %v3702_v41, 0.0  ;;  %v2249_v50 = vunpack.c.h.bf16 %v2343_v51  ;;  %v1626_v29 = vadd.f32 %v2241_v49, %v1434_v57  ;;  %v2348_v57 = vld [vmem:[%s4290_s4 + $0x78] sm:$0xff]  }
 0x2ce   :  { %1746 = vst.msk [vmem:[%s4291_s5 + $0x20] sm:$0xf] %vm1737_vm4, %v1681_v33  ;;  %v1686_v3 = vpack.c.bf16 %v1622_v9, %v1622_v9  ;;  %v2252_v58 = vunpack.c.l.bf16 %v2344_v60  ;;  %v1627_v30 = vadd.f32 %v2244_v31, %v1435_v45  ;;  %v1687_v53 = vpack.c.bf16 %v1623_v11, %v1623_v11  ;;  %v2349_v11 = vld [vmem:[%s4290_s4 + $0x80] sm:$0xff]  }
 0x2cf   :  { %1747 = vst.msk [vmem:[%s4291_s5 + $0x24] sm:$0xf] %vm1737_vm4, %v1682_v4  ;;  %v1440_v41 = vmax.f32 %v3710_v52, 0.0  ;;  %v2253_v7 = vunpack.c.h.bf16 %v2344_v60  ;;  %v1628_v48 = vadd.f32 %v2245_v59, %v1436_v10  ;;  %v1688_v54 = vpack.c.bf16 %v1624_v24, %v1624_v24 }
 0x2d0   :  { %1748 = vst.msk [vmem:[%s4291_s5 + $0x28] sm:$0xf] %vm1737_vm4, %v1683_v16  ;;  %v2256_v22 = vunpack.c.l.bf16 %v2345_v1  ;;  %v1629_v34 = vadd.f32 %v2248_v6, %v1437_v12  ;;  %v1689_v44 = vpack.c.bf16 %v1625_v42, %v1625_v42  ;;  %v1442_v52 = vmax.f32 %v3718_v62, 0.0  ;;  %v2350_v12 = vld [vmem:[%s4290_s4 + $0x88] sm:$0xff]  }
 0x2d1   :  { %1749 = vst.msk [vmem:[%s4291_s5 + $0x2c] sm:$0xf] %vm1737_vm4, %v1684_v14  ;;  %v2257_v5 = vunpack.c.h.bf16 %v2345_v1  ;;  %v1630_v15 = vadd.f32 %v2249_v50, %v1438_v25  ;;  %v1690_v18 = vpack.c.bf16 %v1626_v29, %v1626_v29  ;;  %v2260_v8 = vunpack.c.l.bf16 %v2346_v46  ;;  %v2351_v29 = vld [vmem:[%s4290_s4 + $0x90] sm:$0xff]  }
 0x2d2   :  { %1750 = vst.msk [vmem:[%s4291_s5 + $0x30] sm:$0xf] %vm1737_vm4, %v1685_v38  ;;  %v1631_v28 = vadd.f32 %v2252_v58, %v1439_v36  ;;  %v1691_v61 = vpack.c.bf16 %v1627_v30, %v1627_v30  ;;  %v1444_v62 = vmax.f32 %v3726_v27, 0.0  ;;  %v2261_v33 = vunpack.c.h.bf16 %v2346_v46 }
 0x2d3   :  { %1751 = vst.msk [vmem:[%s4291_s5 + $0x34] sm:$0xf] %vm1737_vm4, %v1686_v3  ;;  %v1632_v49 = vadd.f32 %v2253_v7, %v1440_v41  ;;  %v1692_v51 = vpack.c.bf16 %v1628_v48, %v1628_v48  ;;  %v2264_v9 = vunpack.c.l.bf16 %v2347_v55  ;;  %v1633_v4 = vadd.f32 %v2256_v22, %v1441_v40  ;;  %v2352_v7 = vld [vmem:[%s4290_s4 + $0x98] sm:$0xff]  }
 0x2d4   :  { %1752 = vst.msk [vmem:[%s4291_s5 + $0x38] sm:$0xf] %vm1737_vm4, %v1687_v53  ;;  %v1693_v45 = vpack.c.bf16 %v1629_v34, %v1629_v34  ;;  %v1446_v27 = vmax.f32 %v3734_v63, 0.0  ;;  %v2265_v31 = vunpack.c.h.bf16 %v2347_v55  ;;  %v1634_v16 = vadd.f32 %v2257_v5, %v1442_v52 }
 0x2d5   :  { %1753 = vst.msk [vmem:[%s4291_s5 + $0x3c] sm:$0xf] %vm1737_vm4, %v1688_v54  ;;  %v1694_v10 = vpack.c.bf16 %v1630_v15, %v1630_v15  ;;  %v2268_v59 = vunpack.c.l.bf16 %v2348_v57  ;;  %v1635_v60 = vadd.f32 %v2260_v8, %v1443_v13  ;;  %v1695_v24 = vpack.c.bf16 %v1631_v28, %v1631_v28  ;;  %v2354_v8 = vld [vmem:[%s4290_s4 + $0xa8] sm:$0xff]  }
 0x2d6   :  { %1754 = vst.msk [vmem:[%s4291_s5 + $0x40] sm:$0xf] %vm1737_vm4, %v1689_v44  ;;  %v1448_v63 = vmax.f32 %v3742_v47, 0.0  ;;  %v2269_v14 = vunpack.c.h.bf16 %v2348_v57  ;;  %v1636_v6 = vadd.f32 %v2261_v33, %v1444_v62  ;;  %v1696_v42 = vpack.c.bf16 %v1632_v49, %v1632_v49  ;;  %v2353_v44 = vld [vmem:[%s4290_s4 + $0xa0] sm:$0xff]  }
 0x2d7   :  { %1755 = vst.msk [vmem:[%s4291_s5 + $0x44] sm:$0xf] %vm1737_vm4, %v1690_v18  ;;  %v1449_v35 = vmax.f32 %v3746_v37, 0.0  ;;  %v2272_v38 = vunpack.c.l.bf16 %v2349_v11  ;;  %v1637_v25 = vadd.f32 %v2264_v9, %v1445_v26  ;;  %v1697_v50 = vpack.c.bf16 %v1633_v4, %v1633_v4 }
 0x2d8   :  { %1756 = vst.msk [vmem:[%s4291_s5 + $0x48] sm:$0xf] %vm1737_vm4, %v1691_v61  ;;  %v1450_v47 = vmax.f32 %v3750_v23, 0.0  ;;  %v2273_v1 = vunpack.c.h.bf16 %v2349_v11  ;;  %v1638_v3 = vadd.f32 %v2265_v31, %v1446_v27  ;;  %v1698_v36 = vpack.c.bf16 %v1634_v16, %v1634_v16  ;;  %v2356_v16 = vld [vmem:[%s4290_s4 + $0xb8] sm:$0xff]  }
 0x2d9   :  { %1757 = vst.msk [vmem:[%s4291_s5 + $0x4c] sm:$0xf] %vm1737_vm4, %v1692_v51  ;;  %v1451_v37 = vmax.f32 %v3754_v43, 0.0  ;;  %v2276_v58 = vunpack.c.l.bf16 %v2350_v12  ;;  %v1639_v30 = vadd.f32 %v2268_v59, %v1447_v39  ;;  %v1699_v53 = vpack.c.bf16 %v1635_v60, %v1635_v60  ;;  %v2355_v51 = vld [vmem:[%s4290_s4 + $0xb0] sm:$0xff]  }
 0x2da   :  { %1758 = vst.msk [vmem:[%s4291_s5 + $0x50] sm:$0xf] %vm1737_vm4, %v1693_v45  ;;  %v1452_v23 = vmax.f32 %v3758_v21, 0.0  ;;  %v2277_v41 = vunpack.c.h.bf16 %v2350_v12  ;;  %v1640_v46 = vadd.f32 %v2269_v14, %v1448_v63  ;;  %v1700_v48 = vpack.c.bf16 %v1636_v6, %v1636_v6  ;;  %v4460_v14 = vld [vmem:[#allocation5_spill] sm:$0xff] }
 0x2db   :  { %1759 = vst.msk [vmem:[%s4291_s5 + $0x54] sm:$0xf] %vm1737_vm4, %v1694_v10  ;;  %v1453_v43 = vmax.f32 %v3762_v0, 0.0  ;;  %v2280_v54 = vunpack.c.l.bf16 %v2351_v29  ;;  %v1641_v40 = vadd.f32 %v2272_v38, %v1449_v35  ;;  %v1701_v22 = vpack.c.bf16 %v1637_v25, %v1637_v25  ;;  %v4461_v25 = vld [vmem:[#allocation6_spill] sm:$0xff] }
 0x2dc   :  { %1760 = vst.msk [vmem:[%s4291_s5 + $0x58] sm:$0xf] %vm1737_vm4, %v1695_v24  ;;  %v1454_v21 = vmax.f32 %v3766_v2, 0.0  ;;  %v2281_v34 = vunpack.c.h.bf16 %v2351_v29  ;;  %v1642_v52 = vadd.f32 %v2273_v1, %v1450_v47  ;;  %v1702_v5 = vpack.c.bf16 %v1638_v3, %v1638_v3  ;;  %v4462_v3 = vld [vmem:[#allocation8_spill] sm:$0xff] }
 0x2dd   :  { %1761 = vst.msk [vmem:[%s4291_s5 + $0x5c] sm:$0xf] %vm1737_vm4, %v1696_v42  ;;  %v1455_v0 = vmax.f32 %v3770_v56, 0.0  ;;  %v2284_v55 = vunpack.c.l.bf16 %v2352_v7  ;;  %v1643_v15 = vadd.f32 %v2276_v58, %v1451_v37  ;;  %v1703_v18 = vpack.c.bf16 %v1639_v30, %v1639_v30  ;;  %v2357_v42 = vld [vmem:[%s4290_s4 + $0xc0] sm:$0xff]   ;;  %v2358_v58 = vld [vmem:[%s4290_s4 + $0xc8] sm:$0xff]  }
 0x2de   :  { %1762 = vst.msk [vmem:[%s4291_s5 + $0x60] sm:$0xf] %vm1737_vm4, %v1697_v50  ;;  %v1456_v2 = vmax.f32 %v3774_v17, 0.0  ;;  %v2285_v13 = vunpack.c.h.bf16 %v2352_v7  ;;  %v1644_v28 = vadd.f32 %v2277_v41, %v1452_v23  ;;  %v1704_v61 = vpack.c.bf16 %v1640_v46, %v1640_v46  ;;  %v4463_v23 = vld [vmem:[#allocation10_spill] sm:$0xff] }
 0x2df   :  { %1763 = vst.msk [vmem:[%s4291_s5 + $0x64] sm:$0xf] %vm1737_vm4, %v1698_v36  ;;  %v1457_v56 = vmax.f32 %v3778_v19, 0.0  ;;  %v2288_v62 = vunpack.c.l.bf16 %v2353_v44  ;;  %v1645_v33 = vadd.f32 %v2280_v54, %v1453_v43  ;;  %v1705_v57 = vpack.c.bf16 %v1641_v40, %v1641_v40  ;;  %v4464_v43 = vld [vmem:[#allocation12_spill] sm:$0xff] }
 0x2e0   :  { %1764 = vst.msk [vmem:[%s4291_s5 + $0x68] sm:$0xf] %vm1737_vm4, %v1699_v53  ;;  %v1458_v17 = vmax.f32 %v3782_v32, 0.0  ;;  %v2289_v49 = vunpack.c.h.bf16 %v2353_v44  ;;  %v1646_v26 = vadd.f32 %v2281_v34, %v1454_v21  ;;  %v1706_v9 = vpack.c.bf16 %v1642_v52, %v1642_v52  ;;  %v4458_v32 = vld [vmem:[#allocation3_spill] sm:$0xff]  ;;  %v4465_v44 = vld [vmem:[#allocation14_spill] sm:$0xff] }
 0x2e1   :  { %1765 = vst.msk [vmem:[%s4291_s5 + $0x6c] sm:$0xf] %vm1737_vm4, %v1700_v48  ;;  %v1459_v19 = vmax.f32 %v3786_v20, 0.0  ;;  %v2292_v4 = vunpack.c.l.bf16 %v2354_v8  ;;  %v1647_v45 = vadd.f32 %v2284_v55, %v1455_v0  ;;  %v1707_v27 = vpack.c.bf16 %v1643_v15, %v1643_v15  ;;  %v4459_v20 = vld [vmem:[#allocation4_spill] sm:$0xff] }
 0x2e2   :  { %1766 = vst.msk [vmem:[%s4291_s5 + $0x70] sm:$0xf] %vm1737_vm4, %v1701_v22  ;;  %v1460_v31 = vmax.f32 %v4458_v32, 0.0  ;;  %v2293_v11 = vunpack.c.h.bf16 %v2354_v8  ;;  %v1648_v10 = vadd.f32 %v2285_v13, %v1456_v2  ;;  %v1708_v39 = vpack.c.bf16 %v1644_v28, %v1644_v28  ;;  %v2359_v22 = vld [vmem:[%s4290_s4 + $0xd0] sm:$0xff]   ;;  %v2360_v13 = vld [vmem:[%s4290_s4 + $0xd8] sm:$0xff]  }
 0x2e3   :  { %1767 = vst.msk [vmem:[%s4291_s5 + $0x74] sm:$0xf] %vm1737_vm4, %v1702_v5  ;;  %v1461_v59 = vmax.f32 %v4459_v20, 0.0  ;;  %v2296_v60 = vunpack.c.l.bf16 %v2355_v51  ;;  %v1649_v24 = vadd.f32 %v2288_v62, %v1457_v56  ;;  %v1709_v63 = vpack.c.bf16 %v1645_v33, %v1645_v33  ;;  %v4466_v15 = vld [vmem:[#allocation16_spill] sm:$0xff] }
 0x2e4   :  { %1768 = vst.msk [vmem:[%s4291_s5 + $0x78] sm:$0xf] %vm1737_vm4, %v1703_v18  ;;  %v1462_v12 = vmax.f32 %v4460_v14, 0.0  ;;  %v2297_v6 = vunpack.c.h.bf16 %v2355_v51  ;;  %v1650_v35 = vadd.f32 %v2289_v49, %v1458_v17  ;;  %v1710_v38 = vpack.c.bf16 %v1646_v26, %v1646_v26  ;;  %v4468_v17 = vld [vmem:[#allocation23_spill] sm:$0xff]  ;;  %v2361_v26 = vld [vmem:[%s4290_s4 + $0xe0] sm:$0xff]  }
 0x2e5   :  { %1769 = vst.msk [vmem:[%s4291_s5 + $0x7c] sm:$0xf] %vm1737_vm4, %v1704_v61  ;;  %v1463_v50 = vmax.f32 %v4461_v25, 0.0  ;;  %v2300_v47 = vunpack.c.l.bf16 %v2356_v16  ;;  %v1651_v1 = vadd.f32 %v2292_v4, %v1459_v19  ;;  %v1711_v29 = vpack.c.bf16 %v1647_v45, %v1647_v45  ;;  %v4467_v61 = vld [vmem:[#allocation19_spill] sm:$0xff]  ;;  %v4469_v4 = vld [vmem:[#allocation24_spill] sm:$0xff] }
 0x2e6   :  { %1770 = vst.msk [vmem:[%s4291_s5 + $0x80] sm:$0xf] %vm1737_vm4, %v1705_v57  ;;  %v1464_v36 = vmax.f32 %v4462_v3, 0.0  ;;  %v2301_v37 = vunpack.c.h.bf16 %v2356_v16  ;;  %v1652_v30 = vadd.f32 %v2293_v11, %v1460_v31  ;;  %v1712_v53 = vpack.c.bf16 %v1648_v10, %v1648_v10  ;;  %v4470_v11 = vld [vmem:[#allocation27_spill] sm:$0xff] }
 0x2e7   :  { %1771 = vst.msk [vmem:[%s4291_s5 + $0x84] sm:$0xf] %vm1737_vm4, %v1706_v9  ;;  %v1465_v41 = vmax.f32 %v4463_v23, 0.0  ;;  %v2304_v7 = vunpack.c.l.bf16 %v2357_v42  ;;  %v1653_v46 = vadd.f32 %v2296_v60, %v1461_v59  ;;  %v1713_v48 = vpack.c.bf16 %v1649_v24, %v1649_v24  ;;  %v4471_v60 = vld [vmem:[#allocation28_spill] sm:$0xff] }
 0x2e8   :  { %1772 = vst.msk [vmem:[%s4291_s5 + $0x88] sm:$0xf] %vm1737_vm4, %v1707_v27  ;;  %v1466_v54 = vmax.f32 %v4464_v43, 0.0  ;;  %v2305_v40 = vunpack.c.h.bf16 %v2357_v42  ;;  %v1654_v21 = vadd.f32 %v2297_v6, %v1462_v12  ;;  %v1714_v34 = vpack.c.bf16 %v1650_v35, %v1650_v35  ;;  %v4472_v6 = vld [vmem:[#allocation7_spill] sm:$0xff] }
 0x2e9   :  { %1773 = vst.msk [vmem:[%s4291_s5 + $0x8c] sm:$0xf] %vm1737_vm4, %v1708_v39  ;;  %v1467_v52 = vmax.f32 %v4465_v44, 0.0  ;;  %v2308_v5 = vunpack.c.l.bf16 %v2358_v58  ;;  %v1655_v0 = vadd.f32 %v2300_v47, %v1463_v50  ;;  %v1715_v55 = vpack.c.bf16 %v1651_v1, %v1651_v1  ;;  %v2362_v39 = vld [vmem:[%s4290_s4 + $0xe8] sm:$0xff]   ;;  %v4473_v47 = vld [vmem:[#allocation9_spill] sm:$0xff] }
 0x2ea   :  { %1774 = vst.msk [vmem:[%s4291_s5 + $0x90] sm:$0xf] %vm1737_vm4, %v1709_v63  ;;  %v1468_v18 = vmax.f32 %v4466_v15, 0.0  ;;  %v2309_v2 = vunpack.c.h.bf16 %v2358_v58  ;;  %v1656_v8 = vadd.f32 %v2301_v37, %v1464_v36  ;;  %v1716_v28 = vpack.c.bf16 %v1652_v30, %v1652_v30  ;;  %v4474_v37 = vld [vmem:[#allocation15_spill] sm:$0xff] }
 0x2eb   :  { %1775 = vst.msk [vmem:[%s4291_s5 + $0x94] sm:$0xf] %vm1737_vm4, %v1710_v38  ;;  %v1469_v56 = vmax.f32 %v4467_v61, 0.0  ;;  %v2312_v62 = vunpack.c.l.bf16 %v2359_v22  ;;  %v1657_v33 = vadd.f32 %v2304_v7, %v1465_v41  ;;  %v1717_v57 = vpack.c.bf16 %v1653_v46, %v1653_v46  ;;  %v2363_v38 = vld [vmem:[%s4290_s4 + $0xf0] sm:$0xff]   ;;  %v4475_v7 = vld [vmem:[#allocation17_spill] sm:$0xff] }
 0x2ec   :  { %1776 = vst.msk [vmem:[%s4291_s5 + $0x98] sm:$0xf] %vm1737_vm4, %v1711_v29  ;;  %v1470_v49 = vmax.f32 %v4468_v17, 0.0  ;;  %v2313_v51 = vunpack.c.h.bf16 %v2359_v22  ;;  %v1658_v9 = vadd.f32 %v2305_v40, %v1466_v54  ;;  %v1718_v19 = vpack.c.bf16 %v1654_v21, %v1654_v21  ;;  %v4476_v40 = vld [vmem:[#allocation31_spill] sm:$0xff] }
 0x2ed   :  { %1777 = vst.msk [vmem:[%s4291_s5 + $0x9c] sm:$0xf] %vm1737_vm4, %v1712_v53  ;;  %v1471_v45 = vmax.f32 %v4469_v4, 0.0  ;;  %v2316_v27 = vunpack.c.l.bf16 %v2360_v13  ;;  %v1659_v32 = vadd.f32 %v2308_v5, %v1467_v52  ;;  %v1719_v31 = vpack.c.bf16 %v1655_v0, %v1655_v0  ;;  %v2364_v53 = vld [vmem:[%s4290_s4 + $0xf8] sm:$0xff]   ;;  %v4477_v52 = vld [vmem:[#allocation32_spill] sm:$0xff] }
 0x2ee   :  { %1778 = vst.msk [vmem:[%s4291_s5 + $0xa0] sm:$0xf] %vm1737_vm4, %v1713_v48  ;;  %v1472_v16 = vmax.f32 %v4470_v11, 0.0  ;;  %v2317_v10 = vunpack.c.h.bf16 %v2360_v13  ;;  %v1660_v20 = vadd.f32 %v2309_v2, %v1468_v18  ;;  %v1720_v59 = vpack.c.bf16 %v1656_v8, %v1656_v8  ;;  %v4478_v18 = vld [vmem:[#allocation18_spill] sm:$0xff] }
 0x2ef   :  { %1779 = vst.msk [vmem:[%s4291_s5 + $0xa4] sm:$0xf] %vm1737_vm4, %v1714_v34  ;;  %v1473_v24 = vmax.f32 %v4471_v60, 0.0  ;;  %v2320_v63 = vunpack.c.l.bf16 %v2361_v26  ;;  %v1661_v14 = vadd.f32 %v2312_v62, %v1469_v56  ;;  %v1721_v12 = vpack.c.bf16 %v1657_v33, %v1657_v33 }
 0x2f0   :  { %1780 = vst.msk [vmem:[%s4291_s5 + $0xa8] sm:$0xf] %vm1737_vm4, %v1715_v55  ;;  %v1474_v42 = vmax.f32 %v4472_v6, 0.0  ;;  %v2321_v35 = vunpack.c.h.bf16 %v2361_v26  ;;  %v1662_v25 = vadd.f32 %v2313_v51, %v1470_v49  ;;  %v1722_v50 = vpack.c.bf16 %v1658_v9, %v1658_v9 }
 0x2f1   :  { %1781 = vst.msk [vmem:[%s4291_s5 + $0xac] sm:$0xf] %vm1737_vm4, %v1716_v28  ;;  %v1475_v1 = vmax.f32 %v4473_v47, 0.0  ;;  %v2324_v29 = vunpack.c.l.bf16 %v2362_v39  ;;  %v1663_v3 = vadd.f32 %v2316_v27, %v1471_v45  ;;  %v1723_v36 = vpack.c.bf16 %v1659_v32, %v1659_v32 }
 0x2f2   :  { %1782 = vst.msk [vmem:[%s4291_s5 + $0xb0] sm:$0xf] %vm1737_vm4, %v1717_v57  ;;  %v1476_v58 = vmax.f32 %v4474_v37, 0.0  ;;  %v2325_v30 = vunpack.c.h.bf16 %v2362_v39  ;;  %v1664_v23 = vadd.f32 %v2317_v10, %v1472_v16  ;;  %v1724_v41 = vpack.c.bf16 %v1660_v20, %v1660_v20 }
 0x2f3   :  { %1783 = vst.msk [vmem:[%s4291_s5 + $0xb4] sm:$0xf] %vm1737_vm4, %v1718_v19  ;;  %v1477_v46 = vmax.f32 %v4475_v7, 0.0  ;;  %v2328_v48 = vunpack.c.l.bf16 %v2363_v38  ;;  %v1665_v43 = vadd.f32 %v2320_v63, %v1473_v24  ;;  %v1725_v54 = vpack.c.bf16 %v1661_v14, %v1661_v14 }
 0x2f4   :  { %1784 = vst.msk [vmem:[%s4291_s5 + $0xb8] sm:$0xf] %vm1737_vm4, %v1719_v31  ;;  %v1478_v22 = vmax.f32 %v4476_v40, 0.0  ;;  %v2329_v21 = vunpack.c.h.bf16 %v2363_v38  ;;  %v1666_v34 = vadd.f32 %v2321_v35, %v1474_v42  ;;  %v1726_v44 = vpack.c.bf16 %v1662_v25, %v1662_v25 }
 0x2f5   :  { %1785 = vst.msk [vmem:[%s4291_s5 + $0xbc] sm:$0xf] %vm1737_vm4, %v1720_v59  ;;  %v1479_v5 = vmax.f32 %v4477_v52, 0.0  ;;  %v2332_v0 = vunpack.c.l.bf16 %v2364_v53  ;;  %v1667_v55 = vadd.f32 %v2324_v29, %v1475_v1  ;;  %v1727_v15 = vpack.c.bf16 %v1663_v3, %v1663_v3 }
 0x2f6   :  { %1786 = vst.msk [vmem:[%s4291_s5 + $0xc0] sm:$0xf] %vm1737_vm4, %v1721_v12  ;;  %v1480_v2 = vmax.f32 %v4478_v18, 0.0  ;;  %v2333_v13 = vunpack.c.h.bf16 %v2364_v53  ;;  %v1668_v8 = vadd.f32 %v2325_v30, %v1476_v58  ;;  %v1728_v28 = vpack.c.bf16 %v1664_v23, %v1664_v23 }
 0x2f7   :  { %1787 = vst.msk [vmem:[%s4291_s5 + $0xc4] sm:$0xf] %vm1737_vm4, %v1722_v50  ;;  %v1669_v61 = vadd.f32 %v2328_v48, %v1477_v46  ;;  %v1729_v56 = vpack.c.bf16 %v1665_v43, %v1665_v43  ;;  %v1670_v62 = vadd.f32 %v2329_v21, %v1478_v22  ;;  %v1730_v33 = vpack.c.bf16 %v1666_v34, %v1666_v34 }
 0x2f8   :  { %1788 = vst.msk [vmem:[%s4291_s5 + $0xc8] sm:$0xf] %vm1737_vm4, %v1723_v36  ;;  %v1671_v57 = vadd.f32 %v2332_v0, %v1479_v5  ;;  %v1731_v17 = vpack.c.bf16 %v1667_v55, %v1667_v55  ;;  %v1672_v49 = vadd.f32 %v2333_v13, %v1480_v2  ;;  %v1732_v51 = vpack.c.bf16 %v1668_v8, %v1668_v8 }
 0x2f9   :  { %1789 = vst.msk [vmem:[%s4291_s5 + $0xcc] sm:$0xf] %vm1737_vm4, %v1724_v41  ;;  %v1733_v26 = vpack.c.bf16 %v1669_v61, %v1669_v61  ;;  %v1734_v9 = vpack.c.bf16 %v1670_v62, %v1670_v62 }
 0x2fa   :  { %1790 = vst.msk [vmem:[%s4291_s5 + $0xd0] sm:$0xf] %vm1737_vm4, %v1725_v54  ;;  %v1735_v19 = vpack.c.bf16 %v1671_v57, %v1671_v57  ;;  %v1736_v4 = vpack.c.bf16 %v1672_v49, %v1672_v49 }
 0x2fb   :  { %1791 = vst.msk [vmem:[%s4291_s5 + $0xd4] sm:$0xf] %vm1737_vm4, %v1726_v44 }
 0x2fc   :  { %1792 = vst.msk [vmem:[%s4291_s5 + $0xd8] sm:$0xf] %vm1737_vm4, %v1727_v15 }
 0x2fd   :  { %1793 = vst.msk [vmem:[%s4291_s5 + $0xdc] sm:$0xf] %vm1737_vm4, %v1728_v28 }
 0x2fe   :  { %1794 = vst.msk [vmem:[%s4291_s5 + $0xe0] sm:$0xf] %vm1737_vm4, %v1729_v56 }
 0x2ff   :  { %1795 = vst.msk [vmem:[%s4291_s5 + $0xe4] sm:$0xf] %vm1737_vm4, %v1730_v33 }
 0x300   :  { %1796 = vst.msk [vmem:[%s4291_s5 + $0xe8] sm:$0xf] %vm1737_vm4, %v1731_v17 }
 0x301   :  { %1797 = vst.msk [vmem:[%s4291_s5 + $0xec] sm:$0xf] %vm1737_vm4, %v1732_v51 }
 0x302   :  { %1798 = vst.msk [vmem:[%s4291_s5 + $0xf0] sm:$0xf] %vm1737_vm4, %v1733_v26 }
 0x303   :  { %1799 = vst.msk [vmem:[%s4291_s5 + $0xf4] sm:$0xf] %vm1737_vm4, %v1734_v9 }
 0x304   :  { %1800 = vst.msk [vmem:[%s4291_s5 + $0xf8] sm:$0xf] %vm1737_vm4, %v1735_v19 }
 0x305   :  { %1801 = vst.msk [vmem:[%s4291_s5 + $0xfc] sm:$0xf] %vm1737_vm4, %v1736_v4 }

// kernel: dagan_generator.13
= control target key start
LH: loop header
LB: loop body
LE: loop exit
PB: predicated region body
PF: predicated region fallthrough
CT: control target
= control target key end

     0   :  { %s2417_s18 = smov 0   ;;  %s3200_s0 = inlined_call_operand.vmem [shape: bf16[2048,128], index: 0, kind: input, shape index: {}]   ;;  %s3201_s1 = inlined_call_operand.vmem [shape: bf16[128,4], index: 1, kind: input, shape index: {}]   ;;  %s3202_s2 = inlined_call_operand.vmem [shape: f32[1,4], index: 2, kind: input, shape index: {}]   ;;  %s3203_s3 = inlined_call_operand.vmem [shape: f32[1,4], index: 3, kind: input, shape index: {}]   ;;  %s3204_s4 = inlined_call_operand.vmem [shape: f32[1,4], index: 4, kind: input, shape index: {}]   ;;  %s3205_s5 = inlined_call_operand.vmem [shape: f32[2048,4], index: 5, kind: output, shape index: {}]  }
   0x1 LB: > { %s1714_s19 = sadd.s32 4294967295, %s2385_s18   ;;  %p1718_p0 = scmp.ge.s32.totalorder %s2385_s18, 1  ;;  %s2385_s18 = sphi %s2417_s18, %s15_s18  }
   0x2   : > { %p188_p1 = scmp.lt.s32.totalorder %s2385_s18, 3 }
   0x4   : > { %p189_p2 = pnand %p1718_p0, %p188_p1 }
   0x5   : > { %s1719_s28 = sshll.u32 (!%p189_p2), %s1714_s19, 7 }
   0x6   : > { %192 = sbr.rel (%p189_p2) target bundleno = 439 (0x1b7), region = 40  ;;  %p217_p3 = scmp.lt.s32.totalorder (!%p189_p2), %s1719_s28, 255 }
   0xb   : > { %v2084_v0 = vld [vmem:[%s3201_s1 + $0x38] sm:$0xff]  ;;  %v2083_v1 = vld [vmem:[%s3201_s1 + $0x30] sm:$0xff]  ;;  %v2082_v2 = vld [vmem:[%s3201_s1 + $0x28] sm:$0xff]  ;;  %s3207_s28 = smov (!%p217_p3, %s1719_s28), 255  ;;  %vm1529_vm0 = vcmask 31744  }
   0xc   : > { %808 = vmatpush.bf16.msra.mxu0 %v2084_v0  ;;  %2085 = vmatpush.bf16.msra.mxu1 %v2084_v0  ;;  %v2081_v3 = vld [vmem:[%s3201_s1 + $0x20] sm:$0xff]  ;;  %v2080_v4 = vld [vmem:[%s3201_s1 + $0x18] sm:$0xff]  ;;  %v2079_v5 = vld [vmem:[%s3201_s1 + $0x10] sm:$0xff]  ;;  %s1720_s10 = sshll.u32 %s3207_s28, 2  ;;  %s1722_s21 = sshll.u32 %s3207_s28, 3 }
   0xd   : > { %2086 = vmatpush.bf16.msra.mxu2 %v2084_v0  ;;  %2087 = vmatpush.bf16.msra.mxu3 %v2084_v0  ;;  %v2078_v6 = vld [vmem:[%s3201_s1 + $0x8] sm:$0xff]  ;;  %v2077_v7 = vld [vmem:[%s3201_s1] sm:$0xff]  ;;  %s2455_s15 = scalar_lea.vmem %s3200_s0, %s1720_s10  ;;  %s2519_s26 = scalar_lea.vmem %s3205_s5, %s1722_s21 }
   0xe   : > { %v2013_v8 = vld [vmem:[%s2455_s15] sm:$0xff]  ;;  %v2014_v12 = vld [vmem:[%s2455_s15 + $0x8] sm:$0xff]  ;;  %v2015_v16 = vld [vmem:[%s2455_s15 + $0x10] sm:$0xff] }
   0xf   : > { %v2029_v9 = vld [vmem:[%s2455_s15 + $0x80] sm:$0xff]  ;;  %v2030_v13 = vld [vmem:[%s2455_s15 + $0x88] sm:$0xff]  ;;  %v2031_v17 = vld [vmem:[%s2455_s15 + $0x90] sm:$0xff] }
  0x10   : > { %809 = vmatpush.bf16.msra.mxu0 %v2083_v1  ;;  %2088 = vmatpush.bf16.msra.mxu1 %v2083_v1  ;;  %v2045_v10 = vld [vmem:[%s2455_s15 + $0x100] sm:$0xff]  ;;  %v2046_v14 = vld [vmem:[%s2455_s15 + $0x108] sm:$0xff]  ;;  %v2047_v18 = vld [vmem:[%s2455_s15 + $0x110] sm:$0xff] }
  0x11   : > { %2089 = vmatpush.bf16.msra.mxu2 %v2083_v1  ;;  %2090 = vmatpush.bf16.msra.mxu3 %v2083_v1  ;;  %v2061_v11 = vld [vmem:[%s2455_s15 + $0x180] sm:$0xff]  ;;  %v2062_v15 = vld [vmem:[%s2455_s15 + $0x188] sm:$0xff]  ;;  %v2063_v19 = vld [vmem:[%s2455_s15 + $0x190] sm:$0xff] }
  0x12   : > { %v2016_v20 = vld [vmem:[%s2455_s15 + $0x18] sm:$0xff]  ;;  %v2017_v24 = vld [vmem:[%s2455_s15 + $0x20] sm:$0xff]  ;;  %v2018_v28 = vld [vmem:[%s2455_s15 + $0x28] sm:$0xff] }
  0x13   : > { %v2032_v21 = vld [vmem:[%s2455_s15 + $0x98] sm:$0xff]  ;;  %v2033_v25 = vld [vmem:[%s2455_s15 + $0xa0] sm:$0xff]  ;;  %v2034_v29 = vld [vmem:[%s2455_s15 + $0xa8] sm:$0xff] }
  0x14   : > { %810 = vmatpush.bf16.msra.mxu0 %v2082_v2  ;;  %2091 = vmatpush.bf16.msra.mxu1 %v2082_v2  ;;  %v2048_v22 = vld [vmem:[%s2455_s15 + $0x118] sm:$0xff]  ;;  %v2049_v26 = vld [vmem:[%s2455_s15 + $0x120] sm:$0xff]  ;;  %v2050_v30 = vld [vmem:[%s2455_s15 + $0x128] sm:$0xff] }
  0x15   : > { %2092 = vmatpush.bf16.msra.mxu2 %v2082_v2  ;;  %2093 = vmatpush.bf16.msra.mxu3 %v2082_v2  ;;  %v2064_v23 = vld [vmem:[%s2455_s15 + $0x198] sm:$0xff]  ;;  %v2065_v27 = vld [vmem:[%s2455_s15 + $0x1a0] sm:$0xff]  ;;  %v2066_v31 = vld [vmem:[%s2455_s15 + $0x1a8] sm:$0xff] }
  0x16   : > { %v2019_v32 = vld [vmem:[%s2455_s15 + $0x30] sm:$0xff]  ;;  %v2020_v36 = vld [vmem:[%s2455_s15 + $0x38] sm:$0xff]  ;;  %v2492_v40 = vld [vmem:[%s3202_s2] ss:$0 sm:$0xff] }
  0x17   : > { %v2035_v33 = vld [vmem:[%s2455_s15 + $0xb0] sm:$0xff]  ;;  %v2036_v37 = vld [vmem:[%s2455_s15 + $0xb8] sm:$0xff]  ;;  %v2021_v41 = vld [vmem:[%s2455_s15 + $0x40] sm:$0xff] }
  0x18   : > { %811 = vmatpush.bf16.msra.mxu0 %v2081_v3  ;;  %2094 = vmatpush.bf16.msra.mxu1 %v2081_v3  ;;  %v2051_v34 = vld [vmem:[%s2455_s15 + $0x130] sm:$0xff]  ;;  %v2052_v38 = vld [vmem:[%s2455_s15 + $0x138] sm:$0xff]  ;;  %v2037_v42 = vld [vmem:[%s2455_s15 + $0xc0] sm:$0xff] }
  0x19   : > { %2095 = vmatpush.bf16.msra.mxu2 %v2081_v3  ;;  %2096 = vmatpush.bf16.msra.mxu3 %v2081_v3  ;;  %v2067_v35 = vld [vmem:[%s2455_s15 + $0x1b0] sm:$0xff]  ;;  %v2068_v39 = vld [vmem:[%s2455_s15 + $0x1b8] sm:$0xff]  ;;  %v2053_v45 = vld [vmem:[%s2455_s15 + $0x140] sm:$0xff] }
  0x1a   : > { %v2069_v46 = vld [vmem:[%s2455_s15 + $0x1c0] sm:$0xff]  ;;  %v2022_v3 = vld [vmem:[%s2455_s15 + $0x48] sm:$0xff] }
  0x1b   : > { %v2503_v49 = vld [vmem:[%s3203_s3] ss:$0 sm:$0xff] }
  0x1c   : > { %812 = vmatpush.bf16.msra.mxu0 %v2080_v4  ;;  %2097 = vmatpush.bf16.msra.mxu1 %v2080_v4  ;;  %v2509_v52 = vld [vmem:[%s3204_s4] ss:$0 sm:$0xff] }
  0x1d   : > { %2098 = vmatpush.bf16.msra.mxu2 %v2080_v4  ;;  %2099 = vmatpush.bf16.msra.mxu3 %v2080_v4  ;;  %v2038_v4 = vld [vmem:[%s2455_s15 + $0xc8] sm:$0xff] }
  0x20   : > { %813 = vmatpush.bf16.msra.mxu0 %v2079_v5  ;;  %2100 = vmatpush.bf16.msra.mxu1 %v2079_v5 }
  0x21   : > { %2101 = vmatpush.bf16.msra.mxu2 %v2079_v5  ;;  %2102 = vmatpush.bf16.msra.mxu3 %v2079_v5 }
  0x24   : > { %814 = vmatpush.bf16.msra.mxu0 %v2078_v6  ;;  %2103 = vmatpush.bf16.msra.mxu1 %v2078_v6 }
  0x25   : > { %2104 = vmatpush.bf16.msra.mxu2 %v2078_v6  ;;  %2105 = vmatpush.bf16.msra.mxu3 %v2078_v6 }
  0x28   : > { %815 = vmatpush.bf16.msra.mxu0 %v2077_v7  ;;  %2106 = vmatpush.bf16.msra.mxu1 %v2077_v7 }
  0x29   : > { %2107 = vmatpush.bf16.msra.mxu2 %v2077_v7  ;;  %2108 = vmatpush.bf16.msra.mxu3 %v2077_v7 }
  0x2b   : > { %816 = vmatmul.bf16.vlgmr.msra.gmra.mxu0 %v2013_v8  ;;  %896 = vmatmul.bf16.vlgmr.msra.gmra.mxu1 %v2029_v9 }
  0x2c   : > { %976 = vmatmul.bf16.vlgmr.msra.gmra.mxu2 %v2045_v10  ;;  %1056 = vmatmul.bf16.vlgmr.msra.gmra.mxu3 %v2061_v11  ;;  %v2054_v10 = vld [vmem:[%s2455_s15 + $0x148] sm:$0xff] }
  0x2d   : > { %v2070_v11 = vld [vmem:[%s2455_s15 + $0x1c8] sm:$0xff] }
  0x3b   : > { %821 = vmatmul.bf16.gmra.mxu0 %v2014_v12  ;;  %901 = vmatmul.bf16.gmra.mxu1 %v2030_v13 }
  0x3c   : > { %981 = vmatmul.bf16.gmra.mxu2 %v2046_v14  ;;  %1061 = vmatmul.bf16.gmra.mxu3 %v2062_v15 }
  0x4b   : > { %826 = vmatmul.bf16.gmra.mxu0 %v2015_v16  ;;  %906 = vmatmul.bf16.gmra.mxu1 %v2031_v17 }
  0x4c   : > { %986 = vmatmul.bf16.gmra.mxu2 %v2047_v18  ;;  %1066 = vmatmul.bf16.gmra.mxu3 %v2063_v19 }
  0x5b   : > { %831 = vmatmul.bf16.gmra.mxu0 %v2016_v20  ;;  %911 = vmatmul.bf16.gmra.mxu1 %v2032_v21 }
  0x5c   : > { %991 = vmatmul.bf16.gmra.mxu2 %v2048_v22  ;;  %1071 = vmatmul.bf16.gmra.mxu3 %v2064_v23 }
  0x6b   : > { %836 = vmatmul.bf16.gmra.mxu0 %v2017_v24  ;;  %916 = vmatmul.bf16.gmra.mxu1 %v2033_v25 }
  0x6c   : > { %996 = vmatmul.bf16.gmra.mxu2 %v2049_v26  ;;  %1076 = vmatmul.bf16.gmra.mxu3 %v2065_v27 }
  0x7b   : > { %841 = vmatmul.bf16.gmra.mxu0 %v2018_v28  ;;  %921 = vmatmul.bf16.gmra.mxu1 %v2034_v29 }
  0x7c   : > { %1001 = vmatmul.bf16.gmra.mxu2 %v2050_v30  ;;  %1081 = vmatmul.bf16.gmra.mxu3 %v2066_v31 }
  0x8b   : > { %846 = vmatmul.bf16.gmra.mxu0 %v2019_v32  ;;  %926 = vmatmul.bf16.gmra.mxu1 %v2035_v33 }
  0x8c   : > { %1006 = vmatmul.bf16.gmra.mxu2 %v2051_v34  ;;  %1086 = vmatmul.bf16.gmra.mxu3 %v2067_v35 }
  0x9b   : > { %851 = vmatmul.bf16.gmra.mxu0 %v2020_v36  ;;  %931 = vmatmul.bf16.gmra.mxu1 %v2036_v37 }
  0x9c   : > { %1011 = vmatmul.bf16.gmra.mxu2 %v2052_v38  ;;  %1091 = vmatmul.bf16.gmra.mxu3 %v2068_v39 }
  0xa8   : > { %v817_v43 = vpop.f32.mrf.mxu0  ;;  %v897_v44 = vpop.f32.mrf.mxu1 }
  0xa9   : > { %v818_v47 = vadd.f32 %v2492_v40, %v817_v43  ;;  %v898_v48 = vadd.f32 %v2492_v40, %v897_v44 }
  0xab   : > { %2120 = vtanh.f32 %v818_v47  ;;  %856 = vmatmul.bf16.gmra.mxu0 %v2021_v41  ;;  %936 = vmatmul.bf16.gmra.mxu1 %v2037_v42 }
  0xac   : > { %2122 = vtanh.f32 %v898_v48  ;;  %1016 = vmatmul.bf16.gmra.mxu2 %v2053_v45  ;;  %1096 = vmatmul.bf16.gmra.mxu3 %v2069_v46  ;;  %v2023_v48 = vld [vmem:[%s2455_s15 + $0x50] sm:$0xff] }
  0xaf   : > { %v977_v50 = vpop.f32.mrf.mxu2  ;;  %v1057_v51 = vpop.f32.mrf.mxu3 }
  0xb0   : > { %v978_v53 = vadd.f32 %v2492_v40, %v977_v50  ;;  %v1058_v54 = vadd.f32 %v2492_v40, %v1057_v51  ;;  %v819_v55 = vpop.f32.mrf.mxu0  ;;  %v899_v56 = vpop.f32.mrf.mxu1  ;;  %v2039_v50 = vld [vmem:[%s2455_s15 + $0xd0] sm:$0xff] }
  0xb1   : > { %v2121_v57 = vpop.eup %2120  ;;  %v820_v58 = vadd.f32 %v2492_v40, %v819_v55  ;;  %v900_v59 = vadd.f32 %v2492_v40, %v899_v56 }
  0xb2   : > { %v2123_v60 = vpop.eup %2122  ;;  %v1269_v61 = vmul.f32 %v2121_v57, %v2503_v49  ;;  %2124 = vtanh.f32 %v978_v53  ;;  %v2055_v57 = vld [vmem:[%s2455_s15 + $0x150] sm:$0xff] }
  0xb3   : > { %v1301_v62 = vmul.f32 %v2123_v60, %v2503_v49  ;;  %2126 = vtanh.f32 %v1058_v54 }
  0xb4   : > { %v1401_v63 = vadd.f32 %v2509_v52, %v1269_v61  ;;  %2128 = vtanh.f32 %v820_v58  ;;  %v2071_v58 = vld [vmem:[%s2455_s15 + $0x1d0] sm:$0xff] }
  0xb5   : > { %v1433_v0 = vadd.f32 %v2509_v52, %v1301_v62  ;;  %2130 = vtanh.f32 %v900_v59 }
  0xb6   : > { %1530 = vst.msk [vmem:[%s2519_s26] sm:$0xff] %vm1529_vm0, %v1401_v63 }
  0xb7   : > { %1562 = vst.msk [vmem:[%s2519_s26 + $0x100] sm:$0xff] %vm1529_vm0, %v1433_v0  ;;  %v979_v1 = vpop.f32.mrf.mxu2  ;;  %v1059_v2 = vpop.f32.mrf.mxu3 }
  0xb8   : > { %v2125_v5 = vpop.eup %2124  ;;  %v980_v6 = vadd.f32 %v2492_v40, %v979_v1  ;;  %v1060_v7 = vadd.f32 %v2492_v40, %v1059_v2  ;;  %v822_v8 = vpop.f32.mrf.mxu0 }
  0xb9   : > { %v902_v9 = vpop.f32.mrf.mxu1  ;;  %v2127_v12 = vpop.eup %2126  ;;  %v1333_v13 = vmul.f32 %v2125_v5, %v2503_v49  ;;  %v823_v14 = vadd.f32 %v2492_v40, %v822_v8 }
  0xba   : > { %v903_v15 = vadd.f32 %v2492_v40, %v902_v9  ;;  %v2129_v16 = vpop.eup %2128  ;;  %v1365_v17 = vmul.f32 %v2127_v12, %v2503_v49  ;;  %2132 = vtanh.f32 %v980_v6 }
  0xbb   : > { %v2131_v18 = vpop.eup %2130  ;;  %v1465_v19 = vadd.f32 %v2509_v52, %v1333_v13  ;;  %v1270_v20 = vmul.f32 %v2129_v16, %v2503_v49  ;;  %2134 = vtanh.f32 %v1060_v7  ;;  %861 = vmatmul.bf16.gmra.mxu0 %v2022_v3  ;;  %941 = vmatmul.bf16.gmra.mxu1 %v2038_v4 }
  0xbc   : > { %v1497_v21 = vadd.f32 %v2509_v52, %v1365_v17  ;;  %v1302_v22 = vmul.f32 %v2131_v18, %v2503_v49  ;;  %2136 = vtanh.f32 %v823_v14  ;;  %1021 = vmatmul.bf16.gmra.mxu2 %v2054_v10  ;;  %1101 = vmatmul.bf16.gmra.mxu3 %v2070_v11 }
  0xbd   : > { %1594 = vst.msk [vmem:[%s2519_s26 + $0x200] sm:$0xff] %vm1529_vm0, %v1465_v19  ;;  %v1402_v23 = vadd.f32 %v2509_v52, %v1270_v20  ;;  %2138 = vtanh.f32 %v903_v15 }
  0xbe   : > { %1626 = vst.msk [vmem:[%s2519_s26 + $0x300] sm:$0xff] %vm1529_vm0, %v1497_v21  ;;  %v1434_v24 = vadd.f32 %v2509_v52, %v1302_v22 }
  0xbf   : > { %1531 = vst.msk [vmem:[%s2519_s26 + $0x8] sm:$0xff] %vm1529_vm0, %v1402_v23  ;;  %v982_v25 = vpop.f32.mrf.mxu2  ;;  %v1062_v26 = vpop.f32.mrf.mxu3 }
  0xc0   : > { %v2133_v27 = vpop.eup %2132  ;;  %1563 = vst.msk [vmem:[%s2519_s26 + $0x108] sm:$0xff] %vm1529_vm0, %v1434_v24  ;;  %v983_v28 = vadd.f32 %v2492_v40, %v982_v25  ;;  %v1063_v29 = vadd.f32 %v2492_v40, %v1062_v26  ;;  %v824_v30 = vpop.f32.mrf.mxu0 }
  0xc1   : > { %v904_v31 = vpop.f32.mrf.mxu1  ;;  %v2135_v32 = vpop.eup %2134  ;;  %v1334_v33 = vmul.f32 %v2133_v27, %v2503_v49  ;;  %v825_v34 = vadd.f32 %v2492_v40, %v824_v30  ;;  %v2024_v30 = vld [vmem:[%s2455_s15 + $0x58] sm:$0xff] }
  0xc2   : > { %v905_v35 = vadd.f32 %v2492_v40, %v904_v31  ;;  %v2137_v36 = vpop.eup %2136  ;;  %v1366_v37 = vmul.f32 %v2135_v32, %v2503_v49  ;;  %2140 = vtanh.f32 %v983_v28  ;;  %v2040_v31 = vld [vmem:[%s2455_s15 + $0xd8] sm:$0xff] }
  0xc3   : > { %v2139_v38 = vpop.eup %2138  ;;  %v1466_v39 = vadd.f32 %v2509_v52, %v1334_v33  ;;  %v1271_v41 = vmul.f32 %v2137_v36, %v2503_v49  ;;  %2142 = vtanh.f32 %v1063_v29 }
  0xc4   : > { %v1498_v42 = vadd.f32 %v2509_v52, %v1366_v37  ;;  %v1303_v43 = vmul.f32 %v2139_v38, %v2503_v49  ;;  %2144 = vtanh.f32 %v825_v34  ;;  %v2056_v37 = vld [vmem:[%s2455_s15 + $0x158] sm:$0xff] }
  0xc5   : > { %1595 = vst.msk [vmem:[%s2519_s26 + $0x208] sm:$0xff] %vm1529_vm0, %v1466_v39  ;;  %v1403_v44 = vadd.f32 %v2509_v52, %v1271_v41  ;;  %2146 = vtanh.f32 %v905_v35  ;;  %v2072_v38 = vld [vmem:[%s2455_s15 + $0x1d8] sm:$0xff] }
  0xc6   : > { %1627 = vst.msk [vmem:[%s2519_s26 + $0x308] sm:$0xff] %vm1529_vm0, %v1498_v42  ;;  %v1435_v45 = vadd.f32 %v2509_v52, %v1303_v43 }
  0xc7   : > { %1532 = vst.msk [vmem:[%s2519_s26 + $0x10] sm:$0xff] %vm1529_vm0, %v1403_v44  ;;  %v984_v46 = vpop.f32.mrf.mxu2  ;;  %v1064_v47 = vpop.f32.mrf.mxu3 }
  0xc8   : > { %v2141_v51 = vpop.eup %2140  ;;  %1564 = vst.msk [vmem:[%s2519_s26 + $0x110] sm:$0xff] %vm1529_vm0, %v1435_v45  ;;  %v985_v53 = vadd.f32 %v2492_v40, %v984_v46  ;;  %v1065_v54 = vadd.f32 %v2492_v40, %v1064_v47  ;;  %v827_v55 = vpop.f32.mrf.mxu0 }
  0xc9   : > { %v907_v56 = vpop.f32.mrf.mxu1  ;;  %v2143_v59 = vpop.eup %2142  ;;  %v1335_v60 = vmul.f32 %v2141_v51, %v2503_v49  ;;  %v828_v61 = vadd.f32 %v2492_v40, %v827_v55 }
  0xca   : > { %v908_v62 = vadd.f32 %v2492_v40, %v907_v56  ;;  %v2145_v63 = vpop.eup %2144  ;;  %v1367_v0 = vmul.f32 %v2143_v59, %v2503_v49  ;;  %2148 = vtanh.f32 %v985_v53 }
  0xcb   : > { %v2147_v1 = vpop.eup %2146  ;;  %v1467_v2 = vadd.f32 %v2509_v52, %v1335_v60  ;;  %v1272_v3 = vmul.f32 %v2145_v63, %v2503_v49  ;;  %2150 = vtanh.f32 %v1065_v54  ;;  %866 = vmatmul.bf16.gmra.mxu0 %v2023_v48  ;;  %946 = vmatmul.bf16.gmra.mxu1 %v2039_v50 }
  0xcc   : > { %v1499_v4 = vadd.f32 %v2509_v52, %v1367_v0  ;;  %v1304_v5 = vmul.f32 %v2147_v1, %v2503_v49  ;;  %2152 = vtanh.f32 %v828_v61  ;;  %1026 = vmatmul.bf16.gmra.mxu2 %v2055_v57  ;;  %1106 = vmatmul.bf16.gmra.mxu3 %v2071_v58 }
  0xcd   : > { %1596 = vst.msk [vmem:[%s2519_s26 + $0x210] sm:$0xff] %vm1529_vm0, %v1467_v2  ;;  %v1404_v6 = vadd.f32 %v2509_v52, %v1272_v3  ;;  %2154 = vtanh.f32 %v908_v62 }
  0xce   : > { %1628 = vst.msk [vmem:[%s2519_s26 + $0x310] sm:$0xff] %vm1529_vm0, %v1499_v4  ;;  %v1436_v7 = vadd.f32 %v2509_v52, %v1304_v5 }
  0xcf   : > { %1533 = vst.msk [vmem:[%s2519_s26 + $0x18] sm:$0xff] %vm1529_vm0, %v1404_v6  ;;  %v987_v8 = vpop.f32.mrf.mxu2  ;;  %v1067_v9 = vpop.f32.mrf.mxu3 }
  0xd0   : > { %v2149_v10 = vpop.eup %2148  ;;  %1565 = vst.msk [vmem:[%s2519_s26 + $0x118] sm:$0xff] %vm1529_vm0, %v1436_v7  ;;  %v988_v11 = vadd.f32 %v2492_v40, %v987_v8  ;;  %v1068_v12 = vadd.f32 %v2492_v40, %v1067_v9  ;;  %v829_v13 = vpop.f32.mrf.mxu0 }
  0xd1   : > { %v909_v14 = vpop.f32.mrf.mxu1  ;;  %v2151_v15 = vpop.eup %2150  ;;  %v1336_v16 = vmul.f32 %v2149_v10, %v2503_v49  ;;  %v830_v17 = vadd.f32 %v2492_v40, %v829_v13  ;;  %v2025_v13 = vld [vmem:[%s2455_s15 + $0x60] sm:$0xff] }
  0xd2   : > { %v910_v18 = vadd.f32 %v2492_v40, %v909_v14  ;;  %v2153_v19 = vpop.eup %2152  ;;  %v1368_v20 = vmul.f32 %v2151_v15, %v2503_v49  ;;  %2156 = vtanh.f32 %v988_v11  ;;  %v2041_v14 = vld [vmem:[%s2455_s15 + $0xe0] sm:$0xff] }
  0xd3   : > { %v2155_v21 = vpop.eup %2154  ;;  %v1468_v22 = vadd.f32 %v2509_v52, %v1336_v16  ;;  %v1273_v23 = vmul.f32 %v2153_v19, %v2503_v49  ;;  %2158 = vtanh.f32 %v1068_v12 }
  0xd4   : > { %v1500_v24 = vadd.f32 %v2509_v52, %v1368_v20  ;;  %v1305_v25 = vmul.f32 %v2155_v21, %v2503_v49  ;;  %2160 = vtanh.f32 %v830_v17  ;;  %v2057_v20 = vld [vmem:[%s2455_s15 + $0x160] sm:$0xff] }
  0xd5   : > { %1597 = vst.msk [vmem:[%s2519_s26 + $0x218] sm:$0xff] %vm1529_vm0, %v1468_v22  ;;  %v1405_v26 = vadd.f32 %v2509_v52, %v1273_v23  ;;  %2162 = vtanh.f32 %v910_v18  ;;  %v2073_v21 = vld [vmem:[%s2455_s15 + $0x1e0] sm:$0xff] }
  0xd6   : > { %1629 = vst.msk [vmem:[%s2519_s26 + $0x318] sm:$0xff] %vm1529_vm0, %v1500_v24  ;;  %v1437_v27 = vadd.f32 %v2509_v52, %v1305_v25 }
  0xd7   : > { %1534 = vst.msk [vmem:[%s2519_s26 + $0x20] sm:$0xff] %vm1529_vm0, %v1405_v26  ;;  %v989_v28 = vpop.f32.mrf.mxu2  ;;  %v1069_v29 = vpop.f32.mrf.mxu3 }
  0xd8   : > { %v2157_v32 = vpop.eup %2156  ;;  %1566 = vst.msk [vmem:[%s2519_s26 + $0x120] sm:$0xff] %vm1529_vm0, %v1437_v27  ;;  %v990_v33 = vadd.f32 %v2492_v40, %v989_v28  ;;  %v1070_v34 = vadd.f32 %v2492_v40, %v1069_v29  ;;  %v832_v35 = vpop.f32.mrf.mxu0 }
  0xd9   : > { %v912_v36 = vpop.f32.mrf.mxu1  ;;  %v2159_v39 = vpop.eup %2158  ;;  %v1337_v41 = vmul.f32 %v2157_v32, %v2503_v49  ;;  %v833_v42 = vadd.f32 %v2492_v40, %v832_v35 }
  0xda   : > { %v913_v43 = vadd.f32 %v2492_v40, %v912_v36  ;;  %v2161_v44 = vpop.eup %2160  ;;  %v1369_v45 = vmul.f32 %v2159_v39, %v2503_v49  ;;  %2164 = vtanh.f32 %v990_v33 }
  0xdb   : > { %v2163_v46 = vpop.eup %2162  ;;  %v1469_v47 = vadd.f32 %v2509_v52, %v1337_v41  ;;  %v1274_v48 = vmul.f32 %v2161_v44, %v2503_v49  ;;  %2166 = vtanh.f32 %v1070_v34  ;;  %871 = vmatmul.bf16.gmra.mxu0 %v2024_v30  ;;  %951 = vmatmul.bf16.gmra.mxu1 %v2040_v31 }
  0xdc   : > { %v1501_v50 = vadd.f32 %v2509_v52, %v1369_v45  ;;  %v1306_v51 = vmul.f32 %v2163_v46, %v2503_v49  ;;  %2168 = vtanh.f32 %v833_v42  ;;  %1031 = vmatmul.bf16.gmra.mxu2 %v2056_v37  ;;  %1111 = vmatmul.bf16.gmra.mxu3 %v2072_v38 }
  0xdd   : > { %1598 = vst.msk [vmem:[%s2519_s26 + $0x220] sm:$0xff] %vm1529_vm0, %v1469_v47  ;;  %v1406_v53 = vadd.f32 %v2509_v52, %v1274_v48  ;;  %2170 = vtanh.f32 %v913_v43 }
  0xde   : > { %1630 = vst.msk [vmem:[%s2519_s26 + $0x320] sm:$0xff] %vm1529_vm0, %v1501_v50  ;;  %v1438_v54 = vadd.f32 %v2509_v52, %v1306_v51 }
  0xdf   : > { %1535 = vst.msk [vmem:[%s2519_s26 + $0x28] sm:$0xff] %vm1529_vm0, %v1406_v53  ;;  %v992_v55 = vpop.f32.mrf.mxu2  ;;  %v1072_v56 = vpop.f32.mrf.mxu3 }
  0xe0   : > { %v2165_v57 = vpop.eup %2164  ;;  %1567 = vst.msk [vmem:[%s2519_s26 + $0x128] sm:$0xff] %vm1529_vm0, %v1438_v54  ;;  %v993_v58 = vadd.f32 %v2492_v40, %v992_v55  ;;  %v1073_v59 = vadd.f32 %v2492_v40, %v1072_v56  ;;  %v834_v60 = vpop.f32.mrf.mxu0 }
  0xe1   : > { %v914_v61 = vpop.f32.mrf.mxu1  ;;  %v2167_v62 = vpop.eup %2166  ;;  %v1338_v63 = vmul.f32 %v2165_v57, %v2503_v49  ;;  %v835_v0 = vadd.f32 %v2492_v40, %v834_v60  ;;  %v2026_v60 = vld [vmem:[%s2455_s15 + $0x68] sm:$0xff] }
  0xe2   : > { %v915_v1 = vadd.f32 %v2492_v40, %v914_v61  ;;  %v2169_v2 = vpop.eup %2168  ;;  %v1370_v3 = vmul.f32 %v2167_v62, %v2503_v49  ;;  %2172 = vtanh.f32 %v993_v58  ;;  %v2042_v61 = vld [vmem:[%s2455_s15 + $0xe8] sm:$0xff] }
  0xe3   : > { %v2171_v4 = vpop.eup %2170  ;;  %v1470_v5 = vadd.f32 %v2509_v52, %v1338_v63  ;;  %v1275_v6 = vmul.f32 %v2169_v2, %v2503_v49  ;;  %2174 = vtanh.f32 %v1073_v59 }
  0xe4   : > { %v1502_v7 = vadd.f32 %v2509_v52, %v1370_v3  ;;  %v1307_v8 = vmul.f32 %v2171_v4, %v2503_v49  ;;  %2176 = vtanh.f32 %v835_v0  ;;  %v2058_v3 = vld [vmem:[%s2455_s15 + $0x168] sm:$0xff] }
  0xe5   : > { %1599 = vst.msk [vmem:[%s2519_s26 + $0x228] sm:$0xff] %vm1529_vm0, %v1470_v5  ;;  %v1407_v9 = vadd.f32 %v2509_v52, %v1275_v6  ;;  %2178 = vtanh.f32 %v915_v1  ;;  %v2074_v4 = vld [vmem:[%s2455_s15 + $0x1e8] sm:$0xff] }
  0xe6   : > { %1631 = vst.msk [vmem:[%s2519_s26 + $0x328] sm:$0xff] %vm1529_vm0, %v1502_v7  ;;  %v1439_v10 = vadd.f32 %v2509_v52, %v1307_v8 }
  0xe7   : > { %1536 = vst.msk [vmem:[%s2519_s26 + $0x30] sm:$0xff] %vm1529_vm0, %v1407_v9  ;;  %v994_v11 = vpop.f32.mrf.mxu2  ;;  %v1074_v12 = vpop.f32.mrf.mxu3 }
  0xe8   : > { %v2173_v15 = vpop.eup %2172  ;;  %1568 = vst.msk [vmem:[%s2519_s26 + $0x130] sm:$0xff] %vm1529_vm0, %v1439_v10  ;;  %v995_v16 = vadd.f32 %v2492_v40, %v994_v11  ;;  %v1075_v17 = vadd.f32 %v2492_v40, %v1074_v12  ;;  %v837_v18 = vpop.f32.mrf.mxu0 }
  0xe9   : > { %v917_v19 = vpop.f32.mrf.mxu1  ;;  %v2175_v22 = vpop.eup %2174  ;;  %v1339_v23 = vmul.f32 %v2173_v15, %v2503_v49  ;;  %v838_v24 = vadd.f32 %v2492_v40, %v837_v18 }
  0xea   : > { %v918_v25 = vadd.f32 %v2492_v40, %v917_v19  ;;  %v2177_v26 = vpop.eup %2176  ;;  %v1371_v27 = vmul.f32 %v2175_v22, %v2503_v49  ;;  %2180 = vtanh.f32 %v995_v16 }
  0xeb   : > { %v2179_v28 = vpop.eup %2178  ;;  %v1471_v29 = vadd.f32 %v2509_v52, %v1339_v23  ;;  %v1276_v30 = vmul.f32 %v2177_v26, %v2503_v49  ;;  %2182 = vtanh.f32 %v1075_v17  ;;  %876 = vmatmul.bf16.gmra.mxu0 %v2025_v13  ;;  %956 = vmatmul.bf16.gmra.mxu1 %v2041_v14 }
  0xec   : > { %v1503_v31 = vadd.f32 %v2509_v52, %v1371_v27  ;;  %v1308_v32 = vmul.f32 %v2179_v28, %v2503_v49  ;;  %2184 = vtanh.f32 %v838_v24  ;;  %1036 = vmatmul.bf16.gmra.mxu2 %v2057_v20  ;;  %1116 = vmatmul.bf16.gmra.mxu3 %v2073_v21 }
  0xed   : > { %1600 = vst.msk [vmem:[%s2519_s26 + $0x230] sm:$0xff] %vm1529_vm0, %v1471_v29  ;;  %v1408_v33 = vadd.f32 %v2509_v52, %v1276_v30  ;;  %2186 = vtanh.f32 %v918_v25 }
  0xee   : > { %1632 = vst.msk [vmem:[%s2519_s26 + $0x330] sm:$0xff] %vm1529_vm0, %v1503_v31  ;;  %v1440_v34 = vadd.f32 %v2509_v52, %v1308_v32 }
  0xef   : > { %1537 = vst.msk [vmem:[%s2519_s26 + $0x38] sm:$0xff] %vm1529_vm0, %v1408_v33  ;;  %v997_v35 = vpop.f32.mrf.mxu2  ;;  %v1077_v36 = vpop.f32.mrf.mxu3 }
  0xf0   : > { %v2181_v37 = vpop.eup %2180  ;;  %1569 = vst.msk [vmem:[%s2519_s26 + $0x138] sm:$0xff] %vm1529_vm0, %v1440_v34  ;;  %v998_v38 = vadd.f32 %v2492_v40, %v997_v35  ;;  %v1078_v39 = vadd.f32 %v2492_v40, %v1077_v36  ;;  %v839_v41 = vpop.f32.mrf.mxu0 }
  0xf1   : > { %v919_v42 = vpop.f32.mrf.mxu1  ;;  %v2183_v43 = vpop.eup %2182  ;;  %v1340_v44 = vmul.f32 %v2181_v37, %v2503_v49  ;;  %v840_v45 = vadd.f32 %v2492_v40, %v839_v41  ;;  %v2027_v41 = vld [vmem:[%s2455_s15 + $0x70] sm:$0xff] }
  0xf2   : > { %v920_v46 = vadd.f32 %v2492_v40, %v919_v42  ;;  %v2185_v47 = vpop.eup %2184  ;;  %v1372_v48 = vmul.f32 %v2183_v43, %v2503_v49  ;;  %2188 = vtanh.f32 %v998_v38  ;;  %v2043_v42 = vld [vmem:[%s2455_s15 + $0xf0] sm:$0xff] }
  0xf3   : > { %v2187_v50 = vpop.eup %2186  ;;  %v1472_v51 = vadd.f32 %v2509_v52, %v1340_v44  ;;  %v1277_v53 = vmul.f32 %v2185_v47, %v2503_v49  ;;  %2190 = vtanh.f32 %v1078_v39 }
  0xf4   : > { %v1504_v54 = vadd.f32 %v2509_v52, %v1372_v48  ;;  %v1309_v55 = vmul.f32 %v2187_v50, %v2503_v49  ;;  %2192 = vtanh.f32 %v840_v45  ;;  %v2059_v48 = vld [vmem:[%s2455_s15 + $0x170] sm:$0xff] }
  0xf5   : > { %1601 = vst.msk [vmem:[%s2519_s26 + $0x238] sm:$0xff] %vm1529_vm0, %v1472_v51  ;;  %v1409_v56 = vadd.f32 %v2509_v52, %v1277_v53  ;;  %2194 = vtanh.f32 %v920_v46  ;;  %v2075_v50 = vld [vmem:[%s2455_s15 + $0x1f0] sm:$0xff] }
  0xf6   : > { %1633 = vst.msk [vmem:[%s2519_s26 + $0x338] sm:$0xff] %vm1529_vm0, %v1504_v54  ;;  %v1441_v57 = vadd.f32 %v2509_v52, %v1309_v55 }
  0xf7   : > { %1538 = vst.msk [vmem:[%s2519_s26 + $0x40] sm:$0xff] %vm1529_vm0, %v1409_v56  ;;  %v999_v58 = vpop.f32.mrf.mxu2  ;;  %v1079_v59 = vpop.f32.mrf.mxu3 }
  0xf8   : > { %v2189_v62 = vpop.eup %2188  ;;  %1570 = vst.msk [vmem:[%s2519_s26 + $0x140] sm:$0xff] %vm1529_vm0, %v1441_v57  ;;  %v1000_v63 = vadd.f32 %v2492_v40, %v999_v58  ;;  %v1080_v0 = vadd.f32 %v2492_v40, %v1079_v59  ;;  %v842_v1 = vpop.f32.mrf.mxu0 }
  0xf9   : > { %v922_v2 = vpop.f32.mrf.mxu1  ;;  %v2191_v5 = vpop.eup %2190  ;;  %v1341_v6 = vmul.f32 %v2189_v62, %v2503_v49  ;;  %v843_v7 = vadd.f32 %v2492_v40, %v842_v1 }
  0xfa   : > { %v923_v8 = vadd.f32 %v2492_v40, %v922_v2  ;;  %v2193_v9 = vpop.eup %2192  ;;  %v1373_v10 = vmul.f32 %v2191_v5, %v2503_v49  ;;  %2196 = vtanh.f32 %v1000_v63 }
  0xfb   : > { %v2195_v11 = vpop.eup %2194  ;;  %v1473_v12 = vadd.f32 %v2509_v52, %v1341_v6  ;;  %v1278_v13 = vmul.f32 %v2193_v9, %v2503_v49  ;;  %2198 = vtanh.f32 %v1080_v0  ;;  %881 = vmatmul.bf16.gmra.mxu0 %v2026_v60  ;;  %961 = vmatmul.bf16.gmra.mxu1 %v2042_v61 }
  0xfc   : > { %v1505_v14 = vadd.f32 %v2509_v52, %v1373_v10  ;;  %v1310_v15 = vmul.f32 %v2195_v11, %v2503_v49  ;;  %2200 = vtanh.f32 %v843_v7  ;;  %1041 = vmatmul.bf16.gmra.mxu2 %v2058_v3  ;;  %1121 = vmatmul.bf16.gmra.mxu3 %v2074_v4 }
  0xfd   : > { %1602 = vst.msk [vmem:[%s2519_s26 + $0x240] sm:$0xff] %vm1529_vm0, %v1473_v12  ;;  %v1410_v16 = vadd.f32 %v2509_v52, %v1278_v13  ;;  %2202 = vtanh.f32 %v923_v8 }
  0xfe   : > { %1634 = vst.msk [vmem:[%s2519_s26 + $0x340] sm:$0xff] %vm1529_vm0, %v1505_v14  ;;  %v1442_v17 = vadd.f32 %v2509_v52, %v1310_v15 }
  0xff   : > { %1539 = vst.msk [vmem:[%s2519_s26 + $0x48] sm:$0xff] %vm1529_vm0, %v1410_v16  ;;  %v1002_v18 = vpop.f32.mrf.mxu2  ;;  %v1082_v19 = vpop.f32.mrf.mxu3 }
 0x100   : > { %v2197_v20 = vpop.eup %2196  ;;  %1571 = vst.msk [vmem:[%s2519_s26 + $0x148] sm:$0xff] %vm1529_vm0, %v1442_v17  ;;  %v1003_v21 = vadd.f32 %v2492_v40, %v1002_v18  ;;  %v1083_v22 = vadd.f32 %v2492_v40, %v1082_v19  ;;  %v844_v23 = vpop.f32.mrf.mxu0 }
 0x101   : > { %v924_v24 = vpop.f32.mrf.mxu1  ;;  %v2199_v25 = vpop.eup %2198  ;;  %v1342_v26 = vmul.f32 %v2197_v20, %v2503_v49  ;;  %v845_v27 = vadd.f32 %v2492_v40, %v844_v23  ;;  %v2028_v23 = vld [vmem:[%s2455_s15 + $0x78] sm:$0xff] }
 0x102   : > { %v925_v28 = vadd.f32 %v2492_v40, %v924_v24  ;;  %v2201_v29 = vpop.eup %2200  ;;  %v1374_v30 = vmul.f32 %v2199_v25, %v2503_v49  ;;  %2204 = vtanh.f32 %v1003_v21  ;;  %v2044_v24 = vld [vmem:[%s2455_s15 + $0xf8] sm:$0xff] }
 0x103   : > { %v2203_v31 = vpop.eup %2202  ;;  %v1474_v32 = vadd.f32 %v2509_v52, %v1342_v26  ;;  %v1279_v33 = vmul.f32 %v2201_v29, %v2503_v49  ;;  %2206 = vtanh.f32 %v1083_v22 }
 0x104   : > { %v1506_v34 = vadd.f32 %v2509_v52, %v1374_v30  ;;  %v1311_v35 = vmul.f32 %v2203_v31, %v2503_v49  ;;  %2208 = vtanh.f32 %v845_v27  ;;  %v2060_v30 = vld [vmem:[%s2455_s15 + $0x178] sm:$0xff] }
 0x105   : > { %1603 = vst.msk [vmem:[%s2519_s26 + $0x248] sm:$0xff] %vm1529_vm0, %v1474_v32  ;;  %v1411_v36 = vadd.f32 %v2509_v52, %v1279_v33  ;;  %2210 = vtanh.f32 %v925_v28  ;;  %v2076_v31 = vld [vmem:[%s2455_s15 + $0x1f8] sm:$0xff] }
 0x106   : > { %1635 = vst.msk [vmem:[%s2519_s26 + $0x348] sm:$0xff] %vm1529_vm0, %v1506_v34  ;;  %v1443_v37 = vadd.f32 %v2509_v52, %v1311_v35 }
 0x107   : > { %1540 = vst.msk [vmem:[%s2519_s26 + $0x50] sm:$0xff] %vm1529_vm0, %v1411_v36  ;;  %v1004_v38 = vpop.f32.mrf.mxu2  ;;  %v1084_v39 = vpop.f32.mrf.mxu3 }
 0x108   : > { %v2205_v43 = vpop.eup %2204  ;;  %1572 = vst.msk [vmem:[%s2519_s26 + $0x150] sm:$0xff] %vm1529_vm0, %v1443_v37  ;;  %v1005_v44 = vadd.f32 %v2492_v40, %v1004_v38  ;;  %v1085_v45 = vadd.f32 %v2492_v40, %v1084_v39  ;;  %v847_v46 = vpop.f32.mrf.mxu0 }
 0x109   : > { %v927_v47 = vpop.f32.mrf.mxu1  ;;  %v2207_v51 = vpop.eup %2206  ;;  %v1343_v53 = vmul.f32 %v2205_v43, %v2503_v49  ;;  %v848_v54 = vadd.f32 %v2492_v40, %v847_v46 }
 0x10a   : > { %v928_v55 = vadd.f32 %v2492_v40, %v927_v47  ;;  %v2209_v56 = vpop.eup %2208  ;;  %v1375_v57 = vmul.f32 %v2207_v51, %v2503_v49  ;;  %2212 = vtanh.f32 %v1005_v44 }
 0x10b   : > { %v2211_v58 = vpop.eup %2210  ;;  %v1475_v59 = vadd.f32 %v2509_v52, %v1343_v53  ;;  %v1280_v60 = vmul.f32 %v2209_v56, %v2503_v49  ;;  %2214 = vtanh.f32 %v1085_v45  ;;  %886 = vmatmul.bf16.gmra.mxu0 %v2027_v41  ;;  %966 = vmatmul.bf16.gmra.mxu1 %v2043_v42 }
 0x10c   : > { %v1507_v61 = vadd.f32 %v2509_v52, %v1375_v57  ;;  %v1312_v62 = vmul.f32 %v2211_v58, %v2503_v49  ;;  %2216 = vtanh.f32 %v848_v54  ;;  %1046 = vmatmul.bf16.gmra.mxu2 %v2059_v48  ;;  %1126 = vmatmul.bf16.gmra.mxu3 %v2075_v50 }
 0x10d   : > { %1604 = vst.msk [vmem:[%s2519_s26 + $0x250] sm:$0xff] %vm1529_vm0, %v1475_v59  ;;  %v1412_v63 = vadd.f32 %v2509_v52, %v1280_v60  ;;  %2218 = vtanh.f32 %v928_v55 }
 0x10e   : > { %1636 = vst.msk [vmem:[%s2519_s26 + $0x350] sm:$0xff] %vm1529_vm0, %v1507_v61  ;;  %v1444_v0 = vadd.f32 %v2509_v52, %v1312_v62 }
 0x10f   : > { %1541 = vst.msk [vmem:[%s2519_s26 + $0x58] sm:$0xff] %vm1529_vm0, %v1412_v63  ;;  %v1007_v1 = vpop.f32.mrf.mxu2  ;;  %v1087_v2 = vpop.f32.mrf.mxu3 }
 0x110   : > { %v2213_v3 = vpop.eup %2212  ;;  %1573 = vst.msk [vmem:[%s2519_s26 + $0x158] sm:$0xff] %vm1529_vm0, %v1444_v0  ;;  %v1008_v4 = vadd.f32 %v2492_v40, %v1007_v1  ;;  %v1088_v5 = vadd.f32 %v2492_v40, %v1087_v2  ;;  %v849_v6 = vpop.f32.mrf.mxu0 }
 0x111   : > { %v929_v7 = vpop.f32.mrf.mxu1  ;;  %v2215_v8 = vpop.eup %2214  ;;  %v1344_v9 = vmul.f32 %v2213_v3, %v2503_v49  ;;  %v850_v10 = vadd.f32 %v2492_v40, %v849_v6 }
 0x112   : > { %v930_v11 = vadd.f32 %v2492_v40, %v929_v7  ;;  %v2217_v12 = vpop.eup %2216  ;;  %v1376_v13 = vmul.f32 %v2215_v8, %v2503_v49  ;;  %2220 = vtanh.f32 %v1008_v4 }
 0x113   : > { %v2219_v14 = vpop.eup %2218  ;;  %v1476_v15 = vadd.f32 %v2509_v52, %v1344_v9  ;;  %v1281_v16 = vmul.f32 %v2217_v12, %v2503_v49  ;;  %2222 = vtanh.f32 %v1088_v5 }
 0x114   : > { %v1508_v17 = vadd.f32 %v2509_v52, %v1376_v13  ;;  %v1313_v18 = vmul.f32 %v2219_v14, %v2503_v49  ;;  %2224 = vtanh.f32 %v850_v10 }
 0x115   : > { %1605 = vst.msk [vmem:[%s2519_s26 + $0x258] sm:$0xff] %vm1529_vm0, %v1476_v15  ;;  %v1413_v19 = vadd.f32 %v2509_v52, %v1281_v16  ;;  %2226 = vtanh.f32 %v930_v11 }
 0x116   : > { %1637 = vst.msk [vmem:[%s2519_s26 + $0x358] sm:$0xff] %vm1529_vm0, %v1508_v17  ;;  %v1445_v20 = vadd.f32 %v2509_v52, %v1313_v18 }
 0x117   : > { %1542 = vst.msk [vmem:[%s2519_s26 + $0x60] sm:$0xff] %vm1529_vm0, %v1413_v19  ;;  %v1009_v21 = vpop.f32.mrf.mxu2  ;;  %v1089_v22 = vpop.f32.mrf.mxu3 }
 0x118   : > { %v2221_v25 = vpop.eup %2220  ;;  %1574 = vst.msk [vmem:[%s2519_s26 + $0x160] sm:$0xff] %vm1529_vm0, %v1445_v20  ;;  %v1010_v26 = vadd.f32 %v2492_v40, %v1009_v21  ;;  %v1090_v27 = vadd.f32 %v2492_v40, %v1089_v22  ;;  %v852_v28 = vpop.f32.mrf.mxu0 }
 0x119   : > { %v932_v29 = vpop.f32.mrf.mxu1  ;;  %v2223_v32 = vpop.eup %2222  ;;  %v1345_v33 = vmul.f32 %v2221_v25, %v2503_v49  ;;  %v853_v34 = vadd.f32 %v2492_v40, %v852_v28 }
 0x11a   : > { %v933_v35 = vadd.f32 %v2492_v40, %v932_v29  ;;  %v2225_v36 = vpop.eup %2224  ;;  %v1377_v37 = vmul.f32 %v2223_v32, %v2503_v49  ;;  %2228 = vtanh.f32 %v1010_v26  ;;  %v2859_v26 = vld [vmem:[%s3202_s2] ss:$0 sm:$0xff] }
 0x11b   : > { %v2227_v38 = vpop.eup %2226  ;;  %v1477_v39 = vadd.f32 %v2509_v52, %v1345_v33  ;;  %v1282_v41 = vmul.f32 %v2225_v36, %v2503_v49  ;;  %2230 = vtanh.f32 %v1090_v27  ;;  %891 = vmatmul.bf16.gmra.mxu0 %v2028_v23  ;;  %971 = vmatmul.bf16.gmra.mxu1 %v2044_v24 }
 0x11c   : > { %v1509_v42 = vadd.f32 %v2509_v52, %v1377_v37  ;;  %v1314_v43 = vmul.f32 %v2227_v38, %v2503_v49  ;;  %2232 = vtanh.f32 %v853_v34  ;;  %1051 = vmatmul.bf16.gmra.mxu2 %v2060_v30  ;;  %1131 = vmatmul.bf16.gmra.mxu3 %v2076_v31 }
 0x11d   : > { %1606 = vst.msk [vmem:[%s2519_s26 + $0x260] sm:$0xff] %vm1529_vm0, %v1477_v39  ;;  %v1414_v44 = vadd.f32 %v2509_v52, %v1282_v41  ;;  %2234 = vtanh.f32 %v933_v35  ;;  %v2869_v35 = vld [vmem:[%s3203_s3] ss:$0 sm:$0xff] }
 0x11e   : > { %1638 = vst.msk [vmem:[%s2519_s26 + $0x360] sm:$0xff] %vm1529_vm0, %v1509_v42  ;;  %v1446_v45 = vadd.f32 %v2509_v52, %v1314_v43 }
 0x11f   : > { %1543 = vst.msk [vmem:[%s2519_s26 + $0x68] sm:$0xff] %vm1529_vm0, %v1414_v44  ;;  %v1012_v46 = vpop.f32.mrf.mxu2  ;;  %v1092_v47 = vpop.f32.mrf.mxu3 }
 0x120   : > { %v2229_v48 = vpop.eup %2228  ;;  %1575 = vst.msk [vmem:[%s2519_s26 + $0x168] sm:$0xff] %vm1529_vm0, %v1446_v45  ;;  %v1013_v50 = vadd.f32 %v2492_v40, %v1012_v46  ;;  %v1093_v51 = vadd.f32 %v2492_v40, %v1092_v47  ;;  %v854_v53 = vpop.f32.mrf.mxu0 }
 0x121   : > { %v934_v54 = vpop.f32.mrf.mxu1  ;;  %v2231_v55 = vpop.eup %2230  ;;  %v1346_v56 = vmul.f32 %v2229_v48, %v2503_v49  ;;  %v855_v57 = vadd.f32 %v2492_v40, %v854_v53 }
 0x122   : > { %v935_v58 = vadd.f32 %v2492_v40, %v934_v54  ;;  %v2233_v59 = vpop.eup %2232  ;;  %v1378_v60 = vmul.f32 %v2231_v55, %v2503_v49  ;;  %2236 = vtanh.f32 %v1013_v50 }
 0x123   : > { %v2235_v61 = vpop.eup %2234  ;;  %v1478_v62 = vadd.f32 %v2509_v52, %v1346_v56  ;;  %v1283_v63 = vmul.f32 %v2233_v59, %v2503_v49  ;;  %2238 = vtanh.f32 %v1093_v51 }
 0x124   : > { %v1510_v0 = vadd.f32 %v2509_v52, %v1378_v60  ;;  %v1315_v1 = vmul.f32 %v2235_v61, %v2503_v49  ;;  %2240 = vtanh.f32 %v855_v57 }
 0x125   : > { %1607 = vst.msk [vmem:[%s2519_s26 + $0x268] sm:$0xff] %vm1529_vm0, %v1478_v62  ;;  %v1415_v2 = vadd.f32 %v2509_v52, %v1283_v63  ;;  %2242 = vtanh.f32 %v935_v58 }
 0x126   : > { %1639 = vst.msk [vmem:[%s2519_s26 + $0x368] sm:$0xff] %vm1529_vm0, %v1510_v0  ;;  %v1447_v3 = vadd.f32 %v2509_v52, %v1315_v1 }
 0x127   : > { %1544 = vst.msk [vmem:[%s2519_s26 + $0x70] sm:$0xff] %vm1529_vm0, %v1415_v2  ;;  %v1014_v4 = vpop.f32.mrf.mxu2  ;;  %v1094_v5 = vpop.f32.mrf.mxu3 }
 0x128   : > { %v2237_v6 = vpop.eup %2236  ;;  %1576 = vst.msk [vmem:[%s2519_s26 + $0x170] sm:$0xff] %vm1529_vm0, %v1447_v3  ;;  %v1015_v7 = vadd.f32 %v2492_v40, %v1014_v4  ;;  %v1095_v8 = vadd.f32 %v2492_v40, %v1094_v5  ;;  %v857_v9 = vpop.f32.mrf.mxu0 }
 0x129   : > { %v937_v10 = vpop.f32.mrf.mxu1  ;;  %v2239_v11 = vpop.eup %2238  ;;  %v1347_v12 = vmul.f32 %v2237_v6, %v2503_v49  ;;  %v858_v13 = vadd.f32 %v2492_v40, %v857_v9 }
 0x12a   : > { %v938_v14 = vadd.f32 %v2492_v40, %v937_v10  ;;  %v2241_v15 = vpop.eup %2240  ;;  %v1379_v16 = vmul.f32 %v2239_v11, %v2503_v49  ;;  %2244 = vtanh.f32 %v1015_v7 }
 0x12b   : > { %v2243_v17 = vpop.eup %2242  ;;  %v1479_v18 = vadd.f32 %v2509_v52, %v1347_v12  ;;  %v1284_v19 = vmul.f32 %v2241_v15, %v2503_v49  ;;  %2246 = vtanh.f32 %v1095_v8 }
 0x12c   : > { %v1511_v20 = vadd.f32 %v2509_v52, %v1379_v16  ;;  %v1316_v21 = vmul.f32 %v2243_v17, %v2503_v49  ;;  %2248 = vtanh.f32 %v858_v13 }
 0x12d   : > { %1608 = vst.msk [vmem:[%s2519_s26 + $0x270] sm:$0xff] %vm1529_vm0, %v1479_v18  ;;  %v1416_v40 = vadd.f32 %v2509_v52, %v1284_v19  ;;  %2250 = vtanh.f32 %v938_v14 }
 0x12e   : > { %1640 = vst.msk [vmem:[%s2519_s26 + $0x370] sm:$0xff] %vm1529_vm0, %v1511_v20  ;;  %v1448_v22 = vadd.f32 %v2509_v52, %v1316_v21 }
 0x12f   : > { %1545 = vst.msk [vmem:[%s2519_s26 + $0x78] sm:$0xff] %vm1529_vm0, %v1416_v40  ;;  %v1017_v23 = vpop.f32.mrf.mxu2  ;;  %v1097_v24 = vpop.f32.mrf.mxu3 }
 0x130   : > { %v2245_v25 = vpop.eup %2244  ;;  %1577 = vst.msk [vmem:[%s2519_s26 + $0x178] sm:$0xff] %vm1529_vm0, %v1448_v22  ;;  %v1018_v27 = vadd.f32 %v2859_v26, %v1017_v23  ;;  %v1098_v28 = vadd.f32 %v2859_v26, %v1097_v24  ;;  %v859_v29 = vpop.f32.mrf.mxu0 }
 0x131   : > { %v939_v30 = vpop.f32.mrf.mxu1  ;;  %v2247_v31 = vpop.eup %2246  ;;  %v1348_v52 = vmul.f32 %v2245_v25, %v2503_v49  ;;  %v860_v32 = vadd.f32 %v2859_v26, %v859_v29  ;;  %v2875_v49 = vld [vmem:[%s3204_s4] ss:$0 sm:$0xff] }
 0x132   : > { %v940_v33 = vadd.f32 %v2859_v26, %v939_v30  ;;  %v2249_v34 = vpop.eup %2248  ;;  %v1380_v36 = vmul.f32 %v2869_v35, %v2247_v31  ;;  %2252 = vtanh.f32 %v1018_v27 }
 0x133   : > { %v2251_v37 = vpop.eup %2250  ;;  %v1480_v38 = vadd.f32 %v2875_v49, %v1348_v52  ;;  %v1285_v39 = vmul.f32 %v2869_v35, %v2249_v34  ;;  %2254 = vtanh.f32 %v1098_v28 }
 0x134   : > { %v1512_v41 = vadd.f32 %v2875_v49, %v1380_v36  ;;  %v1317_v42 = vmul.f32 %v2869_v35, %v2251_v37  ;;  %2256 = vtanh.f32 %v860_v32 }
 0x135   : > { %1609 = vst.msk [vmem:[%s2519_s26 + $0x278] sm:$0xff] %vm1529_vm0, %v1480_v38  ;;  %v1417_v43 = vadd.f32 %v2875_v49, %v1285_v39  ;;  %2258 = vtanh.f32 %v940_v33 }
 0x136   : > { %1641 = vst.msk [vmem:[%s2519_s26 + $0x378] sm:$0xff] %vm1529_vm0, %v1512_v41  ;;  %v1449_v44 = vadd.f32 %v2875_v49, %v1317_v42 }
 0x137   : > { %1546 = vst.msk [vmem:[%s2519_s26 + $0x80] sm:$0xff] %vm1529_vm0, %v1417_v43  ;;  %v1019_v45 = vpop.f32.mrf.mxu2  ;;  %v1099_v46 = vpop.f32.mrf.mxu3 }
 0x138   : > { %v2253_v47 = vpop.eup %2252  ;;  %1578 = vst.msk [vmem:[%s2519_s26 + $0x180] sm:$0xff] %vm1529_vm0, %v1449_v44  ;;  %v1020_v48 = vadd.f32 %v2859_v26, %v1019_v45  ;;  %v1100_v50 = vadd.f32 %v2859_v26, %v1099_v46  ;;  %v862_v51 = vpop.f32.mrf.mxu0 }
 0x139   : > { %v942_v53 = vpop.f32.mrf.mxu1  ;;  %v2255_v54 = vpop.eup %2254  ;;  %v1349_v55 = vmul.f32 %v2869_v35, %v2253_v47  ;;  %v863_v56 = vadd.f32 %v2859_v26, %v862_v51 }
 0x13a   : > { %v943_v57 = vadd.f32 %v2859_v26, %v942_v53  ;;  %v2257_v58 = vpop.eup %2256  ;;  %v1381_v59 = vmul.f32 %v2869_v35, %v2255_v54  ;;  %2260 = vtanh.f32 %v1020_v48 }
 0x13b   : > { %v2259_v60 = vpop.eup %2258  ;;  %v1481_v61 = vadd.f32 %v2875_v49, %v1349_v55  ;;  %v1286_v62 = vmul.f32 %v2869_v35, %v2257_v58  ;;  %2262 = vtanh.f32 %v1100_v50 }
 0x13c   : > { %v1513_v63 = vadd.f32 %v2875_v49, %v1381_v59  ;;  %v1318_v0 = vmul.f32 %v2869_v35, %v2259_v60  ;;  %2264 = vtanh.f32 %v863_v56 }
 0x13d   : > { %1610 = vst.msk [vmem:[%s2519_s26 + $0x280] sm:$0xff] %vm1529_vm0, %v1481_v61  ;;  %v1418_v1 = vadd.f32 %v2875_v49, %v1286_v62  ;;  %2266 = vtanh.f32 %v943_v57 }
 0x13e   : > { %1642 = vst.msk [vmem:[%s2519_s26 + $0x380] sm:$0xff] %vm1529_vm0, %v1513_v63  ;;  %v1450_v2 = vadd.f32 %v2875_v49, %v1318_v0 }
 0x13f   : > { %1547 = vst.msk [vmem:[%s2519_s26 + $0x88] sm:$0xff] %vm1529_vm0, %v1418_v1  ;;  %v1022_v3 = vpop.f32.mrf.mxu2  ;;  %v1102_v4 = vpop.f32.mrf.mxu3 }
 0x140   : > { %v2261_v5 = vpop.eup %2260  ;;  %1579 = vst.msk [vmem:[%s2519_s26 + $0x188] sm:$0xff] %vm1529_vm0, %v1450_v2  ;;  %v1023_v6 = vadd.f32 %v2859_v26, %v1022_v3  ;;  %v1103_v7 = vadd.f32 %v2859_v26, %v1102_v4  ;;  %v864_v8 = vpop.f32.mrf.mxu0 }
 0x141   : > { %v944_v9 = vpop.f32.mrf.mxu1  ;;  %v2263_v10 = vpop.eup %2262  ;;  %v1350_v11 = vmul.f32 %v2869_v35, %v2261_v5  ;;  %v865_v12 = vadd.f32 %v2859_v26, %v864_v8 }
 0x142   : > { %v945_v13 = vadd.f32 %v2859_v26, %v944_v9  ;;  %v2265_v14 = vpop.eup %2264  ;;  %v1382_v15 = vmul.f32 %v2869_v35, %v2263_v10  ;;  %2268 = vtanh.f32 %v1023_v6 }
 0x143   : > { %v2267_v16 = vpop.eup %2266  ;;  %v1482_v17 = vadd.f32 %v2875_v49, %v1350_v11  ;;  %v1287_v18 = vmul.f32 %v2869_v35, %v2265_v14  ;;  %2270 = vtanh.f32 %v1103_v7 }
 0x144   : > { %v1514_v19 = vadd.f32 %v2875_v49, %v1382_v15  ;;  %v1319_v20 = vmul.f32 %v2869_v35, %v2267_v16  ;;  %2272 = vtanh.f32 %v865_v12 }
 0x145   : > { %1611 = vst.msk [vmem:[%s2519_s26 + $0x288] sm:$0xff] %vm1529_vm0, %v1482_v17  ;;  %v1419_v21 = vadd.f32 %v2875_v49, %v1287_v18  ;;  %2274 = vtanh.f32 %v945_v13 }
 0x146   : > { %1643 = vst.msk [vmem:[%s2519_s26 + $0x388] sm:$0xff] %vm1529_vm0, %v1514_v19  ;;  %v1451_v40 = vadd.f32 %v2875_v49, %v1319_v20 }
 0x147   : > { %1548 = vst.msk [vmem:[%s2519_s26 + $0x90] sm:$0xff] %vm1529_vm0, %v1419_v21  ;;  %v1024_v22 = vpop.f32.mrf.mxu2  ;;  %v1104_v23 = vpop.f32.mrf.mxu3 }
 0x148   : > { %v2269_v24 = vpop.eup %2268  ;;  %1580 = vst.msk [vmem:[%s2519_s26 + $0x190] sm:$0xff] %vm1529_vm0, %v1451_v40  ;;  %v1025_v25 = vadd.f32 %v2859_v26, %v1024_v22  ;;  %v1105_v27 = vadd.f32 %v2859_v26, %v1104_v23  ;;  %v867_v28 = vpop.f32.mrf.mxu0 }
 0x149   : > { %v947_v29 = vpop.f32.mrf.mxu1  ;;  %v2271_v30 = vpop.eup %2270  ;;  %v1351_v31 = vmul.f32 %v2869_v35, %v2269_v24  ;;  %v868_v52 = vadd.f32 %v2859_v26, %v867_v28 }
 0x14a   : > { %v948_v32 = vadd.f32 %v2859_v26, %v947_v29  ;;  %v2273_v33 = vpop.eup %2272  ;;  %v1383_v34 = vmul.f32 %v2869_v35, %v2271_v30  ;;  %2276 = vtanh.f32 %v1025_v25 }
 0x14b   : > { %v2275_v36 = vpop.eup %2274  ;;  %v1483_v37 = vadd.f32 %v2875_v49, %v1351_v31  ;;  %v1288_v38 = vmul.f32 %v2869_v35, %v2273_v33  ;;  %2278 = vtanh.f32 %v1105_v27 }
 0x14c   : > { %v1515_v39 = vadd.f32 %v2875_v49, %v1383_v34  ;;  %v1320_v41 = vmul.f32 %v2869_v35, %v2275_v36  ;;  %2280 = vtanh.f32 %v868_v52 }
 0x14d   : > { %1612 = vst.msk [vmem:[%s2519_s26 + $0x290] sm:$0xff] %vm1529_vm0, %v1483_v37  ;;  %v1420_v42 = vadd.f32 %v2875_v49, %v1288_v38  ;;  %2282 = vtanh.f32 %v948_v32 }
 0x14e   : > { %1644 = vst.msk [vmem:[%s2519_s26 + $0x390] sm:$0xff] %vm1529_vm0, %v1515_v39  ;;  %v1452_v43 = vadd.f32 %v2875_v49, %v1320_v41 }
 0x14f   : > { %1549 = vst.msk [vmem:[%s2519_s26 + $0x98] sm:$0xff] %vm1529_vm0, %v1420_v42  ;;  %v1027_v44 = vpop.f32.mrf.mxu2  ;;  %v1107_v45 = vpop.f32.mrf.mxu3 }
 0x150   : > { %v2277_v46 = vpop.eup %2276  ;;  %1581 = vst.msk [vmem:[%s2519_s26 + $0x198] sm:$0xff] %vm1529_vm0, %v1452_v43  ;;  %v1028_v47 = vadd.f32 %v2859_v26, %v1027_v44  ;;  %v1108_v48 = vadd.f32 %v2859_v26, %v1107_v45  ;;  %v869_v50 = vpop.f32.mrf.mxu0 }
 0x151   : > { %v949_v51 = vpop.f32.mrf.mxu1  ;;  %v2279_v53 = vpop.eup %2278  ;;  %v1352_v54 = vmul.f32 %v2869_v35, %v2277_v46  ;;  %v870_v55 = vadd.f32 %v2859_v26, %v869_v50 }
 0x152   : > { %v950_v56 = vadd.f32 %v2859_v26, %v949_v51  ;;  %v2281_v57 = vpop.eup %2280  ;;  %v1384_v58 = vmul.f32 %v2869_v35, %v2279_v53  ;;  %2284 = vtanh.f32 %v1028_v47 }
 0x153   : > { %v2283_v59 = vpop.eup %2282  ;;  %v1484_v60 = vadd.f32 %v2875_v49, %v1352_v54  ;;  %v1289_v61 = vmul.f32 %v2869_v35, %v2281_v57  ;;  %2286 = vtanh.f32 %v1108_v48 }
 0x154   : > { %v1516_v62 = vadd.f32 %v2875_v49, %v1384_v58  ;;  %v1321_v63 = vmul.f32 %v2869_v35, %v2283_v59  ;;  %2288 = vtanh.f32 %v870_v55 }
 0x155   : > { %1613 = vst.msk [vmem:[%s2519_s26 + $0x298] sm:$0xff] %vm1529_vm0, %v1484_v60  ;;  %v1421_v0 = vadd.f32 %v2875_v49, %v1289_v61  ;;  %2290 = vtanh.f32 %v950_v56 }
 0x156   : > { %1645 = vst.msk [vmem:[%s2519_s26 + $0x398] sm:$0xff] %vm1529_vm0, %v1516_v62  ;;  %v1453_v1 = vadd.f32 %v2875_v49, %v1321_v63 }
 0x157   : > { %1550 = vst.msk [vmem:[%s2519_s26 + $0xa0] sm:$0xff] %vm1529_vm0, %v1421_v0  ;;  %v1029_v2 = vpop.f32.mrf.mxu2  ;;  %v1109_v3 = vpop.f32.mrf.mxu3 }
 0x158   : > { %v2285_v4 = vpop.eup %2284  ;;  %1582 = vst.msk [vmem:[%s2519_s26 + $0x1a0] sm:$0xff] %vm1529_vm0, %v1453_v1  ;;  %v1030_v5 = vadd.f32 %v2859_v26, %v1029_v2  ;;  %v1110_v6 = vadd.f32 %v2859_v26, %v1109_v3  ;;  %v872_v7 = vpop.f32.mrf.mxu0 }
 0x159   : > { %v952_v8 = vpop.f32.mrf.mxu1  ;;  %v2287_v9 = vpop.eup %2286  ;;  %v1353_v10 = vmul.f32 %v2869_v35, %v2285_v4  ;;  %v873_v11 = vadd.f32 %v2859_v26, %v872_v7 }
 0x15a   : > { %v953_v12 = vadd.f32 %v2859_v26, %v952_v8  ;;  %v2289_v13 = vpop.eup %2288  ;;  %v1385_v14 = vmul.f32 %v2869_v35, %v2287_v9  ;;  %2292 = vtanh.f32 %v1030_v5 }
 0x15b   : > { %v2291_v15 = vpop.eup %2290  ;;  %v1485_v16 = vadd.f32 %v2875_v49, %v1353_v10  ;;  %v1290_v17 = vmul.f32 %v2869_v35, %v2289_v13  ;;  %2294 = vtanh.f32 %v1110_v6 }
 0x15c   : > { %v1517_v18 = vadd.f32 %v2875_v49, %v1385_v14  ;;  %v1322_v19 = vmul.f32 %v2869_v35, %v2291_v15  ;;  %2296 = vtanh.f32 %v873_v11 }
 0x15d   : > { %1614 = vst.msk [vmem:[%s2519_s26 + $0x2a0] sm:$0xff] %vm1529_vm0, %v1485_v16  ;;  %v1422_v20 = vadd.f32 %v2875_v49, %v1290_v17  ;;  %2298 = vtanh.f32 %v953_v12 }
 0x15e   : > { %1646 = vst.msk [vmem:[%s2519_s26 + $0x3a0] sm:$0xff] %vm1529_vm0, %v1517_v18  ;;  %v1454_v21 = vadd.f32 %v2875_v49, %v1322_v19 }
 0x15f   : > { %1551 = vst.msk [vmem:[%s2519_s26 + $0xa8] sm:$0xff] %vm1529_vm0, %v1422_v20  ;;  %v1032_v40 = vpop.f32.mrf.mxu2  ;;  %v1112_v22 = vpop.f32.mrf.mxu3 }
 0x160   : > { %v2293_v23 = vpop.eup %2292  ;;  %1583 = vst.msk [vmem:[%s2519_s26 + $0x1a8] sm:$0xff] %vm1529_vm0, %v1454_v21  ;;  %v1033_v24 = vadd.f32 %v2859_v26, %v1032_v40  ;;  %v1113_v25 = vadd.f32 %v2859_v26, %v1112_v22  ;;  %v874_v27 = vpop.f32.mrf.mxu0 }
 0x161   : > { %v954_v28 = vpop.f32.mrf.mxu1  ;;  %v2295_v29 = vpop.eup %2294  ;;  %v1354_v30 = vmul.f32 %v2869_v35, %v2293_v23  ;;  %v875_v31 = vadd.f32 %v2859_v26, %v874_v27 }
 0x162   : > { %v955_v52 = vadd.f32 %v2859_v26, %v954_v28  ;;  %v2297_v32 = vpop.eup %2296  ;;  %v1386_v33 = vmul.f32 %v2869_v35, %v2295_v29  ;;  %2300 = vtanh.f32 %v1033_v24 }
 0x163   : > { %v2299_v34 = vpop.eup %2298  ;;  %v1486_v36 = vadd.f32 %v2875_v49, %v1354_v30  ;;  %v1291_v37 = vmul.f32 %v2869_v35, %v2297_v32  ;;  %2302 = vtanh.f32 %v1113_v25 }
 0x164   : > { %v1518_v38 = vadd.f32 %v2875_v49, %v1386_v33  ;;  %v1323_v39 = vmul.f32 %v2869_v35, %v2299_v34  ;;  %2304 = vtanh.f32 %v875_v31 }
 0x165   : > { %1615 = vst.msk [vmem:[%s2519_s26 + $0x2a8] sm:$0xff] %vm1529_vm0, %v1486_v36  ;;  %v1423_v41 = vadd.f32 %v2875_v49, %v1291_v37  ;;  %2306 = vtanh.f32 %v955_v52 }
 0x166   : > { %1647 = vst.msk [vmem:[%s2519_s26 + $0x3a8] sm:$0xff] %vm1529_vm0, %v1518_v38  ;;  %v1455_v42 = vadd.f32 %v2875_v49, %v1323_v39 }
 0x167   : > { %1552 = vst.msk [vmem:[%s2519_s26 + $0xb0] sm:$0xff] %vm1529_vm0, %v1423_v41  ;;  %v1034_v43 = vpop.f32.mrf.mxu2  ;;  %v1114_v44 = vpop.f32.mrf.mxu3 }
 0x168   : > { %v2301_v45 = vpop.eup %2300  ;;  %1584 = vst.msk [vmem:[%s2519_s26 + $0x1b0] sm:$0xff] %vm1529_vm0, %v1455_v42  ;;  %v1035_v46 = vadd.f32 %v2859_v26, %v1034_v43  ;;  %v1115_v47 = vadd.f32 %v2859_v26, %v1114_v44  ;;  %v877_v48 = vpop.f32.mrf.mxu0 }
 0x169   : > { %v957_v50 = vpop.f32.mrf.mxu1  ;;  %v2303_v51 = vpop.eup %2302  ;;  %v1355_v53 = vmul.f32 %v2869_v35, %v2301_v45  ;;  %v878_v54 = vadd.f32 %v2859_v26, %v877_v48 }
 0x16a   : > { %v958_v55 = vadd.f32 %v2859_v26, %v957_v50  ;;  %v2305_v56 = vpop.eup %2304  ;;  %v1387_v57 = vmul.f32 %v2869_v35, %v2303_v51  ;;  %2308 = vtanh.f32 %v1035_v46 }
 0x16b   : > { %v2307_v58 = vpop.eup %2306  ;;  %v1487_v59 = vadd.f32 %v2875_v49, %v1355_v53  ;;  %v1292_v60 = vmul.f32 %v2869_v35, %v2305_v56  ;;  %2310 = vtanh.f32 %v1115_v47 }
 0x16c   : > { %v1519_v61 = vadd.f32 %v2875_v49, %v1387_v57  ;;  %v1324_v62 = vmul.f32 %v2869_v35, %v2307_v58  ;;  %2312 = vtanh.f32 %v878_v54 }
 0x16d   : > { %1616 = vst.msk [vmem:[%s2519_s26 + $0x2b0] sm:$0xff] %vm1529_vm0, %v1487_v59  ;;  %v1424_v63 = vadd.f32 %v2875_v49, %v1292_v60  ;;  %2314 = vtanh.f32 %v958_v55 }
 0x16e   : > { %1648 = vst.msk [vmem:[%s2519_s26 + $0x3b0] sm:$0xff] %vm1529_vm0, %v1519_v61  ;;  %v1456_v0 = vadd.f32 %v2875_v49, %v1324_v62 }
 0x16f   : > { %1553 = vst.msk [vmem:[%s2519_s26 + $0xb8] sm:$0xff] %vm1529_vm0, %v1424_v63  ;;  %v1037_v1 = vpop.f32.mrf.mxu2  ;;  %v1117_v2 = vpop.f32.mrf.mxu3 }
 0x170   : > { %v2309_v3 = vpop.eup %2308  ;;  %1585 = vst.msk [vmem:[%s2519_s26 + $0x1b8] sm:$0xff] %vm1529_vm0, %v1456_v0  ;;  %v1038_v4 = vadd.f32 %v2859_v26, %v1037_v1  ;;  %v1118_v5 = vadd.f32 %v2859_v26, %v1117_v2  ;;  %v879_v6 = vpop.f32.mrf.mxu0 }
 0x171   : > { %v959_v7 = vpop.f32.mrf.mxu1  ;;  %v2311_v8 = vpop.eup %2310  ;;  %v1356_v9 = vmul.f32 %v2869_v35, %v2309_v3  ;;  %v880_v10 = vadd.f32 %v2859_v26, %v879_v6 }
 0x172   : > { %v960_v11 = vadd.f32 %v2859_v26, %v959_v7  ;;  %v2313_v12 = vpop.eup %2312  ;;  %v1388_v13 = vmul.f32 %v2869_v35, %v2311_v8  ;;  %2316 = vtanh.f32 %v1038_v4 }
 0x173   : > { %v2315_v14 = vpop.eup %2314  ;;  %v1488_v15 = vadd.f32 %v2875_v49, %v1356_v9  ;;  %v1293_v16 = vmul.f32 %v2869_v35, %v2313_v12  ;;  %2318 = vtanh.f32 %v1118_v5 }
 0x174   : > { %v1520_v17 = vadd.f32 %v2875_v49, %v1388_v13  ;;  %v1325_v18 = vmul.f32 %v2869_v35, %v2315_v14  ;;  %2320 = vtanh.f32 %v880_v10 }
 0x175   : > { %1617 = vst.msk [vmem:[%s2519_s26 + $0x2b8] sm:$0xff] %vm1529_vm0, %v1488_v15  ;;  %v1425_v19 = vadd.f32 %v2875_v49, %v1293_v16  ;;  %2322 = vtanh.f32 %v960_v11 }
 0x176   : > { %1649 = vst.msk [vmem:[%s2519_s26 + $0x3b8] sm:$0xff] %vm1529_vm0, %v1520_v17  ;;  %v1457_v20 = vadd.f32 %v2875_v49, %v1325_v18 }
 0x177   : > { %1554 = vst.msk [vmem:[%s2519_s26 + $0xc0] sm:$0xff] %vm1529_vm0, %v1425_v19  ;;  %v1039_v21 = vpop.f32.mrf.mxu2  ;;  %v1119_v40 = vpop.f32.mrf.mxu3 }
 0x178   : > { %v2317_v22 = vpop.eup %2316  ;;  %1586 = vst.msk [vmem:[%s2519_s26 + $0x1c0] sm:$0xff] %vm1529_vm0, %v1457_v20  ;;  %v1040_v23 = vadd.f32 %v2859_v26, %v1039_v21  ;;  %v1120_v24 = vadd.f32 %v2859_v26, %v1119_v40  ;;  %v882_v25 = vpop.f32.mrf.mxu0 }
 0x179   : > { %v962_v27 = vpop.f32.mrf.mxu1  ;;  %v2319_v28 = vpop.eup %2318  ;;  %v1357_v29 = vmul.f32 %v2869_v35, %v2317_v22  ;;  %v883_v30 = vadd.f32 %v2859_v26, %v882_v25 }
 0x17a   : > { %v963_v31 = vadd.f32 %v2859_v26, %v962_v27  ;;  %v2321_v52 = vpop.eup %2320  ;;  %v1389_v32 = vmul.f32 %v2869_v35, %v2319_v28  ;;  %2324 = vtanh.f32 %v1040_v23 }
 0x17b   : > { %v2323_v33 = vpop.eup %2322  ;;  %v1489_v34 = vadd.f32 %v2875_v49, %v1357_v29  ;;  %v1294_v36 = vmul.f32 %v2869_v35, %v2321_v52  ;;  %2326 = vtanh.f32 %v1120_v24 }
 0x17c   : > { %v1521_v37 = vadd.f32 %v2875_v49, %v1389_v32  ;;  %v1326_v38 = vmul.f32 %v2869_v35, %v2323_v33  ;;  %2328 = vtanh.f32 %v883_v30 }
 0x17d   : > { %1618 = vst.msk [vmem:[%s2519_s26 + $0x2c0] sm:$0xff] %vm1529_vm0, %v1489_v34  ;;  %v1426_v39 = vadd.f32 %v2875_v49, %v1294_v36  ;;  %2330 = vtanh.f32 %v963_v31 }
 0x17e   : > { %1650 = vst.msk [vmem:[%s2519_s26 + $0x3c0] sm:$0xff] %vm1529_vm0, %v1521_v37  ;;  %v1458_v41 = vadd.f32 %v2875_v49, %v1326_v38 }
 0x17f   : > { %1555 = vst.msk [vmem:[%s2519_s26 + $0xc8] sm:$0xff] %vm1529_vm0, %v1426_v39  ;;  %v1042_v42 = vpop.f32.mrf.mxu2  ;;  %v1122_v43 = vpop.f32.mrf.mxu3 }
 0x180   : > { %v2325_v44 = vpop.eup %2324  ;;  %1587 = vst.msk [vmem:[%s2519_s26 + $0x1c8] sm:$0xff] %vm1529_vm0, %v1458_v41  ;;  %v1043_v45 = vadd.f32 %v2859_v26, %v1042_v42  ;;  %v1123_v46 = vadd.f32 %v2859_v26, %v1122_v43  ;;  %v884_v47 = vpop.f32.mrf.mxu0 }
 0x181   : > { %v964_v48 = vpop.f32.mrf.mxu1  ;;  %v2327_v50 = vpop.eup %2326  ;;  %v1358_v51 = vmul.f32 %v2869_v35, %v2325_v44  ;;  %v885_v53 = vadd.f32 %v2859_v26, %v884_v47 }
 0x182   : > { %v965_v54 = vadd.f32 %v2859_v26, %v964_v48  ;;  %v2329_v55 = vpop.eup %2328  ;;  %v1390_v56 = vmul.f32 %v2869_v35, %v2327_v50  ;;  %2332 = vtanh.f32 %v1043_v45 }
 0x183   : > { %v2331_v57 = vpop.eup %2330  ;;  %v1490_v58 = vadd.f32 %v2875_v49, %v1358_v51  ;;  %v1295_v59 = vmul.f32 %v2869_v35, %v2329_v55  ;;  %2334 = vtanh.f32 %v1123_v46 }
 0x184   : > { %v1522_v60 = vadd.f32 %v2875_v49, %v1390_v56  ;;  %v1327_v61 = vmul.f32 %v2869_v35, %v2331_v57  ;;  %2336 = vtanh.f32 %v885_v53 }
 0x185   : > { %1619 = vst.msk [vmem:[%s2519_s26 + $0x2c8] sm:$0xff] %vm1529_vm0, %v1490_v58  ;;  %v1427_v62 = vadd.f32 %v2875_v49, %v1295_v59  ;;  %2338 = vtanh.f32 %v965_v54 }
 0x186   : > { %1651 = vst.msk [vmem:[%s2519_s26 + $0x3c8] sm:$0xff] %vm1529_vm0, %v1522_v60  ;;  %v1459_v63 = vadd.f32 %v2875_v49, %v1327_v61 }
 0x187   : > { %1556 = vst.msk [vmem:[%s2519_s26 + $0xd0] sm:$0xff] %vm1529_vm0, %v1427_v62  ;;  %v1044_v0 = vpop.f32.mrf.mxu2  ;;  %v1124_v1 = vpop.f32.mrf.mxu3 }
 0x188   : > { %v2333_v2 = vpop.eup %2332  ;;  %1588 = vst.msk [vmem:[%s2519_s26 + $0x1d0] sm:$0xff] %vm1529_vm0, %v1459_v63  ;;  %v1045_v3 = vadd.f32 %v2859_v26, %v1044_v0  ;;  %v1125_v4 = vadd.f32 %v2859_v26, %v1124_v1  ;;  %v887_v5 = vpop.f32.mrf.mxu0 }
 0x189   : > { %v967_v6 = vpop.f32.mrf.mxu1  ;;  %v2335_v7 = vpop.eup %2334  ;;  %v1359_v8 = vmul.f32 %v2869_v35, %v2333_v2  ;;  %v888_v9 = vadd.f32 %v2859_v26, %v887_v5 }
 0x18a   : > { %v968_v10 = vadd.f32 %v2859_v26, %v967_v6  ;;  %v2337_v11 = vpop.eup %2336  ;;  %v1391_v12 = vmul.f32 %v2869_v35, %v2335_v7  ;;  %2340 = vtanh.f32 %v1045_v3 }
 0x18b   : > { %v2339_v13 = vpop.eup %2338  ;;  %v1491_v14 = vadd.f32 %v2875_v49, %v1359_v8  ;;  %v1296_v15 = vmul.f32 %v2869_v35, %v2337_v11  ;;  %2342 = vtanh.f32 %v1125_v4 }
 0x18c   : > { %v1523_v16 = vadd.f32 %v2875_v49, %v1391_v12  ;;  %v1328_v17 = vmul.f32 %v2869_v35, %v2339_v13  ;;  %2344 = vtanh.f32 %v888_v9 }
 0x18d   : > { %1620 = vst.msk [vmem:[%s2519_s26 + $0x2d0] sm:$0xff] %vm1529_vm0, %v1491_v14  ;;  %v1428_v18 = vadd.f32 %v2875_v49, %v1296_v15  ;;  %2346 = vtanh.f32 %v968_v10 }
 0x18e   : > { %1652 = vst.msk [vmem:[%s2519_s26 + $0x3d0] sm:$0xff] %vm1529_vm0, %v1523_v16  ;;  %v1460_v19 = vadd.f32 %v2875_v49, %v1328_v17 }
 0x18f   : > { %1557 = vst.msk [vmem:[%s2519_s26 + $0xd8] sm:$0xff] %vm1529_vm0, %v1428_v18  ;;  %v1047_v20 = vpop.f32.mrf.mxu2  ;;  %v1127_v21 = vpop.f32.mrf.mxu3 }
 0x190   : > { %v2341_v40 = vpop.eup %2340  ;;  %1589 = vst.msk [vmem:[%s2519_s26 + $0x1d8] sm:$0xff] %vm1529_vm0, %v1460_v19  ;;  %v1048_v22 = vadd.f32 %v2859_v26, %v1047_v20  ;;  %v1128_v23 = vadd.f32 %v2859_v26, %v1127_v21  ;;  %v889_v24 = vpop.f32.mrf.mxu0 }
 0x191   : > { %v969_v25 = vpop.f32.mrf.mxu1  ;;  %v2343_v27 = vpop.eup %2342  ;;  %v1360_v28 = vmul.f32 %v2869_v35, %v2341_v40  ;;  %v890_v29 = vadd.f32 %v2859_v26, %v889_v24 }
 0x192   : > { %v970_v30 = vadd.f32 %v2859_v26, %v969_v25  ;;  %v2345_v31 = vpop.eup %2344  ;;  %v1392_v52 = vmul.f32 %v2869_v35, %v2343_v27  ;;  %2348 = vtanh.f32 %v1048_v22 }
 0x193   : > { %v2347_v32 = vpop.eup %2346  ;;  %v1492_v33 = vadd.f32 %v2875_v49, %v1360_v28  ;;  %v1297_v34 = vmul.f32 %v2869_v35, %v2345_v31  ;;  %2350 = vtanh.f32 %v1128_v23 }
 0x194   : > { %v1524_v36 = vadd.f32 %v2875_v49, %v1392_v52  ;;  %v1329_v37 = vmul.f32 %v2869_v35, %v2347_v32  ;;  %2352 = vtanh.f32 %v890_v29 }
 0x195   : > { %1621 = vst.msk [vmem:[%s2519_s26 + $0x2d8] sm:$0xff] %vm1529_vm0, %v1492_v33  ;;  %v1429_v38 = vadd.f32 %v2875_v49, %v1297_v34  ;;  %2354 = vtanh.f32 %v970_v30 }
 0x196   : > { %1653 = vst.msk [vmem:[%s2519_s26 + $0x3d8] sm:$0xff] %vm1529_vm0, %v1524_v36  ;;  %v1461_v39 = vadd.f32 %v2875_v49, %v1329_v37 }
 0x197   : > { %1558 = vst.msk [vmem:[%s2519_s26 + $0xe0] sm:$0xff] %vm1529_vm0, %v1429_v38  ;;  %v1049_v41 = vpop.f32.mrf.mxu2  ;;  %v1129_v42 = vpop.f32.mrf.mxu3 }
 0x198   : > { %v2349_v43 = vpop.eup %2348  ;;  %1590 = vst.msk [vmem:[%s2519_s26 + $0x1e0] sm:$0xff] %vm1529_vm0, %v1461_v39  ;;  %v1050_v44 = vadd.f32 %v2859_v26, %v1049_v41  ;;  %v1130_v45 = vadd.f32 %v2859_v26, %v1129_v42  ;;  %v892_v46 = vpop.f32.mrf.mxu0 }
 0x199   : > { %v972_v47 = vpop.f32.mrf.mxu1  ;;  %v2351_v48 = vpop.eup %2350  ;;  %v1361_v50 = vmul.f32 %v2869_v35, %v2349_v43  ;;  %v893_v51 = vadd.f32 %v2859_v26, %v892_v46 }
 0x19a   : > { %v973_v53 = vadd.f32 %v2859_v26, %v972_v47  ;;  %v2353_v54 = vpop.eup %2352  ;;  %v1393_v55 = vmul.f32 %v2869_v35, %v2351_v48  ;;  %2356 = vtanh.f32 %v1050_v44 }
 0x19b   : > { %v2355_v56 = vpop.eup %2354  ;;  %v1493_v57 = vadd.f32 %v2875_v49, %v1361_v50  ;;  %v1298_v58 = vmul.f32 %v2869_v35, %v2353_v54  ;;  %2358 = vtanh.f32 %v1130_v45 }
 0x19c   : > { %v1525_v59 = vadd.f32 %v2875_v49, %v1393_v55  ;;  %v1330_v60 = vmul.f32 %v2869_v35, %v2355_v56  ;;  %2360 = vtanh.f32 %v893_v51 }
 0x19d   : > { %1622 = vst.msk [vmem:[%s2519_s26 + $0x2e0] sm:$0xff] %vm1529_vm0, %v1493_v57  ;;  %v1430_v61 = vadd.f32 %v2875_v49, %v1298_v58  ;;  %2362 = vtanh.f32 %v973_v53 }
 0x19e   : > { %1654 = vst.msk [vmem:[%s2519_s26 + $0x3e0] sm:$0xff] %vm1529_vm0, %v1525_v59  ;;  %v1462_v62 = vadd.f32 %v2875_v49, %v1330_v60 }
 0x19f   : > { %1559 = vst.msk [vmem:[%s2519_s26 + $0xe8] sm:$0xff] %vm1529_vm0, %v1430_v61  ;;  %v1052_v63 = vpop.f32.mrf.mxu2  ;;  %v1132_v0 = vpop.f32.mrf.mxu3 }
 0x1a0   : > { %v2357_v1 = vpop.eup %2356  ;;  %1591 = vst.msk [vmem:[%s2519_s26 + $0x1e8] sm:$0xff] %vm1529_vm0, %v1462_v62  ;;  %v1053_v2 = vadd.f32 %v2859_v26, %v1052_v63  ;;  %v1133_v3 = vadd.f32 %v2859_v26, %v1132_v0  ;;  %v894_v4 = vpop.f32.mrf.mxu0 }
 0x1a1   : > { %v974_v5 = vpop.f32.mrf.mxu1  ;;  %v2359_v6 = vpop.eup %2358  ;;  %v1362_v7 = vmul.f32 %v2869_v35, %v2357_v1  ;;  %v895_v8 = vadd.f32 %v2859_v26, %v894_v4 }
 0x1a2   : > { %v975_v9 = vadd.f32 %v2859_v26, %v974_v5  ;;  %v2361_v10 = vpop.eup %2360  ;;  %v1394_v11 = vmul.f32 %v2869_v35, %v2359_v6  ;;  %2364 = vtanh.f32 %v1053_v2 }
 0x1a3   : > { %v2363_v12 = vpop.eup %2362  ;;  %v1494_v13 = vadd.f32 %v2875_v49, %v1362_v7  ;;  %v1299_v14 = vmul.f32 %v2869_v35, %v2361_v10  ;;  %2366 = vtanh.f32 %v1133_v3 }
 0x1a4   : > { %v1526_v15 = vadd.f32 %v2875_v49, %v1394_v11  ;;  %v1331_v16 = vmul.f32 %v2869_v35, %v2363_v12  ;;  %2368 = vtanh.f32 %v895_v8 }
 0x1a5   : > { %1623 = vst.msk [vmem:[%s2519_s26 + $0x2e8] sm:$0xff] %vm1529_vm0, %v1494_v13  ;;  %v1431_v17 = vadd.f32 %v2875_v49, %v1299_v14  ;;  %2370 = vtanh.f32 %v975_v9 }
 0x1a6   : > { %1655 = vst.msk [vmem:[%s2519_s26 + $0x3e8] sm:$0xff] %vm1529_vm0, %v1526_v15  ;;  %v1463_v18 = vadd.f32 %v2875_v49, %v1331_v16 }
 0x1a7   : > { %1560 = vst.msk [vmem:[%s2519_s26 + $0xf0] sm:$0xff] %vm1529_vm0, %v1431_v17  ;;  %v1054_v19 = vpop.f32.mrf.mxu2  ;;  %v1134_v20 = vpop.f32.mrf.mxu3 }
 0x1a8   : > { %v2365_v21 = vpop.eup %2364  ;;  %1592 = vst.msk [vmem:[%s2519_s26 + $0x1f0] sm:$0xff] %vm1529_vm0, %v1463_v18  ;;  %v1055_v40 = vadd.f32 %v2859_v26, %v1054_v19  ;;  %v1135_v22 = vadd.f32 %v2859_v26, %v1134_v20 }
 0x1a9   : > { %v2367_v23 = vpop.eup %2366  ;;  %v1363_v24 = vmul.f32 %v2869_v35, %v2365_v21 }
 0x1aa   : > { %v2369_v25 = vpop.eup %2368  ;;  %v1395_v27 = vmul.f32 %v2869_v35, %v2367_v23  ;;  %2372 = vtanh.f32 %v1055_v40 }
 0x1ab   : > { %v2371_v28 = vpop.eup %2370  ;;  %v1495_v29 = vadd.f32 %v2875_v49, %v1363_v24  ;;  %v1300_v30 = vmul.f32 %v2869_v35, %v2369_v25  ;;  %2374 = vtanh.f32 %v1135_v22 }
 0x1ac   : > { %v1527_v31 = vadd.f32 %v2875_v49, %v1395_v27  ;;  %v1332_v26 = vmul.f32 %v2869_v35, %v2371_v28 }
 0x1ad   : > { %1624 = vst.msk [vmem:[%s2519_s26 + $0x2f0] sm:$0xff] %vm1529_vm0, %v1495_v29  ;;  %v1432_v52 = vadd.f32 %v2875_v49, %v1300_v30 }
 0x1ae   : > { %1656 = vst.msk [vmem:[%s2519_s26 + $0x3f0] sm:$0xff] %vm1529_vm0, %v1527_v31  ;;  %v1464_v32 = vadd.f32 %v2875_v49, %v1332_v26 }
 0x1af   : > { %1561 = vst.msk [vmem:[%s2519_s26 + $0xf8] sm:$0xff] %vm1529_vm0, %v1432_v52 }
 0x1b0   : > { %v2373_v33 = vpop.eup %2372  ;;  %1593 = vst.msk [vmem:[%s2519_s26 + $0x1f8] sm:$0xff] %vm1529_vm0, %v1464_v32 }
 0x1b1   : > { %v2375_v34 = vpop.eup %2374  ;;  %v1364_v36 = vmul.f32 %v2869_v35, %v2373_v33 }
 0x1b2   : > { %v1396_v37 = vmul.f32 %v2869_v35, %v2375_v34 }
 0x1b3   : > { %v1496_v38 = vadd.f32 %v2875_v49, %v1364_v36 }
 0x1b4   : > { %v1528_v39 = vadd.f32 %v2875_v49, %v1396_v37 }
 0x1b5   : > { %1625 = vst.msk [vmem:[%s2519_s26 + $0x2f8] sm:$0xff] %vm1529_vm0, %v1496_v38 }
 0x1b6   : > { %1657 = vst.msk [vmem:[%s2519_s26 + $0x3f8] sm:$0xff] %vm1529_vm0, %v1528_v39 }
 0x1b7 PF: > { %s15_s18 = sadd.s32 1, %s2385_s18  }
 0x1b8   : > { %p12_p4 = scmp.ge.s32.totalorder %s15_s18, 4  }
 0x1ba   :  { %14 = sbr.rel (!%p12_p4) target bundleno = 1 (0x1), region = 70 }

</bundles_post_ra>
